<compile_context>
chip_gen: v7x
topology: tpu7x:2x2x1
jax: 0.10.0
libtpu: 0.0.40
codegen_flags: <defaults>
</compile_context>

<pallas_src>
import jax
import jax.numpy as jnp
import numpy as np
from jax.experimental import pallas as pl
from jax.experimental.pallas import tpu as pltpu


def convgru_kernel(h_ref, x_ref, w_zr_ref, w_q_ref, b_zr_ref, b_q_ref,
                   out_ref, hx_ref):
    """One (batch, L-tile) block.  Channels on sublanes, L on lanes.

        h_ref:    (1, H, tl)                x_ref:   (1, D, tl)
        w_zr_ref: (2H, H+D) = [Wz; Wr]      w_q_ref: (H, H+D) = Wq
        b_zr_ref: (2H, 1) f32               b_q_ref: (H, 1) f32
        out_ref:  (1, H, tl)                hx_ref:  (H+D, tl) VMEM scratch
    """
    H = h_ref.shape[1]
    mm_dtype = hx_ref.dtype

    h = h_ref[0]                                   # (H, tl), activation dtype
    h_f32 = h.astype(jnp.float32)

    # Fused [h; x] MXU operand: K = H + D on the sublane axis.
    hx_ref[:H, :] = h.astype(mm_dtype)
    hx_ref[H:, :] = x_ref[0].astype(mm_dtype)

    # z / r in a single fused matmul (f32 accumulation), gate math in f32.
    zr = jnp.dot(w_zr_ref[...], hx_ref[...],
                 preferred_element_type=jnp.float32) + b_zr_ref[...]    # (2H, tl)
    zr = jax.nn.sigmoid(zr)
    z = zr[:H]
    r = zr[H:]

    # q: overwrite the h rows of the scratch with r*h, reuse the x rows.
    hx_ref[:H, :] = (r * h_f32).astype(mm_dtype)
    q = jnp.tanh(jnp.dot(w_q_ref[...], hx_ref[...],
                         preferred_element_type=jnp.float32) + b_q_ref[...])

    # GRU update; downcast only at the store.
    out_ref[0] = ((1.0 - z) * h_f32 + z * q).astype(out_ref.dtype)


def convgru_pallas(h, x, params, *, tl=1024, mxu_dtype=None):
    """h: (N, H, L), x: (N, D, L) in NCL layout (same as the PyTorch module).

    params: Wz/Wr/Wq of shape (H, H+D) (Conv1d weight with the trailing
    kernel-size-1 dim squeezed; columns ordered [h-part | x-part], matching
    torch.cat([h, x], dim=1)) and bz/br/bq of shape (H,).

    mxu_dtype: optional dtype for the MXU operands only (e.g. jnp.bfloat16 for
    an f32 model); accumulation and gate math stay f32.

    NOTE: the new hidden state aliases the old one in place
    (input_output_aliases={0: 0}); under jit with donation, do not reuse `h`.
    """
    N, H, L = h.shape
    _, D, _ = x.shape
    dtype = h.dtype
    mm_dtype = jnp.dtype(mxu_dtype) if mxu_dtype is not None else jnp.dtype(dtype)

    # Fused weights (stay resident across the grid: constant-index blocks).
    w_zr = jnp.concatenate([params["Wz"], params["Wr"]], axis=0).astype(mm_dtype)  # (2H, H+D)
    w_q = params["Wq"].astype(mm_dtype)                                            # (H,  H+D)
    b_zr = jnp.concatenate([params["bz"], params["br"]]).reshape(2 * H, 1).astype(jnp.float32)
    b_q = params["bq"].reshape(H, 1).astype(jnp.float32)

    # Lane tiling: the full L axis, or a multiple of 128 (Pallas masks ragged
    # tail blocks; each lane column is independent, so padded reads are safe).
    if tl >= L:
        tl = L
    else:
        tl = max(128, (tl // 128) * 128)
    grid = (N, pl.cdiv(L, tl))

    h_spec = pl.BlockSpec((1, H, tl), lambda n, l: (n, 0, l))
    x_spec = pl.BlockSpec((1, D, tl), lambda n, l: (n, 0, l))
    full = lambda shape: pl.BlockSpec(shape, lambda n, l: (0,) * len(shape))

    return pl.pallas_call(
        convgru_kernel,
        out_shape=jax.ShapeDtypeStruct((N, H, L), dtype),
        grid_spec=pltpu.PrefetchScalarGridSpec(
            num_scalar_prefetch=0,
            grid=grid,
            in_specs=[
                h_spec,                      # h (aliased with the output)
                x_spec,                      # x
                full((2 * H, H + D)),        # [Wz; Wr]
                full((H, H + D)),            # Wq
                full((2 * H, 1)),            # [bz; br]  (lane-padded, accepted)
                full((H, 1)),                # bq
            ],
            out_specs=h_spec,
            scratch_shapes=[pltpu.VMEM((H + D, tl), mm_dtype)],
        ),
        # New hidden state overwrites the old one in place.
        input_output_aliases={0: 0},
        compiler_params=pltpu.CompilerParams(
            dimension_semantics=("parallel", "parallel")),
    )(h, x, w_zr, w_q, b_zr, b_q)


def convgru_reference(h, x, params):
    """Pure-JAX reference matching the PyTorch forward exactly (NCL layout)."""
    def conv1x1(inp, w, b):
        return jnp.einsum("oc,ncl->nol", w, inp) + b[None, :, None]

    hx = jnp.concatenate([h, x], axis=1)
    z = jax.nn.sigmoid(conv1x1(hx, params["Wz"], params["bz"]))
    r = jax.nn.sigmoid(conv1x1(hx, params["Wr"], params["br"]))
    rh_x = jnp.concatenate([r * h, x], axis=1)
    q = jnp.tanh(conv1x1(rh_x, params["Wq"], params["bq"]))
    return (1.0 - z) * h + z * q


if __name__ == "__main__":
    # Module defaults: input_dim=64, hidden_dim=128; small batch / length.
    N, D, H, L = 2, 64, 128, 1024

    key = jax.random.PRNGKey(0)
    ks = jax.random.split(key, 8)
    scale = 1.0 / np.sqrt(H + D)
    params = {
        "Wz": jax.random.uniform(ks[0], (H, H + D), jnp.float32, -scale, scale),
        "Wr": jax.random.uniform(ks[1], (H, H + D), jnp.float32, -scale, scale),
        "Wq": jax.random.uniform(ks[2], (H, H + D), jnp.float32, -scale, scale),
        "bz": jax.random.uniform(ks[3], (H,), jnp.float32, -scale, scale),
        "br": jax.random.uniform(ks[4], (H,), jnp.float32, -scale, scale),
        "bq": jax.random.uniform(ks[5], (H,), jnp.float32, -scale, scale),
    }
    h0 = jax.random.normal(ks[6], (N, H, L), jnp.float32)
    x0 = jax.random.normal(ks[7], (N, D, L), jnp.float32)

    # Reference and per-call input copies are made BEFORE any pallas call,
    # since the hidden state is aliased into the kernel output.
    h_ref = jax.block_until_ready(convgru_reference(h0, x0, params))
    h_a = h0 + 0.0
    h_b = h0 + 0.0
    h0_bf16 = h0.astype(jnp.bfloat16)
    x0_bf16 = x0.astype(jnp.bfloat16)

    # 1) f32 model, f32 MXU operands: tight agreement with the reference.
    out_f32 = jax.block_until_ready(convgru_pallas(h_a, x0, params))
    np.testing.assert_allclose(np.asarray(out_f32), np.asarray(h_ref),
                               rtol=1e-4, atol=1e-4)

    # 2) f32 model, bf16 MXU operands (f32 accumulation + f32 gate math):
    #    ~3-4x faster matmuls at ~1e-3-level output deviation.
    out_mixed = jax.block_until_ready(
        convgru_pallas(h_b, x0, params, mxu_dtype=jnp.bfloat16))
    np.testing.assert_allclose(np.asarray(out_mixed), np.asarray(h_ref),
                               rtol=0, atol=5e-2)

    # 3) bf16 activations end-to-end (halved HBM traffic); f32 gate math keeps
    #    the deviation to the bf16-representation level of h/x themselves.
    out_bf16 = jax.block_until_ready(convgru_pallas(h0_bf16, x0_bf16, params))
    np.testing.assert_allclose(np.asarray(out_bf16.astype(jnp.float32)),
                               np.asarray(h_ref), rtol=0, atol=1e-1)

    print("KERNEL_OK")
</pallas_src>

<mosaic_0001>
module attributes {stable_mosaic.version = 11 : i64} {
  func.func @convgru_kernel(%arg0: i32, %arg1: i32, %arg2: memref<1x128x1024xf32, #tpu.memory_space<vmem>>, %arg3: memref<1x64x1024xf32, #tpu.memory_space<vmem>>, %arg4: memref<256x192xf32, #tpu.memory_space<vmem>>, %arg5: memref<128x192xf32, #tpu.memory_space<vmem>>, %arg6: memref<256x1xf32, #tpu.memory_space<vmem>>, %arg7: memref<128x1xf32, #tpu.memory_space<vmem>>, %arg8: memref<1x128x1024xf32, #tpu.memory_space<vmem>>, %arg9: memref<192x1024xf32, #tpu.memory_space<vmem>>) attributes {dimension_semantics = [#tpu.dimension_semantics<parallel>, #tpu.dimension_semantics<parallel>], iteration_bounds = array<i64: 2, 1>, scalar_prefetch = 0 : i64, scratch_operands = 1 : i64, tpu.core_type = #tpu.core_type<tc>, window_params = [{transform_indices = @transform_0, window_bounds = array<i64: 1, 128, 1024>}, {transform_indices = @transform_1, window_bounds = array<i64: 1, 64, 1024>}, {pipeline_mode = #tpu.pipeline_mode<synchronous>, transform_indices = @transform_2, window_bounds = array<i64: 256, 192>}, {pipeline_mode = #tpu.pipeline_mode<synchronous>, transform_indices = @transform_3, window_bounds = array<i64: 128, 192>}, {pipeline_mode = #tpu.pipeline_mode<synchronous>, transform_indices = @transform_4, window_bounds = array<i64: 256, 1>}, {pipeline_mode = #tpu.pipeline_mode<synchronous>, transform_indices = @transform_5, window_bounds = array<i64: 128, 1>}, {transform_indices = @transform_6, window_bounds = array<i64: 1, 128, 1024>}]} {
    %c0 = arith.constant 0 : index
    %c0_0 = arith.constant 0 : index
    %c0_1 = arith.constant 0 : index
    %0 = vector.load %arg2[%c0, %c0_0, %c0_1] : memref<1x128x1024xf32, #tpu.memory_space<vmem>>, vector<1x128x1024xf32>
    %1 = vector.shape_cast %0 : vector<1x128x1024xf32> to vector<128x1024xf32>
    %c0_2 = arith.constant 0 : index
    %c0_3 = arith.constant 0 : index
    %2 = vector.load %arg9[%c0_2, %c0_3] : memref<192x1024xf32, #tpu.memory_space<vmem>>, vector<128x1024xf32>
    tpu.vector_store %arg9[%c0_2, %c0_3], %1 {strides = array<i32>} : memref<192x1024xf32, #tpu.memory_space<vmem>>, vector<128x1024xf32>,
    %c0_4 = arith.constant 0 : index
    %c0_5 = arith.constant 0 : index
    %c0_6 = arith.constant 0 : index
    %3 = vector.load %arg3[%c0_4, %c0_5, %c0_6] : memref<1x64x1024xf32, #tpu.memory_space<vmem>>, vector<1x64x1024xf32>
    %4 = vector.shape_cast %3 : vector<1x64x1024xf32> to vector<64x1024xf32>
    %c128 = arith.constant 128 : index
    %c0_7 = arith.constant 0 : index
    %5 = vector.load %arg9[%c128, %c0_7] : memref<192x1024xf32, #tpu.memory_space<vmem>>, vector<64x1024xf32>
    tpu.vector_store %arg9[%c128, %c0_7], %4 {strides = array<i32>} : memref<192x1024xf32, #tpu.memory_space<vmem>>, vector<64x1024xf32>,
    %c0_8 = arith.constant 0 : index
    %c0_9 = arith.constant 0 : index
    %6 = vector.load %arg4[%c0_8, %c0_9] : memref<256x192xf32, #tpu.memory_space<vmem>>, vector<256x192xf32>
    %c0_10 = arith.constant 0 : index
    %c0_11 = arith.constant 0 : index
    %7 = vector.load %arg9[%c0_10, %c0_11] : memref<192x1024xf32, #tpu.memory_space<vmem>>, vector<192x1024xf32>
    %cst = arith.constant dense<0.000000e+00> : vector<256x1024xf32>
    %8 = tpu.matmul %6, %7, %cst {dimension_numbers = #tpu.dot_dimension_numbers<[1], [0], [0], [1], [0, 0, 1, 1], [], []>} : vector<256x192xf32>, vector<192x1024xf32>, vector<256x1024xf32> -> vector<256x1024xf32>
    %c0_12 = arith.constant 0 : index
    %c0_13 = arith.constant 0 : index
    %9 = vector.load %arg6[%c0_12, %c0_13] : memref<256x1xf32, #tpu.memory_space<vmem>>, vector<256x1xf32>
    %10 = vector.broadcast %9 : vector<256x1xf32> to vector<256x1024xf32>
    %11 = arith.addf %8, %10 : vector<256x1024xf32>
    %12 = arith.negf %11 : vector<256x1024xf32>
    %13 = math.exp %12 : vector<256x1024xf32>
    %cst_14 = arith.constant 1.000000e+00 : f32
    %14 = vector.broadcast %cst_14 : f32 to vector<256x1024xf32>
    %15 = arith.addf %14, %13 : vector<256x1024xf32>
    %16 = arith.divf %14, %15 : vector<256x1024xf32>
    %17 = vector.extract_strided_slice %16 {offsets = [0, 0], sizes = [128, 1024], strides = [1, 1]} : vector<256x1024xf32> to vector<128x1024xf32>
    %18 = vector.extract_strided_slice %16 {offsets = [128, 0], sizes = [128, 1024], strides = [1, 1]} : vector<256x1024xf32> to vector<128x1024xf32>
    %19 = arith.mulf %18, %1 : vector<128x1024xf32>
    %c0_15 = arith.constant 0 : index
    %c0_16 = arith.constant 0 : index
    %20 = vector.load %arg9[%c0_15, %c0_16] : memref<192x1024xf32, #tpu.memory_space<vmem>>, vector<128x1024xf32>
    tpu.vector_store %arg9[%c0_15, %c0_16], %19 {strides = array<i32>} : memref<192x1024xf32, #tpu.memory_space<vmem>>, vector<128x1024xf32>,
    %c0_17 = arith.constant 0 : index
    %c0_18 = arith.constant 0 : index
    %21 = vector.load %arg5[%c0_17, %c0_18] : memref<128x192xf32, #tpu.memory_space<vmem>>, vector<128x192xf32>
    %c0_19 = arith.constant 0 : index
    %c0_20 = arith.constant 0 : index
    %22 = vector.load %arg9[%c0_19, %c0_20] : memref<192x1024xf32, #tpu.memory_space<vmem>>, vector<192x1024xf32>
    %cst_21 = arith.constant dense<0.000000e+00> : vector<128x1024xf32>
    %23 = tpu.matmul %21, %22, %cst_21 {dimension_numbers = #tpu.dot_dimension_numbers<[1], [0], [0], [1], [0, 0, 1, 1], [], []>} : vector<128x192xf32>, vector<192x1024xf32>, vector<128x1024xf32> -> vector<128x1024xf32>
    %c0_22 = arith.constant 0 : index
    %c0_23 = arith.constant 0 : index
    %24 = vector.load %arg7[%c0_22, %c0_23] : memref<128x1xf32, #tpu.memory_space<vmem>>, vector<128x1xf32>
    %25 = vector.broadcast %24 : vector<128x1xf32> to vector<128x1024xf32>
    %26 = arith.addf %23, %25 : vector<128x1024xf32>
    %27 = math.tanh %26 : vector<128x1024xf32>
    %cst_24 = arith.constant 1.000000e+00 : f32
    %28 = vector.broadcast %cst_24 : f32 to vector<128x1024xf32>
    %29 = arith.subf %28, %17 : vector<128x1024xf32>
    %30 = arith.mulf %29, %1 : vector<128x1024xf32>
    %31 = arith.mulf %17, %27 : vector<128x1024xf32>
    %32 = arith.addf %30, %31 : vector<128x1024xf32>
    %c0_25 = arith.constant 0 : index
    %c0_26 = arith.constant 0 : index
    %c0_27 = arith.constant 0 : index
    %33 = vector.load %arg8[%c0_25, %c0_26, %c0_27] : memref<1x128x1024xf32, #tpu.memory_space<vmem>>, vector<1x128x1024xf32>
    %34 = vector.shape_cast %33 : vector<1x128x1024xf32> to vector<128x1024xf32>
    %35 = vector.shape_cast %32 : vector<128x1024xf32> to vector<1x128x1024xf32>
    tpu.vector_store %arg8[%c0_25, %c0_26, %c0_27], %35 {strides = array<i32>} : memref<1x128x1024xf32, #tpu.memory_space<vmem>>, vector<1x128x1024xf32>,
    return
  }
  func.func @transform_0(%arg0: i32, %arg1: i32) -> (i32, i32, i32) {
    %c0_i32 = arith.constant 0 : i32
    %c0_i32_0 = arith.constant 0 : i32
    return %arg0, %c0_i32, %arg1 : i32, i32, i32
  }
  func.func @transform_1(%arg0: i32, %arg1: i32) -> (i32, i32, i32) {
    %c0_i32 = arith.constant 0 : i32
    %c0_i32_0 = arith.constant 0 : i32
    return %arg0, %c0_i32, %arg1 : i32, i32, i32
  }
  func.func @transform_2(%arg0: i32, %arg1: i32) -> (i32, i32) {
    %c0_i32 = arith.constant 0 : i32
    %c0_i32_0 = arith.constant 0 : i32
    %c0_i32_1 = arith.constant 0 : i32
    return %c0_i32, %c0_i32_0 : i32, i32
  }
  func.func @transform_3(%arg0: i32, %arg1: i32) -> (i32, i32) {
    %c0_i32 = arith.constant 0 : i32
    %c0_i32_0 = arith.constant 0 : i32
    %c0_i32_1 = arith.constant 0 : i32
    return %c0_i32, %c0_i32_0 : i32, i32
  }
  func.func @transform_4(%arg0: i32, %arg1: i32) -> (i32, i32) {
    %c0_i32 = arith.constant 0 : i32
    %c0_i32_0 = arith.constant 0 : i32
    %c0_i32_1 = arith.constant 0 : i32
    return %c0_i32, %c0_i32_0 : i32, i32
  }
  func.func @transform_5(%arg0: i32, %arg1: i32) -> (i32, i32) {
    %c0_i32 = arith.constant 0 : i32
    %c0_i32_0 = arith.constant 0 : i32
    %c0_i32_1 = arith.constant 0 : i32
    return %c0_i32, %c0_i32_0 : i32, i32
  }
  func.func @transform_6(%arg0: i32, %arg1: i32) -> (i32, i32, i32) {
    %c0_i32 = arith.constant 0 : i32
    %c0_i32_0 = arith.constant 0 : i32
    return %arg0, %c0_i32, %arg1 : i32, i32, i32
  }
}

</mosaic_0001>

<bundles_post_ra>
// kernel: tpu_custom_call.1
= control target key start
LH: loop header
LB: loop body
LE: loop exit
PB: predicated region body
PF: predicated region fallthrough
CT: control target
= control target key end

     0   :  { %11 = vsyncpa [#allocation4], 0  ;;  %s13116_s0 = inlined_call_operand.hbm [shape: f32[2,128,1024], index: 0, kind: input, shape index: {}, may-alias: {0,6}]   ;;  %s13117_s1 = inlined_call_operand.vmem [shape: f32[2,64,1024], index: 1, kind: input, shape index: {}]   ;;  %s13118_s2 = inlined_call_operand.vmem [shape: f32[256,192], index: 2, kind: input, shape index: {}]   ;;  %s13119_s3 = inlined_call_operand.vmem [shape: f32[128,192], index: 3, kind: input, shape index: {}]   ;;  %s13120_s4 = inlined_call_operand.vmem [shape: f32[256,1], index: 4, kind: input, shape index: {}]   ;;  %s13121_s5 = inlined_call_operand.vmem [shape: f32[128,1], index: 5, kind: input, shape index: {}]   ;;  %s13122_s6 = inlined_call_operand.hbm [shape: f32[2,128,1024], index: 6, kind: output, shape index: {}, may-alias: {0,6}]  }
   0x1   :  { %13 = vsyncpa [#allocation4 + $0x1], 0 }
   0x2   :  { %14 = vsyncpa [#allocation5], 0 }
   0x3   :  { %16 = vsyncpa [#allocation5 + $0x1], 0  ;;  %s8622_s21 = smov 0   ;;  %s8624_s22 = smov 0  }
   0x4   :  { %s8626_s23 = smov 0   ;;  %s8628_s24 = smov 0  }
   0x5   :  { %s8630_s25 = smov 0   ;;  %s8632_s26 = smov 0  }
   0x6 LB: > { %s5976_s27 = sadd.s32 4294967295, %s8578_s26   ;;  %s5977_s28 = sadd.s32 4294967294, %s8578_s26   ;;  %s8578_s26 = sphi %s8632_s26, %s22_s26   ;;  %s8574_s25 = sphi %s8630_s25, %s14359_s25   ;;  %s8570_s24 = sphi %s8628_s24, %s14358_s24   ;;  %s8566_s23 = sphi %s8626_s23, %s14357_s23   ;;  %s8562_s22 = sphi %s8624_s22, %s14356_s22   ;;  %s8558_s21 = sphi %s8622_s21, %s14355_s21  }
   0x7   : > { %s34_s29 = sadd.s32 1, %s8574_s25  ;;  %s43_s30 = sadd.s32 1, %s8566_s23 }
   0x8   : > { %p36_p0 = scmp.ge.s32.totalorder %s34_s29, 2  ;;  %p50_p1 = scmp.ne.s32.totalorder %s8566_s23, %s8562_s22 }
   0x9   : > { %p51_p2 = scmp.eq.s32.totalorder %s8578_s26, 0  ;;  %p56_p3 = scmp.ne.s32.totalorder %s8562_s22, %s8558_s21 }
   0xa   : > { %s14361_s29 = smov (%p36_p0, %s34_s29), 0  ;;  %p57_p5 = scmp.eq.s32.totalorder %s5976_s27, 0 }
   0xb   : > { %p8663_p4 = por %p51_p2, %p50_p1  ;;  %s38_s8 = ssub.s32 %s8574_s25, %s14361_s29 }
   0xc   : > { %p194_p6 = scmp.eq.s32.totalorder %s5976_s27, 1  ;;  %p41_p7 = scmp.eq.s32.totalorder %s38_s8, 0 }
   0xd   : > { %p8669_p8 = por %p57_p5, %p56_p3  ;;  %p200_p10 = scmp.eq.s32.totalorder %s5977_s28, 1 }
   0xe   : > { %p8673_p9 = por %p194_p6, %p50_p1  ;;  %p6840_p13 = scmp.lt.s32.totalorder %s8578_s26, 2 }
   0xf   : > { %s8678_s11 = scalar_select %p41_p7, %s8566_s23, %s43_s30  }
  0x10   : > { %s13373_s10 = scalar_select %p8673_p9, 1, 0 }
  0x11   : > { %p8680_p11 = por %p200_p10, %p56_p3  ;;  %s232_s13 = sand.u32 1, %s8566_s23  }
  0x12   : > { %s5980_s14 = sshll.u32 %s232_s13, 10  ;;  %s6441_s15 = sshll.u32 %s8574_s25, 14 }
  0x13   : > { %s13374_s12 = scalar_select %p8680_p11, 1, 0 }
  0x14   : > { %s8691_s18 = scalar_lea.hbm %s13116_s0, %s6441_s15  ;;  %s236_s19 = scalar_lea.vmem [#allocation3], %s5980_s14 }
  0x15   : > { %s245_s20 = sshll.u32 %s236_s19, 4  ;;  %p8697_p0 = pnand %p6840_p13, %p8663_p4  ;;  %s8693_s20 = int_to_ptr.vmem [resolvable:$true] %s245_s20 }
  0x16   : > { %s8702_s28 = scalar_lea.sflag [#allocation4], %s232_s13  ;;  %s8466_s30 = scalar_lea.hbm %s8691_s18, 16384 }
  0x17   : > { %p8467_p2 = scmp.ne.s32.totalorder %s8691_s18, %s8466_s30  ;;  %p8468_p3 = pneg %p8697_p0 }
  0x18   : > { %s8471_s7 = scalar_lea.hbm %s13116_s0, 32768  ;;  %p8472_p4 = scmp.lt.u32.totalorder %s8691_s18, %s13116_s0 }
  0x19   : > { %p8469_p5 = pnand %p8468_p3, %p8467_p2  ;;  %p8473_p7 = scmp.lt.u32.totalorder %s8471_s7, %s8466_s30 }
  0x1a   : > { %p8475_p13 = scmp.lt.u32.totalorder %s8466_s30, %s8691_s18 }
  0x1b   : > { %p8470_p6 = pneg %p8469_p5  ;;  %p8474_p10 = por %p8473_p7, %p8472_p4 }
  0x1d   : > { %p8476_p12 = por %p8475_p13, %p8474_p10 }
  0x1f   : > { %p8477_p1 = pnand %p8476_p12, %p8470_p6 }
  0x21   : > { %8480 = shalt.err (!%p8477_p1)
}
  0x22   : > { %s8481_s13 = scalar_lea.vmem %s8693_s20, 16384  ;;  %s8580_s17 = smov [#allocation3]  }
  0x23   : > { %p8482_p2 = scmp.ne.s32.totalorder %s8693_s20, %s8481_s13  ;;  %s8486_s19 = sshll.u32 %s8580_s17, 4  ;;  %s8487_s19 = int_to_ptr.vmem [resolvable:$false] %s8486_s19 }
  0x24   : > { %s8488_s8 = scalar_lea.vmem %s8487_s19, 32768  ;;  %p8489_p9 = scmp.lt.s32.totalorder %s8693_s20, %s8487_s19 }
  0x25   : > { %p8484_p5 = pnand %p8482_p2, %p8468_p3  ;;  %p8490_p4 = scmp.lt.s32.totalorder %s8488_s8, %s8481_s13 }
  0x27   : > { %p8485_p11 = pneg %p8484_p5  ;;  %p8491_p7 = por %p8490_p4, %p8489_p9 }
  0x29   : > { %p8492_p10 = pnand %p8491_p7, %p8485_p11 }
  0x2b   : > { %8495 = shalt.err (!%p8492_p10)
}
  0x2c   : > { %s8581_s30 = smov 1024   ;;  %s8582_s14 = smov 64  }
  0x2d   : > { %6835 = dma.hbm_to_vmem [thread:$0]  (!%p8697_p0), %s8691_s18, 16384, %s8693_s20, %s8702_s28, %s8581_s30, %s8581_s30, %s8582_s14  }
  0x2e   : > { %p266_p12 = scmp.lt.s32.totalorder %s8578_s26, 3  ;;  %p13376_p1 = scmp.ge.s32.totalorder %s8578_s26, 1 }
  0x30   : > { %p267_p3 = pnand %p13376_p1, %p266_p12 }
  0x32   : > { %270 = sbr.rel (%p267_p3) target bundleno = 1206 (0x4b6), region = 44 }
  0x39   : > { %s8734_s7 = sand.u32 1, %s8562_s22  }
  0x3a   : > { %s5984_s15 = sshll.u32 %s8734_s7, 10  ;;  %s273_s16 = scalar_lea.sflag [#allocation4], %s8734_s7 }
  0x3b   : > { %s8740_s13 = scalar_lea.vmem [#allocation3], %s5984_s15 }
  0x3c   : > { %8549 = dma.done.wait (%p8669_p8), %s273_s16, 16384  }
  0x3d   : > { %8551 = vsyncadd (%p8669_p8), %s273_s16, 4294950912  ;;  %v8583_v0 = vmov 0   ;;  %v327_v1 = vld [vmem:[%s8740_s13 + $0x8] sm:$0xff]  ;;  %v329_v3 = vld [vmem:[%s8740_s13 + $0x18] sm:$0xff]  ;;  %p316_p8 = scmp.lt.s32.totalorder %s8570_s24, 1  ;;  %vm1158_vm0 = vcmask 523264  }
  0x3e   : > { %6895 = vset.pattern.permute.xlu0 %v8583_v0  ;;  %6896 = vset.pattern.permute.xlu1 %v8583_v0  ;;  %v335_v2 = vld [vmem:[%s8740_s13 + $0x48] sm:$0xff]  ;;  %v337_v5 = vld [vmem:[%s8740_s13 + $0x58] sm:$0xff]  ;;  %v326_v6 = vld [vmem:[%s8740_s13] sm:$0xff]  ;;  %s6443_s30 = sshll.u32 %s8570_s24, 14  ;;  %p14352_p11 = scmp.ne.s32.totalorder %s13373_s10, 0 }
  0x3f   : > { %v6444_v4 = vpack.c.bf16 %v335_v2, %v327_v1  ;;  %v334_v7 = vld [vmem:[%s8740_s13 + $0x40] sm:$0xff]  ;;  %v6492_v8 = vpack.c.bf16 %v337_v5, %v329_v3  ;;  %v328_v10 = vld [vmem:[%s8740_s13 + $0x10] sm:$0xff]  ;;  %v343_v12 = vld [vmem:[%s8740_s13 + $0x88] sm:$0xff]  ;;  %s8794_s9 = scalar_select %p316_p8, %s8570_s24, 1 }
  0x40   : > { %v6446_v9 = vpack.c.bf16 %v334_v7, %v326_v6  ;;  %v336_v11 = vld [vmem:[%s8740_s13 + $0x50] sm:$0xff]  ;;  %v351_v14 = vld [vmem:[%s8740_s13 + $0xc8] sm:$0xff]  ;;  %v345_v15 = vld [vmem:[%s8740_s13 + $0x98] sm:$0xff]  ;;  %s8584_s20 = smov [#allocation6]  }
  0x41   : > { %6445 = vmatprep.subr.bf16.mxu0 %v6444_v4  ;;  %v6494_v13 = vpack.c.bf16 %v336_v11, %v328_v10  ;;  %v353_v16 = vld [vmem:[%s8740_s13 + $0xd8] sm:$0xff]  ;;  %6493 = vmatprep.subr.bf16.mxu1 %v6492_v8  ;;  %v6448_v17 = vpack.c.bf16 %v351_v14, %v343_v12  ;;  %v342_v19 = vld [vmem:[%s8740_s13 + $0x80] sm:$0xff]  ;;  %v344_v21 = vld [vmem:[%s8740_s13 + $0x90] sm:$0xff]  ;;  %s6442_s18 = sshll.u32 %s8794_s9, 9  ;;  %s13062_s9 = scalar_lea.hbm %s13122_s6, %s6443_s30 }
  0x42   : > { %6447 = vmatpush1.bf16.msra.mxu0 %v6446_v9  ;;  %v6496_v18 = vpack.c.bf16 %v353_v16, %v345_v15  ;;  %v350_v20 = vld [vmem:[%s8740_s13 + $0xc0] sm:$0xff]  ;;  %v352_v23 = vld [vmem:[%s8740_s13 + $0xd0] sm:$0xff]  ;;  %v359_v24 = vld [vmem:[%s8740_s13 + $0x108] sm:$0xff]  ;;  %s8816_s28 = scalar_lea.vmem %s13117_s1, %s6442_s18  ;;  %s11702_s18 = scalar_lea.vmem [#allocation6], %s5984_s15 }
  0x43   : > { %6495 = vmatpush1.bf16.msra.mxu1 %v6494_v13  ;;  %v6450_v22 = vpack.c.bf16 %v350_v20, %v342_v19  ;;  %v367_v25 = vld [vmem:[%s8740_s13 + $0x148] sm:$0xff]  ;;  %6449 = vmatprep.subr.bf16.mxu0 %v6448_v17  ;;  %v6498_v26 = vpack.c.bf16 %v352_v23, %v344_v21  ;;  %v361_v28 = vld [vmem:[%s8740_s13 + $0x118] sm:$0xff]  ;;  %v358_v30 = vld [vmem:[%s8740_s13 + $0x100] sm:$0xff]  ;;  %s5871_s14 = sshll.u32 %s11702_s18, 4  ;;  %s8500_s27 = sshll.u32 %s8584_s20, 4  ;;  %s13064_s14 = int_to_ptr.vmem [resolvable:$true] %s5871_s14  ;;  %s8501_s27 = int_to_ptr.vmem [resolvable:$false] %s8500_s27 }
  0x44   : > { %6497 = vmatprep.subr.bf16.mxu1 %v6496_v18  ;;  %v6452_v27 = vpack.c.bf16 %v367_v25, %v359_v24  ;;  %v369_v29 = vld [vmem:[%s8740_s13 + $0x158] sm:$0xff]  ;;  %v366_v32 = vld [vmem:[%s8740_s13 + $0x140] sm:$0xff]  ;;  %v360_v33 = vld [vmem:[%s8740_s13 + $0x110] sm:$0xff]  ;;  %s8496_s15 = scalar_lea.vmem %s13064_s14, 16384  ;;  %p8503_p13 = scmp.lt.s32.totalorder %s13064_s14, %s8501_s27 }
  0x45   : > { %v6500_v31 = vpack.c.bf16 %v369_v29, %v361_v28  ;;  %v368_v34 = vld [vmem:[%s8740_s13 + $0x150] sm:$0xff]  ;;  %v6454_v35 = vpack.c.bf16 %v366_v32, %v358_v30  ;;  %v375_v36 = vld [vmem:[%s8740_s13 + $0x188] sm:$0xff]  ;;  %v377_v38 = vld [vmem:[%s8740_s13 + $0x198] sm:$0xff]  ;;  %p8497_p9 = scmp.ne.s32.totalorder %s13064_s14, %s8496_s15 }
  0x46   : > { %6451 = vmatpush1.bf16.msra.mxu0 %v6450_v22  ;;  %v383_v37 = vld [vmem:[%s8740_s13 + $0x1c8] sm:$0xff]  ;;  %v6502_v39 = vpack.c.bf16 %v368_v34, %v360_v33  ;;  %v385_v41 = vld [vmem:[%s8740_s13 + $0x1d8] sm:$0xff]  ;;  %v374_v42 = vld [vmem:[%s8740_s13 + $0x180] sm:$0xff] }
  0x47   : > { %6499 = vmatpush1.bf16.msra.mxu1 %v6498_v26  ;;  %6453 = vmatprep.subr.bf16.mxu0 %v6452_v27  ;;  %v6456_v40 = vpack.c.bf16 %v383_v37, %v375_v36  ;;  %v382_v43 = vld [vmem:[%s8740_s13 + $0x1c0] sm:$0xff]  ;;  %v6504_v44 = vpack.c.bf16 %v385_v41, %v377_v38  ;;  %v376_v45 = vld [vmem:[%s8740_s13 + $0x190] sm:$0xff]  ;;  %v391_v47 = vld [vmem:[%s8740_s13 + $0x208] sm:$0xff]  ;;  %p8498_p0 = pnand %p8497_p9, %p14352_p11 }
  0x48   : > { %6501 = vmatprep.subr.bf16.mxu1 %v6500_v31  ;;  %v384_v46 = vld [vmem:[%s8740_s13 + $0x1d0] sm:$0xff]  ;;  %v399_v48 = vld [vmem:[%s8740_s13 + $0x248] sm:$0xff]  ;;  %v393_v49 = vld [vmem:[%s8740_s13 + $0x218] sm:$0xff]  ;;  %v6458_v51 = vpack.c.bf16 %v382_v43, %v374_v42 }
  0x49   : > { %v401_v50 = vld [vmem:[%s8740_s13 + $0x258] sm:$0xff]  ;;  %v6506_v52 = vpack.c.bf16 %v384_v46, %v376_v45  ;;  %v6460_v53 = vpack.c.bf16 %v399_v48, %v391_v47  ;;  %v390_v54 = vld [vmem:[%s8740_s13 + $0x200] sm:$0xff]  ;;  %v392_v56 = vld [vmem:[%s8740_s13 + $0x210] sm:$0xff]  ;;  %p8499_p6 = pneg %p8498_p0 }
  0x4a   : > { %6455 = vmatpush1.bf16.msra.mxu0 %v6454_v35  ;;  %v398_v55 = vld [vmem:[%s8740_s13 + $0x240] sm:$0xff]  ;;  %v6508_v57 = vpack.c.bf16 %v401_v50, %v393_v49  ;;  %v400_v58 = vld [vmem:[%s8740_s13 + $0x250] sm:$0xff]  ;;  %v407_v59 = vld [vmem:[%s8740_s13 + $0x288] sm:$0xff] }
  0x4b   : > { %6503 = vmatpush1.bf16.msra.mxu1 %v6502_v39  ;;  %6457 = vmatprep.subr.bf16.mxu0 %v6456_v40  ;;  %v415_v60 = vld [vmem:[%s8740_s13 + $0x2c8] sm:$0xff]  ;;  %v409_v61 = vld [vmem:[%s8740_s13 + $0x298] sm:$0xff]  ;;  %v6462_v63 = vpack.c.bf16 %v398_v55, %v390_v54  ;;  %v6510_v0 = vpack.c.bf16 %v400_v58, %v392_v56  ;;  %v406_v2 = vld [vmem:[%s8740_s13 + $0x280] sm:$0xff] }
  0x4c   : > { %6505 = vmatprep.subr.bf16.mxu1 %v6504_v44  ;;  %v417_v62 = vld [vmem:[%s8740_s13 + $0x2d8] sm:$0xff]  ;;  %v6464_v1 = vpack.c.bf16 %v415_v60, %v407_v59  ;;  %v414_v3 = vld [vmem:[%s8740_s13 + $0x2c0] sm:$0xff]  ;;  %v408_v4 = vld [vmem:[%s8740_s13 + $0x290] sm:$0xff] }
  0x4d   : > { %v6512_v5 = vpack.c.bf16 %v417_v62, %v409_v61  ;;  %v416_v6 = vld [vmem:[%s8740_s13 + $0x2d0] sm:$0xff]  ;;  %v423_v7 = vld [vmem:[%s8740_s13 + $0x308] sm:$0xff]  ;;  %v425_v9 = vld [vmem:[%s8740_s13 + $0x318] sm:$0xff]  ;;  %v6466_v11 = vpack.c.bf16 %v414_v3, %v406_v2 }
  0x4e   : > { %6459 = vmatpush1.bf16.msra.mxu0 %v6458_v51  ;;  %v431_v8 = vld [vmem:[%s8740_s13 + $0x348] sm:$0xff]  ;;  %v433_v10 = vld [vmem:[%s8740_s13 + $0x358] sm:$0xff]  ;;  %v6514_v12 = vpack.c.bf16 %v416_v6, %v408_v4  ;;  %v422_v14 = vld [vmem:[%s8740_s13 + $0x300] sm:$0xff] }
  0x4f   : > { %6507 = vmatpush1.bf16.msra.mxu1 %v6506_v52  ;;  %6461 = vmatprep.subr.bf16.mxu0 %v6460_v53  ;;  %v6468_v13 = vpack.c.bf16 %v431_v8, %v423_v7  ;;  %v430_v15 = vld [vmem:[%s8740_s13 + $0x340] sm:$0xff]  ;;  %v424_v16 = vld [vmem:[%s8740_s13 + $0x310] sm:$0xff]  ;;  %v6516_v17 = vpack.c.bf16 %v433_v10, %v425_v9  ;;  %v439_v19 = vld [vmem:[%s8740_s13 + $0x388] sm:$0xff] }
  0x50   : > { %6509 = vmatprep.subr.bf16.mxu1 %v6508_v57  ;;  %v432_v18 = vld [vmem:[%s8740_s13 + $0x350] sm:$0xff]  ;;  %v447_v20 = vld [vmem:[%s8740_s13 + $0x3c8] sm:$0xff]  ;;  %v441_v21 = vld [vmem:[%s8740_s13 + $0x398] sm:$0xff]  ;;  %v6470_v23 = vpack.c.bf16 %v430_v15, %v422_v14 }
  0x51   : > { %v449_v22 = vld [vmem:[%s8740_s13 + $0x3d8] sm:$0xff]  ;;  %v6518_v24 = vpack.c.bf16 %v432_v18, %v424_v16  ;;  %v6472_v25 = vpack.c.bf16 %v447_v20, %v439_v19  ;;  %v438_v26 = vld [vmem:[%s8740_s13 + $0x380] sm:$0xff]  ;;  %v440_v28 = vld [vmem:[%s8740_s13 + $0x390] sm:$0xff] }
  0x52   : > { %6463 = vmatpush1.bf16.msra.mxu0 %v6462_v63  ;;  %v446_v27 = vld [vmem:[%s8740_s13 + $0x3c0] sm:$0xff]  ;;  %v6520_v29 = vpack.c.bf16 %v449_v22, %v441_v21  ;;  %v448_v30 = vld [vmem:[%s8740_s13 + $0x3d0] sm:$0xff]  ;;  %v583_v31 = vld [vmem:[%s8816_s28 + $0x8] sm:$0xff] }
  0x53   : > { %6511 = vmatpush1.bf16.msra.mxu1 %v6510_v0  ;;  %6465 = vmatprep.subr.bf16.mxu0 %v6464_v1  ;;  %v591_v32 = vld [vmem:[%s8816_s28 + $0x48] sm:$0xff]  ;;  %v585_v33 = vld [vmem:[%s8816_s28 + $0x18] sm:$0xff]  ;;  %v6474_v35 = vpack.c.bf16 %v446_v27, %v438_v26  ;;  %v6522_v36 = vpack.c.bf16 %v448_v30, %v440_v28  ;;  %v582_v38 = vld [vmem:[%s8816_s28] sm:$0xff] }
  0x54   : > { %6513 = vmatprep.subr.bf16.mxu1 %v6512_v5  ;;  %v593_v34 = vld [vmem:[%s8816_s28 + $0x58] sm:$0xff]  ;;  %v8826_v37 = vpack.c.bf16 %v591_v32, %v583_v31  ;;  %v590_v39 = vld [vmem:[%s8816_s28 + $0x40] sm:$0xff]  ;;  %v584_v40 = vld [vmem:[%s8816_s28 + $0x10] sm:$0xff] }
  0x55   : > { %v8831_v41 = vpack.c.bf16 %v593_v34, %v585_v33  ;;  %v592_v42 = vld [vmem:[%s8816_s28 + $0x50] sm:$0xff]  ;;  %v599_v43 = vld [vmem:[%s8816_s28 + $0x88] sm:$0xff]  ;;  %v601_v45 = vld [vmem:[%s8816_s28 + $0x98] sm:$0xff]  ;;  %v8838_v47 = vpack.c.bf16 %v590_v39, %v582_v38 }
  0x56   : > { %6467 = vmatpush1.bf16.msra.mxu0 %v6466_v11  ;;  %13377 = vst [vmem:[#allocation9_spill] sm:$0xff] %v8826_v37  ;;  %v607_v44 = vld [vmem:[%s8816_s28 + $0xc8] sm:$0xff]  ;;  %v609_v46 = vld [vmem:[%s8816_s28 + $0xd8] sm:$0xff]  ;;  %v8844_v49 = vpack.c.bf16 %v592_v42, %v584_v40  ;;  %v598_v51 = vld [vmem:[%s8816_s28 + $0x80] sm:$0xff] }
  0x57   : > { %6515 = vmatpush1.bf16.msra.mxu1 %v6514_v12  ;;  %6469 = vmatprep.subr.bf16.mxu0 %v6468_v13  ;;  %13378 = vst [vmem:[#allocation10_spill] sm:$0xff] %v8831_v41  ;;  %13379 = vst [vmem:[#allocation11_spill] sm:$0xff] %v8838_v47  ;;  %v711_v48 = vld [vmem:[%s13118_s2 + $0x8] sm:$0xff]  ;;  %v8846_v50 = vpack.c.bf16 %v607_v44, %v599_v43  ;;  %v606_v52 = vld [vmem:[%s8816_s28 + $0xc0] sm:$0xff]  ;;  %v8852_v54 = vpack.c.bf16 %v609_v46, %v601_v45 }
  0x58   : > { %6517 = vmatprep.subr.bf16.mxu1 %v6516_v17  ;;  %13380 = vst [vmem:[#allocation12_spill] sm:$0xff] %v8844_v49  ;;  %v600_v53 = vld [vmem:[%s8816_s28 + $0x90] sm:$0xff]  ;;  %v615_v56 = vld [vmem:[%s8816_s28 + $0x108] sm:$0xff]  ;;  %5988 = vmatprep.mubr.msk.f32.mxu0 %vm1158_vm0, %v711_v48  ;;  %v617_v58 = vld [vmem:[%s8816_s28 + $0x118] sm:$0xff]  ;;  %v8862_v60 = vpack.c.bf16 %v606_v52, %v598_v51 }
  0x59   : > { %13381 = vst [vmem:[#allocation13_spill] sm:$0xff] %v8846_v50  ;;  %13382 = vst [vmem:[#allocation14_spill] sm:$0xff] %v8852_v54  ;;  %v608_v55 = vld [vmem:[%s8816_s28 + $0xd0] sm:$0xff]  ;;  %v623_v57 = vld [vmem:[%s8816_s28 + $0x148] sm:$0xff]  ;;  %6020 = vmatprep.mubr.msk.f32.mxu1 %vm1158_vm0, %v711_v48 }
  0x5a   : > { %6471 = vmatpush1.bf16.msra.mxu0 %v6470_v23  ;;  %v625_v59 = vld [vmem:[%s8816_s28 + $0x158] sm:$0xff]  ;;  %13383 = vst [vmem:[#allocation15_spill] sm:$0xff] %v8862_v60  ;;  %v8866_v61 = vpack.c.bf16 %v608_v55, %v600_v53  ;;  %v8868_v62 = vpack.c.bf16 %v623_v57, %v615_v56  ;;  %v614_v63 = vld [vmem:[%s8816_s28 + $0x100] sm:$0xff]  ;;  %v616_v1 = vld [vmem:[%s8816_s28 + $0x110] sm:$0xff] }
  0x5b   : > { %6519 = vmatpush1.bf16.msra.mxu1 %v6518_v24  ;;  %6473 = vmatprep.subr.bf16.mxu0 %v6472_v25  ;;  %v622_v0 = vld [vmem:[%s8816_s28 + $0x140] sm:$0xff]  ;;  %v8874_v2 = vpack.c.bf16 %v625_v59, %v617_v58  ;;  %v624_v3 = vld [vmem:[%s8816_s28 + $0x150] sm:$0xff]  ;;  %v631_v4 = vld [vmem:[%s8816_s28 + $0x188] sm:$0xff] }
  0x5c   : > { %6521 = vmatprep.subr.bf16.mxu1 %v6520_v29  ;;  %13384 = vst [vmem:[#allocation16_spill] sm:$0xff] %v8866_v61  ;;  %13385 = vst [vmem:[#allocation17_spill] sm:$0xff] %v8868_v62  ;;  %v639_v5 = vld [vmem:[%s8816_s28 + $0x1c8] sm:$0xff]  ;;  %v633_v6 = vld [vmem:[%s8816_s28 + $0x198] sm:$0xff]  ;;  %v8882_v8 = vpack.c.bf16 %v622_v0, %v614_v63  ;;  %v8886_v9 = vpack.c.bf16 %v624_v3, %v616_v1 }
  0x5d   : > { %13386 = vst [vmem:[#allocation18_spill] sm:$0xff] %v8874_v2  ;;  %v641_v7 = vld [vmem:[%s8816_s28 + $0x1d8] sm:$0xff]  ;;  %v8888_v10 = vpack.c.bf16 %v639_v5, %v631_v4  ;;  %v630_v11 = vld [vmem:[%s8816_s28 + $0x180] sm:$0xff]  ;;  %v632_v13 = vld [vmem:[%s8816_s28 + $0x190] sm:$0xff] }
  0x5e   : > { %6475 = vmatpush1.bf16.msra.mxu0 %v6474_v35  ;;  %13387 = vst [vmem:[#allocation19_spill] sm:$0xff] %v8882_v8  ;;  %13388 = vst [vmem:[#allocation20_spill] sm:$0xff] %v8886_v9  ;;  %v638_v12 = vld [vmem:[%s8816_s28 + $0x1c0] sm:$0xff]  ;;  %v8894_v14 = vpack.c.bf16 %v641_v7, %v633_v6  ;;  %v640_v15 = vld [vmem:[%s8816_s28 + $0x1d0] sm:$0xff] }
  0x5f   : > { %6523 = vmatpush1.bf16.msra.mxu1 %v6522_v36  ;;  %6477 = vmatprep.subr.bf16.mxu0 %v8826_v37  ;;  %13389 = vst [vmem:[#allocation21_spill] sm:$0xff] %v8888_v10  ;;  %v331_v16 = vld [vmem:[%s8740_s13 + $0x28] sm:$0xff]  ;;  %v333_v18 = vld [vmem:[%s8740_s13 + $0x38] sm:$0xff]  ;;  %v8902_v20 = vpack.c.bf16 %v638_v12, %v630_v11  ;;  %v8906_v21 = vpack.c.bf16 %v640_v15, %v632_v13  ;;  %v330_v24 = vld [vmem:[%s8740_s13 + $0x20] sm:$0xff] }
  0x60   : > { %6525 = vmatprep.subr.bf16.mxu1 %v8831_v41  ;;  %13390 = vst [vmem:[#allocation22_spill] sm:$0xff] %v8894_v14  ;;  %v339_v17 = vld [vmem:[%s8740_s13 + $0x68] sm:$0xff]  ;;  %v341_v19 = vld [vmem:[%s8740_s13 + $0x78] sm:$0xff]  ;;  %v338_v25 = vld [vmem:[%s8740_s13 + $0x60] sm:$0xff] }
  0x61   : > { %13391 = vst [vmem:[#allocation23_spill] sm:$0xff] %v8902_v20  ;;  %13392 = vst [vmem:[#allocation24_spill] sm:$0xff] %v8906_v21  ;;  %v6540_v22 = vpack.c.bf16 %v339_v17, %v331_v16  ;;  %v6588_v23 = vpack.c.bf16 %v341_v19, %v333_v18  ;;  %v332_v26 = vld [vmem:[%s8740_s13 + $0x30] sm:$0xff]  ;;  %v347_v28 = vld [vmem:[%s8740_s13 + $0xa8] sm:$0xff]  ;;  %v6542_v34 = vpack.c.bf16 %v338_v25, %v330_v24 }
  0x62   : > { %6479 = vmatpush1.bf16.msra.mxu0 %v8838_v47  ;;  %v340_v27 = vld [vmem:[%s8740_s13 + $0x70] sm:$0xff]  ;;  %v355_v29 = vld [vmem:[%s8740_s13 + $0xe8] sm:$0xff]  ;;  %v8919_v30 = vld [vmem:[%s13118_s2] sm:$0xff] }
  0x63   : > { %6527 = vmatpush1.bf16.msra.mxu1 %v8844_v49  ;;  %6481 = vmatprep.subr.bf16.mxu0 %v8846_v50  ;;  %v349_v31 = vld [vmem:[%s8740_s13 + $0xb8] sm:$0xff]  ;;  %v6590_v35 = vpack.c.bf16 %v340_v27, %v332_v26  ;;  %v6544_v36 = vpack.c.bf16 %v355_v29, %v347_v28  ;;  %v346_v38 = vld [vmem:[%s8740_s13 + $0xa0] sm:$0xff]  ;;  %v348_v40 = vld [vmem:[%s8740_s13 + $0xb0] sm:$0xff] }
  0x64   : > { %6529 = vmatprep.subr.bf16.mxu1 %v8852_v54  ;;  %v357_v32 = vld [vmem:[%s8740_s13 + $0xf8] sm:$0xff]  ;;  %v354_v39 = vld [vmem:[%s8740_s13 + $0xe0] sm:$0xff]  ;;  %v356_v43 = vld [vmem:[%s8740_s13 + $0xf0] sm:$0xff] }
  0x65   : > { %v8927_v33 = vld [vmem:[%s13118_s2 + $0x18] sm:$0xff]  ;;  %v6592_v42 = vpack.c.bf16 %v357_v32, %v349_v31  ;;  %v363_v44 = vld [vmem:[%s8740_s13 + $0x128] sm:$0xff]  ;;  %v8942_v46 = vld [vmem:[%s13118_s2 + $0x10] sm:$0xff]  ;;  %v6546_v53 = vpack.c.bf16 %v354_v39, %v346_v38  ;;  %v6594_v55 = vpack.c.bf16 %v356_v43, %v348_v40 }
  0x66   : > { %6483 = vmatpush1.bf16.msra.mxu0 %v8862_v60  ;;  %v371_v45 = vld [vmem:[%s8740_s13 + $0x168] sm:$0xff]  ;;  %v365_v48 = vld [vmem:[%s8740_s13 + $0x138] sm:$0xff]  ;;  %v362_v57 = vld [vmem:[%s8740_s13 + $0x120] sm:$0xff] }
  0x67   : > { %6531 = vmatpush1.bf16.msra.mxu1 %v8866_v61  ;;  %6485 = vmatprep.subr.bf16.mxu0 %v8868_v62  ;;  %v373_v51 = vld [vmem:[%s8740_s13 + $0x178] sm:$0xff]  ;;  %v8951_v52 = vld [vmem:[%s13118_s2 + $0x28] sm:$0xff]  ;;  %v6548_v56 = vpack.c.bf16 %v371_v45, %v363_v44  ;;  %v370_v58 = vld [vmem:[%s8740_s13 + $0x160] sm:$0xff] }
  0x68   : > { %6533 = vmatprep.subr.bf16.mxu1 %v8874_v2  ;;  %v364_v59 = vld [vmem:[%s8740_s13 + $0x130] sm:$0xff]  ;;  %v6596_v63 = vpack.c.bf16 %v373_v51, %v365_v48  ;;  %v379_v1 = vld [vmem:[%s8740_s13 + $0x1a8] sm:$0xff]  ;;  %v8966_v4 = vld [vmem:[%s13118_s2 + $0x20] sm:$0xff]  ;;  %v6550_v11 = vpack.c.bf16 %v370_v58, %v362_v57 }
  0x69   : > { %v372_v0 = vld [vmem:[%s8740_s13 + $0x170] sm:$0xff]  ;;  %v387_v3 = vld [vmem:[%s8740_s13 + $0x1e8] sm:$0xff]  ;;  %v381_v5 = vld [vmem:[%s8740_s13 + $0x1b8] sm:$0xff] }
  0x6a   : > { %6487 = vmatpush1.bf16.msra.mxu0 %v8882_v8  ;;  %v389_v6 = vld [vmem:[%s8740_s13 + $0x1f8] sm:$0xff]  ;;  %v6598_v12 = vpack.c.bf16 %v372_v0, %v364_v59  ;;  %v6552_v13 = vpack.c.bf16 %v387_v3, %v379_v1  ;;  %v378_v15 = vld [vmem:[%s8740_s13 + $0x1a0] sm:$0xff]  ;;  %v380_v17 = vld [vmem:[%s8740_s13 + $0x1b0] sm:$0xff] }
  0x6b   : > { %6535 = vmatpush1.bf16.msra.mxu1 %v8886_v9  ;;  %6489 = vmatprep.subr.bf16.mxu0 %v8888_v10  ;;  %v8975_v7 = vld [vmem:[%s13118_s2 + $0x38] sm:$0xff]  ;;  %v386_v16 = vld [vmem:[%s8740_s13 + $0x1e0] sm:$0xff]  ;;  %v6600_v18 = vpack.c.bf16 %v389_v6, %v381_v5  ;;  %v388_v19 = vld [vmem:[%s8740_s13 + $0x1f0] sm:$0xff] }
  0x6c   : > { %6537 = vmatprep.subr.bf16.mxu1 %v8894_v14  ;;  %v8990_v24 = vld [vmem:[%s13118_s2 + $0x30] sm:$0xff]  ;;  %v397_v25 = vld [vmem:[%s8740_s13 + $0x238] sm:$0xff]  ;;  %v8999_v27 = vld [vmem:[%s13118_s2 + $0x48] sm:$0xff]  ;;  %v6554_v28 = vpack.c.bf16 %v386_v16, %v378_v15  ;;  %v6602_v29 = vpack.c.bf16 %v388_v19, %v380_v17 }
  0x6d   : > { %v405_v26 = vld [vmem:[%s8740_s13 + $0x278] sm:$0xff]  ;;  %v394_v32 = vld [vmem:[%s8740_s13 + $0x220] sm:$0xff]  ;;  %v404_v38 = vld [vmem:[%s8740_s13 + $0x270] sm:$0xff] }
  0x6e   : > { %6491 = vmatpush1.bf16.msra.mxu0 %v8902_v20  ;;  %v9012_v39 = vld [vmem:[%s13118_s2 + $0x40] sm:$0xff]  ;;  %v9019_v40 = vld [vmem:[%s13118_s2 + $0x58] sm:$0xff]  ;;  %v411_v44 = vld [vmem:[%s8740_s13 + $0x2a8] sm:$0xff] }
  0x6f   : > { %6539 = vmatpush1.bf16.msra.mxu1 %v8906_v21  ;;  %6541 = vmatprep.subr.bf16.mxu0 %v6540_v22  ;;  %v395_v22 = vld [vmem:[%s8740_s13 + $0x228] sm:$0xff]  ;;  %v982_v48 = vld [vmem:[%s13120_s4 + $0x80] sm:$0xff]  ;;  %v413_v51 = vld [vmem:[%s8740_s13 + $0x2b8] sm:$0xff] }
  0x70   : > { %6589 = vmatprep.subr.bf16.mxu1 %v6588_v23  ;;  %v403_v23 = vld [vmem:[%s8740_s13 + $0x268] sm:$0xff]  ;;  %1080 = vperm.xlu0 %6895, %v982_v48   ;;  %v418_v0 = vld [vmem:[%s8740_s13 + $0x2e0] sm:$0xff]  ;;  %v412_v3 = vld [vmem:[%s8740_s13 + $0x2b0] sm:$0xff] }
  0x71   : > { %1320 = vmatmul.mubr.f32.vlgmr.msra.gmra.mrb[0].mxu0 %v8919_v30  ;;  %v6556_v31 = vpack.c.bf16 %v403_v23, %v395_v22  ;;  %v419_v45 = vld [vmem:[%s8740_s13 + $0x2e8] sm:$0xff]  ;;  %v420_v5 = vld [vmem:[%s8740_s13 + $0x2f0] sm:$0xff]  ;;  %v9061_v6 = vld [vmem:[%s13118_s2 + $0x60] sm:$0xff] }
  0x72   : > { %1577 = vmatmul.mubr.f32.vlgmr.msra.gmra.mrb[0].mxu1 %v8919_v30  ;;  %5989 = vmatprep.mubr.msk.f32.mxu0 %vm1158_vm0, %v8927_v33  ;;  %v9045_v57 = vld [vmem:[%s13118_s2 + $0x68] sm:$0xff]  ;;  %v6560_v58 = vpack.c.bf16 %v419_v45, %v411_v44  ;;  %v6610_v15 = vpack.c.bf16 %v420_v5, %v412_v3  ;;  %v429_v19 = vld [vmem:[%s8740_s13 + $0x338] sm:$0xff]  ;;  %v9087_v23 = vld [vmem:[%s13118_s2 + $0x70] sm:$0xff] }
  0x73   : > { %6021 = vmatprep.mubr.msk.f32.mxu1 %vm1158_vm0, %v8927_v33  ;;  %6543 = vmatpush1.bf16.msra.mxu0 %v6542_v34  ;;  %v402_v34 = vld [vmem:[%s8740_s13 + $0x260] sm:$0xff]  ;;  %v983_v1 = vld [vmem:[%s13120_s4 + $0x88] sm:$0xff]  ;;  %v437_v22 = vld [vmem:[%s8740_s13 + $0x378] sm:$0xff] }
  0x74   : > { %6591 = vmatpush1.bf16.msra.mxu1 %v6590_v35  ;;  %6545 = vmatprep.subr.bf16.mxu0 %v6544_v36  ;;  %v6604_v35 = vpack.c.bf16 %v405_v26, %v397_v25  ;;  %v396_v36 = vld [vmem:[%s8740_s13 + $0x230] sm:$0xff]  ;;  %v427_v16 = vld [vmem:[%s8740_s13 + $0x328] sm:$0xff]  ;;  %v442_v5 = vld [vmem:[%s8740_s13 + $0x3a0] sm:$0xff] }
  0x75   : > { %1326 = vmatmul.mubr.f32.gmra.mrb[2].mxu0 %v8942_v46  ;;  %6593 = vmatprep.subr.bf16.mxu1 %v6592_v42  ;;  %v6558_v42 = vpack.c.bf16 %v402_v34, %v394_v32  ;;  %v6606_v43 = vpack.c.bf16 %v404_v38, %v396_v36  ;;  %v435_v17 = vld [vmem:[%s8740_s13 + $0x368] sm:$0xff]  ;;  %v434_v32 = vld [vmem:[%s8740_s13 + $0x360] sm:$0xff]  ;;  %v988_v34 = vld [vmem:[%s13120_s4 + $0xb0] sm:$0xff] }
  0x76   : > { %1583 = vmatmul.mubr.f32.gmra.mrb[2].mxu1 %v8942_v46  ;;  %5990 = vmatprep.mubr.msk.f32.mxu0 %vm1158_vm0, %v8951_v52  ;;  %v987_v25 = vld [vmem:[%s13120_s4 + $0xa8] sm:$0xff]  ;;  %v436_v36 = vld [vmem:[%s8740_s13 + $0x370] sm:$0xff]  ;;  %v9113_v38 = vld [vmem:[%s13118_s2 + $0x80] sm:$0xff] }
  0x77   : > { %6022 = vmatprep.mubr.msk.f32.mxu1 %vm1158_vm0, %v8951_v52  ;;  %6547 = vmatpush1.bf16.msra.mxu0 %v6546_v53  ;;  %v421_v53 = vld [vmem:[%s8740_s13 + $0x2f8] sm:$0xff]  ;;  %v9097_v26 = vld [vmem:[%s13118_s2 + $0x88] sm:$0xff]  ;;  %v634_v21 = vld [vmem:[%s8816_s28 + $0x1a0] sm:$0xff] }
  0x78   : > { %6595 = vmatpush1.bf16.msra.mxu1 %v6594_v55  ;;  %6549 = vmatprep.subr.bf16.mxu0 %v6548_v56  ;;  %v9035_v55 = vld [vmem:[%s13118_s2 + $0x50] sm:$0xff]  ;;  %v6608_v59 = vpack.c.bf16 %v421_v53, %v413_v51  ;;  %v443_v48 = vld [vmem:[%s8740_s13 + $0x3a8] sm:$0xff]  ;;  %v990_v53 = vld [vmem:[%s13120_s4 + $0xc0] sm:$0xff] }
  0x79   : > { %1332 = vmatmul.mubr.f32.gmra.mrb[4].mxu0 %v8966_v4  ;;  %6597 = vmatprep.subr.bf16.mxu1 %v6596_v63  ;;  %v984_v56 = vld [vmem:[%s13120_s4 + $0x90] sm:$0xff]  ;;  %v410_v63 = vld [vmem:[%s8740_s13 + $0x2a0] sm:$0xff]  ;;  %v451_v51 = vld [vmem:[%s8740_s13 + $0x3e8] sm:$0xff] }
  0x7a   : > { %1589 = vmatmul.mubr.f32.gmra.mrb[4].mxu1 %v8966_v4  ;;  %5991 = vmatprep.mubr.msk.f32.mxu0 %vm1158_vm0, %v8975_v7  ;;  %v642_v20 = vld [vmem:[%s8816_s28 + $0x1e0] sm:$0xff]  ;;  %v976_v14 = vld [vmem:[%s13120_s4 + $0x50] sm:$0xff]  ;;  %v4306_v8 = vld [vmem:[%s13121_s5 + $0x38] sm:$0xff] }
  0x7b   : > { %6023 = vmatprep.mubr.msk.f32.mxu1 %vm1158_vm0, %v8975_v7  ;;  %6551 = vmatpush1.bf16.msra.mxu0 %v6550_v11  ;;  %v985_v11 = vld [vmem:[%s13120_s4 + $0x98] sm:$0xff]  ;;  %v4307_v9 = vld [vmem:[%s13121_s5 + $0x40] sm:$0xff]  ;;  %v4309_v2 = vld [vmem:[%s13121_s5 + $0x50] sm:$0xff] }
  0x7c   : > { %6599 = vmatpush1.bf16.msra.mxu1 %v6598_v12  ;;  %6553 = vmatprep.subr.bf16.mxu0 %v6552_v13  ;;  %v9071_v12 = vld [vmem:[%s13118_s2 + $0x78] sm:$0xff]  ;;  %v6562_v13 = vpack.c.bf16 %v418_v0, %v410_v63  ;;  %v991_v63 = vld [vmem:[%s13120_s4 + $0xc8] sm:$0xff]  ;;  %v4311_v61 = vld [vmem:[%s13121_s5 + $0x60] sm:$0xff] }
  0x7d   : > { %1338 = vmatmul.mubr.f32.gmra.mrb[6].mxu0 %v8990_v24  ;;  %6601 = vmatprep.subr.bf16.mxu1 %v6600_v18  ;;  %v986_v18 = vld [vmem:[%s13120_s4 + $0xa0] sm:$0xff]  ;;  %v9149_v0 = vld [vmem:[%s13118_s2 + $0xa8] sm:$0xff]  ;;  %v4310_v60 = vld [vmem:[%s13121_s5 + $0x58] sm:$0xff] }
  0x7e   : > { %1595 = vmatmul.mubr.f32.gmra.mrb[6].mxu1 %v8990_v24  ;;  %5992 = vmatprep.mubr.msk.f32.mxu0 %vm1158_vm0, %v8999_v27  ;;  %v4308_v62 = vld [vmem:[%s13121_s5 + $0x48] sm:$0xff]  ;;  %v4313_v54 = vld [vmem:[%s13121_s5 + $0x70] sm:$0xff]  ;;  %v4314_v49 = vld [vmem:[%s13121_s5 + $0x78] sm:$0xff] }
  0x7f   : > { %6024 = vmatprep.mubr.msk.f32.mxu1 %vm1158_vm0, %v8999_v27  ;;  %6555 = vmatpush1.bf16.msra.mxu0 %v6554_v28  ;;  %v6564_v28 = vpack.c.bf16 %v435_v17, %v427_v16  ;;  %v452_v16 = vld [vmem:[%s8740_s13 + $0x3f0] sm:$0xff]  ;;  %v9165_v17 = vld [vmem:[%s13118_s2 + $0xa0] sm:$0xff]  ;;  %v4312_v50 = vld [vmem:[%s13121_s5 + $0x68] sm:$0xff] }
  0x80   : > { %6603 = vmatpush1.bf16.msra.mxu1 %v6602_v29  ;;  %6557 = vmatprep.subr.bf16.mxu0 %v6556_v31  ;;  %v6612_v29 = vpack.c.bf16 %v437_v22, %v429_v19  ;;  %v426_v31 = vld [vmem:[%s8740_s13 + $0x320] sm:$0xff]  ;;  %v9175_v19 = vld [vmem:[%s13118_s2 + $0xb8] sm:$0xff]  ;;  %v9660_v47 = vld [vmem:[%s13118_s2 + $0x1d0] sm:$0xff] }
  0x81   : > { %1344 = vmatmul.mubr.f32.gmra.mrb[8].mxu0 %v9012_v39  ;;  %6605 = vmatprep.subr.bf16.mxu1 %v6604_v35  ;;  %v428_v35 = vld [vmem:[%s8740_s13 + $0x330] sm:$0xff]  ;;  %v6566_v44 = vpack.c.bf16 %v434_v32, %v426_v31  ;;  %v994_v31 = vld [vmem:[%s13120_s4 + $0xe0] sm:$0xff]  ;;  %v589_v32 = vld [vmem:[%s8816_s28 + $0x38] sm:$0xff] }
  0x82   : > { %1601 = vmatmul.mubr.f32.gmra.mrb[8].mxu1 %v9012_v39  ;;  %5993 = vmatprep.mubr.msk.f32.mxu0 %vm1158_vm0, %v9019_v40  ;;  %v6614_v45 = vpack.c.bf16 %v436_v36, %v428_v35  ;;  %v9191_v35 = vld [vmem:[%s13118_s2 + $0xb0] sm:$0xff]  ;;  %v995_v36 = vld [vmem:[%s13120_s4 + $0xe8] sm:$0xff]  ;;  %v9683_v41 = vld [vmem:[%s13118_s2 + $0x1f8] sm:$0xff] }
  0x83   : > { %6025 = vmatprep.mubr.msk.f32.mxu1 %vm1158_vm0, %v9019_v40  ;;  %6559 = vmatpush1.bf16.msra.mxu0 %v6558_v42  ;;  %v989_v42 = vld [vmem:[%s13120_s4 + $0xb8] sm:$0xff]  ;;  %v8177_v37 = vld [vmem:[%s13118_s2 + $0x8] sm:$0xff] }
  0x84   : > { %6607 = vmatpush1.bf16.msra.mxu1 %v6606_v43  ;;  %1090 = vperm.xlu1 %6896, %v984_v56   ;;  %v9123_v43 = vld [vmem:[%s13118_s2 + $0x98] sm:$0xff] }
  0x85   : > { %1350 = vmatmul.mubr.f32.gmra.mrb[10].mxu0 %v9035_v55  ;;  %6561 = vmatprep.subr.bf16.mxu0 %v6560_v58  ;;  %v445_v56 = vld [vmem:[%s8740_s13 + $0x3b8] sm:$0xff] }
  0x86   : > { %1607 = vmatmul.mubr.f32.gmra.mrb[10].mxu1 %v9035_v55  ;;  %5994 = vmatprep.mubr.msk.f32.mxu0 %vm1158_vm0, %v9045_v57  ;;  %v453_v58 = vld [vmem:[%s8740_s13 + $0x3f8] sm:$0xff] }
  0x87   : > { %6026 = vmatprep.mubr.msk.f32.mxu1 %vm1158_vm0, %v9045_v57  ;;  %1085 = vperm.xlu0 %6895, %v983_v1   ;;  %v6568_v1 = vpack.c.bf16 %v451_v51, %v443_v48  ;;  %v6616_v3 = vpack.c.bf16 %v453_v58, %v445_v56  ;;  %v586_v48 = vld [vmem:[%s8816_s28 + $0x20] sm:$0xff]  ;;  %v588_v56 = vld [vmem:[%s8816_s28 + $0x30] sm:$0xff] }
  0x88   : > { %6609 = vmatprep.subr.bf16.mxu1 %v6608_v59  ;;  %1095 = vperm.xlu1 %6896, %v985_v11   ;;  %v9139_v59 = vld [vmem:[%s13118_s2 + $0x90] sm:$0xff]  ;;  %v450_v11 = vld [vmem:[%s8740_s13 + $0x3e0] sm:$0xff] }
  0x89   : > { %1356 = vmatmul.mubr.f32.gmra.mrb[12].mxu0 %v9061_v6  ;;  %6611 = vmatpush1.bf16.msra.mxu1 %v6610_v15  ;;  %v444_v15 = vld [vmem:[%s8740_s13 + $0x3b0] sm:$0xff]  ;;  %v6570_v22 = vpack.c.bf16 %v450_v11, %v442_v5  ;;  %v594_v51 = vld [vmem:[%s8816_s28 + $0x60] sm:$0xff] }
  0x8a   : > { %1613 = vmatmul.mubr.f32.gmra.mrb[12].mxu1 %v9061_v6  ;;  %5995 = vmatprep.mubr.msk.f32.mxu0 %vm1158_vm0, %v9071_v12  ;;  %v596_v58 = vld [vmem:[%s8816_s28 + $0x70] sm:$0xff]  ;;  %v9234_v5 = vpack.c.bf16 %v594_v51, %v586_v48 }
  0x8b   : > { %6027 = vmatprep.mubr.msk.f32.mxu1 %vm1158_vm0, %v9071_v12  ;;  %6563 = vmatpush1.bf16.msra.mxu0 %v6562_v13  ;;  %v992_v13 = vld [vmem:[%s13120_s4 + $0xd0] sm:$0xff]  ;;  %v9237_v11 = vpack.c.bf16 %v596_v58, %v588_v56  ;;  %v9285_v56 = vld [vmem:[%s13118_s2 + $0xe0] sm:$0xff]  ;;  %v969_v58 = vld [vmem:[%s13120_s4 + $0x18] sm:$0xff] }
  0x8c   : > { %1100 = vperm.xlu0 %6895, %v986_v18   ;;  %1105 = vperm.xlu1 %6896, %v987_v25   ;;  %v993_v18 = vld [vmem:[%s13120_s4 + $0xd8] sm:$0xff]  ;;  %v6618_v25 = vpack.c.bf16 %v452_v16, %v444_v15  ;;  %13395 = vst [vmem:[#allocation27_spill] sm:$0xff] %v9234_v5  ;;  %v611_v15 = vld [vmem:[%s8816_s28 + $0xe8] sm:$0xff]  ;;  %v966_v16 = vld [vmem:[%s13120_s4] sm:$0xff] }
  0x8d   : > { %1362 = vmatmul.mubr.f32.gmra.mrb[14].mxu0 %v9087_v23  ;;  %6565 = vmatprep.subr.bf16.mxu0 %v6564_v28  ;;  %v587_v28 = vld [vmem:[%s8816_s28 + $0x28] sm:$0xff]  ;;  %13396 = vst [vmem:[#allocation28_spill] sm:$0xff] %v9237_v11  ;;  %v968_v48 = vld [vmem:[%s13120_s4 + $0x10] sm:$0xff] }
  0x8e   : > { %1619 = vmatmul.mubr.f32.gmra.mrb[14].mxu1 %v9087_v23  ;;  %5996 = vmatprep.mubr.msk.f32.mxu0 %vm1158_vm0, %v9097_v26  ;;  %v604_v51 = vld [vmem:[%s8816_s28 + $0xb0] sm:$0xff] }
  0x8f   : > { %6028 = vmatprep.mubr.msk.f32.mxu1 %vm1158_vm0, %v9097_v26  ;;  %6613 = vmatprep.subr.bf16.mxu1 %v6612_v29  ;;  %v595_v29 = vld [vmem:[%s8816_s28 + $0x68] sm:$0xff] }
  0x90   : > { %1110 = vperm.xlu0 %6895, %v988_v34   ;;  %1115 = vperm.xlu1 %6896, %v989_v42   ;;  %v597_v34 = vld [vmem:[%s8816_s28 + $0x78] sm:$0xff]  ;;  %v9201_v42 = vld [vmem:[%s13118_s2 + $0xc8] sm:$0xff] }
  0x91   : > { %1368 = vmatmul.mubr.f32.gmra.mrb[16].mxu0 %v9113_v38  ;;  %6615 = vmatpush1.bf16.msra.mxu1 %v6614_v45  ;;  %v9205_v45 = vpack.c.bf16 %v597_v34, %v589_v32  ;;  %v602_v34 = vld [vmem:[%s8816_s28 + $0xa0] sm:$0xff] }
  0x92   : > { %1625 = vmatmul.mubr.f32.gmra.mrb[16].mxu1 %v9113_v38  ;;  %5997 = vmatprep.mubr.msk.f32.mxu0 %vm1158_vm0, %v9123_v43 }
  0x93   : > { %6029 = vmatprep.mubr.msk.f32.mxu1 %vm1158_vm0, %v9123_v43  ;;  %6567 = vmatpush1.bf16.msra.mxu0 %v6566_v44  ;;  %v9203_v44 = vpack.c.bf16 %v595_v29, %v587_v28  ;;  %13394 = vst [vmem:[#allocation26_spill] sm:$0xff] %v9205_v45  ;;  %v967_v28 = vld [vmem:[%s13120_s4 + $0x8] sm:$0xff] }
  0x94   : > { %1120 = vperm.xlu0 %6895, %v990_v53   ;;  %1125 = vperm.xlu1 %6896, %v991_v63   ;;  %v996_v53 = vld [vmem:[%s13120_s4 + $0xf0] sm:$0xff]  ;;  %v9221_v63 = vld [vmem:[%s13118_s2 + $0xc0] sm:$0xff]  ;;  %v9263_v29 = vld [vmem:[%s13118_s2 + $0xe8] sm:$0xff] }
  0x95   : > { %1374 = vmatmul.mubr.f32.gmra.mrb[18].mxu0 %v9139_v59  ;;  %6569 = vmatprep.subr.bf16.mxu0 %v6568_v1  ;;  %13393 = vst [vmem:[#allocation25_spill] sm:$0xff] %v9203_v44  ;;  %v997_v1 = vld [vmem:[%s13120_s4 + $0xf8] sm:$0xff] }
  0x96   : > { %1631 = vmatmul.mubr.f32.gmra.mrb[18].mxu1 %v9139_v59  ;;  %5998 = vmatprep.mubr.msk.f32.mxu0 %vm1158_vm0, %v9149_v0 }
  0x97   : > { %6030 = vmatprep.mubr.msk.f32.mxu1 %vm1158_vm0, %v9149_v0  ;;  %6617 = vmatprep.subr.bf16.mxu1 %v6616_v3  ;;  %v9231_v3 = vld [vmem:[%s13118_s2 + $0xd8] sm:$0xff] }
  0x98   : > { %1130 = vperm.xlu0 %6895, %v992_v13   ;;  %1135 = vperm.xlu1 %6896, %v993_v18   ;;  %v603_v13 = vld [vmem:[%s8816_s28 + $0xa8] sm:$0xff]  ;;  %v605_v18 = vld [vmem:[%s8816_s28 + $0xb8] sm:$0xff] }
  0x99   : > { %1380 = vmatmul.mubr.f32.gmra.mrb[20].mxu0 %v9165_v17  ;;  %6619 = vmatpush1.bf16.msra.mxu1 %v6618_v25  ;;  %v9253_v25 = vld [vmem:[%s13118_s2 + $0xd0] sm:$0xff] }
  0x9a   : > { %1637 = vmatmul.mubr.f32.gmra.mrb[20].mxu1 %v9165_v17  ;;  %5999 = vmatprep.mubr.msk.f32.mxu0 %vm1158_vm0, %v9175_v19 }
  0x9b   : > { %6031 = vmatprep.mubr.msk.f32.mxu1 %vm1158_vm0, %v9175_v19  ;;  %6571 = vmatpush1.bf16.msra.mxu0 %v6570_v22  ;;  %v613_v22 = vld [vmem:[%s8816_s28 + $0xf8] sm:$0xff] }
  0x9c   : > { %1140 = vperm.xlu0 %6895, %v994_v31   ;;  %1145 = vperm.xlu1 %6896, %v995_v36   ;;  %v9266_v31 = vpack.c.bf16 %v611_v15, %v603_v13  ;;  %v9269_v32 = vpack.c.bf16 %v613_v22, %v605_v18  ;;  %v610_v36 = vld [vmem:[%s8816_s28 + $0xe0] sm:$0xff]  ;;  %v627_v18 = vld [vmem:[%s8816_s28 + $0x168] sm:$0xff] }
  0x9d   : > { %1386 = vmatmul.mubr.f32.gmra.mrb[22].mxu0 %v9191_v35  ;;  %6573 = vmatprep.subr.bf16.mxu0 %v9203_v44  ;;  %v9298_v13 = vpack.c.bf16 %v610_v36, %v602_v34  ;;  %v970_v22 = vld [vmem:[%s13120_s4 + $0x20] sm:$0xff]  ;;  %v9317_v34 = vld [vmem:[%s13118_s2 + $0xf0] sm:$0xff]  ;;  %v971_v36 = vld [vmem:[%s13120_s4 + $0x28] sm:$0xff] }
  0x9e   : > { %1643 = vmatmul.mubr.f32.gmra.mrb[22].mxu1 %v9191_v35  ;;  %6000 = vmatprep.mubr.msk.f32.mxu0 %vm1158_vm0, %v9201_v42  ;;  %13397 = vst [vmem:[#allocation29_spill] sm:$0xff] %v9266_v31  ;;  %13398 = vst [vmem:[#allocation30_spill] sm:$0xff] %v9269_v32 }
  0x9f   : > { %6032 = vmatprep.mubr.msk.f32.mxu1 %vm1158_vm0, %v9201_v42  ;;  %6621 = vmatprep.subr.bf16.mxu1 %v9205_v45  ;;  %13399 = vst [vmem:[#allocation31_spill] sm:$0xff] %v9298_v13  ;;  %v643_v45 = vld [vmem:[%s8816_s28 + $0x1e8] sm:$0xff] }
  0xa0   : > { %1150 = vperm.xlu0 %6895, %v996_v53   ;;  %1155 = vperm.xlu1 %6896, %v997_v1   ;;  %v612_v53 = vld [vmem:[%s8816_s28 + $0xf0] sm:$0xff]  ;;  %v9295_v1 = vld [vmem:[%s13118_s2 + $0xf8] sm:$0xff] }
  0xa1   : > { %1392 = vmatmul.mubr.f32.gmra.mrb[24].mxu0 %v9221_v63  ;;  %6623 = vmatpush1.bf16.msra.mxu1 %v9237_v11  ;;  %v9301_v15 = vpack.c.bf16 %v612_v53, %v604_v51  ;;  %v972_v11 = vld [vmem:[%s13120_s4 + $0x30] sm:$0xff] }
  0xa2   : > { %1649 = vmatmul.mubr.f32.gmra.mrb[24].mxu1 %v9221_v63  ;;  %6001 = vmatprep.mubr.msk.f32.mxu0 %vm1158_vm0, %v9231_v3 }
  0xa3   : > { %6033 = vmatprep.mubr.msk.f32.mxu1 %vm1158_vm0, %v9231_v3  ;;  %6575 = vmatpush1.bf16.msra.mxu0 %v9234_v5  ;;  %13400 = vst [vmem:[#allocation32_spill] sm:$0xff] %v9301_v15  ;;  %v620_v5 = vld [vmem:[%s8816_s28 + $0x130] sm:$0xff] }
  0xa4   : > { %1000 = vperm.xlu0 %6895, %v966_v16   ;;  %1005 = vperm.xlu1 %6896, %v967_v28   ;;  %v619_v16 = vld [vmem:[%s8816_s28 + $0x128] sm:$0xff]  ;;  %v621_v28 = vld [vmem:[%s8816_s28 + $0x138] sm:$0xff] }
  0xa5   : > { %1398 = vmatmul.mubr.f32.gmra.mrb[26].mxu0 %v9253_v25  ;;  %6577 = vmatprep.subr.bf16.mxu0 %v9266_v31  ;;  %v629_v31 = vld [vmem:[%s8816_s28 + $0x178] sm:$0xff]  ;;  %v9330_v51 = vpack.c.bf16 %v627_v18, %v619_v16 }
  0xa6   : > { %1655 = vmatmul.mubr.f32.gmra.mrb[26].mxu1 %v9253_v25  ;;  %6002 = vmatprep.mubr.msk.f32.mxu0 %vm1158_vm0, %v9263_v29  ;;  %v9333_v53 = vpack.c.bf16 %v629_v31, %v621_v28  ;;  %v9349_v31 = vld [vmem:[%s13118_s2 + $0x100] sm:$0xff]  ;;  %v973_v16 = vld [vmem:[%s13120_s4 + $0x38] sm:$0xff]  ;;  %v9367_v28 = vld [vmem:[%s13118_s2 + $0x110] sm:$0xff] }
  0xa7   : > { %6034 = vmatprep.mubr.msk.f32.mxu1 %vm1158_vm0, %v9263_v29  ;;  %6625 = vmatprep.subr.bf16.mxu1 %v9269_v32  ;;  %13401 = vst [vmem:[#allocation33_spill] sm:$0xff] %v9330_v51  ;;  %v626_v32 = vld [vmem:[%s8816_s28 + $0x160] sm:$0xff]  ;;  %v9359_v18 = vld [vmem:[%s13118_s2 + $0x118] sm:$0xff] }
  0xa8   : > { %1010 = vperm.xlu0 %6895, %v968_v48   ;;  %1015 = vperm.xlu1 %6896, %v969_v58   ;;  %v9327_v48 = vld [vmem:[%s13118_s2 + $0x108] sm:$0xff]  ;;  %13402 = vst [vmem:[#allocation34_spill] sm:$0xff] %v9333_v53  ;;  %v618_v58 = vld [vmem:[%s8816_s28 + $0x120] sm:$0xff] }
  0xa9   : > { %1404 = vmatmul.mubr.f32.gmra.mrb[28].mxu0 %v9285_v56  ;;  %6627 = vmatpush1.bf16.msra.mxu1 %v9301_v15  ;;  %v635_v15 = vld [vmem:[%s8816_s28 + $0x1a8] sm:$0xff] }
  0xaa   : > { %1661 = vmatmul.mubr.f32.gmra.mrb[28].mxu1 %v9285_v56  ;;  %6003 = vmatprep.mubr.msk.f32.mxu0 %vm1158_vm0, %v9295_v1 }
  0xab   : > { %6035 = vmatprep.mubr.msk.f32.mxu1 %vm1158_vm0, %v9295_v1  ;;  %6579 = vmatpush1.bf16.msra.mxu0 %v9298_v13  ;;  %v628_v13 = vld [vmem:[%s8816_s28 + $0x170] sm:$0xff] }
  0xac   : > { %1020 = vperm.xlu0 %6895, %v970_v22   ;;  %1025 = vperm.xlu1 %6896, %v971_v36   ;;  %v9362_v22 = vpack.c.bf16 %v626_v32, %v618_v58  ;;  %v9370_v36 = vpack.c.bf16 %v628_v13, %v620_v5  ;;  %v974_v32 = vld [vmem:[%s13120_s4 + $0x40] sm:$0xff]  ;;  %v637_v58 = vld [vmem:[%s8816_s28 + $0x1b8] sm:$0xff]  ;;  %v975_v5 = vld [vmem:[%s13120_s4 + $0x48] sm:$0xff] }
  0xad   : > { %1410 = vmatmul.mubr.f32.gmra.mrb[30].mxu0 %v9317_v34  ;;  %6581 = vmatprep.subr.bf16.mxu0 %v9330_v51  ;;  %v645_v51 = vld [vmem:[%s8816_s28 + $0x1f8] sm:$0xff]  ;;  %v644_v13 = vld [vmem:[%s8816_s28 + $0x1f0] sm:$0xff] }
  0xae   : > { %1667 = vmatmul.mubr.f32.gmra.mrb[30].mxu1 %v9317_v34  ;;  %6004 = vmatprep.mubr.msk.f32.mxu0 %vm1158_vm0, %v9327_v48  ;;  %13403 = vst [vmem:[#allocation35_spill] sm:$0xff] %v9362_v22  ;;  %13404 = vst [vmem:[#allocation36_spill] sm:$0xff] %v9370_v36  ;;  %v9399_v44 = vpack.c.bf16 %v645_v51, %v637_v58  ;;  %v9425_v51 = vpack.c.bf16 %v642_v20, %v634_v21  ;;  %v978_v58 = vld [vmem:[%s13120_s4 + $0x60] sm:$0xff]  ;;  %v9449_v20 = vld [vmem:[%s13118_s2 + $0x148] sm:$0xff] }
  0xaf   : > { %6036 = vmatprep.mubr.msk.f32.mxu1 %vm1158_vm0, %v9327_v48  ;;  %6629 = vmatprep.subr.bf16.mxu1 %v9333_v53  ;;  %v9396_v53 = vpack.c.bf16 %v643_v45, %v635_v15  ;;  %v9415_v45 = vld [vmem:[%s13118_s2 + $0x120] sm:$0xff]  ;;  %v9422_v15 = vld [vmem:[%s13118_s2 + $0x138] sm:$0xff]  ;;  %v980_v21 = vld [vmem:[%s13120_s4 + $0x70] sm:$0xff] }
  0xb0   : > { %1030 = vperm.xlu0 %6895, %v972_v11   ;;  %1035 = vperm.xlu1 %6896, %v973_v16   ;;  %v636_v11 = vld [vmem:[%s8816_s28 + $0x1b0] sm:$0xff]  ;;  %v9393_v16 = vld [vmem:[%s13118_s2 + $0x128] sm:$0xff]  ;;  %13406 = vst [vmem:[#allocation38_spill] sm:$0xff] %v9399_v44  ;;  %13408 = vst [vmem:[#allocation40_spill] sm:$0xff] %v9425_v51  ;;  %s8502_s28 = scalar_lea.vmem %s8501_s27, 32768 }
  0xb1   : > { %1416 = vmatmul.mubr.f32.gmra.mrb[32].mxu0 %v9349_v31  ;;  %13405 = vst [vmem:[#allocation37_spill] sm:$0xff] %v9396_v53  ;;  %6631 = vmatpush1.bf16.msra.mxu1 %v9370_v36  ;;  %v9407_v10 = vpack.c.bf16 %v644_v13, %v636_v11  ;;  %v9465_v11 = vld [vmem:[%s13118_s2 + $0x140] sm:$0xff]  ;;  %v9472_v13 = vld [vmem:[%s13118_s2 + $0x158] sm:$0xff]  ;;  %v4305_v36 = vld [vmem:[%s13121_s5 + $0x30] sm:$0xff]  ;;  %p8504_p2 = scmp.lt.s32.totalorder %s8502_s28, %s8496_s15 }
  0xb2   : > { %1673 = vmatmul.mubr.f32.gmra.mrb[32].mxu1 %v9349_v31  ;;  %6005 = vmatprep.mubr.msk.f32.mxu0 %vm1158_vm0, %v9359_v18 }
  0xb3   : > { %6037 = vmatprep.mubr.msk.f32.mxu1 %vm1158_vm0, %v9359_v18  ;;  %6583 = vmatpush1.bf16.msra.mxu0 %v9362_v22  ;;  %13407 = vst [vmem:[#allocation39_spill] sm:$0xff] %v9407_v10  ;;  %v4304_v22 = vld [vmem:[%s13121_s5 + $0x28] sm:$0xff]  ;;  %p8505_p5 = por %p8504_p2, %p8503_p13 }
  0xb4   : > { %1040 = vperm.xlu0 %6895, %v974_v32   ;;  %1045 = vperm.xlu1 %6896, %v975_v5   ;;  %v977_v32 = vld [vmem:[%s13120_s4 + $0x58] sm:$0xff]  ;;  %v979_v5 = vld [vmem:[%s13120_s4 + $0x68] sm:$0xff] }
  0xb5   : > { %1422 = vmatmul.mubr.f32.gmra.mrb[34].mxu0 %v9367_v28  ;;  %6585 = vmatprep.subr.bf16.mxu0 %v9396_v53  ;;  %v4302_v53 = vld [vmem:[%s13121_s5 + $0x18] sm:$0xff]  ;;  %p8506_p4 = pnand %p8505_p5, %p8499_p6 }
  0xb6   : > { %1679 = vmatmul.mubr.f32.gmra.mrb[34].mxu1 %v9367_v28  ;;  %6006 = vmatprep.mubr.msk.f32.mxu0 %vm1158_vm0, %v9393_v16 }
  0xb7   : > { %6038 = vmatprep.mubr.msk.f32.mxu1 %vm1158_vm0, %v9393_v16  ;;  %6633 = vmatprep.subr.bf16.mxu1 %v9399_v44  ;;  %v4303_v44 = vld [vmem:[%s13121_s5 + $0x20] sm:$0xff] }
  0xb8   : > { %1050 = vperm.xlu0 %6895, %v976_v14   ;;  %6635 = vmatpush1.bf16.msra.mxu1 %v9407_v10  ;;  %v9442_v14 = vld [vmem:[%s13118_s2 + $0x130] sm:$0xff] }
  0xb9   : > { %1428 = vmatmul.mubr.f32.gmra.mrb[36].mxu0 %v9415_v45  ;;  %1055 = vperm.xlu1 %6896, %v977_v32   ;;  %v4299_v32 = vld [vmem:[%s13121_s5] sm:$0xff]  ;;  %v4301_v10 = vld [vmem:[%s13121_s5 + $0x10] sm:$0xff] }
  0xba   : > { %1685 = vmatmul.mubr.f32.gmra.mrb[36].mxu1 %v9415_v45  ;;  %6007 = vmatprep.mubr.msk.f32.mxu0 %vm1158_vm0, %v9422_v15 }
  0xbb   : > { %6039 = vmatprep.mubr.msk.f32.mxu1 %vm1158_vm0, %v9422_v15  ;;  %6587 = vmatpush1.bf16.msra.mxu0 %v9425_v51  ;;  %v4300_v51 = vld [vmem:[%s13121_s5 + $0x8] sm:$0xff] }
  0xbc   : > { %1060 = vperm.xlu0 %6895, %v978_v58   ;;  %v981_v58 = vld [vmem:[%s13120_s4 + $0x78] sm:$0xff] }
  0xbd   : > { %1434 = vmatmul.mubr.f32.gmra.mrb[38].mxu0 %v9442_v14  ;;  %1065 = vperm.xlu1 %6896, %v979_v5   ;;  %v9494_v5 = vld [vmem:[%s13118_s2 + $0x168] sm:$0xff] }
  0xbe   : > { %1691 = vmatmul.mubr.f32.gmra.mrb[38].mxu1 %v9442_v14  ;;  %6008 = vmatprep.mubr.msk.f32.mxu0 %vm1158_vm0, %v9449_v20 }
  0xbf   : > { %6040 = vmatprep.mubr.msk.f32.mxu1 %vm1158_vm0, %v9449_v20 }
  0xc0   : > { %1070 = vperm.xlu0 %6895, %v980_v21   ;;  %v9487_v21 = vld [vmem:[%s13118_s2 + $0x150] sm:$0xff] }
  0xc1   : > { %1440 = vmatmul.mubr.f32.gmra.mrb[40].mxu0 %v9465_v11  ;;  %1075 = vperm.xlu1 %6896, %v981_v58   ;;  %v9516_v58 = vld [vmem:[%s13118_s2 + $0x178] sm:$0xff] }
  0xc2   : > { %1697 = vmatmul.mubr.f32.gmra.mrb[40].mxu1 %v9465_v11  ;;  %6009 = vmatprep.mubr.msk.f32.mxu0 %vm1158_vm0, %v9472_v13 }
  0xc3   : > { %6041 = vmatprep.mubr.msk.f32.mxu1 %vm1158_vm0, %v9472_v13 }
  0xc4   : > { %4317 = vperm.xlu0 %6895, %v4299_v32   ;;  %v9509_v32 = vld [vmem:[%s13118_s2 + $0x160] sm:$0xff] }
  0xc5   : > { %1446 = vmatmul.mubr.f32.gmra.mrb[42].mxu0 %v9487_v21  ;;  %4322 = vperm.xlu1 %6896, %v4300_v51   ;;  %v9538_v51 = vld [vmem:[%s13118_s2 + $0x188] sm:$0xff] }
  0xc6   : > { %1703 = vmatmul.mubr.f32.gmra.mrb[42].mxu1 %v9487_v21  ;;  %6010 = vmatprep.mubr.msk.f32.mxu0 %vm1158_vm0, %v9494_v5 }
  0xc7   : > { %6042 = vmatprep.mubr.msk.f32.mxu1 %vm1158_vm0, %v9494_v5 }
  0xc8   : > { %4327 = vperm.xlu0 %6895, %v4301_v10   ;;  %v9531_v10 = vld [vmem:[%s13118_s2 + $0x170] sm:$0xff] }
  0xc9   : > { %1452 = vmatmul.mubr.f32.gmra.mrb[44].mxu0 %v9509_v32  ;;  %4332 = vperm.xlu1 %6896, %v4302_v53   ;;  %v9560_v53 = vld [vmem:[%s13118_s2 + $0x198] sm:$0xff] }
  0xca   : > { %1709 = vmatmul.mubr.f32.gmra.mrb[44].mxu1 %v9509_v32  ;;  %6011 = vmatprep.mubr.msk.f32.mxu0 %vm1158_vm0, %v9516_v58 }
  0xcb   : > { %6043 = vmatprep.mubr.msk.f32.mxu1 %vm1158_vm0, %v9516_v58 }
  0xcc   : > { %4337 = vperm.xlu0 %6895, %v4303_v44   ;;  %v9553_v44 = vld [vmem:[%s13118_s2 + $0x180] sm:$0xff] }
  0xcd   : > { %1458 = vmatmul.mubr.f32.gmra.mrb[46].mxu0 %v9531_v10  ;;  %4342 = vperm.xlu1 %6896, %v4304_v22   ;;  %v9582_v22 = vld [vmem:[%s13118_s2 + $0x1a8] sm:$0xff] }
  0xce   : > { %1715 = vmatmul.mubr.f32.gmra.mrb[46].mxu1 %v9531_v10  ;;  %6012 = vmatprep.mubr.msk.f32.mxu0 %vm1158_vm0, %v9538_v51 }
  0xcf   : > { %6044 = vmatprep.mubr.msk.f32.mxu1 %vm1158_vm0, %v9538_v51 }
  0xd0   : > { %4347 = vperm.xlu0 %6895, %v4305_v36   ;;  %v9575_v36 = vld [vmem:[%s13118_s2 + $0x190] sm:$0xff] }
  0xd1   : > { %1464 = vmatmul.mubr.f32.gmra.mrb[48].mxu0 %v9553_v44  ;;  %4352 = vperm.xlu1 %6896, %v4306_v8   ;;  %v9604_v8 = vld [vmem:[%s13118_s2 + $0x1b8] sm:$0xff] }
  0xd2   : > { %1721 = vmatmul.mubr.f32.gmra.mrb[48].mxu1 %v9553_v44  ;;  %6013 = vmatprep.mubr.msk.f32.mxu0 %vm1158_vm0, %v9560_v53 }
  0xd3   : > { %6045 = vmatprep.mubr.msk.f32.mxu1 %vm1158_vm0, %v9560_v53 }
  0xd4   : > { %4357 = vperm.xlu0 %6895, %v4307_v9   ;;  %v9597_v9 = vld [vmem:[%s13118_s2 + $0x1a0] sm:$0xff] }
  0xd5   : > { %1470 = vmatmul.mubr.f32.gmra.mrb[50].mxu0 %v9575_v36  ;;  %4362 = vperm.xlu1 %6896, %v4308_v62   ;;  %v9626_v62 = vld [vmem:[%s13118_s2 + $0x1c8] sm:$0xff] }
  0xd6   : > { %1727 = vmatmul.mubr.f32.gmra.mrb[50].mxu1 %v9575_v36  ;;  %6014 = vmatprep.mubr.msk.f32.mxu0 %vm1158_vm0, %v9582_v22 }
  0xd7   : > { %6046 = vmatprep.mubr.msk.f32.mxu1 %vm1158_vm0, %v9582_v22 }
  0xd8   : > { %4367 = vperm.xlu0 %6895, %v4309_v2   ;;  %v9619_v2 = vld [vmem:[%s13118_s2 + $0x1b0] sm:$0xff] }
  0xd9   : > { %1476 = vmatmul.mubr.f32.gmra.mrb[52].mxu0 %v9597_v9  ;;  %4372 = vperm.xlu1 %6896, %v4310_v60   ;;  %v9648_v60 = vld [vmem:[%s13118_s2 + $0x1d8] sm:$0xff] }
  0xda   : > { %1733 = vmatmul.mubr.f32.gmra.mrb[52].mxu1 %v9597_v9  ;;  %6015 = vmatprep.mubr.msk.f32.mxu0 %vm1158_vm0, %v9604_v8 }
  0xdb   : > { %6047 = vmatprep.mubr.msk.f32.mxu1 %vm1158_vm0, %v9604_v8 }
  0xdc   : > { %4377 = vperm.xlu0 %6895, %v4311_v61   ;;  %v9641_v61 = vld [vmem:[%s13118_s2 + $0x1c0] sm:$0xff] }
  0xdd   : > { %1482 = vmatmul.mubr.f32.gmra.mrb[54].mxu0 %v9619_v2  ;;  %4382 = vperm.xlu1 %6896, %v4312_v50   ;;  %v9667_v50 = vld [vmem:[%s13118_s2 + $0x1e8] sm:$0xff] }
  0xde   : > { %1739 = vmatmul.mubr.f32.gmra.mrb[54].mxu1 %v9619_v2  ;;  %6016 = vmatprep.mubr.msk.f32.mxu0 %vm1158_vm0, %v9626_v62 }
  0xdf   : > { %6048 = vmatprep.mubr.msk.f32.mxu1 %vm1158_vm0, %v9626_v62 }
  0xe0   : > { %4387 = vperm.xlu0 %6895, %v4313_v54   ;;  %v9676_v54 = vld [vmem:[%s13118_s2 + $0x1e0] sm:$0xff] }
  0xe1   : > { %1488 = vmatmul.mubr.f32.gmra.mrb[56].mxu0 %v9641_v61  ;;  %4392 = vperm.xlu1 %6896, %v4314_v49   ;;  %v9692_v49 = vld [vmem:[%s13118_s2 + $0x1f0] sm:$0xff] }
  0xe2   : > { %1745 = vmatmul.mubr.f32.gmra.mrb[56].mxu1 %v9641_v61  ;;  %6017 = vmatprep.mubr.msk.f32.mxu0 %vm1158_vm0, %v9648_v60 }
  0xe3   : > { %6049 = vmatprep.mubr.msk.f32.mxu1 %vm1158_vm0, %v9648_v60 }
  0xe5   : > { %1494 = vmatmul.mubr.f32.gmra.mrb[58].mxu0 %v9660_v47 }
  0xe6   : > { %1751 = vmatmul.mubr.f32.gmra.mrb[58].mxu1 %v9660_v47  ;;  %6018 = vmatprep.mubr.msk.f32.mxu0 %vm1158_vm0, %v9667_v50 }
  0xe7   : > { %6050 = vmatprep.mubr.msk.f32.mxu1 %vm1158_vm0, %v9667_v50 }
  0xe9   : > { %1500 = vmatmul.mubr.f32.gmra.mrb[60].mxu0 %v9676_v54 }
  0xea   : > { %1757 = vmatmul.mubr.f32.gmra.mrb[60].mxu1 %v9676_v54  ;;  %6019 = vmatprep.mubr.msk.f32.mxu0 %vm1158_vm0, %v9683_v41 }
  0xeb   : > { %6051 = vmatprep.mubr.msk.f32.mxu1 %vm1158_vm0, %v9683_v41 }
  0xed   : > { %1506 = vmatmul.mubr.f32.gmra.mrb[62].mxu0 %v9692_v49 }
  0xee   : > { %1763 = vmatmul.mubr.f32.gmra.mrb[62].mxu1 %v9692_v49  ;;  %6052 = vmatprep.mubr.msk.f32.mxu0 %vm1158_vm0, %v8177_v37 }
  0xef   : > { %6084 = vmatprep.mubr.msk.f32.mxu1 %vm1158_vm0, %v8177_v37 }
  0xf1   : > { %1834 = vmatmul.mubr.f32.vlgmr.msra.gmra.mrb[64].mxu0 %v8919_v30 }
  0xf2   : > { %2091 = vmatmul.mubr.f32.vlgmr.msra.gmra.mrb[64].mxu1 %v8919_v30  ;;  %6053 = vmatprep.mubr.msk.f32.mxu0 %vm1158_vm0, %v8927_v33 }
  0xf3   : > { %6085 = vmatprep.mubr.msk.f32.mxu1 %vm1158_vm0, %v8927_v33 }
  0xf5   : > { %1840 = vmatmul.mubr.f32.gmra.mrb[66].mxu0 %v8942_v46 }
  0xf6   : > { %2097 = vmatmul.mubr.f32.gmra.mrb[66].mxu1 %v8942_v46  ;;  %6054 = vmatprep.mubr.msk.f32.mxu0 %vm1158_vm0, %v8951_v52 }
  0xf7   : > { %6086 = vmatprep.mubr.msk.f32.mxu1 %vm1158_vm0, %v8951_v52 }
  0xf9   : > { %1846 = vmatmul.mubr.f32.gmra.mrb[68].mxu0 %v8966_v4 }
  0xfa   : > { %2103 = vmatmul.mubr.f32.gmra.mrb[68].mxu1 %v8966_v4  ;;  %6055 = vmatprep.mubr.msk.f32.mxu0 %vm1158_vm0, %v8975_v7 }
  0xfb   : > { %6087 = vmatprep.mubr.msk.f32.mxu1 %vm1158_vm0, %v8975_v7 }
  0xfd   : > { %1852 = vmatmul.mubr.f32.gmra.mrb[70].mxu0 %v8990_v24 }
  0xfe   : > { %2109 = vmatmul.mubr.f32.gmra.mrb[70].mxu1 %v8990_v24  ;;  %6056 = vmatprep.mubr.msk.f32.mxu0 %vm1158_vm0, %v8999_v27 }
  0xff   : > { %6088 = vmatprep.mubr.msk.f32.mxu1 %vm1158_vm0, %v8999_v27 }
 0x101   : > { %1858 = vmatmul.mubr.f32.gmra.mrb[72].mxu0 %v9012_v39 }
 0x102   : > { %2115 = vmatmul.mubr.f32.gmra.mrb[72].mxu1 %v9012_v39  ;;  %6057 = vmatprep.mubr.msk.f32.mxu0 %vm1158_vm0, %v9019_v40 }
 0x103   : > { %6089 = vmatprep.mubr.msk.f32.mxu1 %vm1158_vm0, %v9019_v40 }
 0x105   : > { %1864 = vmatmul.mubr.f32.gmra.mrb[74].mxu0 %v9035_v55 }
 0x106   : > { %2121 = vmatmul.mubr.f32.gmra.mrb[74].mxu1 %v9035_v55  ;;  %6058 = vmatprep.mubr.msk.f32.mxu0 %vm1158_vm0, %v9045_v57 }
 0x107   : > { %6090 = vmatprep.mubr.msk.f32.mxu1 %vm1158_vm0, %v9045_v57 }
 0x109   : > { %1870 = vmatmul.mubr.f32.gmra.mrb[76].mxu0 %v9061_v6 }
 0x10a   : > { %2127 = vmatmul.mubr.f32.gmra.mrb[76].mxu1 %v9061_v6  ;;  %6059 = vmatprep.mubr.msk.f32.mxu0 %vm1158_vm0, %v9071_v12 }
 0x10b   : > { %6091 = vmatprep.mubr.msk.f32.mxu1 %vm1158_vm0, %v9071_v12 }
 0x10d   : > { %1876 = vmatmul.mubr.f32.gmra.mrb[78].mxu0 %v9087_v23 }
 0x10e   : > { %2133 = vmatmul.mubr.f32.gmra.mrb[78].mxu1 %v9087_v23  ;;  %6060 = vmatprep.mubr.msk.f32.mxu0 %vm1158_vm0, %v9097_v26 }
 0x10f   : > { %6092 = vmatprep.mubr.msk.f32.mxu1 %vm1158_vm0, %v9097_v26 }
 0x111   : > { %1882 = vmatmul.mubr.f32.gmra.mrb[80].mxu0 %v9113_v38 }
 0x112   : > { %2139 = vmatmul.mubr.f32.gmra.mrb[80].mxu1 %v9113_v38  ;;  %6061 = vmatprep.mubr.msk.f32.mxu0 %vm1158_vm0, %v9123_v43 }
 0x113   : > { %6093 = vmatprep.mubr.msk.f32.mxu1 %vm1158_vm0, %v9123_v43 }
 0x115   : > { %1888 = vmatmul.mubr.f32.gmra.mrb[82].mxu0 %v9139_v59 }
 0x116   : > { %2145 = vmatmul.mubr.f32.gmra.mrb[82].mxu1 %v9139_v59  ;;  %6062 = vmatprep.mubr.msk.f32.mxu0 %vm1158_vm0, %v9149_v0 }
 0x117   : > { %6094 = vmatprep.mubr.msk.f32.mxu1 %vm1158_vm0, %v9149_v0 }
 0x119   : > { %1894 = vmatmul.mubr.f32.gmra.mrb[84].mxu0 %v9165_v17 }
 0x11a   : > { %2151 = vmatmul.mubr.f32.gmra.mrb[84].mxu1 %v9165_v17  ;;  %6063 = vmatprep.mubr.msk.f32.mxu0 %vm1158_vm0, %v9175_v19 }
 0x11b   : > { %6095 = vmatprep.mubr.msk.f32.mxu1 %vm1158_vm0, %v9175_v19 }
 0x11d   : > { %1900 = vmatmul.mubr.f32.gmra.mrb[86].mxu0 %v9191_v35 }
 0x11e   : > { %2157 = vmatmul.mubr.f32.gmra.mrb[86].mxu1 %v9191_v35  ;;  %6064 = vmatprep.mubr.msk.f32.mxu0 %vm1158_vm0, %v9201_v42 }
 0x11f   : > { %6096 = vmatprep.mubr.msk.f32.mxu1 %vm1158_vm0, %v9201_v42 }
 0x121   : > { %1906 = vmatmul.mubr.f32.gmra.mrb[88].mxu0 %v9221_v63 }
 0x122   : > { %2163 = vmatmul.mubr.f32.gmra.mrb[88].mxu1 %v9221_v63  ;;  %6065 = vmatprep.mubr.msk.f32.mxu0 %vm1158_vm0, %v9231_v3 }
 0x123   : > { %6097 = vmatprep.mubr.msk.f32.mxu1 %vm1158_vm0, %v9231_v3 }
 0x125   : > { %1912 = vmatmul.mubr.f32.gmra.mrb[90].mxu0 %v9253_v25 }
 0x126   : > { %2169 = vmatmul.mubr.f32.gmra.mrb[90].mxu1 %v9253_v25  ;;  %6066 = vmatprep.mubr.msk.f32.mxu0 %vm1158_vm0, %v9263_v29 }
 0x127   : > { %6098 = vmatprep.mubr.msk.f32.mxu1 %vm1158_vm0, %v9263_v29 }
 0x129   : > { %1918 = vmatmul.mubr.f32.gmra.mrb[92].mxu0 %v9285_v56 }
 0x12a   : > { %2175 = vmatmul.mubr.f32.gmra.mrb[92].mxu1 %v9285_v56  ;;  %6067 = vmatprep.mubr.msk.f32.mxu0 %vm1158_vm0, %v9295_v1 }
 0x12b   : > { %6099 = vmatprep.mubr.msk.f32.mxu1 %vm1158_vm0, %v9295_v1 }
 0x12d   : > { %1924 = vmatmul.mubr.f32.gmra.mrb[94].mxu0 %v9317_v34 }
 0x12e   : > { %2181 = vmatmul.mubr.f32.gmra.mrb[94].mxu1 %v9317_v34  ;;  %6068 = vmatprep.mubr.msk.f32.mxu0 %vm1158_vm0, %v9327_v48 }
 0x12f   : > { %6100 = vmatprep.mubr.msk.f32.mxu1 %vm1158_vm0, %v9327_v48 }
 0x131   : > { %1930 = vmatmul.mubr.f32.gmra.mrb[96].mxu0 %v9349_v31 }
 0x132   : > { %2187 = vmatmul.mubr.f32.gmra.mrb[96].mxu1 %v9349_v31  ;;  %6069 = vmatprep.mubr.msk.f32.mxu0 %vm1158_vm0, %v9359_v18 }
 0x133   : > { %6101 = vmatprep.mubr.msk.f32.mxu1 %vm1158_vm0, %v9359_v18 }
 0x135   : > { %1936 = vmatmul.mubr.f32.gmra.mrb[98].mxu0 %v9367_v28 }
 0x136   : > { %2193 = vmatmul.mubr.f32.gmra.mrb[98].mxu1 %v9367_v28  ;;  %6070 = vmatprep.mubr.msk.f32.mxu0 %vm1158_vm0, %v9393_v16 }
 0x137   : > { %6102 = vmatprep.mubr.msk.f32.mxu1 %vm1158_vm0, %v9393_v16 }
 0x139   : > { %1942 = vmatmul.mubr.f32.gmra.mrb[100].mxu0 %v9415_v45 }
 0x13a   : > { %2199 = vmatmul.mubr.f32.gmra.mrb[100].mxu1 %v9415_v45  ;;  %6071 = vmatprep.mubr.msk.f32.mxu0 %vm1158_vm0, %v9422_v15 }
 0x13b   : > { %6103 = vmatprep.mubr.msk.f32.mxu1 %vm1158_vm0, %v9422_v15 }
 0x13d   : > { %1948 = vmatmul.mubr.f32.gmra.mrb[102].mxu0 %v9442_v14 }
 0x13e   : > { %2205 = vmatmul.mubr.f32.gmra.mrb[102].mxu1 %v9442_v14  ;;  %6072 = vmatprep.mubr.msk.f32.mxu0 %vm1158_vm0, %v9449_v20 }
 0x13f   : > { %6104 = vmatprep.mubr.msk.f32.mxu1 %vm1158_vm0, %v9449_v20 }
 0x141   : > { %1954 = vmatmul.mubr.f32.gmra.mrb[104].mxu0 %v9465_v11 }
 0x142   : > { %2211 = vmatmul.mubr.f32.gmra.mrb[104].mxu1 %v9465_v11  ;;  %6073 = vmatprep.mubr.msk.f32.mxu0 %vm1158_vm0, %v9472_v13 }
 0x143   : > { %6105 = vmatprep.mubr.msk.f32.mxu1 %vm1158_vm0, %v9472_v13 }
 0x144   : > { %v9829_v37 = vpop.f32.mrb[0].mxu0 }
 0x145   : > { %v9831_v30 = vpop.f32.mrb[0].mxu1  ;;  %v9833_v33 = vpop.f32.mrb[1].mxu0  ;;  %1960 = vmatmul.mubr.f32.gmra.mrb[106].mxu0 %v9487_v21 }
 0x146   : > { %v9836_v46 = vpop.f32.mrb[1].mxu1  ;;  %2217 = vmatmul.mubr.f32.gmra.mrb[106].mxu1 %v9487_v21  ;;  %6074 = vmatprep.mubr.msk.f32.mxu0 %vm1158_vm0, %v9494_v5 }
 0x147   : > { %6106 = vmatprep.mubr.msk.f32.mxu1 %vm1158_vm0, %v9494_v5 }
 0x148   : > { %v9843_v52 = vpop.f32.mrb[2].mxu0 }
 0x149   : > { %v9845_v4 = vpop.f32.mrb[2].mxu1  ;;  %v9847_v7 = vpop.f32.mrb[3].mxu0  ;;  %1966 = vmatmul.mubr.f32.gmra.mrb[108].mxu0 %v9509_v32 }
 0x14a   : > { %13409 = vst [vmem:[#allocation41_spill] sm:$0xff] %v9847_v7  ;;  %v9850_v24 = vpop.f32.mrb[3].mxu1  ;;  %2223 = vmatmul.mubr.f32.gmra.mrb[108].mxu1 %v9509_v32  ;;  %6075 = vmatprep.mubr.msk.f32.mxu0 %vm1158_vm0, %v9516_v58 }
 0x14b   : > { %13410 = vst [vmem:[#allocation42_spill] sm:$0xff] %v9850_v24  ;;  %6107 = vmatprep.mubr.msk.f32.mxu1 %vm1158_vm0, %v9516_v58 }
 0x14c   : > { %v9857_v27 = vpop.f32.mrb[4].mxu0 }
 0x14d   : > { %13411 = vst [vmem:[#allocation43_spill] sm:$0xff] %v9857_v27  ;;  %v9859_v39 = vpop.f32.mrb[4].mxu1  ;;  %v9861_v40 = vpop.f32.mrb[5].mxu0  ;;  %1972 = vmatmul.mubr.f32.gmra.mrb[110].mxu0 %v9531_v10 }
 0x14e   : > { %13412 = vst [vmem:[#allocation44_spill] sm:$0xff] %v9859_v39  ;;  %13413 = vst [vmem:[#allocation45_spill] sm:$0xff] %v9861_v40  ;;  %v9864_v55 = vpop.f32.mrb[5].mxu1  ;;  %2229 = vmatmul.mubr.f32.gmra.mrb[110].mxu1 %v9531_v10  ;;  %6076 = vmatprep.mubr.msk.f32.mxu0 %vm1158_vm0, %v9538_v51 }
 0x14f   : > { %13414 = vst [vmem:[#allocation46_spill] sm:$0xff] %v9864_v55  ;;  %6108 = vmatprep.mubr.msk.f32.mxu1 %vm1158_vm0, %v9538_v51 }
 0x150   : > { %v9871_v57 = vpop.f32.mrb[6].mxu0 }
 0x151   : > { %13415 = vst [vmem:[#allocation47_spill] sm:$0xff] %v9871_v57  ;;  %v9873_v6 = vpop.f32.mrb[6].mxu1  ;;  %v9875_v12 = vpop.f32.mrb[7].mxu0  ;;  %1978 = vmatmul.mubr.f32.gmra.mrb[112].mxu0 %v9553_v44 }
 0x152   : > { %13416 = vst [vmem:[#allocation48_spill] sm:$0xff] %v9873_v6  ;;  %13417 = vst [vmem:[#allocation49_spill] sm:$0xff] %v9875_v12  ;;  %v9878_v23 = vpop.f32.mrb[7].mxu1  ;;  %2235 = vmatmul.mubr.f32.gmra.mrb[112].mxu1 %v9553_v44  ;;  %6077 = vmatprep.mubr.msk.f32.mxu0 %vm1158_vm0, %v9560_v53 }
 0x153   : > { %13418 = vst [vmem:[#allocation50_spill] sm:$0xff] %v9878_v23  ;;  %6109 = vmatprep.mubr.msk.f32.mxu1 %vm1158_vm0, %v9560_v53 }
 0x154   : > { %v9885_v26 = vpop.f32.mrb[8].mxu0 }
 0x155   : > { %13419 = vst [vmem:[#allocation51_spill] sm:$0xff] %v9885_v26  ;;  %v9887_v38 = vpop.f32.mrb[8].mxu1  ;;  %v9889_v43 = vpop.f32.mrb[9].mxu0  ;;  %1984 = vmatmul.mubr.f32.gmra.mrb[114].mxu0 %v9575_v36 }
 0x156   : > { %13420 = vst [vmem:[#allocation52_spill] sm:$0xff] %v9887_v38  ;;  %13421 = vst [vmem:[#allocation53_spill] sm:$0xff] %v9889_v43  ;;  %v9892_v59 = vpop.f32.mrb[9].mxu1  ;;  %2241 = vmatmul.mubr.f32.gmra.mrb[114].mxu1 %v9575_v36  ;;  %6078 = vmatprep.mubr.msk.f32.mxu0 %vm1158_vm0, %v9582_v22 }
 0x157   : > { %13422 = vst [vmem:[#allocation54_spill] sm:$0xff] %v9892_v59  ;;  %6110 = vmatprep.mubr.msk.f32.mxu1 %vm1158_vm0, %v9582_v22 }
 0x158   : > { %v9899_v0 = vpop.f32.mrb[10].mxu0 }
 0x159   : > { %13423 = vst [vmem:[#allocation55_spill] sm:$0xff] %v9899_v0  ;;  %v9901_v17 = vpop.f32.mrb[10].mxu1  ;;  %v9903_v19 = vpop.f32.mrb[11].mxu0  ;;  %1990 = vmatmul.mubr.f32.gmra.mrb[116].mxu0 %v9597_v9 }
 0x15a   : > { %13424 = vst [vmem:[#allocation56_spill] sm:$0xff] %v9901_v17  ;;  %13425 = vst [vmem:[#allocation57_spill] sm:$0xff] %v9903_v19  ;;  %v9906_v35 = vpop.f32.mrb[11].mxu1  ;;  %2247 = vmatmul.mubr.f32.gmra.mrb[116].mxu1 %v9597_v9  ;;  %6079 = vmatprep.mubr.msk.f32.mxu0 %vm1158_vm0, %v9604_v8 }
 0x15b   : > { %13426 = vst [vmem:[#allocation58_spill] sm:$0xff] %v9906_v35  ;;  %6111 = vmatprep.mubr.msk.f32.mxu1 %vm1158_vm0, %v9604_v8 }
 0x15c   : > { %v9913_v42 = vpop.f32.mrb[12].mxu0 }
 0x15d   : > { %13427 = vst [vmem:[#allocation59_spill] sm:$0xff] %v9913_v42  ;;  %v9915_v63 = vpop.f32.mrb[12].mxu1  ;;  %v9917_v3 = vpop.f32.mrb[13].mxu0  ;;  %1996 = vmatmul.mubr.f32.gmra.mrb[118].mxu0 %v9619_v2 }
 0x15e   : > { %13428 = vst [vmem:[#allocation60_spill] sm:$0xff] %v9915_v63  ;;  %13429 = vst [vmem:[#allocation61_spill] sm:$0xff] %v9917_v3  ;;  %v9920_v25 = vpop.f32.mrb[13].mxu1  ;;  %2253 = vmatmul.mubr.f32.gmra.mrb[118].mxu1 %v9619_v2  ;;  %6080 = vmatprep.mubr.msk.f32.mxu0 %vm1158_vm0, %v9626_v62 }
 0x15f   : > { %13430 = vst [vmem:[#allocation62_spill] sm:$0xff] %v9920_v25  ;;  %6112 = vmatprep.mubr.msk.f32.mxu1 %vm1158_vm0, %v9626_v62 }
 0x160   : > { %v9927_v29 = vpop.f32.mrb[14].mxu0 }
 0x161   : > { %13431 = vst [vmem:[#allocation63_spill] sm:$0xff] %v9927_v29  ;;  %v9929_v56 = vpop.f32.mrb[14].mxu1  ;;  %v9931_v1 = vpop.f32.mrb[15].mxu0  ;;  %2002 = vmatmul.mubr.f32.gmra.mrb[120].mxu0 %v9641_v61 }
 0x162   : > { %13432 = vst [vmem:[#allocation64_spill] sm:$0xff] %v9929_v56  ;;  %13433 = vst [vmem:[#allocation65_spill] sm:$0xff] %v9931_v1  ;;  %v9934_v34 = vpop.f32.mrb[15].mxu1  ;;  %2259 = vmatmul.mubr.f32.gmra.mrb[120].mxu1 %v9641_v61  ;;  %6081 = vmatprep.mubr.msk.f32.mxu0 %vm1158_vm0, %v9648_v60 }
 0x163   : > { %13434 = vst [vmem:[#allocation66_spill] sm:$0xff] %v9934_v34  ;;  %6113 = vmatprep.mubr.msk.f32.mxu1 %vm1158_vm0, %v9648_v60 }
 0x164   : > { %v9941_v48 = vpop.f32.mrb[16].mxu0 }
 0x165   : > { %13435 = vst [vmem:[#allocation67_spill] sm:$0xff] %v9941_v48  ;;  %v9943_v31 = vpop.f32.mrb[16].mxu1  ;;  %v9945_v18 = vpop.f32.mrb[17].mxu0  ;;  %2008 = vmatmul.mubr.f32.gmra.mrb[122].mxu0 %v9660_v47 }
 0x166   : > { %13436 = vst [vmem:[#allocation68_spill] sm:$0xff] %v9943_v31  ;;  %13437 = vst [vmem:[#allocation69_spill] sm:$0xff] %v9945_v18  ;;  %v9948_v28 = vpop.f32.mrb[17].mxu1  ;;  %2265 = vmatmul.mubr.f32.gmra.mrb[122].mxu1 %v9660_v47  ;;  %6082 = vmatprep.mubr.msk.f32.mxu0 %vm1158_vm0, %v9667_v50 }
 0x167   : > { %13438 = vst [vmem:[#allocation70_spill] sm:$0xff] %v9948_v28  ;;  %6114 = vmatprep.mubr.msk.f32.mxu1 %vm1158_vm0, %v9667_v50 }
 0x168   : > { %v9955_v16 = vpop.f32.mrb[18].mxu0 }
 0x169   : > { %13439 = vst [vmem:[#allocation71_spill] sm:$0xff] %v9955_v16  ;;  %v9957_v45 = vpop.f32.mrb[18].mxu1  ;;  %v9959_v15 = vpop.f32.mrb[19].mxu0  ;;  %2014 = vmatmul.mubr.f32.gmra.mrb[124].mxu0 %v9676_v54 }
 0x16a   : > { %13440 = vst [vmem:[#allocation72_spill] sm:$0xff] %v9957_v45  ;;  %13441 = vst [vmem:[#allocation73_spill] sm:$0xff] %v9959_v15  ;;  %v9962_v14 = vpop.f32.mrb[19].mxu1  ;;  %2271 = vmatmul.mubr.f32.gmra.mrb[124].mxu1 %v9676_v54  ;;  %6083 = vmatprep.mubr.msk.f32.mxu0 %vm1158_vm0, %v9683_v41 }
 0x16b   : > { %13442 = vst [vmem:[#allocation74_spill] sm:$0xff] %v9962_v14  ;;  %6115 = vmatprep.mubr.msk.f32.mxu1 %vm1158_vm0, %v9683_v41 }
 0x16c   : > { %v9969_v47 = vpop.f32.mrb[20].mxu0 }
 0x16d   : > { %13443 = vst [vmem:[#allocation75_spill] sm:$0xff] %v9969_v47  ;;  %v9971_v20 = vpop.f32.mrb[20].mxu1  ;;  %v9973_v11 = vpop.f32.mrb[21].mxu0  ;;  %2020 = vmatmul.mubr.f32.gmra.mrb[126].mxu0 %v9692_v49 }
 0x16e   : > { %13444 = vst [vmem:[#allocation76_spill] sm:$0xff] %v9971_v20  ;;  %13445 = vst [vmem:[#allocation77_spill] sm:$0xff] %v9973_v11  ;;  %v9976_v13 = vpop.f32.mrb[21].mxu1  ;;  %2277 = vmatmul.mubr.f32.gmra.mrb[126].mxu1 %v9692_v49 }
 0x16f   : > { %13446 = vst [vmem:[#allocation78_spill] sm:$0xff] %v9976_v13 }
 0x170   : > { %v9979_v21 = vpop.f32.mrb[22].mxu0 }
 0x171   : > { %13447 = vst [vmem:[#allocation79_spill] sm:$0xff] %v9979_v21  ;;  %v9981_v5 = vpop.f32.mrb[22].mxu1  ;;  %v9983_v32 = vpop.f32.mrb[23].mxu0 }
 0x172   : > { %13448 = vst [vmem:[#allocation80_spill] sm:$0xff] %v9981_v5  ;;  %13449 = vst [vmem:[#allocation81_spill] sm:$0xff] %v9983_v32  ;;  %v9985_v58 = vpop.f32.mrb[23].mxu1 }
 0x173   : > { %13450 = vst [vmem:[#allocation82_spill] sm:$0xff] %v9985_v58 }
 0x174   : > { %v9987_v41 = vpop.f32.mrb[24].mxu0 }
 0x175   : > { %13451 = vst [vmem:[#allocation83_spill] sm:$0xff] %v9987_v41  ;;  %v9989_v10 = vpop.f32.mrb[24].mxu1  ;;  %v9991_v51 = vpop.f32.mrb[25].mxu0 }
 0x176   : > { %13452 = vst [vmem:[#allocation84_spill] sm:$0xff] %v9989_v10  ;;  %13453 = vst [vmem:[#allocation85_spill] sm:$0xff] %v9991_v51  ;;  %v9993_v44 = vpop.f32.mrb[25].mxu1 }
 0x177   : > { %13454 = vst [vmem:[#allocation86_spill] sm:$0xff] %v9993_v44 }
 0x178   : > { %v9995_v53 = vpop.f32.mrb[26].mxu0 }
 0x179   : > { %13455 = vst [vmem:[#allocation87_spill] sm:$0xff] %v9995_v53  ;;  %v9997_v36 = vpop.f32.mrb[26].mxu1  ;;  %v9999_v22 = vpop.f32.mrb[27].mxu0 }
 0x17a   : > { %13456 = vst [vmem:[#allocation88_spill] sm:$0xff] %v9997_v36  ;;  %13457 = vst [vmem:[#allocation89_spill] sm:$0xff] %v9999_v22  ;;  %v10001_v9 = vpop.f32.mrb[27].mxu1 }
 0x17b   : > { %13458 = vst [vmem:[#allocation90_spill] sm:$0xff] %v10001_v9 }
 0x17c   : > { %v10003_v8 = vpop.f32.mrb[28].mxu0 }
 0x17d   : > { %13459 = vst [vmem:[#allocation91_spill] sm:$0xff] %v10003_v8  ;;  %v10005_v2 = vpop.f32.mrb[28].mxu1  ;;  %v10007_v62 = vpop.f32.mrb[29].mxu0 }
 0x17e   : > { %13460 = vst [vmem:[#allocation92_spill] sm:$0xff] %v10005_v2  ;;  %13461 = vst [vmem:[#allocation93_spill] sm:$0xff] %v10007_v62  ;;  %v10009_v61 = vpop.f32.mrb[29].mxu1  ;;  %v10027_v2 = vpop.permute.xlu0 %1080 }
 0x17f   : > { %13462 = vst [vmem:[#allocation94_spill] sm:$0xff] %v10009_v61 }
 0x180   : > { %v10011_v60 = vpop.f32.mrb[30].mxu0 }
 0x181   : > { %13463 = vst [vmem:[#allocation95_spill] sm:$0xff] %v10011_v60  ;;  %v10013_v50 = vpop.f32.mrb[30].mxu1  ;;  %v10015_v54 = vpop.f32.mrb[31].mxu0 }
 0x182   : > { %13464 = vst [vmem:[#allocation96_spill] sm:$0xff] %v10013_v50  ;;  %13465 = vst [vmem:[#allocation97_spill] sm:$0xff] %v10015_v54  ;;  %v10017_v49 = vpop.f32.mrb[31].mxu1  ;;  %v10037_v54 = vpop.permute.xlu1 %1090 }
 0x183   : > { %13466 = vst [vmem:[#allocation98_spill] sm:$0xff] %v10017_v49  ;;  %v10045_v51 = vpop.permute.xlu0 %1085 }
 0x184   : > { %v10019_v36 = vpop.f32.mrb[32].mxu0 }
 0x185   : > { %v10021_v22 = vpop.f32.mrb[32].mxu1  ;;  %v10023_v9 = vpop.f32.mrb[33].mxu0 }
 0x186   : > { %v10025_v8 = vpop.f32.mrb[33].mxu1  ;;  %v10055_v5 = vpop.permute.xlu1 %1095 }
 0x187   : > { %v10059_v13 = vpop.permute.xlu0 %1100 }
 0x188   : > { %v10029_v62 = vpop.f32.mrb[34].mxu0 }
 0x189   : > { %v10031_v61 = vpop.f32.mrb[34].mxu1  ;;  %v10033_v60 = vpop.f32.mrb[35].mxu0 }
 0x18a   : > { %v10035_v50 = vpop.f32.mrb[35].mxu1  ;;  %v10069_v15 = vpop.permute.xlu1 %1105 }
 0x18b   : > { %v10077_v18 = vpop.permute.xlu0 %1110 }
 0x18c   : > { %v10039_v49 = vpop.f32.mrb[36].mxu0  ;;  %13467 = vst [vmem:[#allocation99_spill] sm:$0xff] %v10077_v18 }
 0x18d   : > { %v10041_v53 = vpop.f32.mrb[36].mxu1  ;;  %v10043_v44 = vpop.f32.mrb[37].mxu0 }
 0x18e   : > { %v10047_v10 = vpop.f32.mrb[37].mxu1  ;;  %v10087_v56 = vpop.permute.xlu1 %1115 }
 0x18f   : > { %13468 = vst [vmem:[#allocation100_spill] sm:$0xff] %v10087_v56  ;;  %v10091_v25 = vpop.permute.xlu0 %1120 }
 0x190   : > { %v10049_v41 = vpop.f32.mrb[38].mxu0  ;;  %13469 = vst [vmem:[#allocation101_spill] sm:$0xff] %v10091_v25 }
 0x191   : > { %v10051_v58 = vpop.f32.mrb[38].mxu1  ;;  %v10053_v32 = vpop.f32.mrb[39].mxu0 }
 0x192   : > { %v10057_v21 = vpop.f32.mrb[39].mxu1  ;;  %v10101_v19 = vpop.permute.xlu1 %1125 }
 0x193   : > { %13470 = vst [vmem:[#allocation102_spill] sm:$0xff] %v10101_v19  ;;  %v10109_v43 = vpop.permute.xlu0 %1130 }
 0x194   : > { %v10061_v11 = vpop.f32.mrb[40].mxu0  ;;  %13471 = vst [vmem:[#allocation103_spill] sm:$0xff] %v10109_v43 }
 0x195   : > { %v10063_v20 = vpop.f32.mrb[40].mxu1  ;;  %v10065_v47 = vpop.f32.mrb[41].mxu0 }
 0x196   : > { %v10067_v14 = vpop.f32.mrb[41].mxu1  ;;  %v10119_v6 = vpop.permute.xlu1 %1135 }
 0x197   : > { %13475 = vst [vmem:[#allocation107_spill] sm:$0xff] %v10119_v6  ;;  %v10123_v55 = vpop.permute.xlu0 %1140 }
 0x198   : > { %v10071_v45 = vpop.f32.mrb[42].mxu0  ;;  %13477 = vst [vmem:[#allocation109_spill] sm:$0xff] %v10123_v55 }
 0x199   : > { %v10073_v16 = vpop.f32.mrb[42].mxu1  ;;  %v10075_v28 = vpop.f32.mrb[43].mxu0 }
 0x19a   : > { %v10079_v31 = vpop.f32.mrb[43].mxu1  ;;  %v10133_v7 = vpop.permute.xlu1 %1145 }
 0x19b   : > { %13482 = vst [vmem:[#allocation114_spill] sm:$0xff] %v10133_v7  ;;  %v10141_v6 = vpop.permute.xlu0 %1150 }
 0x19c   : > { %v10081_v48 = vpop.f32.mrb[44].mxu0  ;;  %13486 = vst [vmem:[#allocation118_spill] sm:$0xff] %v10141_v6 }
 0x19d   : > { %v10083_v34 = vpop.f32.mrb[44].mxu1  ;;  %v10085_v1 = vpop.f32.mrb[45].mxu0 }
 0x19e   : > { %v10089_v29 = vpop.f32.mrb[45].mxu1  ;;  %v10153_v7 = vpop.permute.xlu1 %1155 }
 0x19f   : > { %13491 = vst [vmem:[#allocation123_spill] sm:$0xff] %v10153_v7 }
 0x1a0   : > { %v10093_v3 = vpop.f32.mrb[46].mxu0 }
 0x1a1   : > { %v10095_v63 = vpop.f32.mrb[46].mxu1  ;;  %v10097_v42 = vpop.f32.mrb[47].mxu0 }
 0x1a2   : > { %v10099_v35 = vpop.f32.mrb[47].mxu1 }
 0x1a4   : > { %v10103_v17 = vpop.f32.mrb[48].mxu0 }
 0x1a5   : > { %v10105_v0 = vpop.f32.mrb[48].mxu1  ;;  %v10107_v59 = vpop.f32.mrb[49].mxu0 }
 0x1a6   : > { %v10111_v38 = vpop.f32.mrb[49].mxu1 }
 0x1a8   : > { %v10113_v26 = vpop.f32.mrb[50].mxu0 }
 0x1a9   : > { %13472 = vst [vmem:[#allocation104_spill] sm:$0xff] %v10113_v26  ;;  %v10115_v23 = vpop.f32.mrb[50].mxu1  ;;  %v10117_v12 = vpop.f32.mrb[51].mxu0 }
 0x1aa   : > { %13473 = vst [vmem:[#allocation105_spill] sm:$0xff] %v10115_v23  ;;  %13474 = vst [vmem:[#allocation106_spill] sm:$0xff] %v10117_v12  ;;  %v10121_v57 = vpop.f32.mrb[51].mxu1 }
 0x1ab   : > { %13476 = vst [vmem:[#allocation108_spill] sm:$0xff] %v10121_v57 }
 0x1ac   : > { %v10125_v40 = vpop.f32.mrb[52].mxu0 }
 0x1ad   : > { %13478 = vst [vmem:[#allocation110_spill] sm:$0xff] %v10125_v40  ;;  %v10127_v39 = vpop.f32.mrb[52].mxu1  ;;  %v10129_v27 = vpop.f32.mrb[53].mxu0 }
 0x1ae   : > { %13479 = vst [vmem:[#allocation111_spill] sm:$0xff] %v10127_v39  ;;  %13480 = vst [vmem:[#allocation112_spill] sm:$0xff] %v10129_v27  ;;  %v10131_v24 = vpop.f32.mrb[53].mxu1  ;;  %v1418_v39 = vadd.f32 %v10019_v36, %v10027_v2 }
 0x1af   : > { %13481 = vst [vmem:[#allocation113_spill] sm:$0xff] %v10131_v24 }
 0x1b0   : > { %v10135_v43 = vpop.f32.mrb[54].mxu0  ;;  %v6244_v6 = vmul.f32 -1.442695, %v1418_v39 }
 0x1b1   : > { %13483 = vst [vmem:[#allocation115_spill] sm:$0xff] %v10135_v43  ;;  %v10137_v23 = vpop.f32.mrb[54].mxu1  ;;  %v10139_v12 = vpop.f32.mrb[55].mxu0 }
 0x1b2   : > { %13484 = vst [vmem:[#allocation116_spill] sm:$0xff] %v10137_v23  ;;  %13485 = vst [vmem:[#allocation117_spill] sm:$0xff] %v10139_v12  ;;  %v10143_v57 = vpop.f32.mrb[55].mxu1  ;;  %v10157_v23 = vpop.permute.xlu0 %1000  ;;  %6897 = vpow2.f32 %v6244_v6 }
 0x1b3   : > { %13487 = vst [vmem:[#allocation119_spill] sm:$0xff] %v10143_v57  ;;  %13493 = vst [vmem:[#allocation125_spill] sm:$0xff] %v10157_v23  ;;  %v1322_v36 = vadd.f32 %v9829_v37, %v10157_v23  ;;  %v1579_v7 = vadd.f32 %v9831_v30, %v10157_v23  ;;  %v1581_v37 = vadd.f32 %v9836_v46, %v10157_v23 }
 0x1b4   : > { %v10145_v55 = vpop.f32.mrb[56].mxu0  ;;  %v1675_v46 = vadd.f32 %v10021_v22, %v10027_v2  ;;  %v1424_v22 = vadd.f32 %v10029_v62, %v10045_v51 }
 0x1b5   : > { %13488 = vst [vmem:[#allocation120_spill] sm:$0xff] %v10145_v55  ;;  %v10149_v27 = vpop.f32.mrb[56].mxu1  ;;  %v10151_v24 = vpop.f32.mrb[57].mxu0  ;;  %v6118_v30 = vmul.f32 -1.442695, %v1579_v7 }
 0x1b6   : > { %13489 = vst [vmem:[#allocation121_spill] sm:$0xff] %v10149_v27  ;;  %13490 = vst [vmem:[#allocation122_spill] sm:$0xff] %v10151_v24  ;;  %v10155_v43 = vpop.f32.mrb[57].mxu1  ;;  %v10169_v27 = vpop.permute.xlu1 %1005  ;;  %v6252_v62 = vmul.f32 -1.442695, %v1424_v22 }
 0x1b7   : > { %13492 = vst [vmem:[#allocation124_spill] sm:$0xff] %v10155_v43  ;;  %13498 = vst [vmem:[#allocation130_spill] sm:$0xff] %v10169_v27  ;;  %v1585_v6 = vadd.f32 %v9845_v4, %v10169_v27 }
 0x1b8   : > { %v10159_v12 = vpop.f32.mrb[58].mxu0 }
 0x1b9   : > { %13494 = vst [vmem:[#allocation126_spill] sm:$0xff] %v10159_v12  ;;  %v10161_v40 = vpop.f32.mrb[58].mxu1  ;;  %v10163_v57 = vpop.f32.mrb[59].mxu0  ;;  %v6126_v4 = vmul.f32 -1.442695, %v1585_v6 }
 0x1ba   : > { %13495 = vst [vmem:[#allocation127_spill] sm:$0xff] %v10161_v40  ;;  %13496 = vst [vmem:[#allocation128_spill] sm:$0xff] %v10163_v57  ;;  %v10165_v55 = vpop.f32.mrb[59].mxu1  ;;  %v1324_v57 = vadd.f32 %v9833_v33, %v10157_v23  ;;  %v1677_v23 = vadd.f32 %v10025_v8, %v10027_v2  ;;  %v1426_v8 = vadd.f32 %v10033_v60, %v10045_v51 }
 0x1bb   : > { %13497 = vst [vmem:[#allocation129_spill] sm:$0xff] %v10165_v55  ;;  %v6116_v55 = vmul.f32 -1.442695, %v1322_v36  ;;  %v1432_v60 = vadd.f32 %v10043_v44, %v10037_v54  ;;  %v1436_v44 = vadd.f32 %v10049_v41, %v10055_v5 }
 0x1bc   : > { %v10171_v24 = vpop.f32.mrb[60].mxu0  ;;  %v6117_v33 = vmul.f32 -1.442695, %v1324_v57 }
 0x1bd   : > { %13499 = vst [vmem:[#allocation131_spill] sm:$0xff] %v10171_v24  ;;  %v10175_v43 = vpop.f32.mrb[60].mxu1  ;;  %v10177_v39 = vpop.f32.mrb[61].mxu0  ;;  %v1328_v24 = vadd.f32 %v9843_v52, %v10169_v27  ;;  %6899 = vpow2.f32 %v6116_v55  ;;  %v1420_v52 = vadd.f32 %v10023_v9, %v10027_v2  ;;  %v1681_v9 = vadd.f32 %v10031_v61, %v10045_v51 }
 0x1be   : > { %13500 = vst [vmem:[#allocation132_spill] sm:$0xff] %v10175_v43  ;;  %13501 = vst [vmem:[#allocation133_spill] sm:$0xff] %v10177_v39  ;;  %v10181_v40 = vpop.f32.mrb[61].mxu1  ;;  %6901 = vpow2.f32 %v6118_v30  ;;  %v6898_v55 = vpop.eup %6897 }
 0x1bf   : > { %13502 = vst [vmem:[#allocation134_spill] sm:$0xff] %v10181_v40  ;;  %v6119_v40 = vmul.f32 -1.442695, %v1581_v37  ;;  %v6124_v36 = vmul.f32 -1.442695, %v1328_v24  ;;  %6903 = vpow2.f32 %v6117_v33  ;;  %v3179_v37 = vadd.f32 1.0, %v6898_v55 }
 0x1c0   : > { %v10187_v12 = vpop.f32.mrb[62].mxu0  ;;  %v6246_v24 = vmul.f32 -1.442695, %v1675_v46  ;;  %v6245_v30 = vmul.f32 -1.442695, %v1420_v52  ;;  %v1683_v33 = vadd.f32 %v10035_v50, %v10045_v51  ;;  %v1687_v46 = vadd.f32 %v10041_v53, %v10037_v54 }
 0x1c1   : > { %v10191_v43 = vpop.f32.mrb[62].mxu1  ;;  %v10193_v39 = vpop.f32.mrb[63].mxu0  ;;  %6905 = vpow2.f32 %v6119_v40  ;;  %v1430_v40 = vadd.f32 %v10039_v49, %v10037_v54  ;;  %v6254_v61 = vmul.f32 -1.442695, %v1681_v9 }
 0x1c2   : > { %13503 = vst [vmem:[#allocation135_spill] sm:$0xff] %v10193_v39  ;;  %v10195_v26 = vpop.f32.mrb[63].mxu1  ;;  %6907 = vpow2.f32 %v6124_v36  ;;  %v6253_v36 = vmul.f32 -1.442695, %v1426_v8  ;;  %v6255_v50 = vmul.f32 -1.442695, %v1683_v33 }
 0x1c3   : > { %6909 = vpow2.f32 %v6126_v4  ;;  %v1689_v4 = vadd.f32 %v10047_v10, %v10037_v54  ;;  %v6260_v53 = vmul.f32 -1.442695, %v1430_v40  ;;  %v6262_v9 = vmul.f32 -1.442695, %v1687_v46 }
 0x1c4   : > { %v10201_v7 = vpop.f32.mrb[64].mxu0  ;;  %6911 = vrcp.f32 %v3179_v37  ;;  %v6261_v10 = vmul.f32 -1.442695, %v1432_v60 }
 0x1c5   : > { %13504 = vst [vmem:[#allocation136_spill] sm:$0xff] %v10201_v7  ;;  %v10205_v39 = vpop.f32.mrb[64].mxu1  ;;  %v10207_v57 = vpop.f32.mrb[65].mxu0  ;;  %6913 = vpow2.f32 %v6246_v24  ;;  %v6263_v33 = vmul.f32 -1.442695, %v1689_v4 }
 0x1c6   : > { %13505 = vst [vmem:[#allocation137_spill] sm:$0xff] %v10205_v39  ;;  %13506 = vst [vmem:[#allocation138_spill] sm:$0xff] %v10207_v57  ;;  %v10215_v6 = vpop.f32.mrb[65].mxu1  ;;  %v6247_v57 = vmul.f32 -1.442695, %v1677_v23  ;;  %6915 = vpow2.f32 %v6245_v30 }
 0x1c7   : > { %13507 = vst [vmem:[#allocation139_spill] sm:$0xff] %v10215_v6  ;;  %v10235_v55 = vpop.eup %6899 }
 0x1c8   : > { %v10225_v52 = vpop.f32.mrb[66].mxu0  ;;  %6917 = vpow2.f32 %v6247_v57  ;;  %v10239_v24 = vpop.eup %6901  ;;  %v1693_v57 = vadd.f32 %v10051_v58, %v10055_v5 }
 0x1c9   : > { %13508 = vst [vmem:[#allocation140_spill] sm:$0xff] %v10225_v52  ;;  %v10227_v23 = vpop.f32.mrb[66].mxu1  ;;  %v10231_v49 = vpop.f32.mrb[67].mxu0  ;;  %6919 = vpow2.f32 %v6252_v62 }
 0x1ca   : > { %13509 = vst [vmem:[#allocation141_spill] sm:$0xff] %v10227_v23  ;;  %13510 = vst [vmem:[#allocation142_spill] sm:$0xff] %v10231_v49  ;;  %v10233_v22 = vpop.f32.mrb[67].mxu1  ;;  %6921 = vpow2.f32 %v6254_v61  ;;  %v10243_v37 = vpop.eup %6903  ;;  %v6268_v61 = vmul.f32 -1.442695, %v1436_v44 }
 0x1cb   : > { %13511 = vst [vmem:[#allocation143_spill] sm:$0xff] %v10233_v22  ;;  %6923 = vpow2.f32 %v6253_v36  ;;  %v10247_v8 = vpop.eup %6905  ;;  %v6270_v36 = vmul.f32 -1.442695, %v1693_v57 }
 0x1cc   : > { %v10245_v30 = vpop.f32.mrb[68].mxu0  ;;  %6925 = vpow2.f32 %v6255_v50  ;;  %v10253_v40 = vpop.eup %6907 }
 0x1cd   : > { %13512 = vst [vmem:[#allocation144_spill] sm:$0xff] %v10245_v30  ;;  %v10249_v62 = vpop.f32.mrb[68].mxu1  ;;  %v10251_v41 = vpop.f32.mrb[69].mxu0  ;;  %6927 = vpow2.f32 %v6260_v53 }
 0x1ce   : > { %13513 = vst [vmem:[#allocation145_spill] sm:$0xff] %v10249_v62  ;;  %13514 = vst [vmem:[#allocation146_spill] sm:$0xff] %v10251_v41  ;;  %v10255_v46 = vpop.f32.mrb[69].mxu1  ;;  %v10257_v58 = vpop.eup %6909  ;;  %6929 = vpow2.f32 %v6262_v9 }
 0x1cf   : > { %13515 = vst [vmem:[#allocation147_spill] sm:$0xff] %v10255_v46  ;;  %v10259_v60 = vpop.eup %6911  ;;  %6931 = vpow2.f32 %v6261_v10 }
 0x1d0   : > { %v10261_v30 = vpop.f32.mrb[70].mxu0  ;;  %v6914_v50 = vpop.eup %6913  ;;  %6933 = vpow2.f32 %v6263_v33 }
 0x1d1   : > { %13516 = vst [vmem:[#allocation148_spill] sm:$0xff] %v10261_v30  ;;  %v10263_v4 = vpop.f32.mrb[70].mxu1  ;;  %v10265_v41 = vpop.f32.mrb[71].mxu0  ;;  %v3181_v53 = vadd.f32 1.0, %v6914_v50  ;;  %6935 = vpow2.f32 %v6268_v61 }
 0x1d2   : > { %13517 = vst [vmem:[#allocation149_spill] sm:$0xff] %v10263_v4  ;;  %13518 = vst [vmem:[#allocation150_spill] sm:$0xff] %v10265_v41  ;;  %v6916_v62 = vpop.eup %6915  ;;  %v10267_v44 = vpop.f32.mrb[71].mxu1  ;;  %6937 = vpow2.f32 %v6270_v36  ;;  %v1438_v41 = vadd.f32 %v10053_v32, %v10055_v5 }
 0x1d3   : > { %13519 = vst [vmem:[#allocation151_spill] sm:$0xff] %v10267_v44  ;;  %v6918_v46 = vpop.eup %6917  ;;  %v3180_v22 = vadd.f32 1.0, %v6916_v62  ;;  %6939 = vrcp.f32 %v3181_v53 }
 0x1d4   : > { %v6920_v9 = vpop.eup %6919  ;;  %v3182_v57 = vadd.f32 1.0, %v6918_v46  ;;  %v1695_v46 = vadd.f32 %v10057_v21, %v10055_v5  ;;  %v1701_v21 = vadd.f32 %v10067_v14, %v10059_v13 }
 0x1d5   : > { %v6922_v10 = vpop.eup %6921  ;;  %6941 = vrcp.f32 %v3180_v22  ;;  %v3187_v30 = vadd.f32 1.0, %v6920_v9  ;;  %v6269_v9 = vmul.f32 -1.442695, %v1438_v41  ;;  %v1448_v41 = vadd.f32 %v10071_v45, %v10069_v15 }
 0x1d6   : > { %v6924_v49 = vpop.eup %6923  ;;  %6943 = vrcp.f32 %v3182_v57  ;;  %v3189_v33 = vadd.f32 1.0, %v6922_v10  ;;  %v1442_v57 = vadd.f32 %v10061_v11, %v10059_v13 }
 0x1d7   : > { %v6926_v4 = vpop.eup %6925  ;;  %6945 = vrcp.f32 %v3187_v30  ;;  %v3188_v61 = vadd.f32 1.0, %v6924_v49  ;;  %v1699_v49 = vadd.f32 %v10063_v20, %v10059_v13  ;;  %v1450_v20 = vadd.f32 %v10075_v28, %v10069_v15 }
 0x1d8   : > { %v6928_v50 = vpop.eup %6927  ;;  %6947 = vrcp.f32 %v3189_v33  ;;  %v3190_v44 = vadd.f32 1.0, %v6926_v4  ;;  %v1444_v4 = vadd.f32 %v10065_v47, %v10059_v13 }
 0x1d9   : > { %v6930_v62 = vpop.eup %6929  ;;  %6949 = vrcp.f32 %v3188_v61  ;;  %v3195_v36 = vadd.f32 1.0, %v6928_v50  ;;  %v1705_v61 = vadd.f32 %v10073_v16, %v10069_v15  ;;  %v6278_v14 = vmul.f32 -1.442695, %v1699_v49  ;;  %v10293_v49 = vpop.f32.mrb[72].mxu1 }
 0x1da   : > { %v6932_v22 = vpop.eup %6931  ;;  %6951 = vrcp.f32 %v3190_v44  ;;  %v3197_v53 = vadd.f32 1.0, %v6930_v62  ;;  %v6271_v62 = vmul.f32 -1.442695, %v1695_v46  ;;  %v1707_v16 = vadd.f32 %v10079_v31, %v10069_v15  ;;  %13521 = vst [vmem:[#allocation153_spill] sm:$0xff] %v10293_v49  ;;  %v8178_v31 = vld [vmem:[%s8740_s13] sm:$0xff] }
 0x1db   : > { %v6934_v32 = vpop.eup %6933  ;;  %6953 = vrcp.f32 %v3195_v36  ;;  %v3196_v30 = vadd.f32 1.0, %v6932_v22  ;;  %v6276_v22 = vmul.f32 -1.442695, %v1442_v57  ;;  %v6286_v28 = vmul.f32 -1.442695, %v1705_v61  ;;  %v10291_v57 = vpop.f32.mrb[72].mxu0 }
 0x1dc   : > { %v6936_v10 = vpop.eup %6935  ;;  %6955 = vrcp.f32 %v3197_v53  ;;  %v3198_v33 = vadd.f32 1.0, %v6934_v32  ;;  %v6277_v53 = vmul.f32 -1.442695, %v1444_v4  ;;  %v6279_v32 = vmul.f32 -1.442695, %v1701_v21  ;;  %13520 = vst [vmem:[#allocation152_spill] sm:$0xff] %v10291_v57 }
 0x1dd   : > { %v6938_v44 = vpop.eup %6937  ;;  %6957 = vrcp.f32 %v3196_v30  ;;  %v3203_v11 = vadd.f32 1.0, %v6936_v10  ;;  %v6284_v30 = vmul.f32 -1.442695, %v1448_v41  ;;  %v1454_v46 = vadd.f32 %v10081_v48, %v10077_v18  ;;  %v8179_v41 = vld [vmem:[%s8740_s13 + $0x40] sm:$0xff]  ;;  %v10302_v48 = vpop.f32.mrb[73].mxu1 }
 0x1de   : > { %v6940_v50 = vpop.eup %6939  ;;  %6959 = vrcp.f32 %v3198_v33  ;;  %v3205_v47 = vadd.f32 1.0, %v6938_v44  ;;  %v6285_v33 = vmul.f32 -1.442695, %v1450_v20  ;;  %v1711_v21 = vadd.f32 %v10083_v34, %v10077_v18  ;;  %13523 = vst [vmem:[#allocation155_spill] sm:$0xff] %v10302_v48  ;;  %v8184_v48 = vld [vmem:[%s8740_s13 + $0x18] sm:$0xff]  ;;  %v10314_v7 = vpop.f32.mrb[74].mxu1 }
 0x1df   : > { %v6942_v36 = vpop.eup %6941  ;;  %6961 = vrcp.f32 %v3203_v11  ;;  %v10300_v11 = vpop.f32.mrb[73].mxu0  ;;  %v1456_v20 = vadd.f32 %v10085_v1, %v10077_v18  ;;  %13525 = vst [vmem:[#allocation157_spill] sm:$0xff] %v10314_v7 }
 0x1e0   : > { %v6944_v45 = vpop.eup %6943  ;;  %6963 = vrcp.f32 %v3205_v47  ;;  %13522 = vst [vmem:[#allocation154_spill] sm:$0xff] %v10300_v11  ;;  %v8180_v47 = vld [vmem:[%s8740_s13 + $0x10] sm:$0xff]  ;;  %v10312_v1 = vpop.f32.mrb[74].mxu0 }
 0x1e1   : > { %v6946_v10 = vpop.eup %6945  ;;  %6965 = vpow2.f32 %v6269_v9  ;;  %v3819_v9 = vmul.f32 %v8178_v31, %v10259_v60  ;;  %v3821_v34 = vmul.f32 %v8180_v47, %v6940_v50  ;;  %v8182_v60 = vld [vmem:[%s8740_s13 + $0x8] sm:$0xff]  ;;  %v3822_v52 = vmul.f32 %v8184_v48, %v6944_v45  ;;  %13524 = vst [vmem:[#allocation156_spill] sm:$0xff] %v10312_v1  ;;  %v10316_v47 = vpop.f32.mrb[75].mxu0 }
 0x1e2   : > { %v6948_v4 = vpop.eup %6947  ;;  %6967 = vpow2.f32 %v6271_v62  ;;  %v3827_v44 = vmul.f32 %v8179_v41, %v6946_v10  ;;  %v8181_v62 = vld [vmem:[%s8740_s13 + $0x50] sm:$0xff]  ;;  %v3820_v31 = vmul.f32 %v8182_v60, %v6942_v36  ;;  %v8183_v10 = vld [vmem:[%s8740_s13 + $0x48] sm:$0xff]  ;;  %13526 = vst [vmem:[#allocation158_spill] sm:$0xff] %v10316_v47  ;;  %v10318_v36 = vpop.f32.mrb[75].mxu1 }
 0x1e3   : > { %v6950_v61 = vpop.eup %6949  ;;  %6969 = vpow2.f32 %v6276_v22  ;;  %v3829_v49 = vmul.f32 %v8181_v62, %v6948_v4  ;;  %v8185_v22 = vld [vmem:[%s8740_s13 + $0x58] sm:$0xff]  ;;  %v6287_v4 = vmul.f32 -1.442695, %v1707_v16  ;;  %13527 = vst [vmem:[#allocation159_spill] sm:$0xff] %v10318_v36  ;;  %v10324_v16 = vpop.f32.mrb[76].mxu0 }
 0x1e4   : > { %v6952_v57 = vpop.eup %6951  ;;  %6971 = vpow2.f32 %v6278_v14  ;;  %v3828_v41 = vmul.f32 %v8183_v10, %v6950_v61  ;;  %v6638_v11 = vpack.c.bf16 %v3827_v44, %v3819_v9  ;;  %13528 = vst [vmem:[#allocation160_spill] sm:$0xff] %v10324_v16  ;;  %v10326_v48 = vpop.f32.mrb[76].mxu1 }
 0x1e5   : > { %v6954_v23 = vpop.eup %6953  ;;  %6973 = vpow2.f32 %v6277_v53  ;;  %v3830_v6 = vmul.f32 %v8185_v22, %v6952_v57  ;;  %v6686_v39 = vpack.c.bf16 %v3829_v49, %v3821_v34  ;;  %v6292_v53 = vmul.f32 -1.442695, %v1454_v46  ;;  %13529 = vst [vmem:[#allocation161_spill] sm:$0xff] %v10326_v48  ;;  %v8189_v34 = vld [vmem:[%s8740_s13 + $0xd0] sm:$0xff] }
 0x1e6   : > { %v6956_v50 = vpop.eup %6955  ;;  %6975 = vpow2.f32 %v6279_v32  ;;  %v6636_v14 = vpack.c.bf16 %v3828_v41, %v3820_v31  ;;  %v6294_v49 = vmul.f32 -1.442695, %v1711_v21  ;;  %v6293_v32 = vmul.f32 -1.442695, %v1456_v20  ;;  %v10334_v21 = vpop.f32.mrb[77].mxu0 }
 0x1e7   : > { %v10320_v9 = vpop.eup %6957  ;;  %6977 = vpow2.f32 %v6284_v30  ;;  %v6684_v45 = vpack.c.bf16 %v3830_v6, %v3822_v52  ;;  %v8186_v6 = vld [vmem:[%s8740_s13 + $0x80] sm:$0xff]  ;;  %13530 = vst [vmem:[#allocation162_spill] sm:$0xff] %v10334_v21  ;;  %v10348_v22 = vpop.f32.mrb[78].mxu0  ;;  %v8233_v21 = vld [vmem:[%s8740_s13 + $0x358] sm:$0xff] }
 0x1e8   : > { %v10322_v57 = vpop.eup %6959  ;;  %6979 = vpow2.f32 %v6286_v28  ;;  %6637 = vmatprep.subr.bf16.mxu0 %v6636_v14  ;;  %v10329_v52 = vmul.f32 %v8186_v6, %v6954_v23  ;;  %v8187_v28 = vld [vmem:[%s8740_s13 + $0xc0] sm:$0xff]  ;;  %13532 = vst [vmem:[#allocation164_spill] sm:$0xff] %v10348_v22  ;;  %v1460_v6 = vadd.f32 %v10093_v3, %v10087_v56 }
 0x1e9   : > { %v6962_v44 = vpop.eup %6961  ;;  %6981 = vpow2.f32 %v6285_v33  ;;  %6685 = vmatprep.subr.bf16.mxu1 %v6684_v45  ;;  %6639 = vmatpush1.bf16.msra.mxu0 %v6638_v11  ;;  %v10336_v33 = vpop.f32.mrb[77].mxu1  ;;  %v8188_v11 = vld [vmem:[%s8740_s13 + $0x90] sm:$0xff] }
 0x1ea   : > { %v6964_v30 = vpop.eup %6963  ;;  %6983 = vpow2.f32 %v6287_v4  ;;  %6687 = vmatpush1.bf16.msra.mxu1 %v6686_v39  ;;  %v10332_v46 = vmul.f32 %v8187_v28, %v6962_v44  ;;  %13531 = vst [vmem:[#allocation163_spill] sm:$0xff] %v10336_v33  ;;  %v10339_v20 = vmul.f32 %v8188_v11, %v6956_v50  ;;  %v1717_v11 = vadd.f32 %v10095_v63, %v10087_v56 }
 0x1eb   : > { %v6966_v61 = vpop.eup %6965  ;;  %6985 = vpow2.f32 %v6292_v53  ;;  %v10342_v62 = vmul.f32 %v8189_v34, %v6964_v30  ;;  %v6300_v3 = vmul.f32 -1.442695, %v1460_v6  ;;  %v1719_v63 = vadd.f32 %v10099_v35, %v10087_v56  ;;  %v10366_v35 = vpop.f32.mrb[78].mxu1 }
 0x1ec   : > { %v6968_v60 = vpop.eup %6967  ;;  %v3204_v39 = vadd.f32 1.0, %v6966_v61  ;;  %6987 = vpow2.f32 %v6294_v49  ;;  %v1723_v6 = vadd.f32 %v10105_v0, %v10091_v25  ;;  %13533 = vst [vmem:[#allocation165_spill] sm:$0xff] %v10366_v35  ;;  %v8209_v35 = vld [vmem:[%s8740_s13 + $0x1d8] sm:$0xff] }
 0x1ed   : > { %v6970_v31 = vpop.eup %6969  ;;  %v3206_v10 = vadd.f32 1.0, %v6968_v60  ;;  %6989 = vpow2.f32 %v6293_v32  ;;  %v1713_v32 = vadd.f32 %v10089_v29, %v10077_v18  ;;  %v6303_v41 = vmul.f32 -1.442695, %v1719_v63 }
 0x1ee   : > { %v6972_v4 = vpop.eup %6971  ;;  %6991 = vrcp.f32 %v3204_v39  ;;  %v3211_v50 = vadd.f32 1.0, %v6970_v31  ;;  %v1462_v39 = vadd.f32 %v10097_v42, %v10087_v56 }
 0x1ef   : > { %v6974_v14 = vpop.eup %6973  ;;  %6993 = vrcp.f32 %v3206_v10  ;;  %v3213_v53 = vadd.f32 1.0, %v6972_v4 }
 0x1f0   : > { %v6976_v45 = vpop.eup %6975  ;;  %6995 = vrcp.f32 %v3211_v50  ;;  %v3212_v49 = vadd.f32 1.0, %v6974_v14  ;;  %v6295_v50 = vmul.f32 -1.442695, %v1713_v32 }
 0x1f1   : > { %v6978_v44 = vpop.eup %6977  ;;  %6997 = vrcp.f32 %v3213_v53  ;;  %v3214_v30 = vadd.f32 1.0, %v6976_v45  ;;  %v6302_v45 = vmul.f32 -1.442695, %v1717_v11 }
 0x1f2   : > { %v6980_v28 = vpop.eup %6979  ;;  %6999 = vrcp.f32 %v3212_v49  ;;  %v3219_v61 = vadd.f32 1.0, %v6978_v44  ;;  %v6301_v44 = vmul.f32 -1.442695, %v1462_v39  ;;  %v8191_v39 = vld [vmem:[%s8740_s13 + $0xc8] sm:$0xff] }
 0x1f3   : > { %v6982_v34 = vpop.eup %6981  ;;  %7001 = vrcp.f32 %v3214_v30  ;;  %v3221_v60 = vadd.f32 1.0, %v6980_v28  ;;  %v1466_v30 = vadd.f32 %v10103_v17, %v10091_v25 }
 0x1f4   : > { %v6984_v31 = vpop.eup %6983  ;;  %7003 = vrcp.f32 %v3219_v61  ;;  %v3220_v10 = vadd.f32 1.0, %v6982_v34  ;;  %v1468_v61 = vadd.f32 %v10107_v59, %v10091_v25  ;;  %v1725_v34 = vadd.f32 %v10111_v38, %v10091_v25 }
 0x1f5   : > { %v6986_v4 = vpop.eup %6985  ;;  %7005 = vrcp.f32 %v3221_v60  ;;  %v3222_v29 = vadd.f32 1.0, %v6984_v31  ;;  %v8190_v60 = vld [vmem:[%s8740_s13 + $0x88] sm:$0xff] }
 0x1f6   : > { %v6988_v14 = vpop.eup %6987  ;;  %7007 = vrcp.f32 %v3220_v10  ;;  %v3227_v53 = vadd.f32 1.0, %v6986_v4  ;;  %v3836_v17 = vmul.f32 %v8190_v60, %v10320_v9  ;;  %v13534_v4 = vld [vmem:[#allocation104_spill] sm:$0xff]  ;;  %v13537_v9 = vld [vmem:[#allocation105_spill] sm:$0xff]  ;;  %v6311_v63 = vmul.f32 -1.442695, %v1725_v34 }
 0x1f7   : > { %v6990_v49 = vpop.eup %6989  ;;  %7009 = vrcp.f32 %v3222_v29  ;;  %v3229_v42 = vadd.f32 1.0, %v6988_v14  ;;  %v1472_v0 = vadd.f32 %v13534_v4, %v10101_v19  ;;  %v8192_v29 = vld [vmem:[%s8740_s13 + $0x98] sm:$0xff]  ;;  %v13538_v4 = vld [vmem:[#allocation106_spill] sm:$0xff]  ;;  %v8194_v34 = vld [vmem:[%s8740_s13 + $0x100] sm:$0xff] }
 0x1f8   : > { %v6992_v28 = vpop.eup %6991  ;;  %7011 = vrcp.f32 %v3227_v53  ;;  %v3228_v32 = vadd.f32 1.0, %v6990_v49  ;;  %v3838_v59 = vmul.f32 %v8192_v29, %v10322_v57  ;;  %v8193_v14 = vld [vmem:[%s8740_s13 + $0xd8] sm:$0xff]  ;;  %v10378_v49 = vpop.f32.mrb[79].mxu0  ;;  %v1474_v23 = vadd.f32 %v13538_v4, %v10101_v19  ;;  %v8197_v4 = vld [vmem:[%s8740_s13 + $0x150] sm:$0xff] }
 0x1f9   : > { %v6994_v11 = vpop.eup %6993  ;;  %7013 = vrcp.f32 %v3229_v42  ;;  %v3844_v31 = vmul.f32 %v8191_v39, %v6992_v28  ;;  %13535 = vst [vmem:[#allocation104_spill] sm:$0xff] %v10378_v49  ;;  %v10380_v42 = vpop.f32.mrb[79].mxu1  ;;  %v1729_v28 = vadd.f32 %v13537_v9, %v10101_v19  ;;  %v6308_v39 = vmul.f32 -1.442695, %v1466_v30 }
 0x1fa   : > { %v6996_v10 = vpop.eup %6995  ;;  %7015 = vrcp.f32 %v3228_v32  ;;  %v3846_v53 = vmul.f32 %v8193_v14, %v6994_v11  ;;  %13536 = vst [vmem:[#allocation166_spill] sm:$0xff] %v10380_v42  ;;  %v6310_v11 = vmul.f32 -1.442695, %v1723_v6  ;;  %v6309_v14 = vmul.f32 -1.442695, %v1468_v61  ;;  %v10391_v30 = vpop.f32.mrb[80].mxu0 }
 0x1fb   : > { %v6998_v38 = vpop.eup %6997  ;;  %7017 = vpow2.f32 %v6295_v50  ;;  %v6640_v60 = vpack.c.bf16 %v3844_v31, %v3836_v17  ;;  %v6316_v42 = vmul.f32 -1.442695, %v1472_v0  ;;  %v13539_v17 = vld [vmem:[#allocation108_spill] sm:$0xff]  ;;  %13541 = vst [vmem:[#allocation105_spill] sm:$0xff] %v10391_v30  ;;  %v6318_v61 = vmul.f32 -1.442695, %v1729_v28 }
 0x1fc   : > { %v7000_v32 = vpop.eup %6999  ;;  %7019 = vpow2.f32 %v6300_v3  ;;  %v6688_v57 = vpack.c.bf16 %v3846_v53, %v3838_v59  ;;  %v1731_v31 = vadd.f32 %v13539_v17, %v10101_v19  ;;  %v13540_v3 = vpack.c.bf16 %v10332_v46, %v10329_v52  ;;  %v8195_v59 = vld [vmem:[%s8740_s13 + $0x140] sm:$0xff]  ;;  %v10400_v46 = vpop.f32.mrb[81].mxu0  ;;  %v8199_v17 = vld [vmem:[%s8740_s13 + $0x148] sm:$0xff] }
 0x1fd   : > { %v7002_v29 = vpop.eup %7001  ;;  %7021 = vpow2.f32 %v6302_v45  ;;  %6641 = vmatprep.subr.bf16.mxu0 %v6640_v60  ;;  %v10393_v45 = vpop.f32.mrb[80].mxu1  ;;  %v3851_v0 = vmul.f32 %v8194_v34, %v6996_v10  ;;  %13544 = vst [vmem:[#allocation108_spill] sm:$0xff] %v10400_v46  ;;  %v6317_v60 = vmul.f32 -1.442695, %v1474_v23  ;;  %v8200_v34 = vld [vmem:[%s8740_s13 + $0x118] sm:$0xff]  ;;  %v13649_v19 = vld [vmem:[#allocation61_spill] sm:$0xff] }
 0x1fe   : > { %v7004_v50 = vpop.eup %7003  ;;  %7023 = vpow2.f32 %v6301_v44  ;;  %6689 = vmatprep.subr.bf16.mxu1 %v6688_v57  ;;  %6643 = vmatpush1.bf16.msra.mxu0 %v13540_v3  ;;  %13542 = vst [vmem:[#allocation106_spill] sm:$0xff] %v10393_v45  ;;  %v13543_v44 = vpack.c.bf16 %v10342_v62, %v10339_v20  ;;  %v10402_v53 = vpop.f32.mrb[81].mxu1  ;;  %v8198_v57 = vld [vmem:[%s8740_s13 + $0x108] sm:$0xff] }
 0x1ff   : > { %v7006_v6 = vpop.eup %7005  ;;  %7025 = vpow2.f32 %v6303_v41  ;;  %v3859_v52 = vmul.f32 %v8195_v59, %v7004_v50  ;;  %13545 = vst [vmem:[#allocation167_spill] sm:$0xff] %v10402_v53  ;;  %v8196_v41 = vld [vmem:[%s8740_s13 + $0x110] sm:$0xff]  ;;  %v3852_v10 = vmul.f32 %v8198_v57, %v7000_v32  ;;  %v3854_v59 = vmul.f32 %v8200_v34, %v7002_v29  ;;  %v8201_v53 = vld [vmem:[%s8740_s13 + $0x158] sm:$0xff]  ;;  %v10412_v46 = vpop.f32.mrb[82].mxu0 }
 0x200   : > { %6691 = vmatpush1.bf16.msra.mxu1 %v13543_v44  ;;  %v7008_v9 = vpop.eup %7007  ;;  %7027 = vpow2.f32 %v6308_v39  ;;  %v3853_v28 = vmul.f32 %v8196_v41, %v6998_v38  ;;  %v3861_v20 = vmul.f32 %v8197_v4, %v7006_v6  ;;  %13546 = vst [vmem:[#allocation168_spill] sm:$0xff] %v10412_v46  ;;  %v10414_v38 = vpop.f32.mrb[82].mxu1  ;;  %v13552_v34 = vld [vmem:[#allocation103_spill] sm:$0xff] }
 0x201   : > { %v7010_v62 = vpop.eup %7009  ;;  %7029 = vpow2.f32 %v6310_v11  ;;  %v3860_v3 = vmul.f32 %v8199_v17, %v7008_v9  ;;  %v6646_v50 = vpack.c.bf16 %v3859_v52, %v3851_v0  ;;  %13547 = vst [vmem:[#allocation169_spill] sm:$0xff] %v10414_v38  ;;  %v6319_v11 = vmul.f32 -1.442695, %v1731_v31  ;;  %v10418_v41 = vpop.f32.mrb[83].mxu0 }
 0x202   : > { %v10408_v44 = vpop.eup %7011  ;;  %7031 = vpow2.f32 %v6309_v14  ;;  %v3862_v39 = vmul.f32 %v8201_v53, %v7010_v62  ;;  %v6694_v23 = vpack.c.bf16 %v3861_v20, %v3853_v28  ;;  %13548 = vst [vmem:[#allocation170_spill] sm:$0xff] %v10418_v41  ;;  %v10420_v0 = vpop.f32.mrb[83].mxu1 }
 0x203   : > { %v10416_v6 = vpop.eup %7013  ;;  %7033 = vpow2.f32 %v6311_v63  ;;  %v6644_v32 = vpack.c.bf16 %v3860_v3, %v3852_v10  ;;  %13549 = vst [vmem:[#allocation171_spill] sm:$0xff] %v10420_v0  ;;  %v10424_v28 = vpop.f32.mrb[84].mxu0 }
 0x204   : > { %v10422_v52 = vpop.eup %7015  ;;  %7035 = vpow2.f32 %v6316_v42  ;;  %v6692_v29 = vpack.c.bf16 %v3862_v39, %v3854_v59  ;;  %13550 = vst [vmem:[#allocation172_spill] sm:$0xff] %v10424_v28  ;;  %v10426_v63 = vpop.f32.mrb[84].mxu1  ;;  %v13553_v59 = vld [vmem:[#allocation110_spill] sm:$0xff] }
 0x205   : > { %v7018_v14 = vpop.eup %7017  ;;  %7037 = vpow2.f32 %v6318_v61  ;;  %6645 = vmatprep.subr.bf16.mxu0 %v6644_v32  ;;  %13551 = vst [vmem:[#allocation173_spill] sm:$0xff] %v10426_v63  ;;  %v1478_v39 = vadd.f32 %v13553_v59, %v13552_v34  ;;  %v13554_v32 = vld [vmem:[#allocation111_spill] sm:$0xff] }
 0x206   : > { %v7020_v53 = vpop.eup %7019  ;;  %v3230_v9 = vadd.f32 1.0, %v7018_v14  ;;  %7039 = vpow2.f32 %v6317_v60  ;;  %6693 = vmatprep.subr.bf16.mxu1 %v6692_v29  ;;  %6647 = vmatpush1.bf16.msra.mxu0 %v6646_v50  ;;  %v1735_v29 = vadd.f32 %v13554_v32, %v13552_v34  ;;  %v13555_v14 = vld [vmem:[#allocation112_spill] sm:$0xff] }
 0x207   : > { %v7022_v31 = vpop.eup %7021  ;;  %v3235_v4 = vadd.f32 1.0, %v7020_v53  ;;  %7041 = vpow2.f32 %v6319_v11  ;;  %6695 = vmatpush1.bf16.msra.mxu1 %v6694_v23  ;;  %v1480_v53 = vadd.f32 %v13555_v14, %v13552_v34  ;;  %v13561_v14 = vld [vmem:[#allocation41_spill] sm:$0xff] }
 0x208   : > { %v7024_v20 = vpop.eup %7023  ;;  %7043 = vrcp.f32 %v3230_v9  ;;  %v3237_v42 = vadd.f32 1.0, %v7022_v31  ;;  %v6326_v28 = vmul.f32 -1.442695, %v1735_v29  ;;  %v10450_v29 = vpop.f32.mrb[85].mxu1 }
 0x209   : > { %v7026_v62 = vpop.eup %7025  ;;  %7045 = vrcp.f32 %v3235_v4  ;;  %v3236_v61 = vadd.f32 1.0, %v7024_v20  ;;  %v13556_v4 = vld [vmem:[#allocation113_spill] sm:$0xff]  ;;  %13564 = vst [vmem:[#allocation111_spill] sm:$0xff] %v10450_v29  ;;  %v8204_v29 = vld [vmem:[%s8740_s13 + $0x190] sm:$0xff] }
 0x20a   : > { %v7028_v57 = vpop.eup %7027  ;;  %7047 = vrcp.f32 %v3237_v42  ;;  %v3238_v10 = vadd.f32 1.0, %v7026_v62  ;;  %v1737_v20 = vadd.f32 %v13556_v4, %v13552_v34  ;;  %v13557_v42 = vld [vmem:[#allocation107_spill] sm:$0xff]  ;;  %v6324_v4 = vmul.f32 -1.442695, %v1478_v39 }
 0x20b   : > { %v7030_v60 = vpop.eup %7029  ;;  %7049 = vrcp.f32 %v3236_v61  ;;  %v3243_v17 = vadd.f32 1.0, %v7028_v57  ;;  %v13558_v62 = vld [vmem:[#allocation115_spill] sm:$0xff] }
 0x20c   : > { %v7032_v3 = vpop.eup %7031  ;;  %7051 = vrcp.f32 %v3238_v10  ;;  %v3245_v50 = vadd.f32 1.0, %v7030_v60  ;;  %v1484_v61 = vadd.f32 %v13558_v62, %v13557_v42  ;;  %v13559_v60 = vld [vmem:[#allocation116_spill] sm:$0xff]  ;;  %v6327_v0 = vmul.f32 -1.442695, %v1737_v20 }
 0x20d   : > { %v7034_v11 = vpop.eup %7033  ;;  %7053 = vrcp.f32 %v3243_v17  ;;  %v3244_v23 = vadd.f32 1.0, %v7032_v3  ;;  %v1741_v17 = vadd.f32 %v13559_v60, %v13557_v42  ;;  %v13560_v3 = vld [vmem:[#allocation117_spill] sm:$0xff] }
 0x20e   : > { %v7036_v9 = vpop.eup %7035  ;;  %7055 = vrcp.f32 %v3245_v50  ;;  %v3246_v31 = vadd.f32 1.0, %v7034_v11  ;;  %v1486_v59 = vadd.f32 %v13560_v3, %v13557_v42  ;;  %v10444_v50 = vadd.f32 %v13561_v14, %v10169_v27 }
 0x20f   : > { %v7038_v57 = vpop.eup %7037  ;;  %7057 = vrcp.f32 %v3244_v23  ;;  %v3251_v10 = vadd.f32 1.0, %v7036_v9  ;;  %v6325_v23 = vmul.f32 -1.442695, %v1480_v53  ;;  %v6332_v3 = vmul.f32 -1.442695, %v1484_v61  ;;  %v8202_v61 = vld [vmem:[%s8740_s13 + $0x180] sm:$0xff] }
 0x210   : > { %v7040_v32 = vpop.eup %7039  ;;  %7059 = vrcp.f32 %v3246_v31  ;;  %v3253_v11 = vadd.f32 1.0, %v7038_v57  ;;  %v6334_v14 = vmul.f32 -1.442695, %v1741_v17  ;;  %v6333_v38 = vmul.f32 -1.442695, %v1486_v59  ;;  %v13562_v31 = vld [vmem:[#allocation119_spill] sm:$0xff] }
 0x211   : > { %v7042_v63 = vpop.eup %7041  ;;  %7061 = vrcp.f32 %v3251_v10  ;;  %v3252_v62 = vadd.f32 1.0, %v7040_v32  ;;  %v1743_v39 = vadd.f32 %v13562_v31, %v13557_v42  ;;  %v10448_v57 = vpop.f32.mrb[85].mxu0  ;;  %v13565_v10 = vld [vmem:[#allocation109_spill] sm:$0xff]  ;;  %v3867_v32 = vmul.f32 %v8202_v61, %v10408_v44  ;;  %v8207_v44 = vld [vmem:[%s8740_s13 + $0x1c8] sm:$0xff] }
 0x212   : > { %v7044_v9 = vpop.eup %7043  ;;  %7063 = vrcp.f32 %v3253_v11  ;;  %v3254_v60 = vadd.f32 1.0, %v7042_v63  ;;  %13563 = vst [vmem:[#allocation110_spill] sm:$0xff] %v10448_v57  ;;  %v13566_v63 = vld [vmem:[#allocation120_spill] sm:$0xff]  ;;  %v8203_v17 = vld [vmem:[%s8740_s13 + $0x1c0] sm:$0xff]  ;;  %v3869_v57 = vmul.f32 %v8204_v29, %v10416_v6  ;;  %v10467_v33 = vpop.f32.mrb[86].mxu0 }
 0x213   : > { %v7046_v41 = vpop.eup %7045  ;;  %7065 = vrcp.f32 %v3252_v62  ;;  %v1490_v20 = vadd.f32 %v13566_v63, %v13565_v10  ;;  %v13567_v62 = vld [vmem:[#allocation121_spill] sm:$0xff]  ;;  %v8206_v63 = vld [vmem:[%s8740_s13 + $0x188] sm:$0xff]  ;;  %13568 = vst [vmem:[#allocation112_spill] sm:$0xff] %v10467_v33  ;;  %v10469_v6 = vpop.f32.mrb[86].mxu1 }
 0x214   : > { %v7048_v53 = vpop.eup %7047  ;;  %7067 = vrcp.f32 %v3254_v60  ;;  %v3875_v59 = vmul.f32 %v8203_v17, %v7046_v41  ;;  %v1747_v31 = vadd.f32 %v13567_v62, %v13565_v10  ;;  %v8205_v60 = vld [vmem:[%s8740_s13 + $0x1d0] sm:$0xff]  ;;  %v3868_v30 = vmul.f32 %v8206_v63, %v10422_v52  ;;  %13569 = vst [vmem:[#allocation113_spill] sm:$0xff] %v10469_v6 }
 0x215   : > { %v7050_v11 = vpop.eup %7049  ;;  %7069 = vpow2.f32 %v6324_v4  ;;  %v3877_v46 = vmul.f32 %v8205_v60, %v7048_v53  ;;  %v8208_v4 = vld [vmem:[%s8740_s13 + $0x198] sm:$0xff]  ;;  %v13570_v53 = vld [vmem:[#allocation122_spill] sm:$0xff] }
 0x216   : > { %v7052_v45 = vpop.eup %7051  ;;  %7071 = vpow2.f32 %v6326_v28  ;;  %v3876_v61 = vmul.f32 %v8207_v44, %v7050_v11  ;;  %v6650_v41 = vpack.c.bf16 %v3875_v59, %v3867_v32  ;;  %v3870_v49 = vmul.f32 %v8208_v4, %v7044_v9  ;;  %v10473_v11 = vpop.f32.mrb[87].mxu0 }
 0x217   : > { %v7054_v17 = vpop.eup %7053  ;;  %7073 = vpow2.f32 %v6325_v23  ;;  %v3878_v62 = vmul.f32 %v8209_v35, %v7052_v45  ;;  %v6698_v22 = vpack.c.bf16 %v3877_v46, %v3869_v57  ;;  %v6335_v28 = vmul.f32 -1.442695, %v1743_v39  ;;  %13571 = vst [vmem:[#allocation115_spill] sm:$0xff] %v10473_v11  ;;  %v10475_v32 = vpop.f32.mrb[87].mxu1  ;;  %v13573_v35 = vld [vmem:[#allocation114_spill] sm:$0xff]  ;;  %v8225_v11 = vld [vmem:[%s8740_s13 + $0x2d8] sm:$0xff] }
 0x218   : > { %v7056_v29 = vpop.eup %7055  ;;  %7075 = vpow2.f32 %v6327_v0  ;;  %v1492_v52 = vadd.f32 %v13570_v53, %v13565_v10  ;;  %v6648_v60 = vpack.c.bf16 %v3876_v61, %v3868_v30  ;;  %13572 = vst [vmem:[#allocation116_spill] sm:$0xff] %v10475_v32  ;;  %v6340_v9 = vmul.f32 -1.442695, %v1490_v20  ;;  %v13574_v45 = vld [vmem:[#allocation126_spill] sm:$0xff]  ;;  %v10480_v63 = vpop.f32.mrb[88].mxu0  ;;  %v8212_v53 = vld [vmem:[%s8740_s13 + $0x210] sm:$0xff] }
 0x219   : > { %v7058_v23 = vpop.eup %7057  ;;  %7077 = vpow2.f32 %v6332_v3  ;;  %v1496_v46 = vadd.f32 %v13574_v45, %v13573_v35  ;;  %v6696_v57 = vpack.c.bf16 %v3878_v62, %v3870_v49  ;;  %v6342_v0 = vmul.f32 -1.442695, %v1747_v31  ;;  %13575 = vst [vmem:[#allocation117_spill] sm:$0xff] %v10480_v63  ;;  %v10482_v3 = vpop.f32.mrb[88].mxu1  ;;  %v4076_v49 = vld [vmem:[%s13119_s3 + $0x8] sm:$0xff]  ;;  %v8210_v31 = vld [vmem:[%s8740_s13 + $0x200] sm:$0xff] }
 0x21a   : > { %v7060_v59 = vpop.eup %7059  ;;  %7079 = vpow2.f32 %v6334_v14  ;;  %6649 = vmatprep.subr.bf16.mxu0 %v6648_v60  ;;  %v6125_v30 = vmul.f32 -1.442695, %v10444_v50  ;;  %13576 = vst [vmem:[#allocation41_spill] sm:$0xff] %v10482_v3  ;;  %v6341_v14 = vmul.f32 -1.442695, %v1492_v52  ;;  %v3883_v44 = vmul.f32 %v8210_v31, %v7054_v17  ;;  %v10489_v61 = vpop.f32.mrb[89].mxu0  ;;  %6372 = vmatprep.mubr.msk.f32.mxu0 %vm1158_vm0, %v4076_v49 }
 0x21b   : > { %v7062_v39 = vpop.eup %7061  ;;  %7081 = vpow2.f32 %v6333_v38  ;;  %6697 = vmatprep.subr.bf16.mxu1 %v6696_v57  ;;  %6651 = vmatpush1.bf16.msra.mxu0 %v6650_v41  ;;  %v8211_v38 = vld [vmem:[%s8740_s13 + $0x240] sm:$0xff]  ;;  %13577 = vst [vmem:[#allocation119_spill] sm:$0xff] %v10489_v61  ;;  %v10491_v41 = vpop.f32.mrb[89].mxu1  ;;  %v6348_v62 = vmul.f32 -1.442695, %v1496_v46  ;;  %v8214_v60 = vld [vmem:[%s8740_s13 + $0x208] sm:$0xff] }
 0x21c   : > { %v7064_v20 = vpop.eup %7063  ;;  %7083 = vpow2.f32 %v6335_v28  ;;  %6699 = vmatpush1.bf16.msra.mxu1 %v6698_v22  ;;  %v3891_v50 = vmul.f32 %v8211_v38, %v7062_v39  ;;  %13578 = vst [vmem:[#allocation120_spill] sm:$0xff] %v10491_v41  ;;  %v3885_v28 = vmul.f32 %v8212_v53, %v7056_v29  ;;  %v8213_v22 = vld [vmem:[%s8740_s13 + $0x250] sm:$0xff]  ;;  %6388 = vmatprep.mubr.msk.f32.mxu1 %vm1158_vm0, %v4076_v49  ;;  %v8215_v57 = vld [vmem:[%s8740_s13 + $0x248] sm:$0xff]  ;;  %v8216_v41 = vld [vmem:[%s8740_s13 + $0x218] sm:$0xff]  ;;  %v10501_v63 = vpop.f32.mrb[90].mxu0 }
 0x21d   : > { %v7066_v4 = vpop.eup %7065  ;;  %7085 = vpow2.f32 %v6340_v9  ;;  %v3893_v52 = vmul.f32 %v8213_v22, %v7064_v20  ;;  %v3884_v45 = vmul.f32 %v8214_v60, %v7058_v23  ;;  %v3886_v9 = vmul.f32 %v8216_v41, %v7060_v59  ;;  %v8217_v61 = vld [vmem:[%s8740_s13 + $0x258] sm:$0xff]  ;;  %13579 = vst [vmem:[#allocation121_spill] sm:$0xff] %v10501_v63  ;;  %v10503_v29 = vpop.f32.mrb[90].mxu1  ;;  %v8222_v63 = vld [vmem:[%s8740_s13 + $0x288] sm:$0xff] }
 0x21e   : > { %v7068_v17 = vpop.eup %7067  ;;  %7087 = vpow2.f32 %v6342_v0  ;;  %v3892_v39 = vmul.f32 %v8215_v57, %v7066_v4  ;;  %v6654_v31 = vpack.c.bf16 %v3891_v50, %v3883_v44  ;;  %13580 = vst [vmem:[#allocation122_spill] sm:$0xff] %v10503_v29  ;;  %v10505_v53 = vpop.f32.mrb[91].mxu0  ;;  %v13582_v50 = vld [vmem:[#allocation124_spill] sm:$0xff]  ;;  %v8221_v29 = vld [vmem:[%s8740_s13 + $0x2d0] sm:$0xff] }
 0x21f   : > { %v7070_v38 = vpop.eup %7069  ;;  %7089 = vpow2.f32 %v6125_v30  ;;  %v3894_v46 = vmul.f32 %v8217_v61, %v7068_v17  ;;  %v6702_v3 = vpack.c.bf16 %v3893_v52, %v3885_v28  ;;  %13581 = vst [vmem:[#allocation126_spill] sm:$0xff] %v10505_v53  ;;  %v1749_v61 = vadd.f32 %v13582_v50, %v13565_v10 }
 0x220   : > { %v7072_v20 = vpop.eup %7071  ;;  %v3259_v49 = vadd.f32 1.0, %v7070_v38  ;;  %7091 = vpow2.f32 %v6341_v14  ;;  %v6652_v0 = vpack.c.bf16 %v3892_v39, %v3884_v45  ;;  %v13583_v38 = vld [vmem:[#allocation127_spill] sm:$0xff] }
 0x221   : > { %v7074_v23 = vpop.eup %7073  ;;  %v3261_v4 = vadd.f32 1.0, %v7072_v20  ;;  %7093 = vpow2.f32 %v6348_v62  ;;  %v6700_v44 = vpack.c.bf16 %v3894_v46, %v3886_v9  ;;  %v6343_v45 = vmul.f32 -1.442695, %v1749_v61  ;;  %v13584_v46 = vld [vmem:[#allocation128_spill] sm:$0xff] }
 0x222   : > { %v7076_v30 = vpop.eup %7075  ;;  %7095 = vrcp.f32 %v3259_v49  ;;  %v3260_v59 = vadd.f32 1.0, %v7074_v23  ;;  %6653 = vmatprep.subr.bf16.mxu0 %v6652_v0  ;;  %v1753_v9 = vadd.f32 %v13583_v38, %v13573_v35  ;;  %v13585_v23 = vld [vmem:[#allocation129_spill] sm:$0xff]  ;;  %v13591_v38 = vld [vmem:[#allocation123_spill] sm:$0xff] }
 0x223   : > { %v7078_v41 = vpop.eup %7077  ;;  %7097 = vrcp.f32 %v3261_v4  ;;  %v3262_v28 = vadd.f32 1.0, %v7076_v30  ;;  %6701 = vmatprep.subr.bf16.mxu1 %v6700_v44  ;;  %6655 = vmatpush1.bf16.msra.mxu0 %v6654_v31  ;;  %v1498_v31 = vadd.f32 %v13584_v46, %v13573_v35  ;;  %v1755_v4 = vadd.f32 %v13585_v23, %v13573_v35  ;;  %v13586_v30 = vld [vmem:[#allocation118_spill] sm:$0xff]  ;;  %v10529_v46 = vpop.f32.mrb[91].mxu1 }
 0x224   : > { %v7080_v14 = vpop.eup %7079  ;;  %7099 = vrcp.f32 %v3260_v59  ;;  %v3267_v22 = vadd.f32 1.0, %v7078_v41  ;;  %6703 = vmatpush1.bf16.msra.mxu1 %v6702_v3  ;;  %v13587_v59 = vld [vmem:[#allocation131_spill] sm:$0xff]  ;;  %v6350_v41 = vmul.f32 -1.442695, %v1753_v9  ;;  %13592 = vst [vmem:[#allocation124_spill] sm:$0xff] %v10529_v46 }
 0x225   : > { %v7082_v52 = vpop.eup %7081  ;;  %7101 = vrcp.f32 %v3262_v28  ;;  %v3269_v62 = vadd.f32 1.0, %v7080_v14  ;;  %v1502_v50 = vadd.f32 %v13587_v59, %v13586_v30  ;;  %v6349_v28 = vmul.f32 -1.442695, %v1498_v31  ;;  %v13588_v14 = vld [vmem:[#allocation132_spill] sm:$0xff] }
 0x226   : > { %v7084_v17 = vpop.eup %7083  ;;  %7103 = vrcp.f32 %v3267_v22  ;;  %v3268_v60 = vadd.f32 1.0, %v7082_v52  ;;  %v1759_v22 = vadd.f32 %v13588_v14, %v13586_v30  ;;  %v13589_v52 = vld [vmem:[#allocation133_spill] sm:$0xff]  ;;  %v6351_v9 = vmul.f32 -1.442695, %v1755_v4  ;;  %v10537_v4 = vpop.f32.mrb[92].mxu0 }
 0x227   : > { %v7086_v57 = vpop.eup %7085  ;;  %7105 = vrcp.f32 %v3269_v62  ;;  %v3270_v39 = vadd.f32 1.0, %v7084_v17  ;;  %v1504_v62 = vadd.f32 %v13589_v52, %v13586_v30  ;;  %v1765_v31 = vadd.f32 %v10191_v43, %v13591_v38  ;;  %13594 = vst [vmem:[#allocation127_spill] sm:$0xff] %v10537_v4  ;;  %v8220_v4 = vld [vmem:[%s8740_s13 + $0x290] sm:$0xff] }
 0x228   : > { %v7088_v20 = vpop.eup %7087  ;;  %7107 = vrcp.f32 %v3268_v60  ;;  %v3275_v49 = vadd.f32 1.0, %v7086_v57  ;;  %v13590_v57 = vld [vmem:[#allocation134_spill] sm:$0xff]  ;;  %v6356_v59 = vmul.f32 -1.442695, %v1502_v50  ;;  %v6358_v52 = vmul.f32 -1.442695, %v1759_v22 }
 0x229   : > { %v10513_v3 = vpop.eup %7089  ;;  %7109 = vrcp.f32 %v3270_v39  ;;  %v3277_v0 = vadd.f32 1.0, %v7088_v20  ;;  %v1761_v39 = vadd.f32 %v13590_v57, %v13586_v30  ;;  %v1767_v43 = vadd.f32 %v10195_v26, %v13591_v38  ;;  %v10539_v50 = vpop.f32.mrb[92].mxu1  ;;  %v4077_v30 = vld [vmem:[%s13119_s3 + $0x10] sm:$0xff] }
 0x22a   : > { %v10517_v44 = vpop.eup %7091  ;;  %7111 = vpow2.f32 %v6343_v45  ;;  %v1508_v45 = vadd.f32 %v10187_v12, %v13591_v38  ;;  %v6357_v12 = vmul.f32 -1.442695, %v1504_v62  ;;  %13595 = vst [vmem:[#allocation128_spill] sm:$0xff] %v10539_v50  ;;  %v8219_v62 = vld [vmem:[%s8740_s13 + $0x2c0] sm:$0xff] }
 0x22b   : > { %v7094_v61 = vpop.eup %7093  ;;  %7113 = vrcp.f32 %v3275_v49  ;;  %v13593_v49 = vld [vmem:[#allocation135_spill] sm:$0xff]  ;;  %v6359_v46 = vmul.f32 -1.442695, %v1761_v39  ;;  %v10543_v39 = vpop.f32.mrb[93].mxu0 }
 0x22c   : > { %v7096_v17 = vpop.eup %7095  ;;  %v3283_v60 = vadd.f32 1.0, %v7094_v61  ;;  %7115 = vrcp.f32 %v3277_v0  ;;  %v1510_v61 = vadd.f32 %v13593_v49, %v13591_v38  ;;  %v6364_v0 = vmul.f32 -1.442695, %v1508_v45  ;;  %13596 = vst [vmem:[#allocation129_spill] sm:$0xff] %v10543_v39  ;;  %v10545_v45 = vpop.f32.mrb[93].mxu1  ;;  %v8224_v39 = vld [vmem:[%s8740_s13 + $0x298] sm:$0xff] }
 0x22d   : > { %v7098_v20 = vpop.eup %7097  ;;  %v6366_v49 = vmul.f32 -1.442695, %v1765_v31  ;;  %13597 = vst [vmem:[#allocation131_spill] sm:$0xff] %v10545_v45  ;;  %v10555_v33 = vpop.f32.mrb[94].mxu1 }
 0x22e   : > { %v7100_v23 = vpop.eup %7099  ;;  %7117 = vrcp.f32 %v3283_v60  ;;  %v6365_v26 = vmul.f32 -1.442695, %v1510_v61  ;;  %v3901_v50 = vmul.f32 %v8220_v4, %v7098_v20  ;;  %v10553_v61 = vpop.f32.mrb[94].mxu0  ;;  %13599 = vst [vmem:[#allocation133_spill] sm:$0xff] %v10555_v33  ;;  %v8231_v33 = vld [vmem:[%s8740_s13 + $0x348] sm:$0xff] }
 0x22f   : > { %v7102_v14 = vpop.eup %7101  ;;  %7119 = vpow2.f32 %v6350_v41  ;;  %v8218_v41 = vld [vmem:[%s8740_s13 + $0x280] sm:$0xff]  ;;  %13598 = vst [vmem:[#allocation132_spill] sm:$0xff] %v10553_v61  ;;  %v8232_v61 = vld [vmem:[%s8740_s13 + $0x318] sm:$0xff] }
 0x230   : > { %v7104_v57 = vpop.eup %7103  ;;  %7121 = vpow2.f32 %v6349_v28  ;;  %v3899_v22 = vmul.f32 %v8218_v41, %v7096_v17  ;;  %v3900_v17 = vmul.f32 %v8222_v63, %v7100_v23  ;;  %v8223_v41 = vld [vmem:[%s8740_s13 + $0x2c8] sm:$0xff]  ;;  %v3902_v45 = vmul.f32 %v8224_v39, %v7102_v14  ;;  %v10559_v63 = vpop.f32.mrb[95].mxu1 }
 0x231   : > { %v7106_v60 = vpop.eup %7105  ;;  %7123 = vpow2.f32 %v6351_v9  ;;  %v3907_v28 = vmul.f32 %v8219_v62, %v7104_v57  ;;  %13601 = vst [vmem:[#allocation135_spill] sm:$0xff] %v10559_v63  ;;  %v3276_v23 = vadd.f32 1.0, %v10517_v44  ;;  %v8226_v44 = vld [vmem:[%s8740_s13 + $0x300] sm:$0xff]  ;;  %v8230_v63 = vld [vmem:[%s8740_s13 + $0x308] sm:$0xff] }
 0x232   : > { %v7108_v53 = vpop.eup %7107  ;;  %7125 = vpow2.f32 %v6356_v59  ;;  %v3909_v9 = vmul.f32 %v8221_v29, %v7106_v60  ;;  %v6367_v29 = vmul.f32 -1.442695, %v1767_v43 }
 0x233   : > { %v7110_v31 = vpop.eup %7109  ;;  %7127 = vpow2.f32 %v6358_v52  ;;  %v3908_v32 = vmul.f32 %v8223_v41, %v7108_v53  ;;  %v6658_v57 = vpack.c.bf16 %v3907_v28, %v3899_v22  ;;  %v10557_v52 = vpop.f32.mrb[95].mxu0 }
 0x234   : > { %v7112_v62 = vpop.eup %7111  ;;  %7129 = vpow2.f32 %v6357_v12  ;;  %v3910_v6 = vmul.f32 %v8225_v11, %v7110_v31  ;;  %v6706_v59 = vpack.c.bf16 %v3909_v9, %v3901_v50  ;;  %13600 = vst [vmem:[#allocation134_spill] sm:$0xff] %v10557_v52 }
 0x235   : > { %7131 = vpow2.f32 %v6359_v46  ;;  %v6656_v20 = vpack.c.bf16 %v3908_v32, %v3900_v17  ;;  %v7114_v53 = vpop.eup %7113  ;;  %v3278_v12 = vadd.f32 1.0, %v7112_v62  ;;  %v10564_v32 = vpop.f32.mrb[96].mxu0 }
 0x236   : > { %7133 = vpow2.f32 %v6364_v0  ;;  %v6704_v14 = vpack.c.bf16 %v3910_v6, %v3902_v45  ;;  %v10562_v11 = vpop.eup %7115  ;;  %v10566_v46 = vpop.f32.mrb[96].mxu1  ;;  %v10569_v0 = vmul.f32 %v8226_v44, %v7114_v53  ;;  %v8227_v6 = vld [vmem:[%s8740_s13 + $0x340] sm:$0xff] }
 0x237   : > { %7135 = vpow2.f32 %v6366_v49  ;;  %6657 = vmatprep.subr.bf16.mxu0 %v6656_v20  ;;  %v10574_v60 = vpop.f32.mrb[97].mxu0  ;;  %v10576_v49 = vpop.f32.mrb[97].mxu1  ;;  %v13603_v20 = vld [vmem:[#allocation42_spill] sm:$0xff] }
 0x238   : > { %v7118_v4 = vpop.eup %7117  ;;  %7137 = vpow2.f32 %v6365_v26  ;;  %6705 = vmatprep.subr.bf16.mxu1 %v6704_v14  ;;  %6659 = vmatpush1.bf16.msra.mxu0 %v6658_v57  ;;  %v10580_v62 = vpop.permute.xlu0 %1010  ;;  %v1587_v53 = vadd.f32 %v13603_v20, %v10169_v27  ;;  %v13642_v27 = vld [vmem:[#allocation24_spill] sm:$0xff] }
 0x239   : > { %v7120_v43 = vpop.eup %7119  ;;  %7139 = vpow2.f32 %v6367_v29  ;;  %6707 = vmatpush1.bf16.msra.mxu1 %v6706_v59  ;;  %v10572_v50 = vmul.f32 %v8227_v6, %v7118_v4  ;;  %13602 = vst [vmem:[#allocation174_spill] sm:$0xff] %v10580_v62  ;;  %v10603_v16 = vpop.f32.mrb[98].mxu0 }
 0x23a   : > { %v7122_v22 = vpop.eup %7121  ;;  %7141 = vrcp.f32 %v3276_v23  ;;  %v3285_v28 = vadd.f32 1.0, %v7120_v43  ;;  %v13604_v43 = vld [vmem:[#allocation43_spill] sm:$0xff]  ;;  %v10605_v36 = vpop.f32.mrb[98].mxu1 }
 0x23b   : > { %v7124_v39 = vpop.eup %7123  ;;  %7143 = vrcp.f32 %v3278_v12  ;;  %v3284_v45 = vadd.f32 1.0, %v7122_v22  ;;  %v1334_v44 = vadd.f32 %v13604_v43, %v10580_v62 }
 0x23c   : > { %v7126_v9 = vpop.eup %7125  ;;  %7145 = vrcp.f32 %v3285_v28  ;;  %v3286_v31 = vadd.f32 1.0, %v7124_v39 }
 0x23d   : > { %v7128_v17 = vpop.eup %7127  ;;  %7147 = vrcp.f32 %v3284_v45  ;;  %v3291_v41 = vadd.f32 1.0, %v7126_v9  ;;  %v6127_v45 = vmul.f32 -1.442695, %v1587_v53 }
 0x23e   : > { %v7130_v57 = vpop.eup %7129  ;;  %7149 = vrcp.f32 %v3286_v31  ;;  %v3293_v59 = vadd.f32 1.0, %v7128_v17  ;;  %v13605_v17 = vld [vmem:[#allocation44_spill] sm:$0xff] }
 0x23f   : > { %v7132_v29 = vpop.eup %7131  ;;  %7151 = vrcp.f32 %v3291_v41  ;;  %v3292_v23 = vadd.f32 1.0, %v7130_v57  ;;  %v1591_v41 = vadd.f32 %v13605_v17, %v10580_v62  ;;  %v13606_v57 = vld [vmem:[#allocation45_spill] sm:$0xff]  ;;  %v8228_v17 = vld [vmem:[%s8740_s13 + $0x310] sm:$0xff] }
 0x240   : > { %v7134_v14 = vpop.eup %7133  ;;  %7153 = vrcp.f32 %v3293_v59  ;;  %v3294_v12 = vadd.f32 1.0, %v7132_v29  ;;  %v1336_v59 = vadd.f32 %v13606_v57, %v10580_v62  ;;  %v10590_v29 = vpop.permute.xlu1 %1015 }
 0x241   : > { %v7136_v4 = vpop.eup %7135  ;;  %7155 = vrcp.f32 %v3292_v23  ;;  %v3299_v6 = vadd.f32 1.0, %v7134_v14  ;;  %13607 = vst [vmem:[#allocation42_spill] sm:$0xff] %v10590_v29  ;;  %v6132_v14 = vmul.f32 -1.442695, %v1334_v44 }
 0x242   : > { %v7138_v22 = vpop.eup %7137  ;;  %7157 = vrcp.f32 %v3294_v12  ;;  %v3301_v28 = vadd.f32 1.0, %v7136_v4  ;;  %v13608_v12 = vld [vmem:[#allocation46_spill] sm:$0xff]  ;;  %v6133_v26 = vmul.f32 -1.442695, %v1336_v59  ;;  %v10609_v59 = vpop.f32.mrb[99].mxu1 }
 0x243   : > { %v7140_v39 = vpop.eup %7139  ;;  %7159 = vrcp.f32 %v3299_v6  ;;  %v3300_v9 = vadd.f32 1.0, %v7138_v22  ;;  %v1593_v4 = vadd.f32 %v13608_v12, %v10580_v62  ;;  %v13609_v6 = vld [vmem:[#allocation47_spill] sm:$0xff]  ;;  %v4075_v62 = vld [vmem:[%s13119_s3] sm:$0xff] }
 0x244   : > { %v7142_v31 = vpop.eup %7141  ;;  %7161 = vrcp.f32 %v3301_v28  ;;  %v3302_v20 = vadd.f32 1.0, %v7140_v39  ;;  %v1340_v22 = vadd.f32 %v13609_v6, %v10590_v29  ;;  %v3917_v28 = vmul.f32 %v8228_v17, %v10562_v11  ;;  %v8229_v39 = vld [vmem:[%s8740_s13 + $0x350] sm:$0xff] }
 0x245   : > { %v7144_v23 = vpop.eup %7143  ;;  %7163 = vrcp.f32 %v3300_v9  ;;  %v6134_v9 = vmul.f32 -1.442695, %v1591_v41  ;;  %v3916_v52 = vmul.f32 %v8230_v63, %v7142_v31  ;;  %v10607_v41 = vpop.f32.mrb[99].mxu0 }
 0x246   : > { %v7146_v53 = vpop.eup %7145  ;;  %7165 = vrcp.f32 %v3302_v20 }
 0x247   : > { %v7148_v43 = vpop.eup %7147  ;;  %7167 = vpow2.f32 %v6127_v45  ;;  %v3925_v57 = vmul.f32 %v8229_v39, %v7146_v53  ;;  %v3918_v45 = vmul.f32 %v8232_v61, %v7144_v23  ;;  %v6135_v53 = vmul.f32 -1.442695, %v1593_v4 }
 0x248   : > { %v7150_v44 = vpop.eup %7149  ;;  %v3924_v12 = vmul.f32 %v8231_v33, %v7148_v43  ;;  %7169 = vpow2.f32 %v6132_v14  ;;  %v6140_v33 = vmul.f32 -1.442695, %v1340_v22  ;;  %v13610_v23 = vpack.c.bf16 %v10572_v50, %v10569_v0  ;;  %v10616_v14 = vpop.f32.mrb[100].mxu1  ;;  %v8234_v43 = vld [vmem:[%s8740_s13 + $0x380] sm:$0xff] }
 0x249   : > { %v7152_v20 = vpop.eup %7151  ;;  %v3926_v48 = vmul.f32 %v8233_v21, %v7150_v44  ;;  %v6710_v6 = vpack.c.bf16 %v3925_v57, %v3917_v28  ;;  %7171 = vpow2.f32 %v6134_v9  ;;  %v10623_v0 = vpop.f32.mrb[101].mxu1  ;;  %v3053_v57 = vadd.f32 1.0, %v10239_v24  ;;  %v8236_v44 = vld [vmem:[%s8740_s13 + $0x390] sm:$0xff]  ;;  %v8241_v24 = vld [vmem:[%s8740_s13 + $0x3d8] sm:$0xff] }
 0x24a   : > { %v7154_v11 = vpop.eup %7153  ;;  %v6660_v17 = vpack.c.bf16 %v3924_v12, %v3916_v52  ;;  %7173 = vpow2.f32 %v6133_v26  ;;  %v10614_v52 = vpop.f32.mrb[100].mxu0  ;;  %v3931_v22 = vmul.f32 %v8234_v43, %v7152_v20  ;;  %v8235_v26 = vld [vmem:[%s8740_s13 + $0x3c0] sm:$0xff]  ;;  %v8237_v9 = vld [vmem:[%s8740_s13 + $0x3d0] sm:$0xff]  ;;  %v3052_v20 = vadd.f32 1.0, %v10243_v37 }
 0x24b   : > { %v7156_v63 = vpop.eup %7155  ;;  %v6708_v31 = vpack.c.bf16 %v3926_v48, %v3918_v45  ;;  %v3051_v48 = vadd.f32 1.0, %v10235_v55  ;;  %7175 = vpow2.f32 %v6135_v53  ;;  %v10621_v39 = vpop.f32.mrb[101].mxu0  ;;  %v3933_v55 = vmul.f32 %v8236_v44, %v7154_v11 }
 0x24c   : > { %v7158_v61 = vpop.eup %7157  ;;  %6661 = vmatprep.subr.bf16.mxu0 %v6660_v17  ;;  %7177 = vpow2.f32 %v6140_v33  ;;  %v8239_v17 = vld [vmem:[%s8740_s13 + $0x3c8] sm:$0xff]  ;;  %v3054_v43 = vadd.f32 1.0, %v10247_v8  ;;  %v10634_v1 = vpop.f32.mrb[102].mxu0  ;;  %v3059_v37 = vadd.f32 1.0, %v10253_v40  ;;  %v3061_v8 = vadd.f32 1.0, %v10257_v58  ;;  %v13613_v40 = vld [vmem:[#allocation49_spill] sm:$0xff] }
 0x24d   : > { %v7160_v21 = vpop.eup %7159  ;;  %6709 = vmatprep.subr.bf16.mxu1 %v6708_v31  ;;  %6663 = vmatpush1.bf16.msra.mxu0 %v13610_v23  ;;  %v10636_v11 = vpop.f32.mrb[102].mxu1  ;;  %7179 = vrcp.f32 %v3051_v48  ;;  %v3060_v48 = vadd.f32 1.0, %v10513_v3  ;;  %v13616_v3 = vld [vmem:[#allocation9_spill] sm:$0xff] }
 0x24e   : > { %v7162_v4 = vpop.eup %7161  ;;  %6711 = vmatpush1.bf16.msra.mxu1 %v6710_v6  ;;  %v3939_v28 = vmul.f32 %v8235_v26, %v7160_v21  ;;  %v8238_v6 = vld [vmem:[%s8740_s13 + $0x388] sm:$0xff]  ;;  %v8240_v26 = vld [vmem:[%s8740_s13 + $0x398] sm:$0xff]  ;;  %7181 = vrcp.f32 %v3053_v57  ;;  %v10646_v44 = vpop.permute.xlu0 %1020 }
 0x24f   : > { %v7164_v50 = vpop.eup %7163  ;;  %v3941_v12 = vmul.f32 %v8237_v9, %v7162_v4  ;;  %v3932_v53 = vmul.f32 %v8238_v6, %v7156_v63  ;;  %v3934_v47 = vmul.f32 %v8240_v26, %v7158_v61  ;;  %v10639_v63 = vpop.f32.mrb[103].mxu0  ;;  %v13611_v61 = vld [vmem:[#allocation48_spill] sm:$0xff]  ;;  %13612 = vst [vmem:[#allocation43_spill] sm:$0xff] %v10646_v44  ;;  %7183 = vrcp.f32 %v3052_v20 }
 0x250   : > { %v7166_v45 = vpop.eup %7165  ;;  %v3940_v31 = vmul.f32 %v8239_v17, %v7164_v50  ;;  %v6666_v21 = vpack.c.bf16 %v3939_v28, %v3931_v22  ;;  %v10641_v50 = vpop.f32.mrb[103].mxu1  ;;  %v1597_v28 = vadd.f32 %v13611_v61, %v10590_v29  ;;  %v1342_v9 = vadd.f32 %v13613_v40, %v10590_v29  ;;  %v13621_v61 = vld [vmem:[#allocation54_spill] sm:$0xff]  ;;  %v13623_v40 = vld [vmem:[#allocation55_spill] sm:$0xff] }
 0x251   : > { %v7168_v23 = vpop.eup %7167  ;;  %v3942_v33 = vmul.f32 %v8241_v24, %v7166_v45  ;;  %v6714_v7 = vpack.c.bf16 %v3941_v12, %v3933_v55  ;;  %7185 = vrcp.f32 %v3054_v43  ;;  %v13614_v45 = vld [vmem:[#allocation50_spill] sm:$0xff]  ;;  %v10653_v58 = vpop.f32.mrb[104].mxu0 }
 0x252   : > { %v6664_v4 = vpack.c.bf16 %v3940_v31, %v3932_v53  ;;  %v7170_v22 = vpop.eup %7169  ;;  %v3062_v12 = vadd.f32 1.0, %v7168_v23  ;;  %v1599_v57 = vadd.f32 %v13614_v45, %v10590_v29  ;;  %7187 = vrcp.f32 %v3059_v37  ;;  %v13617_v23 = vld [vmem:[#allocation52_spill] sm:$0xff]  ;;  %v10660_v26 = vpop.permute.xlu1 %1025  ;;  %v13620_v37 = vld [vmem:[#allocation53_spill] sm:$0xff]  ;;  %v13641_v29 = vld [vmem:[#allocation23_spill] sm:$0xff] }
 0x253   : > { %v6712_v55 = vpack.c.bf16 %v3942_v33, %v3934_v47  ;;  %v7172_v6 = vpop.eup %7171  ;;  %v3067_v53 = vadd.f32 1.0, %v7170_v22  ;;  %v13615_v47 = vld [vmem:[#allocation51_spill] sm:$0xff]  ;;  %7189 = vrcp.f32 %v3061_v8  ;;  %v6142_v31 = vmul.f32 -1.442695, %v1597_v28  ;;  %13618 = vst [vmem:[#allocation44_spill] sm:$0xff] %v10660_v26 }
 0x254   : > { %6665 = vmatprep.subr.bf16.mxu0 %v6664_v4  ;;  %v1346_v20 = vadd.f32 %v13615_v47, %v10646_v44  ;;  %v7174_v17 = vpop.eup %7173  ;;  %v1603_v43 = vadd.f32 %v13617_v23, %v10646_v44  ;;  %7191 = vrcp.f32 %v3060_v48  ;;  %v6141_v33 = vmul.f32 -1.442695, %v1342_v9  ;;  %v13622_v28 = vld [vmem:[#allocation11_spill] sm:$0xff]  ;;  %v13624_v47 = vld [vmem:[#allocation12_spill] sm:$0xff]  ;;  %v13625_v48 = vld [vmem:[#allocation13_spill] sm:$0xff] }
 0x255   : > { %6713 = vmatprep.subr.bf16.mxu1 %v6712_v55  ;;  %6667 = vmatpush1.bf16.msra.mxu0 %v6666_v21  ;;  %v13619_v21 = vld [vmem:[#allocation10_spill] sm:$0xff]  ;;  %v7176_v24 = vpop.eup %7175  ;;  %v1348_v4 = vadd.f32 %v13620_v37, %v10646_v44  ;;  %7193 = vrcp.f32 %v3062_v12  ;;  %v1605_v8 = vadd.f32 %v13621_v61, %v10646_v44  ;;  %v1352_v45 = vadd.f32 %v13623_v40, %v10660_v26  ;;  %v13628_v37 = vld [vmem:[#allocation15_spill] sm:$0xff]  ;;  %v10706_v44 = vpop.f32.mrb[105].mxu0 }
 0x256   : > { %6715 = vmatpush1.bf16.msra.mxu1 %v6714_v7  ;;  %6669 = vmatprep.subr.bf16.mxu0 %v13616_v3  ;;  %v7178_v22 = vpop.eup %7177  ;;  %v6143_v7 = vmul.f32 -1.442695, %v1599_v57  ;;  %7195 = vrcp.f32 %v3067_v53  ;;  %v6148_v55 = vmul.f32 -1.442695, %v1346_v20  ;;  %v6150_v9 = vmul.f32 -1.442695, %v1603_v43 }
 0x257   : > { %6717 = vmatprep.subr.bf16.mxu1 %v13619_v21  ;;  %7197 = vpow2.f32 %v6142_v31  ;;  %v13626_v3 = vld [vmem:[#allocation56_spill] sm:$0xff]  ;;  %v13627_v57 = vld [vmem:[#allocation14_spill] sm:$0xff]  ;;  %v10675_v23 = vpop.eup %7179  ;;  %v6149_v21 = vmul.f32 -1.442695, %v1348_v4  ;;  %v6151_v20 = vmul.f32 -1.442695, %v1605_v8 }
 0x258   : > { %v1609_v12 = vadd.f32 %v13626_v3, %v10660_v26  ;;  %7199 = vpow2.f32 %v6141_v33  ;;  %v10677_v53 = vpop.eup %7181  ;;  %v6156_v31 = vmul.f32 -1.442695, %v1352_v45  ;;  %v13629_v43 = vld [vmem:[#allocation16_spill] sm:$0xff]  ;;  %v10686_v33 = vpop.permute.xlu0 %1030  ;;  %v13632_v4 = vld [vmem:[#allocation18_spill] sm:$0xff]  ;;  %v3069_v8 = vadd.f32 1.0, %v7172_v6  ;;  %v13636_v6 = vld [vmem:[#allocation59_spill] sm:$0xff] }
 0x259   : > { %6671 = vmatpush1.bf16.msra.mxu0 %v13622_v28  ;;  %7201 = vpow2.f32 %v6143_v7  ;;  %v10680_v61 = vpop.eup %7183  ;;  %v13630_v28 = vld [vmem:[#allocation17_spill] sm:$0xff]  ;;  %13631 = vst [vmem:[#allocation45_spill] sm:$0xff] %v10686_v33  ;;  %v10693_v45 = vpop.f32.mrb[104].mxu1  ;;  %v1360_v25 = vadd.f32 %v13649_v19, %v10686_v33  ;;  %v4082_v19 = vld [vmem:[%s13119_s3 + $0x38] sm:$0xff] }
 0x25a   : > { %6719 = vmatpush1.bf16.msra.mxu1 %v13624_v47  ;;  %6673 = vmatprep.subr.bf16.mxu0 %v13625_v48  ;;  %7203 = vpow2.f32 %v6148_v55  ;;  %v6158_v47 = vmul.f32 -1.442695, %v1609_v12  ;;  %v13633_v48 = vld [vmem:[#allocation57_spill] sm:$0xff] }
 0x25b   : > { %6721 = vmatprep.subr.bf16.mxu1 %v13627_v57  ;;  %v10684_v40 = vpop.eup %7185  ;;  %7205 = vpow2.f32 %v6150_v9  ;;  %v1354_v55 = vadd.f32 %v13633_v48, %v10660_v26  ;;  %v3068_v57 = vadd.f32 1.0, %v7174_v17  ;;  %v13634_v9 = vld [vmem:[#allocation58_spill] sm:$0xff]  ;;  %v13638_v48 = vld [vmem:[#allocation21_spill] sm:$0xff]  ;;  %v10708_v17 = vpop.f32.mrb[105].mxu1 }
 0x25c   : > { %v10689_v7 = vpop.eup %7187  ;;  %7207 = vpow2.f32 %v6149_v21  ;;  %v1611_v12 = vadd.f32 %v13634_v9, %v10660_v26  ;;  %v1358_v21 = vadd.f32 %v13636_v6, %v10686_v33  ;;  %v3075_v9 = vadd.f32 1.0, %v7178_v22 }
 0x25d   : > { %6675 = vmatpush1.bf16.msra.mxu0 %v13628_v37  ;;  %v10695_v3 = vpop.eup %7189  ;;  %7209 = vpow2.f32 %v6151_v20  ;;  %v13635_v37 = vld [vmem:[#allocation19_spill] sm:$0xff]  ;;  %v6157_v6 = vmul.f32 -1.442695, %v1354_v55  ;;  %v10727_v55 = vpop.f32.mrb[106].mxu1 }
 0x25e   : > { %6723 = vmatpush1.bf16.msra.mxu1 %v13629_v43  ;;  %6677 = vmatprep.subr.bf16.mxu0 %v13630_v28  ;;  %v10700_v43 = vpop.eup %7191  ;;  %v3070_v28 = vadd.f32 1.0, %v7176_v24  ;;  %7211 = vpow2.f32 %v6156_v31  ;;  %v13640_v24 = vld [vmem:[#allocation22_spill] sm:$0xff] }
 0x25f   : > { %6725 = vmatprep.subr.bf16.mxu1 %v13632_v4  ;;  %v13637_v4 = vld [vmem:[#allocation20_spill] sm:$0xff]  ;;  %v10710_v20 = vpop.eup %7193  ;;  %7213 = vpow2.f32 %v6158_v47  ;;  %v6164_v47 = vmul.f32 -1.442695, %v1358_v21 }
 0x260   : > { %v10715_v31 = vpop.eup %7195  ;;  %7215 = vrcp.f32 %v3069_v8  ;;  %v10725_v8 = vpop.f32.mrb[106].mxu0 }
 0x261   : > { %6679 = vmatpush1.bf16.msra.mxu0 %v13635_v37  ;;  %v13639_v37 = vld [vmem:[#allocation60_spill] sm:$0xff]  ;;  %7217 = vrcp.f32 %v3068_v57 }
 0x262   : > { %6727 = vmatpush1.bf16.msra.mxu1 %v13637_v4  ;;  %6681 = vmatprep.subr.bf16.mxu0 %v13638_v48  ;;  %v1615_v26 = vadd.f32 %v13639_v37, %v10686_v33  ;;  %v7198_v4 = vpop.eup %7197  ;;  %v6159_v48 = vmul.f32 -1.442695, %v1611_v12  ;;  %7219 = vrcp.f32 %v3070_v28  ;;  %v4078_v37 = vld [vmem:[%s13119_s3 + $0x18] sm:$0xff]  ;;  %v10729_v12 = vpop.f32.mrb[107].mxu0 }
 0x263   : > { %6729 = vmatprep.subr.bf16.mxu1 %v13640_v24  ;;  %v7200_v22 = vpop.eup %7199  ;;  %7221 = vrcp.f32 %v3075_v9  ;;  %v10731_v24 = vpop.f32.mrb[107].mxu1  ;;  %v3077_v28 = vadd.f32 1.0, %v7198_v4 }
 0x264   : > { %v7202_v57 = vpop.eup %7201  ;;  %13643 = vst [vmem:[#allocation46_spill] sm:$0xff] %v10731_v24  ;;  %7223 = vpow2.f32 %v6157_v6  ;;  %v3076_v21 = vadd.f32 1.0, %v7200_v22  ;;  %v4080_v6 = vld [vmem:[%s13119_s3 + $0x28] sm:$0xff]  ;;  %v10741_v4 = vpop.f32.mrb[108].mxu0 }
 0x265   : > { %6683 = vmatpush1.bf16.msra.mxu0 %v13641_v29  ;;  %v6166_v29 = vmul.f32 -1.442695, %v1615_v26  ;;  %v7204_v38 = vpop.eup %7203  ;;  %7225 = vpow2.f32 %v6159_v48  ;;  %v3078_v26 = vadd.f32 1.0, %v7202_v57  ;;  %13644 = vst [vmem:[#allocation47_spill] sm:$0xff] %v10741_v4  ;;  %v10745_v35 = vpop.f32.mrb[109].mxu0 }
 0x266   : > { %6731 = vmatpush1.bf16.msra.mxu1 %v13642_v27  ;;  %v7206_v27 = vpop.eup %7205  ;;  %7227 = vpow2.f32 %v6164_v47  ;;  %v3083_v48 = vadd.f32 1.0, %v7204_v38  ;;  %13646 = vst [vmem:[#allocation49_spill] sm:$0xff] %v10745_v35  ;;  %v10747_v57 = vpop.permute.xlu1 %1035  ;;  %v4079_v38 = vld [vmem:[%s13119_s3 + $0x20] sm:$0xff] }
 0x267   : > { %v7208_v9 = vpop.eup %7207  ;;  %7229 = vpow2.f32 %v6166_v29  ;;  %v3085_v42 = vadd.f32 1.0, %v7206_v27  ;;  %13647 = vst [vmem:[#allocation50_spill] sm:$0xff] %v10747_v57  ;;  %v13650_v27 = vld [vmem:[#allocation62_spill] sm:$0xff] }
 0x268   : > { %4508 = vmatmul.mubr.f32.vlgmr.msra.gmra.mrb[128].mxu0 %v4075_v62  ;;  %v7210_v22 = vpop.eup %7209  ;;  %7231 = vrcp.f32 %v3077_v28  ;;  %v3084_v34 = vadd.f32 1.0, %v7208_v9  ;;  %v1617_v56 = vadd.f32 %v13650_v27, %v10686_v33 }
 0x269   : > { %4669 = vmatmul.mubr.f32.vlgmr.msra.gmra.mrb[128].mxu1 %v4075_v62  ;;  %6373 = vmatprep.mubr.msk.f32.mxu0 %vm1158_vm0, %v4078_v37  ;;  %v10743_v62 = vpop.f32.mrb[108].mxu1  ;;  %v7212_v10 = vpop.eup %7211  ;;  %7233 = vrcp.f32 %v3076_v21  ;;  %v3086_v28 = vadd.f32 1.0, %v7210_v22 }
 0x26a   : > { %6389 = vmatprep.mubr.msk.f32.mxu1 %vm1158_vm0, %v4078_v37  ;;  %13645 = vst [vmem:[#allocation48_spill] sm:$0xff] %v10743_v62  ;;  %v10749_v47 = vpop.f32.mrb[109].mxu1  ;;  %v7214_v37 = vpop.eup %7213  ;;  %7235 = vrcp.f32 %v3078_v26  ;;  %v3091_v9 = vadd.f32 1.0, %v7212_v10  ;;  %v13658_v10 = vld [vmem:[#allocation65_spill] sm:$0xff] }
 0x26b   : > { %13648 = vst [vmem:[#allocation51_spill] sm:$0xff] %v10749_v47  ;;  %v10757_v29 = vpop.eup %7215  ;;  %7237 = vrcp.f32 %v3083_v48  ;;  %v13652_v47 = vld [vmem:[#allocation63_spill] sm:$0xff]  ;;  %v10771_v26 = vpop.f32.mrb[110].mxu1  ;;  %v3093_v27 = vadd.f32 1.0, %v7214_v37  ;;  %v6165_v48 = vmul.f32 -1.442695, %v1360_v25  ;;  %v1366_v4 = vadd.f32 %v13658_v10, %v10747_v57 }
 0x26c   : > { %4514 = vmatmul.mubr.f32.gmra.mrb[130].mxu0 %v4077_v30  ;;  %v10767_v21 = vpop.eup %7217  ;;  %v1364_v35 = vadd.f32 %v13652_v47, %v10747_v57  ;;  %13653 = vst [vmem:[#allocation52_spill] sm:$0xff] %v10771_v26  ;;  %7239 = vrcp.f32 %v3085_v42  ;;  %v10777_v62 = vpop.permute.xlu0 %1040  ;;  %v4081_v42 = vld [vmem:[%s13119_s3 + $0x30] sm:$0xff]  ;;  %v6167_v37 = vmul.f32 -1.442695, %v1617_v56  ;;  %v4084_v25 = vld [vmem:[%s13119_s3 + $0x48] sm:$0xff]  ;;  %v13661_v56 = vld [vmem:[#allocation68_spill] sm:$0xff] }
 0x26d   : > { %4675 = vmatmul.mubr.f32.gmra.mrb[130].mxu1 %v4077_v30  ;;  %6374 = vmatprep.mubr.msk.f32.mxu0 %vm1158_vm0, %v4080_v6  ;;  %v10765_v30 = vpop.f32.mrb[110].mxu0  ;;  %v10773_v22 = vpop.eup %7219  ;;  %13656 = vst [vmem:[#allocation53_spill] sm:$0xff] %v10777_v62  ;;  %7241 = vrcp.f32 %v3084_v34  ;;  %v13660_v10 = vld [vmem:[#allocation67_spill] sm:$0xff] }
 0x26e   : > { %6390 = vmatprep.mubr.msk.f32.mxu1 %vm1158_vm0, %v4080_v6  ;;  %13651 = vst [vmem:[#allocation9_spill] sm:$0xff] %v10765_v30  ;;  %13654 = vst [vmem:[#allocation10_spill] sm:$0xff] %v10773_v22  ;;  %v13655_v6 = vld [vmem:[#allocation64_spill] sm:$0xff]  ;;  %v10779_v30 = vpop.eup %7221  ;;  %7243 = vrcp.f32 %v3086_v28  ;;  %v1627_v28 = vadd.f32 %v13661_v56, %v10777_v62 }
 0x26f   : > { %v1621_v33 = vadd.f32 %v13655_v6, %v10747_v57  ;;  %13657 = vst [vmem:[#allocation54_spill] sm:$0xff] %v10779_v30  ;;  %v7224_v47 = vpop.eup %7223  ;;  %v13659_v6 = vld [vmem:[#allocation66_spill] sm:$0xff]  ;;  %7245 = vrcp.f32 %v3091_v9  ;;  %v1370_v30 = vadd.f32 %v13660_v10, %v10777_v62  ;;  %v10813_v10 = vpop.permute.xlu1 %1045 }
 0x270   : > { %4520 = vmatmul.mubr.f32.gmra.mrb[132].mxu0 %v4079_v38  ;;  %v1623_v26 = vadd.f32 %v13659_v6, %v10747_v57  ;;  %v7226_v34 = vpop.eup %7225  ;;  %7247 = vrcp.f32 %v3093_v27  ;;  %v13662_v57 = vld [vmem:[#allocation69_spill] sm:$0xff]  ;;  %13666 = vst [vmem:[#allocation13_spill] sm:$0xff] %v10813_v10 }
 0x271   : > { %4681 = vmatmul.mubr.f32.gmra.mrb[132].mxu1 %v4079_v38  ;;  %6375 = vmatprep.mubr.msk.f32.mxu0 %vm1158_vm0, %v4082_v19  ;;  %v6172_v38 = vmul.f32 -1.442695, %v1364_v35  ;;  %v7228_v22 = vpop.eup %7227  ;;  %v6174_v18 = vmul.f32 -1.442695, %v1621_v33  ;;  %7249 = vpow2.f32 %v6165_v48  ;;  %v1372_v24 = vadd.f32 %v13662_v57, %v10777_v62  ;;  %v4083_v35 = vld [vmem:[%s13119_s3 + $0x40] sm:$0xff] }
 0x272   : > { %6391 = vmatprep.mubr.msk.f32.mxu1 %vm1158_vm0, %v4082_v19  ;;  %v7230_v6 = vpop.eup %7229  ;;  %v6173_v19 = vmul.f32 -1.442695, %v1366_v4  ;;  %7251 = vpow2.f32 %v6167_v37  ;;  %v6175_v33 = vmul.f32 -1.442695, %v1623_v26  ;;  %v4086_v4 = vld [vmem:[%s13119_s3 + $0x58] sm:$0xff]  ;;  %v4085_v37 = vld [vmem:[%s13119_s3 + $0x50] sm:$0xff] }
 0x273   : > { %v10803_v9 = vpop.eup %7231  ;;  %7253 = vpow2.f32 %v6172_v38  ;;  %v6180_v57 = vmul.f32 -1.442695, %v1370_v30  ;;  %v6181_v26 = vmul.f32 -1.442695, %v1372_v24  ;;  %v3092_v30 = vadd.f32 1.0, %v7224_v47  ;;  %v4088_v24 = vld [vmem:[%s13119_s3 + $0x68] sm:$0xff] }
 0x274   : > { %4526 = vmatmul.mubr.f32.gmra.mrb[134].mxu0 %v4081_v42  ;;  %13663 = vst [vmem:[#allocation11_spill] sm:$0xff] %v10803_v9  ;;  %v10809_v27 = vpop.eup %7233  ;;  %7255 = vpow2.f32 %v6174_v18  ;;  %v13669_v18 = vld [vmem:[#allocation70_spill] sm:$0xff]  ;;  %v10835_v47 = vpop.f32.mrb[111].mxu1 }
 0x275   : > { %4687 = vmatmul.mubr.f32.gmra.mrb[134].mxu1 %v4081_v42  ;;  %6376 = vmatprep.mubr.msk.f32.mxu0 %vm1158_vm0, %v4084_v25  ;;  %13664 = vst [vmem:[#allocation55_spill] sm:$0xff] %v10809_v27  ;;  %v10811_v48 = vpop.eup %7235  ;;  %v6182_v42 = vmul.f32 -1.442695, %v1627_v28  ;;  %7257 = vpow2.f32 %v6173_v19  ;;  %v1629_v38 = vadd.f32 %v13669_v18, %v10777_v62  ;;  %v3094_v19 = vadd.f32 1.0, %v7226_v34  ;;  %13673 = vst [vmem:[#allocation17_spill] sm:$0xff] %v10835_v47  ;;  %v13677_v34 = vld [vmem:[#allocation73_spill] sm:$0xff] }
 0x276   : > { %6392 = vmatprep.mubr.msk.f32.mxu1 %vm1158_vm0, %v4084_v25  ;;  %13665 = vst [vmem:[#allocation12_spill] sm:$0xff] %v10811_v48  ;;  %v10815_v56 = vpop.eup %7237  ;;  %7259 = vpow2.f32 %v6175_v33  ;;  %v10833_v48 = vpop.f32.mrb[111].mxu0  ;;  %v3099_v18 = vadd.f32 1.0, %v7228_v22 }
 0x277   : > { %13667 = vst [vmem:[#allocation56_spill] sm:$0xff] %v10815_v56  ;;  %v10821_v25 = vpop.eup %7239  ;;  %7261 = vpow2.f32 %v6180_v57  ;;  %13672 = vst [vmem:[#allocation16_spill] sm:$0xff] %v10833_v48  ;;  %v1378_v57 = vadd.f32 %v13677_v34, %v10813_v10  ;;  %v10857_v34 = vpop.f32.mrb[112].mxu1 }
 0x278   : > { %4532 = vmatmul.mubr.f32.gmra.mrb[136].mxu0 %v4083_v35  ;;  %13668 = vst [vmem:[#allocation14_spill] sm:$0xff] %v10821_v25  ;;  %v10829_v28 = vpop.eup %7241  ;;  %7263 = vpow2.f32 %v6182_v42  ;;  %v6183_v42 = vmul.f32 -1.442695, %v1629_v38  ;;  %13680 = vst [vmem:[#allocation59_spill] sm:$0xff] %v10857_v34 }
 0x279   : > { %4693 = vmatmul.mubr.f32.gmra.mrb[136].mxu1 %v4083_v35  ;;  %6377 = vmatprep.mubr.msk.f32.mxu0 %vm1158_vm0, %v4086_v4  ;;  %13670 = vst [vmem:[#allocation15_spill] sm:$0xff] %v10829_v28  ;;  %v13671_v35 = vld [vmem:[#allocation71_spill] sm:$0xff]  ;;  %v10837_v33 = vpop.eup %7243  ;;  %v3101_v28 = vadd.f32 1.0, %v7230_v6  ;;  %7265 = vpow2.f32 %v6181_v26  ;;  %v4090_v6 = vld [vmem:[%s13119_s3 + $0x78] sm:$0xff] }
 0x27a   : > { %6393 = vmatprep.mubr.msk.f32.mxu1 %vm1158_vm0, %v4086_v4  ;;  %v1376_v56 = vadd.f32 %v13671_v35, %v10813_v10  ;;  %13674 = vst [vmem:[#allocation18_spill] sm:$0xff] %v10837_v33  ;;  %v13675_v4 = vld [vmem:[#allocation72_spill] sm:$0xff]  ;;  %v10841_v25 = vpop.eup %7245  ;;  %v4087_v35 = vld [vmem:[%s13119_s3 + $0x60] sm:$0xff]  ;;  %7267 = vrcp.f32 %v3092_v30  ;;  %v10861_v30 = vpop.f32.mrb[113].mxu1 }
 0x27b   : > { %v1633_v62 = vadd.f32 %v13675_v4, %v10813_v10  ;;  %13676 = vst [vmem:[#allocation57_spill] sm:$0xff] %v10841_v25  ;;  %v10849_v22 = vpop.eup %7247  ;;  %7269 = vrcp.f32 %v3094_v19  ;;  %13682 = vst [vmem:[#allocation21_spill] sm:$0xff] %v10861_v30 }
 0x27c   : > { %4538 = vmatmul.mubr.f32.gmra.mrb[138].mxu0 %v4085_v37  ;;  %13678 = vst [vmem:[#allocation58_spill] sm:$0xff] %v10849_v22  ;;  %v7250_v26 = vpop.eup %7249  ;;  %v6188_v4 = vmul.f32 -1.442695, %v1376_v56  ;;  %7271 = vrcp.f32 %v3099_v18  ;;  %v4089_v56 = vld [vmem:[%s13119_s3 + $0x70] sm:$0xff] }
 0x27d   : > { %4699 = vmatmul.mubr.f32.gmra.mrb[138].mxu1 %v4085_v37  ;;  %6378 = vmatprep.mubr.msk.f32.mxu0 %vm1158_vm0, %v4088_v24  ;;  %v10855_v37 = vpop.f32.mrb[112].mxu0  ;;  %v7252_v47 = vpop.eup %7251  ;;  %v6190_v48 = vmul.f32 -1.442695, %v1633_v62  ;;  %7273 = vrcp.f32 %v3101_v28  ;;  %v3100_v34 = vadd.f32 1.0, %v7250_v26  ;;  %v4092_v62 = vld [vmem:[%s13119_s3 + $0x88] sm:$0xff] }
 0x27e   : > { %6394 = vmatprep.mubr.msk.f32.mxu1 %vm1158_vm0, %v4088_v24  ;;  %13679 = vst [vmem:[#allocation19_spill] sm:$0xff] %v10855_v37  ;;  %v10859_v22 = vpop.f32.mrb[113].mxu0  ;;  %v7254_v38 = vpop.eup %7253  ;;  %v6189_v24 = vmul.f32 -1.442695, %v1378_v57  ;;  %7275 = vpow2.f32 %v6183_v42  ;;  %v3102_v30 = vadd.f32 1.0, %v7252_v47  ;;  %v4091_v47 = vld [vmem:[%s13119_s3 + $0x80] sm:$0xff] }
 0x27f   : > { %13681 = vst [vmem:[#allocation20_spill] sm:$0xff] %v10859_v22  ;;  %v7256_v19 = vpop.eup %7255  ;;  %7277 = vpow2.f32 %v6188_v4  ;;  %v10871_v28 = vpop.f32.mrb[114].mxu0 }
 0x280   : > { %4544 = vmatmul.mubr.f32.gmra.mrb[140].mxu0 %v4087_v35  ;;  %v7258_v18 = vpop.eup %7257  ;;  %13683 = vst [vmem:[#allocation60_spill] sm:$0xff] %v10871_v28  ;;  %7279 = vpow2.f32 %v6190_v48  ;;  %v10873_v22 = vpop.f32.mrb[114].mxu1  ;;  %v3109_v26 = vadd.f32 1.0, %v7256_v19 }
 0x281   : > { %4705 = vmatmul.mubr.f32.gmra.mrb[140].mxu1 %v4087_v35  ;;  %6379 = vmatprep.mubr.msk.f32.mxu0 %vm1158_vm0, %v4090_v6  ;;  %v7260_v57 = vpop.eup %7259  ;;  %v3107_v35 = vadd.f32 1.0, %v7254_v38  ;;  %13684 = vst [vmem:[#allocation22_spill] sm:$0xff] %v10873_v22  ;;  %v10875_v37 = vpop.f32.mrb[115].mxu0  ;;  %7281 = vpow2.f32 %v6189_v24  ;;  %v3108_v38 = vadd.f32 1.0, %v7258_v18  ;;  %v4094_v24 = vld [vmem:[%s13119_s3 + $0x98] sm:$0xff] }
 0x282   : > { %6395 = vmatprep.mubr.msk.f32.mxu1 %vm1158_vm0, %v4090_v6  ;;  %13685 = vst [vmem:[#allocation23_spill] sm:$0xff] %v10875_v37  ;;  %v7262_v42 = vpop.eup %7261  ;;  %v10877_v6 = vpop.permute.xlu0 %1050  ;;  %7283 = vrcp.f32 %v3100_v34  ;;  %v13688_v37 = vld [vmem:[#allocation74_spill] sm:$0xff]  ;;  %v13691_v34 = vld [vmem:[#allocation75_spill] sm:$0xff] }
 0x283   : > { %13686 = vst [vmem:[#allocation24_spill] sm:$0xff] %v10877_v6  ;;  %v10883_v4 = vpop.f32.mrb[115].mxu1  ;;  %v7264_v48 = vpop.eup %7263  ;;  %7285 = vrcp.f32 %v3102_v30  ;;  %v1635_v22 = vadd.f32 %v13688_v37, %v10813_v10  ;;  %v1382_v18 = vadd.f32 %v13691_v34, %v10877_v6  ;;  %v13695_v37 = vld [vmem:[#allocation76_spill] sm:$0xff] }
 0x284   : > { %4550 = vmatmul.mubr.f32.gmra.mrb[142].mxu0 %v4089_v56  ;;  %13687 = vst [vmem:[#allocation61_spill] sm:$0xff] %v10883_v4  ;;  %v7266_v19 = vpop.eup %7265  ;;  %v10891_v28 = vpop.f32.mrb[116].mxu0  ;;  %7287 = vrcp.f32 %v3107_v35  ;;  %v3115_v4 = vadd.f32 1.0, %v7262_v42  ;;  %v3117_v30 = vadd.f32 1.0, %v7264_v48  ;;  %v4093_v35 = vld [vmem:[%s13119_s3 + $0x90] sm:$0xff]  ;;  %v4096_v48 = vld [vmem:[%s13119_s3 + $0xa8] sm:$0xff] }
 0x285   : > { %4711 = vmatmul.mubr.f32.gmra.mrb[142].mxu1 %v4089_v56  ;;  %6380 = vmatprep.mubr.msk.f32.mxu0 %vm1158_vm0, %v4092_v62  ;;  %v3110_v56 = vadd.f32 1.0, %v7260_v57  ;;  %13689 = vst [vmem:[#allocation62_spill] sm:$0xff] %v10891_v28  ;;  %v10893_v25 = vpop.eup %7267  ;;  %v10899_v33 = vpop.f32.mrb[117].mxu0  ;;  %7289 = vrcp.f32 %v3109_v26  ;;  %v1639_v57 = vadd.f32 %v13695_v37, %v10877_v6  ;;  %v3116_v34 = vadd.f32 1.0, %v7266_v19  ;;  %v13701_v19 = vld [vmem:[#allocation79_spill] sm:$0xff] }
 0x286   : > { %6396 = vmatprep.mubr.msk.f32.mxu1 %vm1158_vm0, %v4092_v62  ;;  %13690 = vst [vmem:[#allocation63_spill] sm:$0xff] %v10893_v25  ;;  %v10897_v62 = vpop.f32.mrb[116].mxu1  ;;  %13693 = vst [vmem:[#allocation65_spill] sm:$0xff] %v10899_v33  ;;  %v10901_v27 = vpop.eup %7269  ;;  %7291 = vrcp.f32 %v3108_v38  ;;  %v13698_v33 = vld [vmem:[#allocation77_spill] sm:$0xff]  ;;  %v6191_v37 = vmul.f32 -1.442695, %v1635_v22 }
 0x287   : > { %13692 = vst [vmem:[#allocation64_spill] sm:$0xff] %v10897_v62  ;;  %13694 = vst [vmem:[#allocation66_spill] sm:$0xff] %v10901_v27  ;;  %v10905_v10 = vpop.permute.xlu1 %1055  ;;  %v10911_v42 = vpop.eup %7271  ;;  %v1384_v26 = vadd.f32 %v13698_v33, %v10877_v6  ;;  %7293 = vrcp.f32 %v3110_v56  ;;  %v13700_v62 = vld [vmem:[#allocation78_spill] sm:$0xff]  ;;  %v6196_v38 = vmul.f32 -1.442695, %v1382_v18  ;;  %v13702_v25 = vld [vmem:[#allocation80_spill] sm:$0xff] }
 0x288   : > { %4556 = vmatmul.mubr.f32.gmra.mrb[144].mxu0 %v4091_v47  ;;  %13696 = vst [vmem:[#allocation67_spill] sm:$0xff] %v10905_v10  ;;  %13697 = vst [vmem:[#allocation68_spill] sm:$0xff] %v10911_v42  ;;  %v1641_v28 = vadd.f32 %v13700_v62, %v10877_v6  ;;  %7295 = vrcp.f32 %v3115_v4  ;;  %v1388_v42 = vadd.f32 %v13701_v19, %v10905_v10  ;;  %v4095_v22 = vld [vmem:[%s13119_s3 + $0xa0] sm:$0xff] }
 0x289   : > { %4717 = vmatmul.mubr.f32.gmra.mrb[144].mxu1 %v4091_v47  ;;  %6381 = vmatprep.mubr.msk.f32.mxu0 %vm1158_vm0, %v4094_v24  ;;  %v10919_v47 = vpop.eup %7273  ;;  %7297 = vrcp.f32 %v3117_v30  ;;  %v1645_v9 = vadd.f32 %v13702_v25, %v10905_v10  ;;  %v6197_v4 = vmul.f32 -1.442695, %v1384_v26  ;;  %v13703_v18 = vld [vmem:[#allocation81_spill] sm:$0xff]  ;;  %v4098_v30 = vld [vmem:[%s13119_s3 + $0xb8] sm:$0xff] }
 0x28a   : > { %6397 = vmatprep.mubr.msk.f32.mxu1 %vm1158_vm0, %v4094_v24  ;;  %13699 = vst [vmem:[#allocation69_spill] sm:$0xff] %v10919_v47  ;;  %v7276_v27 = vpop.eup %7275  ;;  %v6198_v24 = vmul.f32 -1.442695, %v1639_v57  ;;  %7299 = vrcp.f32 %v3116_v34  ;;  %v1390_v62 = vadd.f32 %v13703_v18, %v10905_v10  ;;  %v6199_v57 = vmul.f32 -1.442695, %v1641_v28  ;;  %v4097_v28 = vld [vmem:[%s13119_s3 + $0xb0] sm:$0xff] }
 0x28b   : > { %v7278_v33 = vpop.eup %7277  ;;  %7301 = vpow2.f32 %v6191_v37  ;;  %v6204_v6 = vmul.f32 -1.442695, %v1388_v42  ;;  %v6206_v26 = vmul.f32 -1.442695, %v1645_v9  ;;  %v13709_v42 = vld [vmem:[#allocation83_spill] sm:$0xff]  ;;  %v4100_v9 = vld [vmem:[%s13119_s3 + $0xc8] sm:$0xff] }
 0x28c   : > { %4562 = vmatmul.mubr.f32.gmra.mrb[146].mxu0 %v4093_v35  ;;  %v7280_v56 = vpop.eup %7279  ;;  %7303 = vpow2.f32 %v6196_v38  ;;  %v6205_v38 = vmul.f32 -1.442695, %v1390_v62  ;;  %v10963_v62 = vpop.f32.mrb[117].mxu1 }
 0x28d   : > { %4723 = vmatmul.mubr.f32.gmra.mrb[146].mxu1 %v4093_v35  ;;  %6382 = vmatprep.mubr.msk.f32.mxu0 %vm1158_vm0, %v4096_v48  ;;  %v7282_v25 = vpop.eup %7281  ;;  %v10937_v35 = vpop.permute.xlu0 %1060  ;;  %7305 = vpow2.f32 %v6198_v24  ;;  %13713 = vst [vmem:[#allocation76_spill] sm:$0xff] %v10963_v62  ;;  %v13718_v62 = vld [vmem:[#allocation86_spill] sm:$0xff] }
 0x28e   : > { %6398 = vmatprep.mubr.msk.f32.mxu1 %vm1158_vm0, %v4096_v48  ;;  %13704 = vst [vmem:[#allocation70_spill] sm:$0xff] %v10937_v35  ;;  %v10939_v19 = vpop.eup %7283  ;;  %v13707_v48 = vld [vmem:[#allocation82_spill] sm:$0xff]  ;;  %7307 = vpow2.f32 %v6197_v4  ;;  %v3123_v4 = vadd.f32 1.0, %v7278_v33 }
 0x28f   : > { %13705 = vst [vmem:[#allocation71_spill] sm:$0xff] %v10939_v19  ;;  %v10941_v34 = vpop.eup %7285  ;;  %v1647_v18 = vadd.f32 %v13707_v48, %v10905_v10  ;;  %v1394_v19 = vadd.f32 %v13709_v42, %v10937_v35  ;;  %7309 = vpow2.f32 %v6199_v57  ;;  %v13711_v48 = vld [vmem:[#allocation84_spill] sm:$0xff] }
 0x290   : > { %4568 = vmatmul.mubr.f32.gmra.mrb[148].mxu0 %v4095_v22  ;;  %13706 = vst [vmem:[#allocation72_spill] sm:$0xff] %v10941_v34  ;;  %v10949_v37 = vpop.eup %7287  ;;  %v1651_v10 = vadd.f32 %v13711_v48, %v10937_v35  ;;  %7311 = vpow2.f32 %v6204_v6  ;;  %v13716_v6 = vld [vmem:[#allocation85_spill] sm:$0xff] }
 0x291   : > { %4729 = vmatmul.mubr.f32.gmra.mrb[148].mxu1 %v4095_v22  ;;  %6383 = vmatprep.mubr.msk.f32.mxu0 %vm1158_vm0, %v4098_v30  ;;  %13708 = vst [vmem:[#allocation73_spill] sm:$0xff] %v10949_v37  ;;  %v10957_v24 = vpop.eup %7289  ;;  %v3118_v22 = vadd.f32 1.0, %v7276_v27  ;;  %7313 = vpow2.f32 %v6206_v26  ;;  %v4099_v27 = vld [vmem:[%s13119_s3 + $0xc0] sm:$0xff]  ;;  %v6212_v48 = vmul.f32 -1.442695, %v1394_v19  ;;  %v1396_v33 = vadd.f32 %v13716_v6, %v10937_v35  ;;  %v4102_v26 = vld [vmem:[%s13119_s3 + $0xd8] sm:$0xff] }
 0x292   : > { %6399 = vmatprep.mubr.msk.f32.mxu1 %vm1158_vm0, %v4098_v30  ;;  %13710 = vst [vmem:[#allocation74_spill] sm:$0xff] %v10957_v24  ;;  %v10961_v34 = vpop.eup %7291  ;;  %v6207_v30 = vmul.f32 -1.442695, %v1647_v18  ;;  %7315 = vpow2.f32 %v6205_v38  ;;  %v3125_v19 = vadd.f32 1.0, %v7280_v56  ;;  %v10985_v38 = vpop.f32.mrb[118].mxu0 }
 0x293   : > { %13712 = vst [vmem:[#allocation75_spill] sm:$0xff] %v10961_v34  ;;  %v10965_v42 = vpop.eup %7293  ;;  %7317 = vrcp.f32 %v3118_v22  ;;  %13720 = vst [vmem:[#allocation81_spill] sm:$0xff] %v10985_v38  ;;  %v10987_v6 = vpop.f32.mrb[118].mxu1 }
 0x294   : > { %4574 = vmatmul.mubr.f32.gmra.mrb[150].mxu0 %v4097_v28  ;;  %13714 = vst [vmem:[#allocation77_spill] sm:$0xff] %v10965_v42  ;;  %v10971_v57 = vpop.eup %7295  ;;  %v1653_v42 = vadd.f32 %v13718_v62, %v10937_v35  ;;  %7319 = vrcp.f32 %v3123_v4  ;;  %13721 = vst [vmem:[#allocation82_spill] sm:$0xff] %v10987_v6  ;;  %v10993_v22 = vpop.f32.mrb[119].mxu0  ;;  %v6213_v4 = vmul.f32 -1.442695, %v1396_v33  ;;  %v4103_v33 = vld [vmem:[%s13119_s3 + $0xe0] sm:$0xff] }
 0x295   : > { %4735 = vmatmul.mubr.f32.gmra.mrb[150].mxu1 %v4097_v28  ;;  %6384 = vmatprep.mubr.msk.f32.mxu0 %vm1158_vm0, %v4100_v9  ;;  %13715 = vst [vmem:[#allocation78_spill] sm:$0xff] %v10971_v57  ;;  %v10979_v18 = vpop.eup %7297  ;;  %v6214_v28 = vmul.f32 -1.442695, %v1651_v10  ;;  %v3124_v57 = vadd.f32 1.0, %v7282_v25  ;;  %7321 = vpow2.f32 %v6207_v30  ;;  %v4101_v10 = vld [vmem:[%s13119_s3 + $0xd0] sm:$0xff]  ;;  %13722 = vst [vmem:[#allocation83_spill] sm:$0xff] %v10993_v22  ;;  %v11001_v38 = vpop.permute.xlu1 %1065 }
 0x296   : > { %6400 = vmatprep.mubr.msk.f32.mxu1 %vm1158_vm0, %v4100_v9  ;;  %13717 = vst [vmem:[#allocation79_spill] sm:$0xff] %v10979_v18  ;;  %v10983_v34 = vpop.eup %7299  ;;  %v10995_v62 = vpop.f32.mrb[119].mxu1  ;;  %7323 = vpow2.f32 %v6212_v48  ;;  %v4104_v25 = vld [vmem:[%s13119_s3 + $0xe8] sm:$0xff]  ;;  %13724 = vst [vmem:[#allocation85_spill] sm:$0xff] %v11001_v38  ;;  %v13732_v18 = vld [vmem:[#allocation88_spill] sm:$0xff] }
 0x297   : > { %13719 = vst [vmem:[#allocation80_spill] sm:$0xff] %v10983_v34  ;;  %v7302_v9 = vpop.eup %7301  ;;  %13723 = vst [vmem:[#allocation84_spill] sm:$0xff] %v10995_v62  ;;  %7325 = vpow2.f32 %v6214_v28  ;;  %v11003_v22 = vpop.f32.mrb[120].mxu0  ;;  %v1657_v24 = vadd.f32 %v13732_v18, %v11001_v38 }
 0x298   : > { %4580 = vmatmul.mubr.f32.gmra.mrb[152].mxu0 %v4099_v27  ;;  %v7304_v56 = vpop.eup %7303  ;;  %7327 = vrcp.f32 %v3125_v19  ;;  %v3126_v6 = vadd.f32 1.0, %v7302_v9  ;;  %13725 = vst [vmem:[#allocation86_spill] sm:$0xff] %v11003_v22 }
 0x299   : > { %4741 = vmatmul.mubr.f32.gmra.mrb[152].mxu1 %v4099_v27  ;;  %6385 = vmatprep.mubr.msk.f32.mxu0 %vm1158_vm0, %v4102_v26  ;;  %v7306_v30 = vpop.eup %7305  ;;  %v6215_v27 = vmul.f32 -1.442695, %v1653_v42  ;;  %7329 = vrcp.f32 %v3124_v57  ;;  %v3131_v48 = vadd.f32 1.0, %v7304_v56  ;;  %v11011_v42 = vpop.f32.mrb[121].mxu0  ;;  %v4106_v57 = vld [vmem:[%s13119_s3 + $0xf8] sm:$0xff] }
 0x29a   : > { %6401 = vmatprep.mubr.msk.f32.mxu1 %vm1158_vm0, %v4102_v26  ;;  %v7308_v35 = vpop.eup %7307  ;;  %v11009_v26 = vpop.f32.mrb[120].mxu1  ;;  %13727 = vst [vmem:[#allocation176_spill] sm:$0xff] %v11011_v42  ;;  %v3133_v19 = vadd.f32 1.0, %v7306_v30  ;;  %7331 = vpow2.f32 %v6213_v4 }
 0x29b   : > { %v7310_v62 = vpop.eup %7309  ;;  %13726 = vst [vmem:[#allocation175_spill] sm:$0xff] %v11009_v26  ;;  %v11017_v9 = vpop.f32.mrb[121].mxu1  ;;  %v3132_v56 = vadd.f32 1.0, %v7308_v35  ;;  %7333 = vpow2.f32 %v6215_v27  ;;  %v13729_v26 = vld [vmem:[#allocation87_spill] sm:$0xff] }
 0x29c   : > { %4586 = vmatmul.mubr.f32.gmra.mrb[154].mxu0 %v4101_v10  ;;  %v7312_v28 = vpop.eup %7311  ;;  %13728 = vst [vmem:[#allocation177_spill] sm:$0xff] %v11017_v9  ;;  %7335 = vrcp.f32 %v3126_v6  ;;  %v3134_v34 = vadd.f32 1.0, %v7310_v62  ;;  %v1400_v42 = vadd.f32 %v13729_v26, %v11001_v38  ;;  %v11021_v30 = vpop.f32.mrb[122].mxu0  ;;  %v4105_v35 = vld [vmem:[%s13119_s3 + $0xf0] sm:$0xff] }
 0x29d   : > { %4747 = vmatmul.mubr.f32.gmra.mrb[154].mxu1 %v4101_v10  ;;  %6386 = vmatprep.mubr.msk.f32.mxu0 %vm1158_vm0, %v4104_v25  ;;  %v7314_v10 = vpop.eup %7313  ;;  %13730 = vst [vmem:[#allocation87_spill] sm:$0xff] %v11021_v30  ;;  %7337 = vrcp.f32 %v3131_v48  ;;  %v11031_v6 = vpop.f32.mrb[122].mxu1 }
 0x29e   : > { %6402 = vmatprep.mubr.msk.f32.mxu1 %vm1158_vm0, %v4104_v25  ;;  %v7316_v22 = vpop.eup %7315  ;;  %v3139_v25 = vadd.f32 1.0, %v7312_v28  ;;  %13733 = vst [vmem:[#allocation88_spill] sm:$0xff] %v11031_v6  ;;  %v11033_v62 = vpop.f32.mrb[123].mxu0  ;;  %7339 = vrcp.f32 %v3133_v19  ;;  %v3141_v26 = vadd.f32 1.0, %v7314_v10  ;;  %v6220_v9 = vmul.f32 -1.442695, %v1400_v42 }
 0x29f   : > { %v11023_v4 = vpop.eup %7317  ;;  %13734 = vst [vmem:[#allocation179_spill] sm:$0xff] %v11033_v62  ;;  %v11038_v48 = vpop.f32.mrb[123].mxu1  ;;  %7341 = vrcp.f32 %v3132_v56  ;;  %v6222_v62 = vmul.f32 -1.442695, %v1657_v24  ;;  %v13740_v42 = vld [vmem:[#allocation90_spill] sm:$0xff] }
 0x2a0   : > { %4592 = vmatmul.mubr.f32.gmra.mrb[156].mxu0 %v4103_v33  ;;  %13731 = vst [vmem:[#allocation178_spill] sm:$0xff] %v11023_v4  ;;  %v11035_v27 = vpop.eup %7319  ;;  %13736 = vst [vmem:[#allocation181_spill] sm:$0xff] %v11038_v48  ;;  %7343 = vrcp.f32 %v3134_v34  ;;  %v11040_v30 = vpop.permute.xlu0 %1070  ;;  %v1659_v10 = vadd.f32 %v13740_v42, %v11001_v38  ;;  %v13743_v4 = vld [vmem:[#allocation92_spill] sm:$0xff] }
 0x2a1   : > { %4753 = vmatmul.mubr.f32.gmra.mrb[156].mxu1 %v4103_v33  ;;  %6387 = vmatprep.mubr.msk.f32.mxu0 %vm1158_vm0, %v4106_v57  ;;  %13735 = vst [vmem:[#allocation180_spill] sm:$0xff] %v11035_v27  ;;  %v7322_v18 = vpop.eup %7321  ;;  %v3140_v33 = vadd.f32 1.0, %v7316_v22  ;;  %13737 = vst [vmem:[#allocation182_spill] sm:$0xff] %v11040_v30  ;;  %7345 = vrcp.f32 %v3139_v25  ;;  %v13738_v27 = vld [vmem:[#allocation89_spill] sm:$0xff]  ;;  %v13742_v25 = vld [vmem:[#allocation91_spill] sm:$0xff] }
 0x2a2   : > { %6403 = vmatprep.mubr.msk.f32.mxu1 %vm1158_vm0, %v4106_v57  ;;  %v7324_v28 = vpop.eup %7323  ;;  %v1402_v19 = vadd.f32 %v13738_v27, %v11001_v38  ;;  %v8242_v57 = vld [vmem:[%s13119_s3 + $0x8] sm:$0xff]  ;;  %7347 = vrcp.f32 %v3141_v26  ;;  %v3142_v34 = vadd.f32 1.0, %v7322_v18  ;;  %v11059_v26 = vpop.permute.xlu1 %1075 }
 0x2a3   : > { %v7326_v6 = vpop.eup %7325  ;;  %7349 = vrcp.f32 %v3140_v33  ;;  %v3147_v56 = vadd.f32 1.0, %v7324_v28  ;;  %13744 = vst [vmem:[#allocation91_spill] sm:$0xff] %v11059_v26  ;;  %v6223_v33 = vmul.f32 -1.442695, %v1659_v10  ;;  %v13747_v28 = vld [vmem:[#allocation94_spill] sm:$0xff]  ;;  %v13753_v10 = vld [vmem:[#allocation97_spill] sm:$0xff] }
 0x2a4   : > { %4598 = vmatmul.mubr.f32.gmra.mrb[158].mxu0 %v4105_v35  ;;  %v11048_v22 = vpop.eup %7327  ;;  %v3149_v48 = vadd.f32 1.0, %v7326_v6  ;;  %7351 = vpow2.f32 %v6220_v9  ;;  %v6221_v42 = vmul.f32 -1.442695, %v1402_v19  ;;  %v13751_v19 = vld [vmem:[#allocation96_spill] sm:$0xff] }
 0x2a5   : > { %4759 = vmatmul.mubr.f32.gmra.mrb[158].mxu1 %v4105_v35  ;;  %6404 = vmatprep.mubr.msk.f32.mxu0 %vm1158_vm0, %v8242_v57  ;;  %13739 = vst [vmem:[#allocation89_spill] sm:$0xff] %v11048_v22  ;;  %v11053_v24 = vpop.eup %7329  ;;  %v1406_v35 = vadd.f32 %v13742_v25, %v11040_v30  ;;  %v1663_v22 = vadd.f32 %v13743_v4, %v11040_v30  ;;  %7353 = vpow2.f32 %v6222_v62  ;;  %v13749_v4 = vld [vmem:[#allocation95_spill] sm:$0xff] }
 0x2a6   : > { %6420 = vmatprep.mubr.msk.f32.mxu1 %vm1158_vm0, %v8242_v57  ;;  %13741 = vst [vmem:[#allocation90_spill] sm:$0xff] %v11053_v24  ;;  %v7332_v27 = vpop.eup %7331  ;;  %v13745_v57 = vld [vmem:[#allocation93_spill] sm:$0xff]  ;;  %7355 = vrcp.f32 %v3142_v34  ;;  %v1665_v25 = vadd.f32 %v13747_v28, %v11040_v30  ;;  %v1412_v37 = vadd.f32 %v13749_v4, %v11059_v26  ;;  %v1414_v28 = vadd.f32 %v13753_v10, %v11059_v26  ;;  %v11089_v10 = vpop.f32.mrb[124].mxu0 }
 0x2a7   : > { %v7334_v18 = vpop.eup %7333  ;;  %v1408_v38 = vadd.f32 %v13745_v57, %v11040_v30  ;;  %7357 = vrcp.f32 %v3147_v56  ;;  %v6228_v9 = vmul.f32 -1.442695, %v1406_v35  ;;  %v6230_v62 = vmul.f32 -1.442695, %v1663_v22  ;;  %v13755_v35 = vld [vmem:[#allocation98_spill] sm:$0xff]  ;;  %13759 = vst [vmem:[#allocation184_spill] sm:$0xff] %v11089_v10 }
 0x2a8   : > { %v11063_v24 = vpop.eup %7335  ;;  %7359 = vrcp.f32 %v3149_v48  ;;  %v1669_v57 = vadd.f32 %v13751_v19, %v11059_v26  ;;  %v6231_v56 = vmul.f32 -1.442695, %v1665_v25  ;;  %v1671_v4 = vadd.f32 %v13755_v35, %v11059_v26  ;;  %v11093_v35 = vpop.f32.mrb[125].mxu0 }
 0x2a9   : > { %13746 = vst [vmem:[#allocation92_spill] sm:$0xff] %v11063_v24  ;;  %v11067_v6 = vpop.eup %7337  ;;  %7361 = vpow2.f32 %v6221_v42  ;;  %v6229_v34 = vmul.f32 -1.442695, %v1408_v38  ;;  %v6236_v48 = vmul.f32 -1.442695, %v1412_v37  ;;  %13761 = vst [vmem:[#allocation186_spill] sm:$0xff] %v11093_v35 }
 0x2aa   : > { %13748 = vst [vmem:[#allocation93_spill] sm:$0xff] %v11067_v6  ;;  %v11071_v47 = vpop.eup %7339  ;;  %7363 = vpow2.f32 %v6223_v33  ;;  %v6238_v19 = vmul.f32 -1.442695, %v1669_v57  ;;  %v6237_v38 = vmul.f32 -1.442695, %v1414_v28  ;;  %v2189_v28 = vadd.f32 %v10566_v46, %v10027_v2  ;;  %v8271_v6 = vld [vmem:[%s8740_s13 + $0x1a8] sm:$0xff] }
 0x2ab   : > { %13750 = vst [vmem:[#allocation94_spill] sm:$0xff] %v11071_v47  ;;  %v11075_v24 = vpop.eup %7341  ;;  %7365 = vpow2.f32 %v6228_v9  ;;  %v6239_v25 = vmul.f32 -1.442695, %v1671_v4  ;;  %v3148_v9 = vadd.f32 1.0, %v7332_v27  ;;  %v1934_v4 = vadd.f32 %v10574_v60, %v10027_v2 }
 0x2ac   : > { %13752 = vst [vmem:[#allocation95_spill] sm:$0xff] %v11075_v24  ;;  %v11079_v30 = vpop.eup %7343  ;;  %7367 = vpow2.f32 %v6230_v62  ;;  %v1932_v62 = vadd.f32 %v10564_v32, %v10027_v2 }
 0x2ad   : > { %13754 = vst [vmem:[#allocation96_spill] sm:$0xff] %v11079_v30  ;;  %v11083_v47 = vpop.eup %7345  ;;  %7369 = vpow2.f32 %v6229_v34  ;;  %v11091_v30 = vpop.f32.mrb[124].mxu1  ;;  %v3150_v34 = vadd.f32 1.0, %v7334_v18  ;;  %v6249_v60 = vmul.f32 -1.442695, %v1934_v4 }
 0x2ae   : > { %13756 = vst [vmem:[#allocation97_spill] sm:$0xff] %v11083_v47  ;;  %v11085_v22 = vpop.eup %7347  ;;  %13760 = vst [vmem:[#allocation185_spill] sm:$0xff] %v11091_v30  ;;  %7371 = vpow2.f32 %v6231_v56  ;;  %v11095_v26 = vpop.f32.mrb[125].mxu1  ;;  %v6248_v46 = vmul.f32 -1.442695, %v1932_v62 }
 0x2af   : > { %13757 = vst [vmem:[#allocation98_spill] sm:$0xff] %v11085_v22  ;;  %v11087_v42 = vpop.eup %7349  ;;  %13762 = vst [vmem:[#allocation187_spill] sm:$0xff] %v11095_v26  ;;  %7373 = vpow2.f32 %v6236_v48  ;;  %v11107_v26 = vpop.f32.mrb[126].mxu0 }
 0x2b0   : > { %13758 = vst [vmem:[#allocation183_spill] sm:$0xff] %v11087_v42  ;;  %v7352_v33 = vpop.eup %7351  ;;  %7375 = vpow2.f32 %v6238_v19  ;;  %13765 = vst [vmem:[#allocation190_spill] sm:$0xff] %v11107_v26  ;;  %v11111_v32 = vpop.f32.mrb[126].mxu1 }
 0x2b1   : > { %v7354_v37 = vpop.eup %7353  ;;  %v3155_v56 = vadd.f32 1.0, %v7352_v33  ;;  %7377 = vpow2.f32 %v6237_v38  ;;  %13767 = vst [vmem:[#allocation192_spill] sm:$0xff] %v11111_v32  ;;  %v11113_v18 = vpop.f32.mrb[127].mxu0  ;;  %v6250_v38 = vmul.f32 -1.442695, %v2189_v28 }
 0x2b2   : > { %v11099_v57 = vpop.eup %7355  ;;  %v3157_v48 = vadd.f32 1.0, %v7354_v37  ;;  %7379 = vpow2.f32 %v6239_v25  ;;  %13768 = vst [vmem:[#allocation193_spill] sm:$0xff] %v11113_v18  ;;  %v11115_v35 = vpop.f32.mrb[127].mxu1 }
 0x2b3   : > { %13763 = vst [vmem:[#allocation188_spill] sm:$0xff] %v11099_v57  ;;  %v11103_v30 = vpop.eup %7357  ;;  %7381 = vrcp.f32 %v3148_v9  ;;  %13769 = vst [vmem:[#allocation194_spill] sm:$0xff] %v11115_v35  ;;  %v13853_v57 = vld [vmem:[#allocation87_spill] sm:$0xff] }
 0x2b4   : > { %13764 = vst [vmem:[#allocation189_spill] sm:$0xff] %v11103_v30  ;;  %v11109_v27 = vpop.eup %7359  ;;  %7383 = vrcp.f32 %v3150_v34 }
 0x2b5   : > { %13766 = vst [vmem:[#allocation191_spill] sm:$0xff] %v11109_v27  ;;  %v7362_v19 = vpop.eup %7361  ;;  %7385 = vrcp.f32 %v3155_v56 }
 0x2b6   : > { %v7364_v33 = vpop.eup %7363  ;;  %7387 = vrcp.f32 %v3157_v48  ;;  %v3156_v27 = vadd.f32 1.0, %v7362_v19 }
 0x2b7   : > { %v7366_v10 = vpop.eup %7365  ;;  %v3158_v25 = vadd.f32 1.0, %v7364_v33  ;;  %7389 = vpow2.f32 %v6248_v46 }
 0x2b8   : > { %v7368_v26 = vpop.eup %7367  ;;  %v3163_v30 = vadd.f32 1.0, %v7366_v10  ;;  %7391 = vpow2.f32 %v6250_v38 }
 0x2b9   : > { %v7370_v37 = vpop.eup %7369  ;;  %v3165_v9 = vadd.f32 1.0, %v7368_v26  ;;  %7393 = vpow2.f32 %v6249_v60 }
 0x2ba   : > { %v7372_v32 = vpop.eup %7371  ;;  %7395 = vrcp.f32 %v3156_v27  ;;  %v3164_v35 = vadd.f32 1.0, %v7370_v37  ;;  %v2191_v27 = vadd.f32 %v10576_v49, %v10027_v2  ;;  %v1940_v37 = vadd.f32 %v10607_v41, %v10045_v51 }
 0x2bb   : > { %v7374_v18 = vpop.eup %7373  ;;  %7397 = vrcp.f32 %v3158_v25  ;;  %v3166_v28 = vadd.f32 1.0, %v7372_v32  ;;  %v2201_v41 = vadd.f32 %v10616_v14, %v10037_v54  ;;  %v1950_v14 = vadd.f32 %v10634_v1, %v10055_v5 }
 0x2bc   : > { %v7376_v62 = vpop.eup %7375  ;;  %7399 = vrcp.f32 %v3163_v30  ;;  %v3171_v4 = vadd.f32 1.0, %v7374_v18  ;;  %v1938_v30 = vadd.f32 %v10603_v16, %v10045_v51  ;;  %v2195_v18 = vadd.f32 %v10605_v36, %v10045_v51 }
 0x2bd   : > { %v7378_v34 = vpop.eup %7377  ;;  %7401 = vrcp.f32 %v3165_v9  ;;  %v3173_v19 = vadd.f32 1.0, %v7376_v62  ;;  %v6251_v49 = vmul.f32 -1.442695, %v2191_v27  ;;  %v2197_v9 = vadd.f32 %v10609_v59, %v10045_v51 }
 0x2be   : > { %v7380_v56 = vpop.eup %7379  ;;  %7403 = vrcp.f32 %v3164_v35  ;;  %v3172_v10 = vadd.f32 1.0, %v7378_v34  ;;  %v6256_v34 = vmul.f32 -1.442695, %v1938_v30  ;;  %v1944_v36 = vadd.f32 %v10614_v52, %v10037_v54 }
 0x2bf   : > { %v11117_v48 = vpop.eup %7381  ;;  %7405 = vrcp.f32 %v3166_v28  ;;  %v3174_v26 = vadd.f32 1.0, %v7380_v56  ;;  %v6258_v56 = vmul.f32 -1.442695, %v2195_v18  ;;  %v1946_v51 = vadd.f32 %v10621_v39, %v10037_v54 }
 0x2c0   : > { %13770 = vst [vmem:[#allocation195_spill] sm:$0xff] %v11117_v48  ;;  %v11119_v46 = vpop.eup %7383  ;;  %7407 = vrcp.f32 %v3171_v4  ;;  %v2203_v52 = vadd.f32 %v10623_v0, %v10037_v54  ;;  %v6264_v27 = vmul.f32 -1.442695, %v1944_v36  ;;  %v2207_v39 = vadd.f32 %v10636_v11, %v10055_v5  ;;  %v8299_v48 = vld [vmem:[%s8740_s13 + $0x100] sm:$0xff] }
 0x2c1   : > { %13771 = vst [vmem:[#allocation196_spill] sm:$0xff] %v11119_v46  ;;  %v11121_v33 = vpop.eup %7385  ;;  %7409 = vrcp.f32 %v3173_v19  ;;  %v6257_v19 = vmul.f32 -1.442695, %v1940_v37  ;;  %v1952_v54 = vadd.f32 %v10639_v63, %v10055_v5  ;;  %v2209_v1 = vadd.f32 %v10641_v50, %v10055_v5 }
 0x2c2   : > { %13772 = vst [vmem:[#allocation197_spill] sm:$0xff] %v11121_v33  ;;  %v11125_v38 = vpop.eup %7387  ;;  %7411 = vrcp.f32 %v3172_v10  ;;  %v6259_v10 = vmul.f32 -1.442695, %v2197_v9  ;;  %v6274_v11 = vmul.f32 -1.442695, %v2207_v39 }
 0x2c3   : > { %13773 = vst [vmem:[#allocation198_spill] sm:$0xff] %v11125_v38  ;;  %v7390_v32 = vpop.eup %7389  ;;  %7413 = vrcp.f32 %v3174_v26  ;;  %v6273_v9 = vmul.f32 -1.442695, %v1952_v54 }
 0x2c4   : > { %v7392_v35 = vpop.eup %7391  ;;  %v3183_v60 = vadd.f32 1.0, %v7390_v32  ;;  %v6266_v32 = vmul.f32 -1.442695, %v2201_v41  ;;  %v8250_v41 = vld [vmem:[%s8740_s13 + $0x78] sm:$0xff] }
 0x2c5   : > { %v7394_v25 = vpop.eup %7393  ;;  %v3185_v2 = vadd.f32 1.0, %v7392_v35  ;;  %v6265_v35 = vmul.f32 -1.442695, %v1946_v51 }
 0x2c6   : > { %v11135_v62 = vpop.eup %7395  ;;  %7415 = vrcp.f32 %v3183_v60  ;;  %v3184_v16 = vadd.f32 1.0, %v7394_v25  ;;  %v6267_v60 = vmul.f32 -1.442695, %v2203_v52  ;;  %v6272_v25 = vmul.f32 -1.442695, %v1950_v14 }
 0x2c7   : > { %13774 = vst [vmem:[#allocation199_spill] sm:$0xff] %v11135_v62  ;;  %v11139_v28 = vpop.eup %7397  ;;  %7417 = vrcp.f32 %v3185_v2 }
 0x2c8   : > { %13775 = vst [vmem:[#allocation200_spill] sm:$0xff] %v11139_v28  ;;  %v11143_v4 = vpop.eup %7399  ;;  %7419 = vrcp.f32 %v3184_v16  ;;  %v6275_v16 = vmul.f32 -1.442695, %v2209_v1  ;;  %v13883_v28 = vld [vmem:[#allocation190_spill] sm:$0xff] }
 0x2c9   : > { %13776 = vst [vmem:[#allocation201_spill] sm:$0xff] %v11143_v4  ;;  %v11147_v59 = vpop.eup %7401  ;;  %7421 = vpow2.f32 %v6251_v49  ;;  %v13881_v4 = vld [vmem:[#allocation187_spill] sm:$0xff] }
 0x2ca   : > { %13777 = vst [vmem:[#allocation202_spill] sm:$0xff] %v11147_v59  ;;  %v11151_v26 = vpop.eup %7403  ;;  %7423 = vpow2.f32 %v6256_v34 }
 0x2cb   : > { %13778 = vst [vmem:[#allocation203_spill] sm:$0xff] %v11151_v26  ;;  %v11155_v30 = vpop.eup %7405  ;;  %7425 = vpow2.f32 %v6258_v56 }
 0x2cc   : > { %13779 = vst [vmem:[#allocation204_spill] sm:$0xff] %v11155_v30  ;;  %v11159_v18 = vpop.eup %7407  ;;  %7427 = vpow2.f32 %v6257_v19 }
 0x2cd   : > { %13780 = vst [vmem:[#allocation205_spill] sm:$0xff] %v11159_v18  ;;  %v11163_v0 = vpop.eup %7409  ;;  %7429 = vpow2.f32 %v6259_v10 }
 0x2ce   : > { %13781 = vst [vmem:[#allocation206_spill] sm:$0xff] %v11163_v0  ;;  %v11167_v37 = vpop.eup %7411  ;;  %7431 = vpow2.f32 %v6264_v27 }
 0x2cf   : > { %13782 = vst [vmem:[#allocation207_spill] sm:$0xff] %v11167_v37  ;;  %v11169_v2 = vpop.eup %7413  ;;  %7433 = vpow2.f32 %v6266_v32 }
 0x2d0   : > { %13783 = vst [vmem:[#allocation208_spill] sm:$0xff] %v11169_v2  ;;  %v11171_v49 = vpop.eup %7415  ;;  %7435 = vpow2.f32 %v6265_v35 }
 0x2d1   : > { %v11173_v63 = vpop.eup %7417  ;;  %7437 = vpow2.f32 %v6267_v60 }
 0x2d2   : > { %v11175_v34 = vpop.eup %7419  ;;  %7439 = vpow2.f32 %v6272_v25 }
 0x2d3   : > { %v7422_v5 = vpop.eup %7421  ;;  %7441 = vpow2.f32 %v6274_v11 }
 0x2d4   : > { %v7424_v50 = vpop.eup %7423  ;;  %v3186_v36 = vadd.f32 1.0, %v7422_v5  ;;  %7443 = vpow2.f32 %v6273_v9  ;;  %v2215_v5 = vadd.f32 %v10708_v17, %v10059_v13 }
 0x2d5   : > { %v7426_v56 = vpop.eup %7425  ;;  %v3191_v51 = vadd.f32 1.0, %v7424_v50  ;;  %7445 = vpow2.f32 %v6275_v16 }
 0x2d6   : > { %v7428_v10 = vpop.eup %7427  ;;  %7447 = vrcp.f32 %v3186_v36  ;;  %v3193_v14 = vadd.f32 1.0, %v7426_v56 }
 0x2d7   : > { %v7430_v32 = vpop.eup %7429  ;;  %7449 = vrcp.f32 %v3191_v51  ;;  %v3192_v54 = vadd.f32 1.0, %v7428_v10  ;;  %v1956_v51 = vadd.f32 %v10653_v58, %v10059_v13  ;;  %v2213_v10 = vadd.f32 %v10693_v45, %v10059_v13 }
 0x2d8   : > { %v7432_v60 = vpop.eup %7431  ;;  %7451 = vrcp.f32 %v3193_v14  ;;  %v3194_v11 = vadd.f32 1.0, %v7430_v32  ;;  %v1958_v32 = vadd.f32 %v10706_v44, %v10059_v13  ;;  %v1962_v58 = vadd.f32 %v10725_v8, %v10069_v15 }
 0x2d9   : > { %v7434_v9 = vpop.eup %7433  ;;  %7453 = vrcp.f32 %v3192_v54  ;;  %v3199_v50 = vadd.f32 1.0, %v7432_v60  ;;  %v1964_v44 = vadd.f32 %v10729_v12, %v10069_v15  ;;  %v6280_v17 = vmul.f32 -1.442695, %v1956_v51 }
 0x2da   : > { %v7436_v36 = vpop.eup %7435  ;;  %7455 = vrcp.f32 %v3194_v11  ;;  %v3201_v56 = vadd.f32 1.0, %v7434_v9  ;;  %v6282_v16 = vmul.f32 -1.442695, %v2213_v10  ;;  %v6283_v8 = vmul.f32 -1.442695, %v2215_v5  ;;  %v13787_v5 = vld [vmem:[#allocation48_spill] sm:$0xff] }
 0x2db   : > { %v7438_v1 = vpop.eup %7437  ;;  %7457 = vrcp.f32 %v3199_v50  ;;  %v3200_v14 = vadd.f32 1.0, %v7436_v36  ;;  %v2219_v50 = vadd.f32 %v10727_v55, %v10069_v15  ;;  %v6288_v25 = vmul.f32 -1.442695, %v1962_v58  ;;  %v13784_v55 = vld [vmem:[#allocation46_spill] sm:$0xff] }
 0x2dc   : > { %v7440_v54 = vpop.eup %7439  ;;  %7459 = vrcp.f32 %v3201_v56  ;;  %v3202_v11 = vadd.f32 1.0, %v7438_v1  ;;  %v6281_v56 = vmul.f32 -1.442695, %v1958_v32  ;;  %v2221_v35 = vadd.f32 %v13784_v55, %v10069_v15  ;;  %v8244_v15 = vld [vmem:[%s8740_s13 + $0x60] sm:$0xff] }
 0x2dd   : > { %v7442_v9 = vpop.eup %7441  ;;  %7461 = vrcp.f32 %v3200_v14  ;;  %v3207_v45 = vadd.f32 1.0, %v7440_v54  ;;  %v6290_v51 = vmul.f32 -1.442695, %v2219_v50  ;;  %v6289_v10 = vmul.f32 -1.442695, %v1964_v44  ;;  %v13788_v50 = vld [vmem:[#allocation49_spill] sm:$0xff] }
 0x2de   : > { %v7444_v36 = vpop.eup %7443  ;;  %7463 = vrcp.f32 %v3202_v11  ;;  %v3209_v13 = vadd.f32 1.0, %v7442_v9  ;;  %v13785_v11 = vld [vmem:[#allocation99_spill] sm:$0xff] }
 0x2df   : > { %v7446_v60 = vpop.eup %7445  ;;  %7465 = vrcp.f32 %v3207_v45  ;;  %v3208_v1 = vadd.f32 1.0, %v7444_v36  ;;  %v13786_v9 = vld [vmem:[#allocation47_spill] sm:$0xff]  ;;  %v2225_v32 = vadd.f32 %v13787_v5, %v13785_v11  ;;  %v1970_v44 = vadd.f32 %v13788_v50, %v13785_v11  ;;  %v8247_v5 = vld [vmem:[%s8740_s13 + $0x28] sm:$0xff] }
 0x2e0   : > { %v7448_v14 = vpop.eup %7447  ;;  %7467 = vrcp.f32 %v3209_v13  ;;  %v3210_v54 = vadd.f32 1.0, %v7446_v60  ;;  %v1968_v45 = vadd.f32 %v13786_v9, %v13785_v11  ;;  %v8243_v60 = vld [vmem:[%s8740_s13 + $0x20] sm:$0xff]  ;;  %v3824_v52 = vmul.f32 %v8247_v5, %v11175_v34  ;;  %v13790_v5 = vld [vmem:[#allocation100_spill] sm:$0xff] }
 0x2e1   : > { %v7450_v12 = vpop.eup %7449  ;;  %7469 = vrcp.f32 %v3208_v1  ;;  %v3823_v58 = vmul.f32 %v8243_v60, %v11171_v49  ;;  %v8245_v1 = vld [vmem:[%s8740_s13 + $0x30] sm:$0xff]  ;;  %v8248_v49 = vld [vmem:[%s8740_s13 + $0x68] sm:$0xff] }
 0x2e2   : > { %v7452_v36 = vpop.eup %7451  ;;  %7471 = vrcp.f32 %v3210_v54  ;;  %v3831_v13 = vmul.f32 %v8244_v15, %v7450_v12  ;;  %v3825_v9 = vmul.f32 %v8245_v1, %v11173_v63  ;;  %v8246_v54 = vld [vmem:[%s8740_s13 + $0x70] sm:$0xff]  ;;  %v6291_v63 = vmul.f32 -1.442695, %v2221_v35 }
 0x2e3   : > { %v7454_v55 = vpop.eup %7453  ;;  %7473 = vpow2.f32 %v6280_v17  ;;  %v3833_v39 = vmul.f32 %v8246_v54, %v7452_v36  ;;  %v8249_v17 = vld [vmem:[%s8740_s13 + $0x38] sm:$0xff]  ;;  %v13789_v36 = vld [vmem:[#allocation51_spill] sm:$0xff]  ;;  %v6296_v34 = vmul.f32 -1.442695, %v1968_v45 }
 0x2e4   : > { %v7456_v27 = vpop.eup %7455  ;;  %7475 = vpow2.f32 %v6282_v16  ;;  %v3832_v60 = vmul.f32 %v8248_v49, %v7454_v55  ;;  %v6734_v12 = vpack.c.bf16 %v3831_v13, %v3823_v58  ;;  %v3826_v19 = vmul.f32 %v8249_v17, %v7448_v14  ;;  %v13791_v55 = vld [vmem:[#allocation9_spill] sm:$0xff]  ;;  %v13792_v49 = vld [vmem:[#allocation10_spill] sm:$0xff]  ;;  %v13794_v35 = vld [vmem:[#allocation11_spill] sm:$0xff] }
 0x2e5   : > { %v7458_v15 = vpop.eup %7457  ;;  %7477 = vpow2.f32 %v6281_v56  ;;  %v3834_v50 = vmul.f32 %v8250_v41, %v7456_v27  ;;  %v6782_v2 = vpack.c.bf16 %v3833_v39, %v3825_v9  ;;  %v2227_v1 = vadd.f32 %v13789_v36, %v13785_v11  ;;  %v13793_v17 = vld [vmem:[#allocation54_spill] sm:$0xff]  ;;  %v8252_v9 = vld [vmem:[%s8740_s13 + $0xe0] sm:$0xff]  ;;  %v13796_v41 = vld [vmem:[#allocation12_spill] sm:$0xff] }
 0x2e6   : > { %v7460_v37 = vpop.eup %7459  ;;  %7479 = vpow2.f32 %v6283_v8  ;;  %v6732_v16 = vpack.c.bf16 %v3832_v60, %v3824_v52  ;;  %v1974_v58 = vadd.f32 %v13791_v55, %v13790_v5  ;;  %v6298_v27 = vmul.f32 -1.442695, %v2225_v32  ;;  %v13795_v8 = vld [vmem:[#allocation55_spill] sm:$0xff] }
 0x2e7   : > { %v7462_v54 = vpop.eup %7461  ;;  %7481 = vpow2.f32 %v6288_v25  ;;  %v6780_v13 = vpack.c.bf16 %v3834_v50, %v3826_v19  ;;  %v6297_v11 = vmul.f32 -1.442695, %v1970_v44  ;;  %v6299_v45 = vmul.f32 -1.442695, %v2227_v1  ;;  %v8256_v1 = vld [vmem:[%s8740_s13 + $0xe8] sm:$0xff] }
 0x2e8   : > { %v7464_v56 = vpop.eup %7463  ;;  %7483 = vpow2.f32 %v6290_v51  ;;  %6733 = vmatprep.subr.bf16.mxu0 %v6732_v16  ;;  %v8251_v51 = vld [vmem:[%s8740_s13 + $0xa0] sm:$0xff]  ;;  %v6304_v36 = vmul.f32 -1.442695, %v1974_v58  ;;  %v8254_v16 = vld [vmem:[%s8740_s13 + $0xf0] sm:$0xff] }
 0x2e9   : > { %v7466_v39 = vpop.eup %7465  ;;  %7485 = vpow2.f32 %v6289_v10  ;;  %6781 = vmatprep.subr.bf16.mxu1 %v6780_v13  ;;  %6735 = vmatpush1.bf16.msra.mxu0 %v6734_v12  ;;  %v3839_v32 = vmul.f32 %v8251_v51, %v7458_v15  ;;  %v8253_v10 = vld [vmem:[%s8740_s13 + $0xb0] sm:$0xff]  ;;  %v8257_v15 = vld [vmem:[%s8740_s13 + $0xb8] sm:$0xff] }
 0x2ea   : > { %v7468_v19 = vpop.eup %7467  ;;  %7487 = vpow2.f32 %v6291_v63  ;;  %6783 = vmatpush1.bf16.msra.mxu1 %v6782_v2  ;;  %v3847_v60 = vmul.f32 %v8252_v9, %v7466_v39  ;;  %v3841_v44 = vmul.f32 %v8253_v10, %v7460_v37  ;;  %v8255_v63 = vld [vmem:[%s8740_s13 + $0xa8] sm:$0xff]  ;;  %v3842_v39 = vmul.f32 %v8257_v15, %v7464_v56  ;;  %v8258_v51 = vld [vmem:[%s8740_s13 + $0xf8] sm:$0xff] }
 0x2eb   : > { %v7470_v50 = vpop.eup %7469  ;;  %7489 = vpow2.f32 %v6296_v34  ;;  %v3849_v55 = vmul.f32 %v8254_v16, %v7468_v19  ;;  %v3840_v13 = vmul.f32 %v8255_v63, %v7462_v54 }
 0x2ec   : > { %v7472_v12 = vpop.eup %7471  ;;  %7491 = vpow2.f32 %v6298_v27  ;;  %v3848_v2 = vmul.f32 %v8256_v1, %v7470_v50  ;;  %v6738_v25 = vpack.c.bf16 %v3847_v60, %v3839_v32  ;;  %v13827_v27 = vld [vmem:[#allocation75_spill] sm:$0xff] }
 0x2ed   : > { %v7474_v52 = vpop.eup %7473  ;;  %7493 = vpow2.f32 %v6297_v11  ;;  %v3850_v9 = vmul.f32 %v8258_v51, %v7472_v12  ;;  %v6786_v34 = vpack.c.bf16 %v3849_v55, %v3841_v44  ;;  %v13803_v51 = vld [vmem:[#allocation52_spill] sm:$0xff] }
 0x2ee   : > { %v7476_v58 = vpop.eup %7475  ;;  %v3215_v37 = vadd.f32 1.0, %v7474_v52  ;;  %7495 = vpow2.f32 %v6299_v45  ;;  %v6736_v19 = vpack.c.bf16 %v3848_v2, %v3840_v13  ;;  %v13805_v45 = vld [vmem:[#allocation16_spill] sm:$0xff]  ;;  %v8264_v52 = vld [vmem:[%s8740_s13 + $0x168] sm:$0xff] }
 0x2ef   : > { %v7478_v10 = vpop.eup %7477  ;;  %v3217_v54 = vadd.f32 1.0, %v7476_v58  ;;  %7497 = vpow2.f32 %v6304_v36  ;;  %v6784_v50 = vpack.c.bf16 %v3850_v9, %v3842_v39  ;;  %v2231_v9 = vadd.f32 %v13803_v51, %v13790_v5 }
 0x2f0   : > { %v7480_v32 = vpop.eup %7479  ;;  %7499 = vrcp.f32 %v3215_v37  ;;  %v3216_v12 = vadd.f32 1.0, %v7478_v10  ;;  %6737 = vmatprep.subr.bf16.mxu0 %v6736_v19 }
 0x2f1   : > { %v7482_v44 = vpop.eup %7481  ;;  %7501 = vrcp.f32 %v3217_v54  ;;  %v3218_v13 = vadd.f32 1.0, %v7480_v32  ;;  %6785 = vmatprep.subr.bf16.mxu1 %v6784_v50  ;;  %6739 = vmatpush1.bf16.msra.mxu0 %v6738_v25  ;;  %v1976_v54 = vadd.f32 %v13805_v45, %v13790_v5  ;;  %v13810_v45 = vld [vmem:[#allocation17_spill] sm:$0xff] }
 0x2f2   : > { %v7484_v2 = vpop.eup %7483  ;;  %7503 = vrcp.f32 %v3216_v12  ;;  %v3223_v39 = vadd.f32 1.0, %v7482_v44  ;;  %6787 = vmatpush1.bf16.msra.mxu1 %v6786_v34  ;;  %v2233_v14 = vadd.f32 %v13810_v45, %v13790_v5  ;;  %v13815_v5 = vld [vmem:[#allocation21_spill] sm:$0xff] }
 0x2f3   : > { %v7486_v58 = vpop.eup %7485  ;;  %7505 = vrcp.f32 %v3218_v13  ;;  %v3225_v10 = vadd.f32 1.0, %v7484_v2  ;;  %v6306_v2 = vmul.f32 -1.442695, %v2231_v9  ;;  %v6305_v56 = vmul.f32 -1.442695, %v1976_v54  ;;  %v13817_v54 = vld [vmem:[#allocation60_spill] sm:$0xff] }
 0x2f4   : > { %v7488_v32 = vpop.eup %7487  ;;  %7507 = vrcp.f32 %v3223_v39  ;;  %v3224_v12 = vadd.f32 1.0, %v7486_v58  ;;  %v13811_v39 = vld [vmem:[#allocation101_spill] sm:$0xff]  ;;  %v13812_v58 = vld [vmem:[#allocation19_spill] sm:$0xff]  ;;  %v6307_v1 = vmul.f32 -1.442695, %v2233_v14 }
 0x2f5   : > { %v7490_v44 = vpop.eup %7489  ;;  %7509 = vrcp.f32 %v3225_v10  ;;  %v3226_v16 = vadd.f32 1.0, %v7488_v32  ;;  %v1980_v18 = vadd.f32 %v13812_v58, %v13811_v39  ;;  %v13813_v10 = vld [vmem:[#allocation59_spill] sm:$0xff]  ;;  %v13823_v14 = vld [vmem:[#allocation61_spill] sm:$0xff] }
 0x2f6   : > { %v7492_v19 = vpop.eup %7491  ;;  %7511 = vrcp.f32 %v3224_v12  ;;  %v3231_v13 = vadd.f32 1.0, %v7490_v44  ;;  %v2237_v32 = vadd.f32 %v13813_v10, %v13811_v39  ;;  %v13814_v12 = vld [vmem:[#allocation20_spill] sm:$0xff]  ;;  %v13819_v10 = vld [vmem:[#allocation23_spill] sm:$0xff] }
 0x2f7   : > { %v7494_v0 = vpop.eup %7493  ;;  %7513 = vrcp.f32 %v3226_v16  ;;  %v3233_v25 = vadd.f32 1.0, %v7492_v19  ;;  %v1982_v44 = vadd.f32 %v13814_v12, %v13811_v39  ;;  %v2239_v16 = vadd.f32 %v13815_v5, %v13811_v39  ;;  %v13816_v19 = vld [vmem:[#allocation102_spill] sm:$0xff] }
 0x2f8   : > { %v7496_v30 = vpop.eup %7495  ;;  %7515 = vrcp.f32 %v3231_v13  ;;  %v3232_v11 = vadd.f32 1.0, %v7494_v0  ;;  %v1986_v45 = vadd.f32 %v13817_v54, %v13816_v19  ;;  %v13818_v0 = vld [vmem:[#allocation22_spill] sm:$0xff]  ;;  %v1988_v59 = vadd.f32 %v13819_v10, %v13816_v19 }
 0x2f9   : > { %v7498_v9 = vpop.eup %7497  ;;  %7517 = vrcp.f32 %v3233_v25  ;;  %v3234_v34 = vadd.f32 1.0, %v7496_v30  ;;  %v2243_v13 = vadd.f32 %v13818_v0, %v13816_v19  ;;  %v6313_v0 = vmul.f32 -1.442695, %v1982_v44  ;;  %v8263_v12 = vld [vmem:[%s8740_s13 + $0x128] sm:$0xff] }
 0x2fa   : > { %v7500_v26 = vpop.eup %7499  ;;  %7519 = vrcp.f32 %v3232_v11  ;;  %v3239_v58 = vadd.f32 1.0, %v7498_v9  ;;  %v6312_v11 = vmul.f32 -1.442695, %v1980_v18  ;;  %v6314_v9 = vmul.f32 -1.442695, %v2237_v32  ;;  %v13824_v18 = vld [vmem:[#allocation103_spill] sm:$0xff] }
 0x2fb   : > { %v7502_v51 = vpop.eup %7501  ;;  %7521 = vrcp.f32 %v3234_v34  ;;  %v6315_v37 = vmul.f32 -1.442695, %v2239_v16  ;;  %v6320_v10 = vmul.f32 -1.442695, %v1986_v45  ;;  %v6322_v30 = vmul.f32 -1.442695, %v2243_v13 }
 0x2fc   : > { %v7504_v39 = vpop.eup %7503  ;;  %7523 = vrcp.f32 %v3239_v58  ;;  %v6321_v34 = vmul.f32 -1.442695, %v1988_v59  ;;  %v2245_v15 = vadd.f32 %v13823_v14, %v13816_v19  ;;  %v13825_v32 = vld [vmem:[#allocation62_spill] sm:$0xff]  ;;  %v8260_v16 = vld [vmem:[%s8740_s13 + $0x160] sm:$0xff]  ;;  %v8261_v13 = vld [vmem:[%s8740_s13 + $0x130] sm:$0xff] }
 0x2fd   : > { %v7506_v54 = vpop.eup %7505  ;;  %7525 = vpow2.f32 %v6306_v2  ;;  %v1992_v58 = vadd.f32 %v13825_v32, %v13824_v18  ;;  %v8259_v2 = vld [vmem:[%s8740_s13 + $0x120] sm:$0xff]  ;;  %v3857_v19 = vmul.f32 %v8261_v13, %v7502_v51  ;;  %v8262_v14 = vld [vmem:[%s8740_s13 + $0x170] sm:$0xff]  ;;  %v3856_v32 = vmul.f32 %v8263_v12, %v7504_v39 }
 0x2fe   : > { %v7508_v36 = vpop.eup %7507  ;;  %7527 = vpow2.f32 %v6305_v56  ;;  %v3855_v44 = vmul.f32 %v8259_v2, %v7500_v26  ;;  %v13826_v56 = vld [vmem:[#allocation64_spill] sm:$0xff]  ;;  %v13828_v12 = vld [vmem:[#allocation77_spill] sm:$0xff] }
 0x2ff   : > { %v7510_v50 = vpop.eup %7509  ;;  %7529 = vpow2.f32 %v6307_v1  ;;  %v3863_v45 = vmul.f32 %v8260_v16, %v7508_v36  ;;  %v2249_v59 = vadd.f32 %v13826_v56, %v13824_v18  ;;  %v8265_v36 = vld [vmem:[%s8740_s13 + $0x138] sm:$0xff]  ;;  %v13839_v39 = vld [vmem:[#allocation65_spill] sm:$0xff] }
 0x300   : > { %v7512_v5 = vpop.eup %7511  ;;  %7531 = vpow2.f32 %v6312_v11  ;;  %v3865_v25 = vmul.f32 %v8262_v14, %v7510_v50  ;;  %v3858_v16 = vmul.f32 %v8265_v36, %v7506_v54  ;;  %v8266_v11 = vld [vmem:[%s8740_s13 + $0x178] sm:$0xff]  ;;  %v6323_v50 = vmul.f32 -1.442695, %v2245_v15  ;;  %v13829_v54 = vld [vmem:[#allocation78_spill] sm:$0xff] }
 0x301   : > { %v7514_v1 = vpop.eup %7513  ;;  %7533 = vpow2.f32 %v6314_v9  ;;  %v3864_v55 = vmul.f32 %v8264_v52, %v7512_v5  ;;  %v6742_v26 = vpack.c.bf16 %v3863_v45, %v3855_v44  ;;  %v6328_v52 = vmul.f32 -1.442695, %v1992_v58  ;;  %v13830_v45 = vld [vmem:[#allocation79_spill] sm:$0xff]  ;;  %v8273_v58 = vld [vmem:[%s8740_s13 + $0x1b8] sm:$0xff] }
 0x302   : > { %v7516_v2 = vpop.eup %7515  ;;  %7535 = vpow2.f32 %v6313_v0  ;;  %v3866_v63 = vmul.f32 %v8266_v11, %v7514_v1  ;;  %v6790_v60 = vpack.c.bf16 %v3865_v25, %v3857_v19  ;;  %v6330_v19 = vmul.f32 -1.442695, %v2249_v59  ;;  %v8268_v59 = vld [vmem:[%s8740_s13 + $0x1e0] sm:$0xff]  ;;  %v8272_v1 = vld [vmem:[%s8740_s13 + $0x1e8] sm:$0xff] }
 0x303   : > { %v11286_v56 = vpop.eup %7517  ;;  %7537 = vpow2.f32 %v6315_v37  ;;  %v6740_v13 = vpack.c.bf16 %v3864_v55, %v3856_v32  ;;  %v1994_v51 = vadd.f32 %v13839_v39, %v13824_v18 }
 0x304   : > { %v11289_v9 = vpop.eup %7519  ;;  %7539 = vpow2.f32 %v6320_v10  ;;  %v6788_v5 = vpack.c.bf16 %v3866_v63, %v3858_v16  ;;  %v8267_v16 = vld [vmem:[%s8740_s13 + $0x1a0] sm:$0xff] }
 0x305   : > { %v11292_v0 = vpop.eup %7521  ;;  %7541 = vpow2.f32 %v6322_v30  ;;  %6741 = vmatprep.subr.bf16.mxu0 %v6740_v13  ;;  %v11301_v30 = vmul.f32 %v8267_v16, %v7516_v2 }
 0x306   : > { %v7524_v15 = vpop.eup %7523  ;;  %7543 = vpow2.f32 %v6321_v34  ;;  %6789 = vmatprep.subr.bf16.mxu1 %v6788_v5  ;;  %6743 = vmatpush1.bf16.msra.mxu0 %v6742_v26 }
 0x307   : > { %v7526_v63 = vpop.eup %7525  ;;  %7545 = vpow2.f32 %v6323_v50  ;;  %6791 = vmatpush1.bf16.msra.mxu1 %v6790_v60  ;;  %v11304_v11 = vmul.f32 %v8268_v59, %v7524_v15 }
 0x308   : > { %v7528_v13 = vpop.eup %7527  ;;  %v3241_v10 = vadd.f32 1.0, %v7526_v63  ;;  %7547 = vpow2.f32 %v6328_v52  ;;  %v13842_v52 = vld [vmem:[#allocation81_spill] sm:$0xff] }
 0x309   : > { %v7530_v34 = vpop.eup %7529  ;;  %v3240_v5 = vadd.f32 1.0, %v7528_v13  ;;  %7549 = vpow2.f32 %v6330_v19 }
 0x30a   : > { %v7532_v2 = vpop.eup %7531  ;;  %7551 = vrcp.f32 %v3241_v10  ;;  %v3242_v59 = vadd.f32 1.0, %v7530_v34  ;;  %v13840_v34 = vld [vmem:[#allocation76_spill] sm:$0xff] }
 0x30b   : > { %v7534_v25 = vpop.eup %7533  ;;  %7553 = vrcp.f32 %v3240_v5  ;;  %v3247_v63 = vadd.f32 1.0, %v7532_v2  ;;  %v2251_v44 = vadd.f32 %v13840_v34, %v13824_v18  ;;  %v13841_v2 = vld [vmem:[#allocation107_spill] sm:$0xff] }
 0x30c   : > { %v7536_v26 = vpop.eup %7535  ;;  %7555 = vrcp.f32 %v3242_v59  ;;  %v3249_v13 = vadd.f32 1.0, %v7534_v25  ;;  %v1998_v47 = vadd.f32 %v13842_v52, %v13841_v2  ;;  %v13843_v59 = vld [vmem:[#allocation82_spill] sm:$0xff] }
 0x30d   : > { %v7538_v16 = vpop.eup %7537  ;;  %7557 = vrcp.f32 %v3247_v63  ;;  %v3248_v10 = vadd.f32 1.0, %v7536_v26  ;;  %v2255_v25 = vadd.f32 %v13843_v59, %v13841_v2  ;;  %v13844_v63 = vld [vmem:[#allocation83_spill] sm:$0xff]  ;;  %v6331_v36 = vmul.f32 -1.442695, %v2251_v44  ;;  %v13846_v59 = vld [vmem:[#allocation84_spill] sm:$0xff] }
 0x30e   : > { %v7540_v60 = vpop.eup %7539  ;;  %7559 = vrcp.f32 %v3249_v13  ;;  %v3250_v5 = vadd.f32 1.0, %v7538_v16  ;;  %v2000_v26 = vadd.f32 %v13844_v63, %v13841_v2  ;;  %v6329_v16 = vmul.f32 -1.442695, %v1994_v51  ;;  %v13848_v51 = vld [vmem:[#allocation86_spill] sm:$0xff] }
 0x30f   : > { %v7542_v19 = vpop.eup %7541  ;;  %7561 = vrcp.f32 %v3248_v10  ;;  %v3255_v22 = vadd.f32 1.0, %v7540_v60  ;;  %v2257_v24 = vadd.f32 %v13846_v59, %v13841_v2  ;;  %v6336_v60 = vmul.f32 -1.442695, %v1998_v47  ;;  %v8270_v59 = vld [vmem:[%s8740_s13 + $0x1f0] sm:$0xff] }
 0x310   : > { %v7544_v15 = vpop.eup %7543  ;;  %7563 = vrcp.f32 %v3250_v5  ;;  %v3257_v13 = vadd.f32 1.0, %v7542_v19  ;;  %v6338_v39 = vmul.f32 -1.442695, %v2255_v25  ;;  %v6337_v5 = vmul.f32 -1.442695, %v2000_v26  ;;  %v13847_v19 = vld [vmem:[#allocation109_spill] sm:$0xff] }
 0x311   : > { %v7546_v34 = vpop.eup %7545  ;;  %7565 = vrcp.f32 %v3255_v22  ;;  %v3256_v52 = vadd.f32 1.0, %v7544_v15  ;;  %v2004_v42 = vadd.f32 %v13848_v51, %v13847_v19  ;;  %v13849_v15 = vld [vmem:[#allocation175_spill] sm:$0xff] }
 0x312   : > { %v7548_v50 = vpop.eup %7547  ;;  %7567 = vrcp.f32 %v3257_v13  ;;  %v3258_v10 = vadd.f32 1.0, %v7546_v34  ;;  %v2261_v2 = vadd.f32 %v13849_v15, %v13847_v19  ;;  %v13850_v13 = vld [vmem:[#allocation176_spill] sm:$0xff]  ;;  %v8269_v34 = vld [vmem:[%s8740_s13 + $0x1b0] sm:$0xff] }
 0x313   : > { %v7550_v63 = vpop.eup %7549  ;;  %7569 = vrcp.f32 %v3256_v52  ;;  %v3263_v18 = vadd.f32 1.0, %v7548_v50  ;;  %v2006_v47 = vadd.f32 %v13850_v13, %v13847_v19  ;;  %v13851_v50 = vld [vmem:[#allocation177_spill] sm:$0xff]  ;;  %v3873_v52 = vmul.f32 %v8269_v34, %v11286_v56 }
 0x314   : > { %v7552_v22 = vpop.eup %7551  ;;  %7571 = vrcp.f32 %v3258_v10  ;;  %v3265_v44 = vadd.f32 1.0, %v7550_v63  ;;  %v2263_v26 = vadd.f32 %v13851_v50, %v13847_v19  ;;  %v13852_v63 = vld [vmem:[#allocation114_spill] sm:$0xff]  ;;  %v3872_v13 = vmul.f32 %v8271_v6, %v11289_v9  ;;  %v8274_v50 = vld [vmem:[%s8740_s13 + $0x1f8] sm:$0xff]  ;;  %v13855_v9 = vld [vmem:[#allocation179_spill] sm:$0xff] }
 0x315   : > { %v7554_v25 = vpop.eup %7553  ;;  %7573 = vrcp.f32 %v3263_v18  ;;  %v3881_v10 = vmul.f32 %v8270_v59, %v7552_v22  ;;  %v2010_v15 = vadd.f32 %v13853_v57, %v13852_v63  ;;  %v3874_v19 = vmul.f32 %v8273_v58, %v11292_v0  ;;  %v8298_v58 = vld [vmem:[%s8740_s13 + $0xd8] sm:$0xff] }
 0x316   : > { %v7556_v51 = vpop.eup %7555  ;;  %7575 = vrcp.f32 %v3265_v44  ;;  %v3880_v37 = vmul.f32 %v8272_v1, %v7554_v25  ;;  %v6339_v22 = vmul.f32 -1.442695, %v2257_v24  ;;  %v13854_v44 = vld [vmem:[#allocation88_spill] sm:$0xff]  ;;  %v6344_v6 = vmul.f32 -1.442695, %v2004_v42 }
 0x317   : > { %v7558_v18 = vpop.eup %7557  ;;  %7577 = vpow2.f32 %v6329_v16  ;;  %v3882_v32 = vmul.f32 %v8274_v50, %v7556_v51  ;;  %v6794_v56 = vpack.c.bf16 %v3881_v10, %v3873_v52  ;;  %v2267_v59 = vadd.f32 %v13854_v44, %v13852_v63  ;;  %v8276_v51 = vld [vmem:[%s8740_s13 + $0x260] sm:$0xff]  ;;  %v8279_v50 = vld [vmem:[%s8740_s13 + $0x228] sm:$0xff] }
 0x318   : > { %v7560_v34 = vpop.eup %7559  ;;  %7579 = vpow2.f32 %v6331_v36  ;;  %v6744_v57 = vpack.c.bf16 %v3880_v37, %v3872_v13  ;;  %v2012_v1 = vadd.f32 %v13855_v9, %v13852_v63  ;;  %v6346_v24 = vmul.f32 -1.442695, %v2261_v2  ;;  %v8280_v44 = vld [vmem:[%s8740_s13 + $0x268] sm:$0xff] }
 0x319   : > { %v7562_v14 = vpop.eup %7561  ;;  %7581 = vpow2.f32 %v6336_v60  ;;  %v6792_v16 = vpack.c.bf16 %v3882_v32, %v3874_v19  ;;  %v6345_v37 = vmul.f32 -1.442695, %v2006_v47  ;;  %v6347_v60 = vmul.f32 -1.442695, %v2263_v26  ;;  %v8278_v19 = vld [vmem:[%s8740_s13 + $0x270] sm:$0xff] }
 0x31a   : > { %v7564_v25 = vpop.eup %7563  ;;  %7583 = vpow2.f32 %v6338_v39  ;;  %6745 = vmatprep.subr.bf16.mxu0 %v6744_v57  ;;  %v6352_v42 = vmul.f32 -1.442695, %v2010_v15  ;;  %v13857_v32 = vpack.c.bf16 %v11304_v11, %v11301_v30  ;;  %v6354_v10 = vmul.f32 -1.442695, %v2267_v59  ;;  %v8275_v39 = vld [vmem:[%s8740_s13 + $0x220] sm:$0xff]  ;;  %v8277_v15 = vld [vmem:[%s8740_s13 + $0x230] sm:$0xff] }
 0x31b   : > { %v7566_v36 = vpop.eup %7565  ;;  %7585 = vpow2.f32 %v6337_v5  ;;  %6793 = vmatprep.subr.bf16.mxu1 %v6792_v16  ;;  %v3887_v2 = vmul.f32 %v8275_v39, %v7558_v18  ;;  %v6353_v26 = vmul.f32 -1.442695, %v2012_v1  ;;  %v3889_v13 = vmul.f32 %v8277_v15, %v7560_v34  ;;  %v8281_v18 = vld [vmem:[%s8740_s13 + $0x238] sm:$0xff]  ;;  %v8283_v15 = vld [vmem:[%s8740_s13] sm:$0xff] }
 0x31c   : > { %6747 = vmatpush1.bf16.msra.mxu0 %v13857_v32  ;;  %v7568_v52 = vpop.eup %7567  ;;  %7587 = vpow2.f32 %v6339_v22  ;;  %6795 = vmatpush1.bf16.msra.mxu1 %v6794_v56  ;;  %v3895_v5 = vmul.f32 %v8276_v51, %v7566_v36  ;;  %v3888_v22 = vmul.f32 %v8279_v50, %v7562_v14  ;;  %v3890_v9 = vmul.f32 %v8281_v18, %v7564_v25  ;;  %v8282_v16 = vld [vmem:[%s8740_s13 + $0x278] sm:$0xff] }
 0x31d   : > { %v7570_v47 = vpop.eup %7569  ;;  %7589 = vpow2.f32 %v6344_v6  ;;  %v3897_v30 = vmul.f32 %v8278_v19, %v7568_v52  ;;  %v8284_v19 = vld [vmem:[%s8740_s13 + $0x10] sm:$0xff]  ;;  %v13873_v39 = vld [vmem:[#allocation184_spill] sm:$0xff]  ;;  %v13875_v32 = vsub.f32 1.0, %v13795_v8 }
 0x31e   : > { %v7572_v11 = vpop.eup %7571  ;;  %7591 = vpow2.f32 %v6346_v24  ;;  %v3896_v56 = vmul.f32 %v8280_v44, %v7570_v47  ;;  %v6750_v59 = vpack.c.bf16 %v3895_v5, %v3887_v2 }
 0x31f   : > { %v11365_v57 = vpop.eup %7573  ;;  %7593 = vpow2.f32 %v6345_v37  ;;  %v3898_v6 = vmul.f32 %v8282_v16, %v7572_v11  ;;  %v6798_v1 = vpack.c.bf16 %v3897_v30, %v3889_v13  ;;  %v13859_v30 = vsub.f32 1.0, %v10677_v53 }
 0x320   : > { %v11369_v36 = vpop.eup %7575  ;;  %7595 = vpow2.f32 %v6347_v60  ;;  %v6748_v24 = vpack.c.bf16 %v3896_v56, %v3888_v22  ;;  %v13860_v22 = vsub.f32 1.0, %v10680_v61  ;;  %v8286_v56 = vld [vmem:[%s8740_s13 + $0x18] sm:$0xff] }
 0x321   : > { %v7578_v14 = vpop.eup %7577  ;;  %7597 = vpow2.f32 %v6352_v42  ;;  %v6796_v25 = vpack.c.bf16 %v3898_v6, %v3890_v9  ;;  %v13858_v42 = vsub.f32 1.0, %v10675_v23  ;;  %v11385_v11 = vmul.f32 %v8284_v19, %v13859_v30  ;;  %v8287_v6 = vld [vmem:[%s8740_s13 + $0x40] sm:$0xff]  ;;  %v8290_v19 = vld [vmem:[%s8740_s13 + $0x58] sm:$0xff] }
 0x322   : > { %v7580_v37 = vpop.eup %7579  ;;  %v3264_v5 = vadd.f32 1.0, %v7578_v14  ;;  %7599 = vpow2.f32 %v6354_v10  ;;  %6749 = vmatprep.subr.bf16.mxu0 %v6748_v24  ;;  %v13862_v24 = vsub.f32 1.0, %v10689_v7  ;;  %v8288_v14 = vld [vmem:[%s8740_s13 + $0x50] sm:$0xff]  ;;  %v13865_v30 = vsub.f32 1.0, %v10710_v20 }
 0x323   : > { %v7582_v60 = vpop.eup %7581  ;;  %v3266_v47 = vadd.f32 1.0, %v7580_v37  ;;  %7601 = vpow2.f32 %v6353_v26  ;;  %6797 = vmatprep.subr.bf16.mxu1 %v6796_v25  ;;  %6751 = vmatpush1.bf16.msra.mxu0 %v6750_v59  ;;  %v11380_v13 = vmul.f32 %v8283_v15, %v13858_v42  ;;  %v8285_v26 = vld [vmem:[%s8740_s13 + $0x8] sm:$0xff]  ;;  %v13861_v59 = vsub.f32 1.0, %v10684_v40 }
 0x324   : > { %v7584_v10 = vpop.eup %7583  ;;  %7603 = vrcp.f32 %v3264_v5  ;;  %v3271_v50 = vadd.f32 1.0, %v7582_v60  ;;  %6799 = vmatpush1.bf16.msra.mxu1 %v6798_v1  ;;  %v11390_v44 = vmul.f32 %v8285_v26, %v13860_v22  ;;  %v11400_v1 = vmul.f32 %v8287_v6, %v13862_v24  ;;  %v8289_v15 = vld [vmem:[%s8740_s13 + $0x48] sm:$0xff] }
 0x325   : > { %v11395_v18 = vmul.f32 %v8286_v56, %v13861_v59  ;;  %v7586_v9 = vpop.eup %7585  ;;  %7605 = vrcp.f32 %v3266_v47  ;;  %v3273_v16 = vadd.f32 1.0, %v7584_v10  ;;  %v13863_v25 = vsub.f32 1.0, %v10695_v3  ;;  %v8291_v56 = vld [vmem:[%s8740_s13 + $0x80] sm:$0xff] }
 0x326   : > { %v7588_v5 = vpop.eup %7587  ;;  %7607 = vrcp.f32 %v3271_v50  ;;  %v3272_v60 = vadd.f32 1.0, %v7586_v9  ;;  %v13864_v47 = vsub.f32 1.0, %v10700_v43  ;;  %v11415_v10 = vmul.f32 %v8290_v19, %v13865_v30  ;;  %v8292_v9 = vld [vmem:[%s8740_s13 + $0x90] sm:$0xff] }
 0x327   : > { %v11405_v37 = vmul.f32 %v8288_v14, %v13863_v25  ;;  %v7590_v26 = vpop.eup %7589  ;;  %7609 = vrcp.f32 %v3273_v16  ;;  %v3274_v22 = vadd.f32 1.0, %v7588_v5  ;;  %v13866_v50 = vsub.f32 1.0, %v10715_v31 }
 0x328   : > { %v11410_v42 = vmul.f32 %v8289_v15, %v13864_v47  ;;  %v13867_v6 = vsub.f32 1.0, %v10757_v29  ;;  %v7592_v14 = vpop.eup %7591  ;;  %7611 = vrcp.f32 %v3272_v60  ;;  %v3279_v25 = vadd.f32 1.0, %v7590_v26  ;;  %v8293_v15 = vld [vmem:[%s8740_s13 + $0x88] sm:$0xff]  ;;  %v8294_v47 = vld [vmem:[%s8740_s13 + $0x98] sm:$0xff]  ;;  %v8295_v60 = vld [vmem:[%s8740_s13 + $0xc0] sm:$0xff] }
 0x329   : > { %v11420_v59 = vmul.f32 %v8291_v56, %v13866_v50  ;;  %v13868_v16 = vsub.f32 1.0, %v10767_v21  ;;  %v13869_v19 = vsub.f32 1.0, %v13792_v49  ;;  %v7594_v56 = vpop.eup %7593  ;;  %7613 = vrcp.f32 %v3274_v22 }
 0x32a   : > { %v11425_v24 = vmul.f32 %v8292_v9, %v13867_v6  ;;  %v3281_v50 = vadd.f32 1.0, %v7592_v14  ;;  %v13870_v9 = vld [vmem:[#allocation181_spill] sm:$0xff]  ;;  %v13871_v26 = vsub.f32 1.0, %v13793_v17  ;;  %v11444_v2 = vpop.eup %7595  ;;  %v8297_v14 = vld [vmem:[%s8740_s13 + $0xc8] sm:$0xff]  ;;  %7615 = vrcp.f32 %v3279_v25 }
 0x32b   : > { %v11430_v5 = vmul.f32 %v8293_v15, %v13868_v16  ;;  %v11435_v30 = vmul.f32 %v8294_v47, %v13869_v19  ;;  %v2269_v6 = vadd.f32 %v13870_v9, %v13852_v63  ;;  %v3280_v15 = vadd.f32 1.0, %v7594_v56  ;;  %v13872_v16 = vld [vmem:[#allocation118_spill] sm:$0xff]  ;;  %v8296_v47 = vld [vmem:[%s8740_s13 + $0xd0] sm:$0xff]  ;;  %v7598_v9 = vpop.eup %7597 }
 0x32c   : > { %v11442_v51 = vmul.f32 %v8295_v60, %v13871_v26  ;;  %v2016_v52 = vadd.f32 %v13873_v39, %v13872_v16  ;;  %v13874_v19 = vsub.f32 1.0, %v13794_v35  ;;  %v11456_v63 = vmul.f32 %v8297_v14, %v13875_v32  ;;  %v13877_v60 = vld [vmem:[#allocation185_spill] sm:$0xff]  ;;  %v13878_v56 = vld [vmem:[#allocation186_spill] sm:$0xff]  ;;  %v13882_v14 = vld [vmem:[#allocation123_spill] sm:$0xff] }
 0x32d   : > { %v2273_v26 = vadd.f32 %v13877_v60, %v13872_v16  ;;  %v2018_v34 = vadd.f32 %v13878_v56, %v13872_v16  ;;  %v13879_v39 = vsub.f32 1.0, %v13796_v41  ;;  %7617 = vrcp.f32 %v3281_v50  ;;  %v13884_v56 = vld [vmem:[#allocation192_spill] sm:$0xff]  ;;  %v13885_v50 = vld [vmem:[#allocation193_spill] sm:$0xff] }
 0x32e   : > { %v11451_v22 = vmul.f32 %v8296_v47, %v13874_v19  ;;  %13876 = vst [vmem:[#allocation46_spill] sm:$0xff] %v11456_v63  ;;  %v7600_v47 = vpop.eup %7599  ;;  %v3287_v19 = vadd.f32 1.0, %v7598_v9  ;;  %v2275_v32 = vadd.f32 %v13881_v4, %v13872_v16  ;;  %v2022_v25 = vadd.f32 %v13883_v28, %v13882_v14 }
 0x32f   : > { %v11465_v0 = vmul.f32 %v8298_v58, %v13879_v39  ;;  %v7602_v62 = vpop.eup %7601  ;;  %7619 = vrcp.f32 %v3280_v15  ;;  %v3289_v60 = vadd.f32 1.0, %v7600_v47  ;;  %v6355_v38 = vmul.f32 -1.442695, %v2269_v6  ;;  %v13886_v15 = vld [vmem:[#allocation56_spill] sm:$0xff] }
 0x330   : > { %v2279_v33 = vadd.f32 %v13884_v56, %v13882_v14  ;;  %v7604_v46 = vpop.eup %7603  ;;  %7621 = vrcp.f32 %v3287_v19  ;;  %v3288_v58 = vadd.f32 1.0, %v7602_v62  ;;  %v6360_v39 = vmul.f32 -1.442695, %v2016_v52  ;;  %v13889_v19 = vld [vmem:[#allocation194_spill] sm:$0xff] }
 0x331   : > { %13880 = vst [vmem:[#allocation99_spill] sm:$0xff] %v11465_v0  ;;  %v2024_v9 = vadd.f32 %v13885_v50, %v13882_v14  ;;  %v7606_v4 = vpop.eup %7605  ;;  %7623 = vrcp.f32 %v3289_v60  ;;  %v6362_v16 = vmul.f32 -1.442695, %v2273_v26  ;;  %v6361_v28 = vmul.f32 -1.442695, %v2018_v34  ;;  %v8300_v34 = vld [vmem:[%s8740_s13 + $0x2a0] sm:$0xff] }
 0x332   : > { %v13887_v47 = vsub.f32 1.0, %v13886_v15  ;;  %v7608_v56 = vpop.eup %7607  ;;  %7625 = vrcp.f32 %v3288_v58  ;;  %v6363_v62 = vmul.f32 -1.442695, %v2275_v32  ;;  %v6368_v52 = vmul.f32 -1.442695, %v2022_v25  ;;  %v8301_v0 = vld [vmem:[%s8740_s13 + $0x2e0] sm:$0xff] }
 0x333   : > { %v2281_v55 = vadd.f32 %v13889_v19, %v13882_v14  ;;  %v7610_v50 = vpop.eup %7609  ;;  %7627 = vpow2.f32 %v6355_v38  ;;  %v6370_v60 = vmul.f32 -1.442695, %v2279_v33  ;;  %v3903_v26 = vmul.f32 %v8300_v34, %v11365_v57  ;;  %v8302_v32 = vld [vmem:[%s8740_s13 + $0x2b0] sm:$0xff]  ;;  %v8304_v33 = vld [vmem:[%s8740_s13 + $0x2a8] sm:$0xff] }
 0x334   : > { %v11478_v6 = vmul.f32 %v8299_v48, %v13887_v47  ;;  %v3911_v48 = vmul.f32 %v8301_v0, %v7608_v56  ;;  %v7612_v47 = vpop.eup %7611  ;;  %7629 = vpow2.f32 %v6360_v39  ;;  %v6369_v58 = vmul.f32 -1.442695, %v2024_v9  ;;  %v8305_v15 = vld [vmem:[%s8740_s13 + $0x2e8] sm:$0xff]  ;;  %v8306_v0 = vld [vmem:[%s8740_s13 + $0x2b8] sm:$0xff] }
 0x335   : > { %v3905_v25 = vmul.f32 %v8302_v32, %v11369_v36  ;;  %v7614_v19 = vpop.eup %7613  ;;  %7631 = vpow2.f32 %v6362_v16  ;;  %v3904_v38 = vmul.f32 %v8304_v33, %v7604_v46  ;;  %v3912_v63 = vmul.f32 %v8305_v15, %v7612_v47  ;;  %v8307_v39 = vld [vmem:[%s8740_s13 + $0x2f8] sm:$0xff]  ;;  %v8308_v16 = vld [vmem:[%s8740_s13 + $0x110] sm:$0xff]  ;;  %v8311_v33 = vld [vmem:[%s8740_s13 + $0x140] sm:$0xff] }
 0x336   : > { %13888 = vst [vmem:[#allocation47_spill] sm:$0xff] %v11478_v6  ;;  %v8303_v6 = vld [vmem:[%s8740_s13 + $0x2f0] sm:$0xff]  ;;  %v6754_v57 = vpack.c.bf16 %v3911_v48, %v3903_v26  ;;  %7633 = vpow2.f32 %v6361_v28  ;;  %v3906_v56 = vmul.f32 %v8306_v0, %v7606_v4  ;;  %v3914_v34 = vmul.f32 %v8307_v39, %v7614_v19  ;;  %v7616_v41 = vpop.eup %7615  ;;  %v8309_v26 = vld [vmem:[%s8740_s13 + $0x108] sm:$0xff] }
 0x337   : > { %v3913_v14 = vmul.f32 %v8303_v6, %v7610_v50  ;;  %7635 = vpow2.f32 %v6363_v62  ;;  %v6371_v36 = vmul.f32 -1.442695, %v2281_v55  ;;  %v6752_v6 = vpack.c.bf16 %v3912_v63, %v3904_v38  ;;  %v13890_v50 = vld [vmem:[#allocation14_spill] sm:$0xff]  ;;  %v7618_v15 = vpop.eup %7617  ;;  %v13893_v48 = vld [vmem:[#allocation15_spill] sm:$0xff]  ;;  %v8310_v63 = vld [vmem:[%s8740_s13 + $0x118] sm:$0xff] }
 0x338   : > { %v13891_v46 = vsub.f32 1.0, %v13890_v50  ;;  %v3282_v28 = vadd.f32 1.0, %v11444_v2  ;;  %7637 = vpow2.f32 %v6368_v52  ;;  %v6800_v4 = vpack.c.bf16 %v3914_v34, %v3906_v56  ;;  %v13896_v62 = vld [vmem:[#allocation18_spill] sm:$0xff]  ;;  %v13899_v2 = vld [vmem:[#allocation57_spill] sm:$0xff]  ;;  %v8312_v0 = vld [vmem:[%s8740_s13 + $0x150] sm:$0xff] }
 0x339   : > { %v6802_v9 = vpack.c.bf16 %v3913_v14, %v3905_v25  ;;  %v13894_v47 = vsub.f32 1.0, %v13893_v48  ;;  %v7620_v55 = vpop.eup %7619  ;;  %7639 = vpow2.f32 %v6370_v60  ;;  %6753 = vmatprep.subr.bf16.mxu0 %v6752_v6  ;;  %v13897_v14 = vsub.f32 1.0, %v13896_v62  ;;  %v13902_v56 = vld [vmem:[#allocation58_spill] sm:$0xff]  ;;  %v13905_v6 = vld [vmem:[#allocation63_spill] sm:$0xff]  ;;  %v8341_v62 = vld [vmem:[%s8740_s13 + $0x2c0] sm:$0xff] }
 0x33a   : > { %v11495_v32 = vmul.f32 %v8308_v16, %v13891_v46  ;;  %v13900_v52 = vsub.f32 1.0, %v13899_v2  ;;  %v13903_v39 = vsub.f32 1.0, %v13902_v56  ;;  %v7622_v16 = vpop.eup %7621  ;;  %7641 = vpow2.f32 %v6369_v58  ;;  %6801 = vmatprep.subr.bf16.mxu1 %v6800_v4  ;;  %6755 = vmatpush1.bf16.msra.mxu0 %v6754_v57  ;;  %v8313_v60 = vld [vmem:[%s8740_s13 + $0x148] sm:$0xff]  ;;  %v11533_v57 = vpop.permute.xlu0 %4317  ;;  %v8316_v4 = vld [vmem:[%s8740_s13 + $0x320] sm:$0xff] }
 0x33b   : > { %v11501_v25 = vmul.f32 %v8309_v26, %v13894_v47  ;;  %v11506_v19 = vmul.f32 %v8310_v63, %v13897_v14  ;;  %v13906_v46 = vsub.f32 1.0, %v13905_v6  ;;  %v8314_v47 = vld [vmem:[%s8740_s13 + $0x158] sm:$0xff]  ;;  %v13908_v63 = vld [vmem:[#allocation66_spill] sm:$0xff]  ;;  %v7624_v58 = vpop.eup %7623  ;;  %13914 = vst [vmem:[#allocation55_spill] sm:$0xff] %v11533_v57  ;;  %7643 = vpow2.f32 %v6371_v36  ;;  %6803 = vmatpush1.bf16.msra.mxu1 %v6802_v9 }
 0x33c   : > { %13892 = vst [vmem:[#allocation48_spill] sm:$0xff] %v11495_v32  ;;  %v11511_v38 = vmul.f32 %v8311_v33, %v13900_v52  ;;  %v11516_v34 = vmul.f32 %v8312_v0, %v13903_v39  ;;  %v13909_v14 = vsub.f32 1.0, %v13908_v63  ;;  %v8315_v52 = vld [vmem:[%s8740_s13 + $0x180] sm:$0xff]  ;;  %v13911_v0 = vld [vmem:[#allocation68_spill] sm:$0xff]  ;;  %7645 = vrcp.f32 %v3282_v28  ;;  %v4670_v9 = vpop.f32.mrb[128].mxu1 }
 0x33d   : > { %13895 = vst [vmem:[#allocation49_spill] sm:$0xff] %v11501_v25  ;;  %13898 = vst [vmem:[#allocation51_spill] sm:$0xff] %v11506_v19  ;;  %v11521_v26 = vmul.f32 %v8313_v60, %v13906_v46  ;;  %v13912_v39 = vsub.f32 1.0, %v13911_v0  ;;  %v3919_v60 = vmul.f32 %v8316_v4, %v7616_v41  ;;  %v8317_v46 = vld [vmem:[%s8740_s13 + $0x360] sm:$0xff]  ;;  %v8320_v0 = vld [vmem:[%s8740_s13 + $0x370] sm:$0xff]  ;;  %v4671_v28 = vadd.f32 %v4670_v9, %v11533_v57 }
 0x33e   : > { %13901 = vst [vmem:[#allocation100_spill] sm:$0xff] %v11511_v38  ;;  %13904 = vst [vmem:[#allocation9_spill] sm:$0xff] %v11516_v34  ;;  %v11526_v33 = vmul.f32 %v8314_v47, %v13909_v14  ;;  %v4509_v47 = vpop.f32.mrb[128].mxu0  ;;  %v8318_v14 = vld [vmem:[%s8740_s13 + $0x190] sm:$0xff]  ;;  %v11546_v36 = vmul.f32 %v8320_v0, %v7624_v58  ;;  %v13921_v9 = vld [vmem:[#allocation72_spill] sm:$0xff] }
 0x33f   : > { %13907 = vst [vmem:[#allocation10_spill] sm:$0xff] %v11521_v26  ;;  %v11531_v34 = vmul.f32 %v8315_v52, %v13912_v39  ;;  %v3927_v26 = vmul.f32 %v8317_v46, %v7622_v16  ;;  %v7626_v52 = vpop.eup %7625  ;;  %v8319_v39 = vld [vmem:[%s8740_s13 + $0x330] sm:$0xff]  ;;  %v4510_v41 = vadd.f32 %v4509_v47, %v11533_v57  ;;  %v11549_v16 = vpop.f32.mrb[129].mxu0  ;;  %v8321_v46 = vld [vmem:[%s8740_s13 + $0x328] sm:$0xff]  ;;  %v13922_v19 = vsub.f32 1.0, %v13921_v9  ;;  %v8355_v32 = vld [vmem:[%s8740_s13 + $0x3f8] sm:$0xff] }
 0x340   : > { %13910 = vst [vmem:[#allocation54_spill] sm:$0xff] %v11526_v33  ;;  %v13915_v33 = vld [vmem:[#allocation69_spill] sm:$0xff]  ;;  %v7628_v4 = vpop.eup %7627  ;;  %v3920_v38 = vmul.f32 %v8321_v46, %v7620_v55  ;;  %v8323_v47 = vld [vmem:[%s8740_s13 + $0x188] sm:$0xff] }
 0x341   : > { %13913 = vst [vmem:[#allocation11_spill] sm:$0xff] %v11531_v34  ;;  %v13916_v63 = vsub.f32 1.0, %v13915_v33  ;;  %v11543_v34 = vmul.f32 %v8319_v39, %v7618_v15  ;;  %v8322_v33 = vld [vmem:[%s8740_s13 + $0x368] sm:$0xff]  ;;  %v11554_v15 = vpop.f32.mrb[129].mxu1  ;;  %v7630_v39 = vpop.eup %7629  ;;  %v3290_v0 = vadd.f32 1.0, %v7628_v4  ;;  %7647 = vtanh.f32 %v4510_v41 }
 0x342   : > { %v7632_v46 = vpop.eup %7631  ;;  %7649 = vtanh.f32 %v4671_v28  ;;  %v11568_v2 = vpop.f32.mrb[130].mxu1  ;;  %v13927_v28 = vld [vmem:[#allocation74_spill] sm:$0xff] }
 0x343   : > { %v11540_v6 = vmul.f32 %v8318_v14, %v13916_v63  ;;  %v3928_v63 = vmul.f32 %v8322_v33, %v7626_v52  ;;  %v6758_v14 = vpack.c.bf16 %v3927_v26, %v3919_v60  ;;  %v3295_v33 = vadd.f32 1.0, %v7630_v39  ;;  %v4515_v60 = vpop.f32.mrb[130].mxu0  ;;  %v8324_v52 = vld [vmem:[%s8740_s13 + $0x198] sm:$0xff]  ;;  %v7634_v58 = vpop.eup %7633 }
 0x344   : > { %v11566_v4 = vmul.f32 %v8324_v52, %v13922_v19  ;;  %7651 = vrcp.f32 %v3290_v0  ;;  %v3297_v41 = vadd.f32 1.0, %v7632_v46  ;;  %v7636_v19 = vpop.eup %7635  ;;  %v3296_v0 = vadd.f32 1.0, %v7634_v58  ;;  %v11582_v46 = vpop.f32.mrb[131].mxu1  ;;  %v8327_v52 = vld [vmem:[%s8740_s13 + $0x1c8] sm:$0xff]  ;;  %v8329_v58 = vld [vmem:[%s8740_s13 + $0x200] sm:$0xff] }
 0x345   : > { %13917 = vst [vmem:[#allocation52_spill] sm:$0xff] %v11540_v6  ;;  %v13918_v6 = vld [vmem:[#allocation71_spill] sm:$0xff]  ;;  %v6756_v26 = vpack.c.bf16 %v3928_v63, %v3920_v38  ;;  %7653 = vrcp.f32 %v3295_v33  ;;  %v13934_v33 = vsub.f32 1.0, %v13829_v54  ;;  %v8332_v54 = vld [vmem:[%s8740_s13 + $0x218] sm:$0xff] }
 0x346   : > { %v13919_v56 = vsub.f32 1.0, %v13918_v6  ;;  %13923 = vst [vmem:[#allocation17_spill] sm:$0xff] %v11566_v4  ;;  %v11570_v6 = vpop.f32.mrb[131].mxu0  ;;  %v8326_v63 = vld [vmem:[%s8740_s13 + $0x1d0] sm:$0xff]  ;;  %v13930_v4 = vsub.f32 1.0, %v13827_v27  ;;  %7655 = vrcp.f32 %v3297_v41  ;;  %v8331_v41 = vld [vmem:[%s8740_s13 + $0x208] sm:$0xff] }
 0x347   : > { %6757 = vmatprep.subr.bf16.mxu0 %v6756_v26  ;;  %v11597_v26 = vmul.f32 %v8329_v58, %v13934_v33  ;;  %7657 = vrcp.f32 %v3296_v0  ;;  %v13941_v58 = vld [vmem:[#allocation178_spill] sm:$0xff]  ;;  %v8333_v0 = vld [vmem:[%s8740_s13 + $0x240] sm:$0xff] }
 0x348   : > { %v11561_v55 = vmul.f32 %v8323_v47, %v13919_v56  ;;  %v8325_v56 = vld [vmem:[%s8740_s13 + $0x1c0] sm:$0xff]  ;;  %6759 = vmatpush1.bf16.msra.mxu0 %v6758_v14  ;;  %v13942_v33 = vsub.f32 1.0, %v13941_v58 }
 0x349   : > { %v13924_v47 = vld [vmem:[#allocation73_spill] sm:$0xff]  ;;  %13935 = vst [vmem:[#allocation21_spill] sm:$0xff] %v11597_v26 }
 0x34a   : > { %13920 = vst [vmem:[#allocation16_spill] sm:$0xff] %v11561_v55  ;;  %v13925_v39 = vsub.f32 1.0, %v13924_v47  ;;  %v13928_v55 = vsub.f32 1.0, %v13927_v28  ;;  %v11587_v47 = vmul.f32 %v8327_v52, %v13930_v4  ;;  %v13936_v4 = vsub.f32 1.0, %v13830_v45  ;;  %v13960_v28 = vld [vmem:[#allocation94_spill] sm:$0xff] }
 0x34b   : > { %v11614_v26 = vmul.f32 %v8332_v54, %v13942_v33  ;;  %v8335_v33 = vld [vmem:[%s8740_s13 + $0x248] sm:$0xff]  ;;  %v13961_v25 = vsub.f32 1.0, %v13960_v28 }
 0x34c   : > { %v11575_v38 = vmul.f32 %v8325_v56, %v13925_v39  ;;  %v11580_v9 = vmul.f32 %v8326_v63, %v13928_v55  ;;  %13931 = vst [vmem:[#allocation59_spill] sm:$0xff] %v11587_v47  ;;  %v8328_v56 = vld [vmem:[%s8740_s13 + $0x1d8] sm:$0xff]  ;;  %v13932_v39 = vsub.f32 1.0, %v13828_v12  ;;  %v7638_v55 = vpop.eup %7637  ;;  %v3298_v63 = vadd.f32 1.0, %v7636_v19 }
 0x34d   : > { %v7640_v47 = vpop.eup %7639  ;;  %v13938_v19 = vld [vmem:[#allocation80_spill] sm:$0xff]  ;;  %13943 = vst [vmem:[#allocation22_spill] sm:$0xff] %v11614_v26  ;;  %v13950_v26 = vld [vmem:[#allocation90_spill] sm:$0xff] }
 0x34e   : > { %13926 = vst [vmem:[#allocation101_spill] sm:$0xff] %v11575_v38  ;;  %13929 = vst [vmem:[#allocation19_spill] sm:$0xff] %v11580_v9  ;;  %v11592_v38 = vmul.f32 %v8328_v56, %v13932_v39  ;;  %v8330_v9 = vld [vmem:[%s8740_s13 + $0x210] sm:$0xff]  ;;  %v3303_v56 = vadd.f32 1.0, %v7638_v55  ;;  %v11604_v39 = vpop.f32.mrb[132].mxu0  ;;  %v13939_v14 = vsub.f32 1.0, %v13938_v19  ;;  %v7642_v45 = vpop.eup %7641  ;;  %7659 = vrcp.f32 %v3298_v63 }
 0x34f   : > { %v11602_v52 = vmul.f32 %v8330_v9, %v13936_v4  ;;  %v3305_v9 = vadd.f32 1.0, %v7640_v47  ;;  %v4682_v4 = vpop.f32.mrb[132].mxu1  ;;  %v13944_v55 = vld [vmem:[#allocation180_spill] sm:$0xff]  ;;  %v7644_v58 = vpop.eup %7643  ;;  %v3304_v54 = vadd.f32 1.0, %v7642_v45  ;;  %v4512_v47 = vadd.f32 %v11549_v16, %v11533_v57 }
 0x350   : > { %13933 = vst [vmem:[#allocation20_spill] sm:$0xff] %v11592_v38  ;;  %v11609_v38 = vmul.f32 %v8331_v41, %v13939_v14  ;;  %v13945_v12 = vsub.f32 1.0, %v13944_v55  ;;  %v8334_v41 = vld [vmem:[%s8740_s13 + $0x250] sm:$0xff]  ;;  %v13947_v14 = vld [vmem:[#allocation89_spill] sm:$0xff]  ;;  %7661 = vrcp.f32 %v3303_v56  ;;  %v11630_v63 = vpop.f32.mrb[133].mxu1  ;;  %v13951_v55 = vsub.f32 1.0, %v13950_v26 }
 0x351   : > { %13937 = vst [vmem:[#allocation102_spill] sm:$0xff] %v11602_v52  ;;  %v11616_v52 = vpop.f32.mrb[133].mxu0  ;;  %7663 = vrcp.f32 %v3305_v9  ;;  %v4673_v45 = vadd.f32 %v11554_v15, %v11533_v57  ;;  %v8336_v56 = vld [vmem:[%s8740_s13 + $0x258] sm:$0xff] }
 0x352   : > { %13940 = vst [vmem:[#allocation60_spill] sm:$0xff] %v11609_v38  ;;  %v11621_v27 = vmul.f32 %v8333_v0, %v13945_v12  ;;  %v13948_v38 = vsub.f32 1.0, %v13947_v14  ;;  %v11635_v12 = vmul.f32 %v8335_v33, %v13951_v55  ;;  %v7646_v0 = vpop.eup %7645  ;;  %7665 = vrcp.f32 %v3304_v54  ;;  %v11647_v55 = vpop.f32.mrb[134].mxu0  ;;  %v8337_v33 = vld [vmem:[%s8740_s13 + $0x280] sm:$0xff] }
 0x353   : > { %v7648_v57 = vpop.eup %7647 }
 0x354   : > { %13946 = vst [vmem:[#allocation23_spill] sm:$0xff] %v11621_v27  ;;  %v11626_v19 = vmul.f32 %v8334_v41, %v13948_v38  ;;  %13952 = vst [vmem:[#allocation103_spill] sm:$0xff] %v11635_v12  ;;  %v11637_v27 = vpop.permute.xlu1 %4322  ;;  %v3306_v38 = vadd.f32 1.0, %v7644_v58  ;;  %v13954_v41 = vld [vmem:[#allocation92_spill] sm:$0xff]  ;;  %v13957_v12 = vld [vmem:[#allocation93_spill] sm:$0xff] }
 0x355   : > { %13953 = vst [vmem:[#allocation62_spill] sm:$0xff] %v11637_v27  ;;  %v13955_v16 = vsub.f32 1.0, %v13954_v41  ;;  %v4516_v26 = vadd.f32 %v4515_v60, %v11637_v27  ;;  %v13958_v14 = vsub.f32 1.0, %v13957_v12  ;;  %v8338_v58 = vld [vmem:[%s8740_s13 + $0x290] sm:$0xff]  ;;  %v4677_v54 = vadd.f32 %v11568_v2, %v11637_v27  ;;  %v4688_v60 = vpop.f32.mrb[134].mxu1 }
 0x356   : > { %13949 = vst [vmem:[#allocation61_spill] sm:$0xff] %v11626_v19  ;;  %v11657_v15 = vmul.f32 %v8338_v58, %v13961_v25  ;;  %7667 = vrcp.f32 %v3306_v38  ;;  %v7650_v25 = vpop.eup %7649  ;;  %v11671_v58 = vpop.permute.xlu0 %4327  ;;  %v5471_v38 = vmul.f32 %v7648_v57, %v10675_v23  ;;  %v4518_v2 = vadd.f32 %v11570_v6, %v11637_v27 }
 0x357   : > { %v11644_v19 = vmul.f32 %v8336_v56, %v13955_v16  ;;  %v11652_v9 = vmul.f32 %v8337_v33, %v13958_v14  ;;  %v4529_v56 = vpop.f32.mrb[135].mxu0  ;;  %v8339_v16 = vld [vmem:[%s8740_s13 + $0x288] sm:$0xff]  ;;  %v8340_v14 = vld [vmem:[%s8740_s13 + $0x298] sm:$0xff]  ;;  %13969 = vst [vmem:[#allocation82_spill] sm:$0xff] %v11671_v58  ;;  %7669 = vtanh.f32 %v4512_v47  ;;  %v4679_v23 = vadd.f32 %v11582_v46, %v11637_v27 }
 0x358   : > { %13962 = vst [vmem:[#allocation76_spill] sm:$0xff] %v11657_v15  ;;  %v13966_v33 = vld [vmem:[#allocation96_spill] sm:$0xff]  ;;  %v4690_v15 = vpop.f32.mrb[135].mxu1  ;;  %7671 = vtanh.f32 %v4673_v45  ;;  %v4683_v45 = vadd.f32 %v4682_v4, %v11671_v58  ;;  %v11714_v27 = vpop.permute.xlu1 %4332 }
 0x359   : > { %13956 = vst [vmem:[#allocation64_spill] sm:$0xff] %v11644_v19  ;;  %13959 = vst [vmem:[#allocation65_spill] sm:$0xff] %v11652_v9  ;;  %v13963_v19 = vld [vmem:[#allocation95_spill] sm:$0xff]  ;;  %v13967_v9 = vsub.f32 1.0, %v13966_v33  ;;  %v8342_v33 = vld [vmem:[%s8740_s13 + $0x338] sm:$0xff]  ;;  %7673 = vtanh.f32 %v4516_v26 }
 0x35a   : > { %v13964_v41 = vsub.f32 1.0, %v13963_v19  ;;  %v13970_v19 = vld [vmem:[#allocation97_spill] sm:$0xff]  ;;  %v8343_v47 = vld [vmem:[%s8740_s13 + $0x378] sm:$0xff]  ;;  %7675 = vtanh.f32 %v4677_v54  ;;  %v8345_v54 = vld [vmem:[%s8740_s13 + $0x2c8] sm:$0xff]  ;;  %13979 = vst [vmem:[#allocation86_spill] sm:$0xff] %v11714_v27 }
 0x35b   : > { %v11669_v28 = vmul.f32 %v8340_v14, %v13967_v9  ;;  %v3922_v9 = vmul.f32 %v8342_v33, %v7646_v0  ;;  %v5473_v14 = vmul.f32 %v7650_v25, %v10677_v53  ;;  %v11691_v33 = vpop.f32.mrb[136].mxu1  ;;  %v8344_v25 = vld [vmem:[%s8740_s13 + $0x2d0] sm:$0xff]  ;;  %7677 = vtanh.f32 %v4518_v2  ;;  %v8346_v2 = vld [vmem:[%s8740_s13 + $0x2d8] sm:$0xff] }
 0x35c   : > { %v11664_v12 = vmul.f32 %v8339_v16, %v13964_v41  ;;  %v13971_v41 = vsub.f32 1.0, %v13970_v19  ;;  %v11707_v4 = vpop.f32.mrb[137].mxu1  ;;  %7679 = vtanh.f32 %v4679_v23  ;;  %v4689_v23 = vadd.f32 %v4688_v60, %v11714_v27 }
 0x35d   : > { %13968 = vst [vmem:[#allocation81_spill] sm:$0xff] %v11669_v28  ;;  %v5599_v28 = vadd.f32 %v5471_v38, %v11380_v13  ;;  %v5601_v53 = vadd.f32 %v5473_v14, %v11385_v11  ;;  %v4524_v11 = vadd.f32 %v11616_v52, %v11671_v58  ;;  %v13976_v38 = vld [vmem:[#allocation183_spill] sm:$0xff] }
 0x35e   : > { %13965 = vst [vmem:[#allocation107_spill] sm:$0xff] %v11664_v12  ;;  %v11679_v16 = vmul.f32 %v8341_v62, %v13971_v41  ;;  %v7652_v12 = vpop.eup %7651  ;;  %v4522_v62 = vadd.f32 %v11604_v39, %v11671_v58  ;;  %v4533_v41 = vpop.f32.mrb[136].mxu0  ;;  %v13977_v14 = vsub.f32 1.0, %v13976_v38 }
 0x35f   : > { %v7654_v57 = vpop.eup %7653  ;;  %v3930_v6 = vmul.f32 %v8343_v47, %v7652_v12  ;;  %v11693_v46 = vpop.f32.mrb[137].mxu0  ;;  %v13973_v12 = vld [vmem:[#allocation98_spill] sm:$0xff]  ;;  %5727 = vst [vmem:[%s11702_s18] sm:$0xff] %v5599_v28  ;;  %5729 = vst [vmem:[%s11702_s18 + $0x10] sm:$0xff] %v5601_v53  ;;  %v4685_v28 = vadd.f32 %v11630_v63, %v11671_v58  ;;  %v4528_v63 = vadd.f32 %v11647_v55, %v11714_v27 }
 0x360   : > { %13972 = vst [vmem:[#allocation83_spill] sm:$0xff] %v11679_v16  ;;  %v7656_v0 = vpop.eup %7655  ;;  %v13974_v47 = vsub.f32 1.0, %v13973_v12  ;;  %v13983_v16 = vld [vmem:[#allocation189_spill] sm:$0xff]  ;;  %7681 = vtanh.f32 %v4522_v62  ;;  %v4530_v53 = vadd.f32 %v4529_v56, %v11714_v27  ;;  %v4691_v55 = vadd.f32 %v4690_v15, %v11714_v27  ;;  %v8350_v56 = vld [vmem:[%s8740_s13 + $0x3b0] sm:$0xff]  ;;  %v8354_v12 = vld [vmem:[%s8740_s13 + $0x3b8] sm:$0xff] }
 0x361   : > { %v7658_v26 = vpop.eup %7657  ;;  %v6804_v39 = vpack.c.bf16 %v3930_v6, %v3922_v9  ;;  %v13980_v9 = vld [vmem:[#allocation188_spill] sm:$0xff]  ;;  %v13984_v38 = vsub.f32 1.0, %v13983_v16  ;;  %7683 = vtanh.f32 %v4683_v45  ;;  %v3937_v16 = vmul.f32 %v8350_v56, %v7656_v0 }
 0x362   : > { %v11698_v13 = vmul.f32 %v8344_v25, %v13974_v47  ;;  %v11712_v25 = vmul.f32 %v8345_v54, %v13977_v14  ;;  %v7660_v47 = vpop.eup %7659  ;;  %v13981_v6 = vsub.f32 1.0, %v13980_v9  ;;  %v8351_v9 = vld [vmem:[%s8740_s13 + $0x3f0] sm:$0xff]  ;;  %7685 = vtanh.f32 %v4524_v11 }
 0x363   : > { %v7662_v14 = vpop.eup %7661  ;;  %6805 = vmatprep.subr.bf16.mxu1 %v6804_v39  ;;  %v8349_v39 = vld [vmem:[%s8740_s13 + $0x3e0] sm:$0xff]  ;;  %7687 = vtanh.f32 %v4685_v28  ;;  %v3938_v19 = vmul.f32 %v8354_v12, %v7660_v47 }
 0x364   : > { %13975 = vst [vmem:[#allocation84_spill] sm:$0xff] %v11698_v13  ;;  %13978 = vst [vmem:[#allocation109_spill] sm:$0xff] %v11712_v25  ;;  %v11722_v52 = vmul.f32 %v8346_v2, %v13981_v6  ;;  %v8347_v13 = vld [vmem:[%s8740_s13 + $0x300] sm:$0xff]  ;;  %v11729_v25 = vpop.permute.xlu0 %4337  ;;  %v4539_v2 = vpop.f32.mrb[138].mxu0  ;;  %v3943_v62 = vmul.f32 %v8349_v39, %v7662_v14  ;;  %7689 = vtanh.f32 %v4528_v63 }
 0x365   : > { %v11727_v54 = vmul.f32 %v8347_v13, %v13984_v38  ;;  %13986 = vst [vmem:[#allocation177_spill] sm:$0xff] %v11729_v25  ;;  %v7664_v6 = vpop.eup %7663  ;;  %v13987_v13 = vpack.c.bf16 %v11546_v36, %v11543_v34  ;;  %v8348_v38 = vld [vmem:[%s8740_s13 + $0x3a0] sm:$0xff]  ;;  %v11741_v60 = vpop.f32.mrb[139].mxu0  ;;  %v4534_v36 = vadd.f32 %v4533_v41, %v11729_v25  ;;  %7691 = vtanh.f32 %v4689_v23 }
 0x366   : > { %13982 = vst [vmem:[#allocation175_spill] sm:$0xff] %v11722_v52  ;;  %v3935_v58 = vmul.f32 %v8348_v38, %v7654_v57  ;;  %v7666_v52 = vpop.eup %7665  ;;  %v3945_v34 = vmul.f32 %v8351_v9, %v7664_v6  ;;  %v8353_v38 = vld [vmem:[%s8740_s13 + $0x3e8] sm:$0xff]  ;;  %v4545_v9 = vpop.f32.mrb[140].mxu0  ;;  %7693 = vtanh.f32 %v4530_v53 }
 0x367   : > { %13985 = vst [vmem:[#allocation176_spill] sm:$0xff] %v11727_v54  ;;  %6807 = vmatpush1.bf16.msra.mxu1 %v13987_v13  ;;  %v4700_v54 = vpop.f32.mrb[138].mxu1  ;;  %v7668_v14 = vpop.eup %7667  ;;  %v8352_v13 = vld [vmem:[%s8740_s13 + $0x3a8] sm:$0xff]  ;;  %v3944_v15 = vmul.f32 %v8353_v38, %v7666_v52  ;;  %7695 = vtanh.f32 %v4691_v55 }
 0x368   : > { %v11746_v57 = vpop.f32.mrb[139].mxu1  ;;  %v3936_v45 = vmul.f32 %v8352_v13, %v7658_v26  ;;  %v6762_v39 = vpack.c.bf16 %v3943_v62, %v3935_v58  ;;  %v7670_v27 = vpop.eup %7669  ;;  %v3946_v0 = vmul.f32 %v8355_v32, %v7668_v14  ;;  %v6810_v56 = vpack.c.bf16 %v3945_v34, %v3937_v16  ;;  %v13990_v34 = vld [vmem:[#allocation26_spill] sm:$0xff] }
 0x369   : > { %v7672_v11 = vpop.eup %7671  ;;  %v5472_v41 = vmul.f32 %v7670_v27, %v10680_v61  ;;  %v4695_v26 = vadd.f32 %v11691_v33, %v11729_v25  ;;  %v11755_v13 = vpop.f32.mrb[140].mxu1  ;;  %v4536_v32 = vadd.f32 %v11693_v46, %v11729_v25  ;;  %7697 = vtanh.f32 %v4534_v36 }
 0x36a   : > { %v6760_v6 = vpack.c.bf16 %v3944_v15, %v3936_v45  ;;  %v11757_v58 = vpop.f32.mrb[141].mxu0  ;;  %v7674_v28 = vpop.eup %7673  ;;  %v6808_v52 = vpack.c.bf16 %v3946_v0, %v3938_v19  ;;  %v5474_v12 = vmul.f32 %v7672_v11, %v10684_v40  ;;  %v4697_v19 = vadd.f32 %v11707_v4, %v11729_v25 }
 0x36b   : > { %v11762_v16 = vpop.f32.mrb[141].mxu1  ;;  %v7676_v47 = vpop.eup %7675  ;;  %v5600_v27 = vadd.f32 %v5472_v41, %v11390_v44  ;;  %v5479_v33 = vmul.f32 %v7674_v28, %v10689_v7  ;;  %v13989_v7 = vld [vmem:[#allocation25_spill] sm:$0xff]  ;;  %7699 = vtanh.f32 %v4695_v26  ;;  %v13995_v28 = vld [vmem:[#allocation30_spill] sm:$0xff] }
 0x36c   : > { %v11764_v61 = vpop.permute.xlu1 %4342  ;;  %6761 = vmatprep.subr.bf16.mxu0 %v6760_v6  ;;  %v7678_v40 = vpop.eup %7677  ;;  %6809 = vmatprep.subr.bf16.mxu1 %v6808_v52  ;;  %v5602_v46 = vadd.f32 %v5474_v12, %v11395_v18  ;;  %v5481_v63 = vmul.f32 %v7676_v47, %v10695_v3  ;;  %7701 = vtanh.f32 %v4536_v32  ;;  %v13994_v6 = vld [vmem:[#allocation29_spill] sm:$0xff] }
 0x36d   : > { %13988 = vst [vmem:[#allocation114_spill] sm:$0xff] %v11764_v61  ;;  %6763 = vmatpush1.bf16.msra.mxu0 %v6762_v39  ;;  %v4540_v23 = vadd.f32 %v4539_v2, %v11764_v61  ;;  %v11773_v53 = vpop.f32.mrb[142].mxu0  ;;  %v7680_v44 = vpop.eup %7679  ;;  %6811 = vmatpush1.bf16.msra.mxu1 %v6810_v56  ;;  %5728 = vst [vmem:[%s11702_s18 + $0x8] sm:$0xff] %v5600_v27  ;;  %v5607_v4 = vadd.f32 %v5479_v33, %v11400_v1  ;;  %7703 = vtanh.f32 %v4697_v19  ;;  %v13992_v39 = vld [vmem:[#allocation27_spill] sm:$0xff] }
 0x36e   : > { %6765 = vmatprep.subr.bf16.mxu0 %v13989_v7  ;;  %v5480_v62 = vmul.f32 %v7678_v40, %v10700_v43  ;;  %v4701_v18 = vadd.f32 %v4700_v54, %v11764_v61  ;;  %v11780_v3 = vpop.f32.mrb[142].mxu1  ;;  %v11782_v55 = vpop.f32.mrb[143].mxu0  ;;  %6813 = vmatprep.subr.bf16.mxu1 %v13990_v34  ;;  %5730 = vst [vmem:[%s11702_s18 + $0x18] sm:$0xff] %v5602_v46  ;;  %v13997_v33 = vld [vmem:[#allocation31_spill] sm:$0xff]  ;;  %v13998_v46 = vld [vmem:[#allocation32_spill] sm:$0xff]  ;;  %v14000_v7 = vld [vmem:[#allocation34_spill] sm:$0xff] }
 0x36f   : > { %v7682_v2 = vpop.eup %7681  ;;  %v5609_v36 = vadd.f32 %v5481_v63, %v11405_v37  ;;  %v5482_v14 = vmul.f32 %v7680_v44, %v10710_v20  ;;  %v4542_v43 = vadd.f32 %v11741_v60, %v11764_v61  ;;  %v11790_v1 = vpop.f32.mrb[143].mxu1  ;;  %5735 = vst [vmem:[%s11702_s18 + $0x40] sm:$0xff] %v5607_v4  ;;  %v4703_v37 = vadd.f32 %v11746_v57, %v11764_v61  ;;  %v13999_v63 = vld [vmem:[#allocation33_spill] sm:$0xff]  ;;  %v14003_v34 = vld [vmem:[#allocation46_spill] sm:$0xff] }
 0x370   : > { %v7684_v54 = vpop.eup %7683  ;;  %v11792_v45 = vpop.permute.xlu0 %4347  ;;  %v5608_v38 = vadd.f32 %v5480_v62, %v11410_v42  ;;  %v5487_v15 = vmul.f32 %v7682_v2, %v10715_v31  ;;  %7705 = vtanh.f32 %v4540_v23  ;;  %v13993_v31 = vld [vmem:[#allocation28_spill] sm:$0xff] }
 0x371   : > { %13991 = vst [vmem:[#allocation87_spill] sm:$0xff] %v11792_v45  ;;  %v7686_v20 = vpop.eup %7685  ;;  %6767 = vmatpush1.bf16.msra.mxu0 %v13992_v39  ;;  %5737 = vst [vmem:[%s11702_s18 + $0x50] sm:$0xff] %v5609_v36  ;;  %v5610_v60 = vadd.f32 %v5482_v14, %v11415_v10  ;;  %v5489_v0 = vmul.f32 %v7684_v54, %v10757_v29  ;;  %v4546_v56 = vadd.f32 %v4545_v9, %v11792_v45  ;;  %v11804_v11 = vpop.f32.mrb[144].mxu0  ;;  %v14001_v62 = vld [vmem:[#allocation12_spill] sm:$0xff] }
 0x372   : > { %v7688_v42 = vpop.eup %7687  ;;  %6815 = vmatpush1.bf16.msra.mxu1 %v13993_v31  ;;  %6769 = vmatprep.subr.bf16.mxu0 %v13994_v6  ;;  %5736 = vst [vmem:[%s11702_s18 + $0x48] sm:$0xff] %v5608_v38  ;;  %v5615_v57 = vadd.f32 %v5487_v15, %v11420_v59  ;;  %v5488_v41 = vmul.f32 %v7686_v20, %v10767_v21  ;;  %7707 = vtanh.f32 %v4701_v18  ;;  %v11813_v10 = vpop.f32.mrb[144].mxu1  ;;  %v14004_v14 = vld [vmem:[#allocation56_spill] sm:$0xff]  ;;  %v14005_v38 = vld [vmem:[#allocation35_spill] sm:$0xff] }
 0x373   : > { %v4707_v29 = vadd.f32 %v11755_v13, %v11792_v45  ;;  %v11815_v9 = vpop.f32.mrb[145].mxu0  ;;  %v7690_v26 = vpop.eup %7689  ;;  %6817 = vmatprep.subr.bf16.mxu1 %v13995_v28  ;;  %5738 = vst [vmem:[%s11702_s18 + $0x58] sm:$0xff] %v5610_v60  ;;  %v5617_v52 = vadd.f32 %v5489_v0, %v11425_v24  ;;  %v5490_v59 = vmul.f32 %v7688_v42, %v13792_v49  ;;  %7709 = vtanh.f32 %v4542_v43  ;;  %v14007_v0 = vld [vmem:[#allocation36_spill] sm:$0xff]  ;;  %v14012_v28 = vld [vmem:[#allocation18_spill] sm:$0xff] }
 0x374   : > { %v4548_v21 = vadd.f32 %v11757_v58, %v11792_v45  ;;  %v11823_v12 = vpop.f32.mrb[145].mxu1  ;;  %v7692_v13 = vpop.eup %7691  ;;  %5743 = vst [vmem:[%s11702_s18 + $0x80] sm:$0xff] %v5615_v57  ;;  %v5616_v47 = vadd.f32 %v5488_v41, %v11430_v5  ;;  %v5495_v27 = vmul.f32 %v7690_v26, %v13793_v17  ;;  %7711 = vtanh.f32 %v4703_v37  ;;  %v14010_v41 = vld [vmem:[#allocation38_spill] sm:$0xff] }
 0x375   : > { %v11825_v32 = vpop.permute.xlu1 %4352  ;;  %v4709_v24 = vadd.f32 %v11762_v16, %v11792_v45  ;;  %v7694_v49 = vpop.eup %7693  ;;  %6771 = vmatpush1.bf16.msra.mxu0 %v13997_v33  ;;  %5745 = vst [vmem:[%s11702_s18 + $0x90] sm:$0xff] %v5617_v52  ;;  %v5618_v58 = vadd.f32 %v5490_v59, %v11435_v30  ;;  %v5497_v19 = vmul.f32 %v7692_v13, %v13794_v35  ;;  %7713 = vtanh.f32 %v4546_v56  ;;  %v14008_v56 = vld [vmem:[#allocation37_spill] sm:$0xff] }
 0x376   : > { %13996 = vst [vmem:[#allocation88_spill] sm:$0xff] %v11825_v32  ;;  %v4552_v40 = vadd.f32 %v11773_v53, %v11825_v32  ;;  %v11838_v5 = vpop.f32.mrb[146].mxu0  ;;  %v7696_v17 = vpop.eup %7695  ;;  %6819 = vmatpush1.bf16.msra.mxu1 %v13998_v46  ;;  %6773 = vmatprep.subr.bf16.mxu0 %v13999_v63  ;;  %5744 = vst [vmem:[%s11702_s18 + $0x88] sm:$0xff] %v5616_v47  ;;  %v5623_v16 = vadd.f32 %v5495_v27, %v11442_v51  ;;  %7715 = vtanh.f32 %v4707_v29  ;;  %v14011_v29 = vld [vmem:[#allocation48_spill] sm:$0xff]  ;;  %v14014_v13 = vld [vmem:[#allocation49_spill] sm:$0xff] }
 0x377   : > { %v5496_v30 = vmul.f32 %v7694_v49, %v13795_v8  ;;  %v4713_v35 = vadd.f32 %v11780_v3, %v11825_v32  ;;  %v11847_v23 = vpop.f32.mrb[146].mxu1  ;;  %v11849_v53 = vpop.f32.mrb[147].mxu0  ;;  %6821 = vmatprep.subr.bf16.mxu1 %v14000_v7  ;;  %5746 = vst [vmem:[%s11702_s18 + $0x98] sm:$0xff] %v5618_v58  ;;  %v5625_v4 = vadd.f32 %v5497_v19, %v11451_v22  ;;  %7717 = vtanh.f32 %v4548_v21  ;;  %v14015_v27 = vld [vmem:[#allocation57_spill] sm:$0xff]  ;;  %v14016_v58 = vld [vmem:[#allocation40_spill] sm:$0xff] }
 0x378   : > { %v7698_v44 = vpop.eup %7697  ;;  %v5498_v51 = vmul.f32 %v7696_v17, %v14001_v62  ;;  %v4554_v8 = vadd.f32 %v11782_v55, %v11825_v32  ;;  %v11857_v18 = vpop.f32.mrb[147].mxu1  ;;  %5751 = vst [vmem:[%s11702_s18 + $0xc0] sm:$0xff] %v5623_v16  ;;  %7719 = vtanh.f32 %v4709_v24  ;;  %v4715_v22 = vadd.f32 %v11790_v1, %v11825_v32  ;;  %v14006_v55 = vld [vmem:[#allocation99_spill] sm:$0xff]  ;;  %v14213_v32 = vld [vmem:[#allocation132_spill] sm:$0xff] }
 0x379   : > { %v7700_v3 = vpop.eup %7699  ;;  %v11859_v2 = vpop.permute.xlu0 %4357  ;;  %v5624_v36 = vadd.f32 %v5496_v30, %v14003_v34  ;;  %v5503_v43 = vmul.f32 %v7698_v44, %v14004_v14  ;;  %6775 = vmatpush1.bf16.msra.mxu0 %v14005_v38  ;;  %5753 = vst [vmem:[%s11702_s18 + $0xd0] sm:$0xff] %v5625_v4  ;;  %7721 = vtanh.f32 %v4552_v40  ;;  %v14009_v1 = vld [vmem:[#allocation47_spill] sm:$0xff]  ;;  %v14018_v40 = vld [vmem:[#allocation58_spill] sm:$0xff] }
 0x37a   : > { %14002 = vst [vmem:[#allocation179_spill] sm:$0xff] %v11859_v2  ;;  %v7702_v54 = vpop.eup %7701  ;;  %v5626_v15 = vadd.f32 %v5498_v51, %v14006_v55  ;;  %v5505_v37 = vmul.f32 %v7700_v3, %v13890_v50  ;;  %v4558_v20 = vadd.f32 %v11804_v11, %v11859_v2  ;;  %v11872_v39 = vpop.f32.mrb[148].mxu0  ;;  %6823 = vmatpush1.bf16.msra.mxu1 %v14007_v0  ;;  %7723 = vtanh.f32 %v4713_v35  ;;  %v14019_v30 = vld [vmem:[#allocation39_spill] sm:$0xff]  ;;  %v14023_v34 = vld [vmem:[#allocation66_spill] sm:$0xff] }
 0x37b   : > { %v7704_v60 = vpop.eup %7703  ;;  %6777 = vmatprep.subr.bf16.mxu0 %v14008_v56  ;;  %5752 = vst [vmem:[%s11702_s18 + $0xc8] sm:$0xff] %v5624_v36  ;;  %v5631_v42 = vadd.f32 %v5503_v43, %v14009_v1  ;;  %v5504_v31 = vmul.f32 %v7702_v54, %v13893_v48  ;;  %v4719_v50 = vadd.f32 %v11813_v10, %v11859_v2  ;;  %v11881_v6 = vpop.f32.mrb[148].mxu1  ;;  %7725 = vtanh.f32 %v4554_v8  ;;  %v14021_v44 = vld [vmem:[#allocation63_spill] sm:$0xff]  ;;  %v14022_v8 = vld [vmem:[#allocation9_spill] sm:$0xff]  ;;  %v14025_v38 = vld [vmem:[#allocation10_spill] sm:$0xff] }
 0x37c   : > { %v11883_v11 = vpop.f32.mrb[149].mxu0  ;;  %v7706_v57 = vpop.eup %7705  ;;  %6825 = vmatprep.subr.bf16.mxu1 %v14010_v41  ;;  %5754 = vst [vmem:[%s11702_s18 + $0xd8] sm:$0xff] %v5626_v15  ;;  %v5633_v26 = vadd.f32 %v5505_v37, %v14011_v29  ;;  %v5506_v52 = vmul.f32 %v7704_v60, %v14012_v28  ;;  %v4560_v48 = vadd.f32 %v11815_v9, %v11859_v2  ;;  %7727 = vtanh.f32 %v4715_v22  ;;  %v14017_v9 = vld [vmem:[#allocation51_spill] sm:$0xff]  ;;  %v14026_v15 = vld [vmem:[#allocation68_spill] sm:$0xff]  ;;  %v14027_v0 = vld [vmem:[#allocation54_spill] sm:$0xff] }
 0x37d   : > { %v11891_v59 = vpop.f32.mrb[149].mxu1  ;;  %v7708_v10 = vpop.eup %7707  ;;  %5759 = vst [vmem:[%s11702_s18 + $0x100] sm:$0xff] %v5631_v42  ;;  %v5632_v47 = vadd.f32 %v5504_v31, %v14014_v13  ;;  %v5511_v24 = vmul.f32 %v7706_v57, %v14015_v27  ;;  %v4721_v49 = vadd.f32 %v11823_v12, %v11859_v2  ;;  %6779 = vmatpush1.bf16.msra.mxu0 %v14016_v58  ;;  %7729 = vtanh.f32 %v4558_v20  ;;  %v14020_v12 = vld [vmem:[#allocation100_spill] sm:$0xff]  ;;  %v14028_v1 = vld [vmem:[#allocation69_spill] sm:$0xff]  ;;  %v14029_v57 = vld [vmem:[#allocation11_spill] sm:$0xff] }
 0x37e   : > { %v11893_v21 = vpop.permute.xlu1 %4362  ;;  %v7710_v33 = vpop.eup %7709  ;;  %5761 = vst [vmem:[%s11702_s18 + $0x110] sm:$0xff] %v5633_v26  ;;  %v5634_v19 = vadd.f32 %v5506_v52, %v14017_v9  ;;  %v5513_v17 = vmul.f32 %v7708_v10, %v14018_v40  ;;  %6827 = vmatpush1.bf16.msra.mxu1 %v14019_v30  ;;  %7731 = vtanh.f32 %v4719_v50  ;;  %v8357_v60 = vld [vmem:[%s13119_s3 + $0x18] sm:$0xff]  ;;  %v14030_v29 = vld [vmem:[#allocation71_spill] sm:$0xff]  ;;  %v14035_v40 = vld [vmem:[#allocation73_spill] sm:$0xff] }
 0x37f   : > { %14013 = vst [vmem:[#allocation181_spill] sm:$0xff] %v11893_v21  ;;  %v4564_v46 = vadd.f32 %v11838_v5, %v11893_v21  ;;  %v11906_v63 = vpop.f32.mrb[150].mxu0  ;;  %v7712_v16 = vpop.eup %7711  ;;  %5760 = vst [vmem:[%s11702_s18 + $0x108] sm:$0xff] %v5632_v47  ;;  %v5639_v35 = vadd.f32 %v5511_v24, %v14020_v12  ;;  %v5512_v7 = vmul.f32 %v7710_v33, %v14021_v44  ;;  %7733 = vtanh.f32 %v4560_v48  ;;  %v14031_v10 = vld [vmem:[#allocation52_spill] sm:$0xff]  ;;  %v14036_v30 = vld [vmem:[#allocation17_spill] sm:$0xff] }
 0x380   : > { %v4725_v4 = vadd.f32 %v11847_v23, %v11893_v21  ;;  %v11914_v62 = vpop.f32.mrb[150].mxu1  ;;  %v11916_v51 = vpop.f32.mrb[151].mxu0  ;;  %5762 = vst [vmem:[%s11702_s18 + $0x118] sm:$0xff] %v5634_v19  ;;  %v5641_v3 = vadd.f32 %v5513_v17, %v14022_v8  ;;  %v5514_v36 = vmul.f32 %v7712_v16, %v14023_v34  ;;  %v4566_v14 = vadd.f32 %v11849_v53, %v11893_v21  ;;  %v8356_v23 = vld [vmem:[%s13119_s3] sm:$0xff]  ;;  %v14032_v47 = vld [vmem:[#allocation72_spill] sm:$0xff]  ;;  %v8359_v16 = vld [vmem:[%s13119_s3 + $0x28] sm:$0xff] }
 0x381   : > { %v7714_v5 = vpop.eup %7713  ;;  %v11923_v43 = vpop.f32.mrb[151].mxu1  ;;  %4830 = vmatmul.mubr.f32.vlgmr.msra.gmra.mrb[160].mxu0 %v8356_v23  ;;  %5767 = vst [vmem:[%s11702_s18 + $0x140] sm:$0xff] %v5639_v35  ;;  %v5640_v55 = vadd.f32 %v5512_v7, %v14025_v38  ;;  %7735 = vtanh.f32 %v4721_v49  ;;  %v4727_v53 = vadd.f32 %v11857_v18, %v11893_v21  ;;  %4991 = vmatmul.mubr.f32.vlgmr.msra.gmra.mrb[160].mxu1 %v8356_v23  ;;  %v14034_v9 = vld [vmem:[#allocation16_spill] sm:$0xff]  ;;  %v14037_v35 = vld [vmem:[#allocation74_spill] sm:$0xff]  ;;  %v14040_v23 = vld [vmem:[#allocation19_spill] sm:$0xff] }
 0x382   : > { %v7716_v22 = vpop.eup %7715  ;;  %v11925_v54 = vpop.permute.xlu0 %4367  ;;  %v5519_v37 = vmul.f32 %v7714_v5, %v14026_v15  ;;  %6405 = vmatprep.mubr.msk.f32.mxu0 %vm1158_vm0, %v8357_v60  ;;  %5769 = vst [vmem:[%s11702_s18 + $0x150] sm:$0xff] %v5641_v3  ;;  %v5642_v56 = vadd.f32 %v5514_v36, %v14027_v0  ;;  %7737 = vtanh.f32 %v4564_v46  ;;  %6421 = vmatprep.mubr.msk.f32.mxu1 %vm1158_vm0, %v8357_v60  ;;  %v14038_v5 = vld [vmem:[#allocation101_spill] sm:$0xff]  ;;  %v14039_v3 = vld [vmem:[#allocation75_spill] sm:$0xff] }
 0x383   : > { %14024 = vst [vmem:[#allocation118_spill] sm:$0xff] %v11925_v54  ;;  %v7718_v20 = vpop.eup %7717  ;;  %v5521_v42 = vmul.f32 %v7716_v22, %v14028_v1  ;;  %v4570_v31 = vadd.f32 %v11872_v39, %v11925_v54  ;;  %v11944_v50 = vpop.f32.mrb[152].mxu0  ;;  %5768 = vst [vmem:[%s11702_s18 + $0x148] sm:$0xff] %v5640_v55  ;;  %7739 = vtanh.f32 %v4725_v4  ;;  %v4731_v28 = vadd.f32 %v11881_v6, %v11925_v54  ;;  %v8358_v6 = vld [vmem:[%s13119_s3 + $0x10] sm:$0xff]  ;;  %v14041_v55 = vld [vmem:[#allocation77_spill] sm:$0xff] }
 0x384   : > { %v7720_v18 = vpop.eup %7719  ;;  %v5647_v41 = vadd.f32 %v5519_v37, %v14029_v57  ;;  %v5520_v26 = vmul.f32 %v7718_v20, %v14030_v29  ;;  %v11952_v52 = vpop.f32.mrb[152].mxu1  ;;  %5770 = vst [vmem:[%s11702_s18 + $0x158] sm:$0xff] %v5642_v56  ;;  %7741 = vtanh.f32 %v4566_v14  ;;  %v4572_v24 = vadd.f32 %v11883_v11, %v11925_v54  ;;  %v14043_v0 = vld [vmem:[#allocation59_spill] sm:$0xff]  ;;  %v14044_v1 = vld [vmem:[#allocation78_spill] sm:$0xff]  ;;  %v14045_v57 = vld [vmem:[#allocation20_spill] sm:$0xff] }
 0x385   : > { %v11954_v48 = vpop.f32.mrb[153].mxu0  ;;  %v7722_v39 = vpop.eup %7721  ;;  %v5649_v13 = vadd.f32 %v5521_v42, %v14031_v10  ;;  %v5522_v27 = vmul.f32 %v7720_v18, %v14032_v47  ;;  %4836 = vmatmul.mubr.f32.gmra.mrb[162].mxu0 %v8358_v6  ;;  %7743 = vtanh.f32 %v4727_v53  ;;  %v4733_v11 = vadd.f32 %v11891_v59, %v11925_v54  ;;  %4997 = vmatmul.mubr.f32.gmra.mrb[162].mxu1 %v8358_v6  ;;  %v8361_v18 = vld [vmem:[%s13119_s3 + $0x38] sm:$0xff]  ;;  %v14046_v29 = vld [vmem:[#allocation79_spill] sm:$0xff]  ;;  %v14047_v10 = vld [vmem:[#allocation21_spill] sm:$0xff] }
 0x386   : > { %v11961_v49 = vpop.f32.mrb[153].mxu1  ;;  %v7724_v33 = vpop.eup %7723  ;;  %5775 = vst [vmem:[%s11702_s18 + $0x180] sm:$0xff] %v5647_v41  ;;  %v5648_v19 = vadd.f32 %v5520_v26, %v14034_v9  ;;  %v5527_v17 = vmul.f32 %v7722_v39, %v14035_v40  ;;  %6406 = vmatprep.mubr.msk.f32.mxu0 %vm1158_vm0, %v8359_v16  ;;  %7745 = vtanh.f32 %v4570_v31  ;;  %6422 = vmatprep.mubr.msk.f32.mxu1 %vm1158_vm0, %v8359_v16  ;;  %v14048_v47 = vld [vmem:[#allocation80_spill] sm:$0xff]  ;;  %v14049_v9 = vld [vmem:[#allocation102_spill] sm:$0xff] }
 0x387   : > { %v11963_v58 = vpop.permute.xlu1 %4372  ;;  %v7726_v46 = vpop.eup %7725  ;;  %5777 = vst [vmem:[%s11702_s18 + $0x190] sm:$0xff] %v5649_v13  ;;  %v5650_v12 = vadd.f32 %v5522_v27, %v14036_v30  ;;  %v5529_v44 = vmul.f32 %v7724_v33, %v14037_v35  ;;  %7747 = vtanh.f32 %v4731_v28  ;;  %v14050_v40 = vld [vmem:[#allocation178_spill] sm:$0xff] }
 0x388   : > { %14033 = vst [vmem:[#allocation184_spill] sm:$0xff] %v11963_v58  ;;  %v4576_v7 = vadd.f32 %v11906_v63, %v11963_v58  ;;  %v11982_v4 = vpop.f32.mrb[154].mxu0  ;;  %v7728_v59 = vpop.eup %7727  ;;  %5776 = vst [vmem:[%s11702_s18 + $0x188] sm:$0xff] %v5648_v19  ;;  %v5655_v8 = vadd.f32 %v5527_v17, %v14038_v5  ;;  %v5528_v34 = vmul.f32 %v7726_v46, %v14039_v3  ;;  %7749 = vtanh.f32 %v4572_v24  ;;  %v8363_v5 = vld [vmem:[%s13119_s3 + $0x48] sm:$0xff] }
 0x389   : > { %v4737_v36 = vadd.f32 %v11914_v62, %v11963_v58  ;;  %v11990_v14 = vpop.f32.mrb[154].mxu1  ;;  %v11992_v22 = vpop.f32.mrb[155].mxu0  ;;  %5778 = vst [vmem:[%s11702_s18 + $0x198] sm:$0xff] %v5650_v12  ;;  %v5657_v38 = vadd.f32 %v5529_v44, %v14040_v23  ;;  %v5530_v15 = vmul.f32 %v7728_v59, %v14041_v55  ;;  %v4578_v37 = vadd.f32 %v11916_v51, %v11963_v58  ;;  %v8360_v62 = vld [vmem:[%s13119_s3 + $0x20] sm:$0xff]  ;;  %v14052_v12 = vld [vmem:[#allocation60_spill] sm:$0xff] }
 0x38a   : > { %v7730_v63 = vpop.eup %7729  ;;  %v11999_v53 = vpop.f32.mrb[155].mxu1  ;;  %4842 = vmatmul.mubr.f32.gmra.mrb[164].mxu0 %v8360_v62  ;;  %5783 = vst [vmem:[%s11702_s18 + $0x1c0] sm:$0xff] %v5655_v8  ;;  %v5656_v56 = vadd.f32 %v5528_v34, %v14043_v0  ;;  %7751 = vtanh.f32 %v4733_v11  ;;  %v4739_v51 = vadd.f32 %v11923_v43, %v11963_v58  ;;  %5003 = vmatmul.mubr.f32.gmra.mrb[164].mxu1 %v8360_v62  ;;  %v14053_v44 = vld [vmem:[#allocation180_spill] sm:$0xff]  ;;  %v14054_v8 = vld [vmem:[#allocation22_spill] sm:$0xff]  ;;  %v14055_v34 = vld [vmem:[#allocation89_spill] sm:$0xff] }
 0x38b   : > { %v7732_v20 = vpop.eup %7731  ;;  %v12001_v60 = vpop.permute.xlu0 %4377  ;;  %v5535_v42 = vmul.f32 %v7730_v63, %v14044_v1  ;;  %6407 = vmatprep.mubr.msk.f32.mxu0 %vm1158_vm0, %v8361_v18  ;;  %5785 = vst [vmem:[%s11702_s18 + $0x1d0] sm:$0xff] %v5657_v38  ;;  %v5658_v41 = vadd.f32 %v5530_v15, %v14045_v57  ;;  %7753 = vtanh.f32 %v4576_v7  ;;  %6423 = vmatprep.mubr.msk.f32.mxu1 %vm1158_vm0, %v8361_v18  ;;  %v14056_v38 = vld [vmem:[#allocation23_spill] sm:$0xff]  ;;  %v14057_v15 = vld [vmem:[#allocation90_spill] sm:$0xff] }
 0x38c   : > { %14042 = vst [vmem:[#allocation185_spill] sm:$0xff] %v12001_v60  ;;  %v7734_v31 = vpop.eup %7733  ;;  %v5537_v26 = vmul.f32 %v7732_v20, %v14046_v29  ;;  %v4582_v28 = vadd.f32 %v11944_v50, %v12001_v60  ;;  %v12020_v39 = vpop.f32.mrb[156].mxu0  ;;  %5784 = vst [vmem:[%s11702_s18 + $0x1c8] sm:$0xff] %v5656_v56  ;;  %7755 = vtanh.f32 %v4737_v36  ;;  %v4743_v24 = vadd.f32 %v11952_v52, %v12001_v60  ;;  %v8362_v52 = vld [vmem:[%s13119_s3 + $0x30] sm:$0xff]  ;;  %v14058_v56 = vld [vmem:[#allocation61_spill] sm:$0xff] }
 0x38d   : > { %v7736_v43 = vpop.eup %7735  ;;  %v5663_v13 = vadd.f32 %v5535_v42, %v14047_v10  ;;  %v5536_v27 = vmul.f32 %v7734_v31, %v14048_v47  ;;  %v12028_v33 = vpop.f32.mrb[156].mxu1  ;;  %5786 = vst [vmem:[%s11702_s18 + $0x1d8] sm:$0xff] %v5658_v41  ;;  %7757 = vtanh.f32 %v4578_v37  ;;  %v4584_v11 = vadd.f32 %v11954_v48, %v12001_v60  ;;  %v14059_v42 = vld [vmem:[#allocation92_spill] sm:$0xff]  ;;  %v14061_v29 = vld [vmem:[#allocation103_spill] sm:$0xff] }
 0x38e   : > { %v12030_v6 = vpop.f32.mrb[157].mxu0  ;;  %v7738_v50 = vpop.eup %7737  ;;  %v5665_v19 = vadd.f32 %v5537_v26, %v14049_v9  ;;  %v5538_v17 = vmul.f32 %v7736_v43, %v14050_v40  ;;  %4848 = vmatmul.mubr.f32.gmra.mrb[166].mxu0 %v8362_v52  ;;  %7759 = vtanh.f32 %v4739_v51  ;;  %v4745_v48 = vadd.f32 %v11961_v49, %v12001_v60  ;;  %5009 = vmatmul.mubr.f32.gmra.mrb[166].mxu1 %v8362_v52  ;;  %v14063_v47 = vld [vmem:[#allocation64_spill] sm:$0xff]  ;;  %v14206_v58 = vld [vmem:[#allocation127_spill] sm:$0xff] }
 0x38f   : > { %v12037_v46 = vpop.f32.mrb[157].mxu1  ;;  %v7740_v16 = vpop.eup %7739  ;;  %5791 = vst [vmem:[%s11702_s18 + $0x200] sm:$0xff] %v5663_v13  ;;  %v5664_v35 = vadd.f32 %v5536_v27, %v14052_v12  ;;  %v5543_v7 = vmul.f32 %v7738_v50, %v14053_v44  ;;  %6408 = vmatprep.mubr.msk.f32.mxu0 %vm1158_vm0, %v8363_v5  ;;  %7761 = vtanh.f32 %v4582_v28  ;;  %6424 = vmatprep.mubr.msk.f32.mxu1 %vm1158_vm0, %v8363_v5  ;;  %v14062_v28 = vld [vmem:[#allocation93_spill] sm:$0xff]  ;;  %v8365_v13 = vld [vmem:[%s13119_s3 + $0x58] sm:$0xff]  ;;  %v8366_v5 = vld [vmem:[%s13119_s3 + $0x50] sm:$0xff] }
 0x390   : > { %v12039_v30 = vpop.permute.xlu1 %4382  ;;  %v7742_v59 = vpop.eup %7741  ;;  %5793 = vst [vmem:[%s11702_s18 + $0x210] sm:$0xff] %v5665_v19  ;;  %v5666_v3 = vadd.f32 %v5538_v17, %v14054_v8  ;;  %v5545_v36 = vmul.f32 %v7740_v16, %v14055_v34  ;;  %7763 = vtanh.f32 %v4743_v24  ;;  %v14064_v24 = vld [vmem:[#allocation94_spill] sm:$0xff]  ;;  %v14066_v17 = vld [vmem:[#allocation95_spill] sm:$0xff]  ;;  %v14067_v12 = vld [vmem:[#allocation76_spill] sm:$0xff] }
 0x391   : > { %14051 = vst [vmem:[#allocation186_spill] sm:$0xff] %v12039_v30  ;;  %v4588_v63 = vadd.f32 %v11982_v4, %v12039_v30  ;;  %v12058_v23 = vpop.f32.mrb[158].mxu0  ;;  %v7744_v49 = vpop.eup %7743  ;;  %5792 = vst [vmem:[%s11702_s18 + $0x208] sm:$0xff] %v5664_v35  ;;  %v5671_v55 = vadd.f32 %v5543_v7, %v14056_v38  ;;  %v5544_v37 = vmul.f32 %v7742_v59, %v14057_v15  ;;  %7765 = vtanh.f32 %v4584_v11  ;;  %v14068_v44 = vld [vmem:[#allocation96_spill] sm:$0xff] }
 0x392   : > { %v4749_v20 = vadd.f32 %v11990_v14, %v12039_v30  ;;  %v12066_v62 = vpop.f32.mrb[158].mxu1  ;;  %v12068_v0 = vpop.f32.mrb[159].mxu0  ;;  %5794 = vst [vmem:[%s11702_s18 + $0x218] sm:$0xff] %v5666_v3  ;;  %v5673_v1 = vadd.f32 %v5545_v36, %v14058_v56  ;;  %v5546_v51 = vmul.f32 %v7744_v49, %v14059_v42  ;;  %v4590_v31 = vadd.f32 %v11992_v22, %v12039_v30  ;;  %v8364_v14 = vld [vmem:[%s13119_s3 + $0x40] sm:$0xff]  ;;  %v14075_v56 = vld [vmem:[#allocation183_spill] sm:$0xff] }
 0x393   : > { %v7746_v4 = vpop.eup %7745  ;;  %v12075_v18 = vpop.f32.mrb[159].mxu1  ;;  %4854 = vmatmul.mubr.f32.gmra.mrb[168].mxu0 %v8364_v14  ;;  %5799 = vst [vmem:[%s11702_s18 + $0x240] sm:$0xff] %v5671_v55  ;;  %v5672_v26 = vadd.f32 %v5544_v37, %v14061_v29  ;;  %7767 = vtanh.f32 %v4745_v48  ;;  %v4751_v22 = vadd.f32 %v11999_v53, %v12039_v30  ;;  %5015 = vmatmul.mubr.f32.gmra.mrb[168].mxu1 %v8364_v14  ;;  %v14065_v53 = vld [vmem:[#allocation65_spill] sm:$0xff]  ;;  %v14073_v55 = vld [vmem:[#allocation98_spill] sm:$0xff]  ;;  %v14077_v14 = vld [vmem:[#allocation188_spill] sm:$0xff] }
 0x394   : > { %v7748_v57 = vpop.eup %7747  ;;  %v12077_v41 = vpop.permute.xlu0 %4387  ;;  %v5551_v43 = vmul.f32 %v7746_v4, %v14062_v28  ;;  %6409 = vmatprep.mubr.msk.f32.mxu0 %vm1158_vm0, %v8365_v13  ;;  %5801 = vst [vmem:[%s11702_s18 + $0x250] sm:$0xff] %v5673_v1  ;;  %v5674_v27 = vadd.f32 %v5546_v51, %v14063_v47  ;;  %7769 = vtanh.f32 %v4588_v63  ;;  %6425 = vmatprep.mubr.msk.f32.mxu1 %vm1158_vm0, %v8365_v13  ;;  %v14071_v3 = vld [vmem:[#allocation97_spill] sm:$0xff] }
 0x395   : > { %14060 = vst [vmem:[#allocation187_spill] sm:$0xff] %v12077_v41  ;;  %v7750_v10 = vpop.eup %7749  ;;  %v5553_v50 = vmul.f32 %v7748_v57, %v14064_v24  ;;  %v4594_v9 = vadd.f32 %v12020_v39, %v12077_v41  ;;  %5800 = vst [vmem:[%s11702_s18 + $0x248] sm:$0xff] %v5672_v26  ;;  %7771 = vtanh.f32 %v4749_v20  ;;  %v4755_v16 = vadd.f32 %v12028_v33, %v12077_v41  ;;  %v12107_v59 = vpop.permute.xlu1 %4392  ;;  %v14070_v33 = vld [vmem:[#allocation107_spill] sm:$0xff]  ;;  %v14072_v49 = vld [vmem:[#allocation81_spill] sm:$0xff] }
 0x396   : > { %v7752_v19 = vpop.eup %7751  ;;  %v5679_v40 = vadd.f32 %v5551_v43, %v14065_v53  ;;  %v5552_v11 = vmul.f32 %v7750_v10, %v14066_v17  ;;  %5802 = vst [vmem:[%s11702_s18 + $0x258] sm:$0xff] %v5674_v27  ;;  %7773 = vtanh.f32 %v4590_v31  ;;  %v4596_v39 = vadd.f32 %v12030_v6, %v12077_v41  ;;  %14069 = vst [vmem:[#allocation123_spill] sm:$0xff] %v12107_v59  ;;  %v8367_v6 = vld [vmem:[%s13119_s3 + $0x68] sm:$0xff]  ;;  %v14076_v31 = vld [vmem:[#allocation84_spill] sm:$0xff] }
 0x397   : > { %v7754_v52 = vpop.eup %7753  ;;  %v5681_v35 = vadd.f32 %v5553_v50, %v14067_v12  ;;  %v5554_v7 = vmul.f32 %v7752_v19, %v14068_v44  ;;  %4860 = vmatmul.mubr.f32.gmra.mrb[170].mxu0 %v8366_v5  ;;  %7775 = vtanh.f32 %v4751_v22  ;;  %v4757_v36 = vadd.f32 %v12037_v46, %v12077_v41  ;;  %5021 = vmatmul.mubr.f32.gmra.mrb[170].mxu1 %v8366_v5  ;;  %v14074_v46 = vld [vmem:[#allocation83_spill] sm:$0xff]  ;;  %v8368_v28 = vld [vmem:[%s13119_s3 + $0x60] sm:$0xff]  ;;  %v14083_v17 = vld [vmem:[#allocation176_spill] sm:$0xff] }
 0x398   : > { %v7756_v48 = vpop.eup %7755  ;;  %5807 = vst [vmem:[%s11702_s18 + $0x280] sm:$0xff] %v5679_v40  ;;  %v5680_v8 = vadd.f32 %v5552_v11, %v14070_v33  ;;  %v5559_v34 = vmul.f32 %v7754_v52, %v14071_v3  ;;  %6410 = vmatprep.mubr.msk.f32.mxu0 %vm1158_vm0, %v8367_v6  ;;  %7777 = vtanh.f32 %v4594_v9  ;;  %v4600_v37 = vadd.f32 %v12058_v23, %v12107_v59  ;;  %v14079_v22 = vld [vmem:[#allocation189_spill] sm:$0xff]  ;;  %v14080_v27 = vld [vmem:[#allocation175_spill] sm:$0xff]  ;;  %v14086_v5 = vld [vmem:[#allocation196_spill] sm:$0xff] }
 0x399   : > { %v7758_v63 = vpop.eup %7757  ;;  %5809 = vst [vmem:[%s11702_s18 + $0x290] sm:$0xff] %v5681_v35  ;;  %v5682_v38 = vadd.f32 %v5554_v7, %v14072_v49  ;;  %v5561_v15 = vmul.f32 %v7756_v48, %v14073_v55  ;;  %6426 = vmatprep.mubr.msk.f32.mxu1 %vm1158_vm0, %v8367_v6  ;;  %7779 = vtanh.f32 %v4755_v16  ;;  %v4761_v42 = vadd.f32 %v12066_v62, %v12107_v59  ;;  %v14078_v62 = vld [vmem:[#allocation109_spill] sm:$0xff]  ;;  %v8370_v50 = vld [vmem:[%s8740_s13 + $0x310] sm:$0xff]  ;;  %v8371_v16 = vld [vmem:[%s8740_s13 + $0x308] sm:$0xff] }
 0x39a   : > { %v7760_v20 = vpop.eup %7759  ;;  %5808 = vst [vmem:[%s11702_s18 + $0x288] sm:$0xff] %v5680_v8  ;;  %v5687_v4 = vadd.f32 %v5559_v34, %v14074_v46  ;;  %v5560_v1 = vmul.f32 %v7758_v63, %v14075_v56  ;;  %7781 = vtanh.f32 %v4596_v39  ;;  %v4602_v29 = vadd.f32 %v12068_v0, %v12107_v59  ;;  %v8369_v0 = vld [vmem:[%s13119_s3 + $0x78] sm:$0xff]  ;;  %v14081_v9 = vld [vmem:[#allocation191_spill] sm:$0xff]  ;;  %v8374_v6 = vld [vmem:[%s8740_s13 + $0x340] sm:$0xff] }
 0x39b   : > { %v7762_v51 = vpop.eup %7761  ;;  %5810 = vst [vmem:[%s11702_s18 + $0x298] sm:$0xff] %v5682_v38  ;;  %v5689_v57 = vadd.f32 %v5561_v15, %v14076_v31  ;;  %v5562_v23 = vmul.f32 %v7760_v20, %v14077_v14  ;;  %4866 = vmatmul.mubr.f32.gmra.mrb[172].mxu0 %v8368_v28  ;;  %7783 = vtanh.f32 %v4757_v36  ;;  %v4763_v13 = vadd.f32 %v12075_v18, %v12107_v59  ;;  %v14084_v52 = vld [vmem:[#allocation195_spill] sm:$0xff]  ;;  %v8372_v48 = vld [vmem:[%s8740_s13 + $0x318] sm:$0xff]  ;;  %v14088_v49 = vld [vmem:[#allocation197_spill] sm:$0xff] }
 0x39c   : > { %v7764_v26 = vpop.eup %7763  ;;  %5815 = vst [vmem:[%s11702_s18 + $0x2c0] sm:$0xff] %v5687_v4  ;;  %v5688_v43 = vadd.f32 %v5560_v1, %v14078_v62  ;;  %v5567_v10 = vmul.f32 %v7762_v51, %v14079_v22  ;;  %5027 = vmatmul.mubr.f32.gmra.mrb[172].mxu1 %v8368_v28  ;;  %6411 = vmatprep.mubr.msk.f32.mxu0 %vm1158_vm0, %v8369_v0  ;;  %v14082_v19 = vsub.f32 1.0, %v14081_v9  ;;  %7785 = vtanh.f32 %v4600_v37  ;;  %v8373_v36 = vld [vmem:[%s13119_s3 + $0x70] sm:$0xff]  ;;  %v14090_v20 = vld [vmem:[#allocation202_spill] sm:$0xff]  ;;  %v14199_v30 = vld [vmem:[#allocation85_spill] sm:$0xff] }
 0x39d   : > { %v7766_v47 = vpop.eup %7765  ;;  %5817 = vst [vmem:[%s11702_s18 + $0x2d0] sm:$0xff] %v5689_v57  ;;  %v5690_v24 = vadd.f32 %v5562_v23, %v14080_v27  ;;  %v5569_v40 = vmul.f32 %v7764_v26, %v14081_v9  ;;  %6427 = vmatprep.mubr.msk.f32.mxu1 %vm1158_vm0, %v8369_v0  ;;  %v14085_v12 = vsub.f32 1.0, %v14084_v52  ;;  %7787 = vtanh.f32 %v4761_v42  ;;  %v8375_v4 = vld [vmem:[%s13119_s3 + $0x88] sm:$0xff]  ;;  %v8376_v1 = vld [vmem:[%s8740_s13 + $0x350] sm:$0xff] }
 0x39e   : > { %v5441_v53 = vmul.f32 %v8370_v50, %v14082_v19  ;;  %v7768_v18 = vpop.eup %7767  ;;  %5816 = vst [vmem:[%s11702_s18 + $0x2c8] sm:$0xff] %v5688_v43  ;;  %v5695_v11 = vadd.f32 %v5567_v10, %v14083_v17  ;;  %v5568_v44 = vmul.f32 %v7766_v47, %v14084_v52  ;;  %v14087_v33 = vsub.f32 1.0, %v14086_v5  ;;  %v14091_v42 = vld [vmem:[#allocation198_spill] sm:$0xff]  ;;  %v14093_v23 = vld [vmem:[#allocation203_spill] sm:$0xff]  ;;  %v14096_v47 = vld [vmem:[#allocation204_spill] sm:$0xff] }
 0x39f   : > { %v5440_v35 = vmul.f32 %v8371_v16, %v14085_v12  ;;  %v7770_v7 = vpop.eup %7769  ;;  %5818 = vst [vmem:[%s11702_s18 + $0x2d8] sm:$0xff] %v5690_v24  ;;  %v5570_v3 = vmul.f32 %v7768_v18, %v14086_v5  ;;  %7789 = vtanh.f32 %v4602_v29  ;;  %4872 = vmatmul.mubr.f32.gmra.mrb[174].mxu0 %v8373_v36  ;;  %v14089_v38 = vsub.f32 1.0, %v14088_v49  ;;  %v8377_v28 = vld [vmem:[%s8740_s13 + $0x348] sm:$0xff]  ;;  %v14094_v62 = vld [vmem:[#allocation199_spill] sm:$0xff]  ;;  %v8378_v24 = vld [vmem:[%s8740_s13 + $0x358] sm:$0xff] }
 0x3a0   : > { %v5697_v39 = vadd.f32 %v5569_v40, %v5441_v53  ;;  %v5442_v8 = vmul.f32 %v8372_v48, %v14087_v33  ;;  %v7772_v34 = vpop.eup %7771  ;;  %5823 = vst [vmem:[%s11702_s18 + $0x300] sm:$0xff] %v5695_v11  ;;  %v5575_v15 = vmul.f32 %v7770_v7, %v14088_v49  ;;  %7791 = vtanh.f32 %v4763_v13  ;;  %5033 = vmatmul.mubr.f32.gmra.mrb[174].mxu1 %v8373_v36  ;;  %v14097_v50 = vld [vmem:[#allocation200_spill] sm:$0xff]  ;;  %v14099_v18 = vld [vmem:[#allocation205_spill] sm:$0xff]  ;;  %v14102_v48 = vld [vmem:[#allocation206_spill] sm:$0xff] }
 0x3a1   : > { %v5696_v63 = vadd.f32 %v5568_v44, %v5440_v35  ;;  %v5447_v55 = vmul.f32 %v8374_v6, %v14089_v38  ;;  %v7774_v37 = vpop.eup %7773  ;;  %v5329_v46 = vsub.f32 1.0, %v14090_v20  ;;  %6412 = vmatprep.mubr.msk.f32.mxu0 %vm1158_vm0, %v8375_v4  ;;  %v14092_v51 = vsub.f32 1.0, %v14091_v42  ;;  %6428 = vmatprep.mubr.msk.f32.mxu1 %vm1158_vm0, %v8375_v4  ;;  %v8379_v11 = vld [vmem:[%s13119_s3 + $0x80] sm:$0xff]  ;;  %v8381_v33 = vld [vmem:[%s13119_s3 + $0x98] sm:$0xff]  ;;  %v14103_v6 = vld [vmem:[#allocation207_spill] sm:$0xff] }
 0x3a2   : > { %5825 = vst [vmem:[%s11702_s18 + $0x310] sm:$0xff] %v5697_v39  ;;  %v5698_v56 = vadd.f32 %v5570_v3, %v5442_v8  ;;  %v5577_v57 = vmul.f32 %v7772_v34, %v14091_v42  ;;  %v7776_v14 = vpop.eup %7775  ;;  %v5328_v29 = vsub.f32 1.0, %v14093_v23  ;;  %v14095_v43 = vsub.f32 1.0, %v14094_v62  ;;  %v8380_v52 = vld [vmem:[%s8740_s13 + $0x380] sm:$0xff]  ;;  %v8382_v3 = vld [vmem:[%s8740_s13 + $0x390] sm:$0xff] }
 0x3a3   : > { %v5449_v31 = vmul.f32 %v8376_v1, %v14092_v51  ;;  %5824 = vst [vmem:[%s11702_s18 + $0x308] sm:$0xff] %v5696_v63  ;;  %v5703_v26 = vadd.f32 %v5575_v15, %v5447_v55  ;;  %v5576_v10 = vmul.f32 %v7774_v37, %v14094_v62  ;;  %v7778_v13 = vpop.eup %7777  ;;  %v5330_v0 = vsub.f32 1.0, %v14096_v47  ;;  %4878 = vmatmul.mubr.f32.gmra.mrb[176].mxu0 %v8379_v11  ;;  %v14100_v12 = vld [vmem:[#allocation201_spill] sm:$0xff]  ;;  %v8383_v55 = vld [vmem:[%s8740_s13 + $0x388] sm:$0xff] }
 0x3a4   : > { %v5448_v22 = vmul.f32 %v8377_v28, %v14095_v43  ;;  %5826 = vst [vmem:[%s11702_s18 + $0x318] sm:$0xff] %v5698_v56  ;;  %v14098_v9 = vsub.f32 1.0, %v14097_v50  ;;  %v5578_v53 = vmul.f32 %v7776_v14, %v14097_v50  ;;  %v7780_v40 = vpop.eup %7779  ;;  %v5335_v17 = vsub.f32 1.0, %v14099_v18  ;;  %5039 = vmatmul.mubr.f32.gmra.mrb[176].mxu1 %v8379_v11  ;;  %6413 = vmatprep.mubr.msk.f32.mxu0 %vm1158_vm0, %v8381_v33  ;;  %v14104_v56 = vld [vmem:[#allocation208_spill] sm:$0xff]  ;;  %v8387_v62 = vld [vmem:[%s13119_s3 + $0xa8] sm:$0xff] }
 0x3a5   : > { %v5705_v27 = vadd.f32 %v5577_v57, %v5449_v31  ;;  %5831 = vst [vmem:[%s11702_s18 + $0x340] sm:$0xff] %v5703_v26  ;;  %v14101_v35 = vsub.f32 1.0, %v14100_v12  ;;  %v5583_v7 = vmul.f32 %v7778_v13, %v14100_v12  ;;  %v7782_v39 = vpop.eup %7781  ;;  %v5337_v5 = vsub.f32 1.0, %v14102_v48  ;;  %6429 = vmatprep.mubr.msk.f32.mxu1 %vm1158_vm0, %v8381_v33  ;;  %v8385_v57 = vld [vmem:[%s13119_s3 + $0x90] sm:$0xff]  ;;  %v8392_v11 = vld [vmem:[%s13119_s3 + $0xb8] sm:$0xff]  ;;  %v8394_v12 = vld [vmem:[%s13119_s3 + $0xc8] sm:$0xff] }
 0x3a6   : > { %v5450_v19 = vmul.f32 %v8378_v24, %v14098_v9  ;;  %v5704_v16 = vadd.f32 %v5576_v10, %v5448_v22  ;;  %v5457_v34 = vmul.f32 %v8382_v3, %v5329_v46  ;;  %v5585_v36 = vmul.f32 %v7780_v40, %v14090_v20  ;;  %v7784_v63 = vpop.eup %7783  ;;  %v8384_v20 = vld [vmem:[%s8740_s13 + $0x398] sm:$0xff]  ;;  %v8388_v22 = vld [vmem:[%s8740_s13 + $0x3d0] sm:$0xff] }
 0x3a7   : > { %v5455_v44 = vmul.f32 %v8380_v52, %v14101_v35  ;;  %5833 = vst [vmem:[%s11702_s18 + $0x350] sm:$0xff] %v5705_v27  ;;  %v5336_v49 = vsub.f32 1.0, %v14103_v6  ;;  %v5456_v15 = vmul.f32 %v8383_v55, %v5328_v29  ;;  %v5584_v37 = vmul.f32 %v7782_v39, %v14093_v23  ;;  %v7786_v4 = vpop.eup %7785  ;;  %4884 = vmatmul.mubr.f32.gmra.mrb[178].mxu0 %v8385_v57  ;;  %v8386_v23 = vld [vmem:[%s8740_s13 + $0x3c0] sm:$0xff]  ;;  %v8389_v27 = vld [vmem:[%s8740_s13 + $0x3c8] sm:$0xff]  ;;  %v8393_v52 = vld [vmem:[%s13119_s3 + $0xb0] sm:$0xff] }
 0x3a8   : > { %v5706_v8 = vadd.f32 %v5578_v53, %v5450_v19  ;;  %5832 = vst [vmem:[%s11702_s18 + $0x348] sm:$0xff] %v5704_v16  ;;  %v5338_v1 = vsub.f32 1.0, %v14104_v56  ;;  %v5713_v46 = vadd.f32 %v5585_v36, %v5457_v34  ;;  %v5458_v42 = vmul.f32 %v8384_v20, %v5330_v0  ;;  %v7788_v31 = vpop.eup %7787  ;;  %5045 = vmatmul.mubr.f32.gmra.mrb[178].mxu1 %v8385_v57  ;;  %v8390_v19 = vld [vmem:[%s8740_s13 + $0x3d8] sm:$0xff]  ;;  %v8395_v35 = vld [vmem:[%s13119_s3 + $0xc0] sm:$0xff]  ;;  %v8398_v39 = vld [vmem:[%s13119_s3 + $0xe8] sm:$0xff] }
 0x3a9   : > { %v5711_v38 = vadd.f32 %v5583_v7, %v5455_v44  ;;  %v5586_v51 = vmul.f32 %v7784_v63, %v14096_v47  ;;  %v5712_v14 = vadd.f32 %v5584_v37, %v5456_v15  ;;  %v5463_v29 = vmul.f32 %v8386_v23, %v5335_v17  ;;  %v7790_v28 = vpop.eup %7789  ;;  %6414 = vmatprep.mubr.msk.f32.mxu0 %vm1158_vm0, %v8387_v62  ;;  %v8396_v44 = vld [vmem:[%s13119_s3 + $0xd8] sm:$0xff]  ;;  %v8397_v7 = vld [vmem:[%s13119_s3 + $0xd0] sm:$0xff]  ;;  %v14107_v36 = vld [vmem:[#allocation137_spill] sm:$0xff] }
 0x3aa   : > { %5834 = vst [vmem:[%s11702_s18 + $0x358] sm:$0xff] %v5706_v8  ;;  %v5591_v26 = vmul.f32 %v7786_v4, %v14099_v18  ;;  %5841 = vst [vmem:[%s11702_s18 + $0x390] sm:$0xff] %v5713_v46  ;;  %v5465_v10 = vmul.f32 %v8388_v22, %v5337_v5  ;;  %v5593_v13 = vmul.f32 %v7788_v31, %v14102_v48  ;;  %v7792_v47 = vpop.eup %7791  ;;  %6430 = vmatprep.mubr.msk.f32.mxu1 %vm1158_vm0, %v8387_v62  ;;  %v8391_v18 = vld [vmem:[%s13119_s3 + $0xa0] sm:$0xff]  ;;  %v8400_v5 = vld [vmem:[%s13119_s3 + $0xf8] sm:$0xff] }
 0x3ab   : > { %5839 = vst [vmem:[%s11702_s18 + $0x380] sm:$0xff] %v5711_v38  ;;  %v5714_v43 = vadd.f32 %v5586_v51, %v5458_v42  ;;  %5840 = vst [vmem:[%s11702_s18 + $0x388] sm:$0xff] %v5712_v14  ;;  %v5464_v24 = vmul.f32 %v8389_v27, %v5336_v49  ;;  %v5592_v50 = vmul.f32 %v7790_v28, %v14103_v6  ;;  %4890 = vmatmul.mubr.f32.gmra.mrb[180].mxu0 %v8391_v18  ;;  %v8399_v48 = vld [vmem:[%s13119_s3 + $0xe0] sm:$0xff]  ;;  %v8401_v33 = vld [vmem:[%s13119_s3 + $0xf0] sm:$0xff] }
 0x3ac   : > { %v5719_v0 = vadd.f32 %v5591_v26, %v5463_v29  ;;  %v5721_v9 = vadd.f32 %v5593_v13, %v5465_v10  ;;  %v5466_v53 = vmul.f32 %v8390_v19, %v5338_v1  ;;  %v5594_v40 = vmul.f32 %v7792_v47, %v14104_v56  ;;  %5051 = vmatmul.mubr.f32.gmra.mrb[180].mxu1 %v8391_v18  ;;  %v14105_v8 = vld [vmem:[#allocation125_spill] sm:$0xff]  ;;  %v14106_v3 = vld [vmem:[#allocation136_spill] sm:$0xff]  ;;  %v14108_v38 = vld [vmem:[#allocation138_spill] sm:$0xff] }
 0x3ad   : > { %5842 = vst [vmem:[%s11702_s18 + $0x398] sm:$0xff] %v5714_v43  ;;  %v5720_v17 = vadd.f32 %v5592_v50, %v5464_v24  ;;  %6415 = vmatprep.mubr.msk.f32.mxu0 %vm1158_vm0, %v8392_v11  ;;  %6431 = vmatprep.mubr.msk.f32.mxu1 %vm1158_vm0, %v8392_v11  ;;  %v1836_v34 = vadd.f32 %v14106_v3, %v14105_v8  ;;  %v14109_v15 = vld [vmem:[#allocation139_spill] sm:$0xff]  ;;  %v14110_v4 = vld [vmem:[#allocation130_spill] sm:$0xff]  ;;  %v14111_v56 = vld [vmem:[#allocation140_spill] sm:$0xff] }
 0x3ae   : > { %5847 = vst [vmem:[%s11702_s18 + $0x3c0] sm:$0xff] %v5719_v0  ;;  %5849 = vst [vmem:[%s11702_s18 + $0x3d0] sm:$0xff] %v5721_v9  ;;  %v5722_v16 = vadd.f32 %v5594_v40, %v5466_v53  ;;  %v2093_v63 = vadd.f32 %v14107_v36, %v14105_v8  ;;  %v1838_v55 = vadd.f32 %v14108_v38, %v14105_v8  ;;  %v14112_v46 = vld [vmem:[#allocation141_spill] sm:$0xff]  ;;  %v14113_v51 = vld [vmem:[#allocation142_spill] sm:$0xff] }
 0x3af   : > { %5848 = vst [vmem:[%s11702_s18 + $0x3c8] sm:$0xff] %v5720_v17  ;;  %4896 = vmatmul.mubr.f32.gmra.mrb[182].mxu0 %v8393_v52  ;;  %v6120_v6 = vmul.f32 -1.442695, %v1836_v34  ;;  %v2095_v37 = vadd.f32 %v14109_v15, %v14105_v8  ;;  %v1842_v1 = vadd.f32 %v14111_v56, %v14110_v4  ;;  %v2099_v20 = vadd.f32 %v14112_v46, %v14110_v4  ;;  %v14114_v14 = vld [vmem:[#allocation143_spill] sm:$0xff]  ;;  %v14115_v26 = vld [vmem:[#allocation174_spill] sm:$0xff]  ;;  %v14116_v28 = vld [vmem:[#allocation144_spill] sm:$0xff] }
 0x3b0   : > { %5850 = vst [vmem:[%s11702_s18 + $0x3d8] sm:$0xff] %v5722_v16  ;;  %5057 = vmatmul.mubr.f32.gmra.mrb[182].mxu1 %v8393_v52  ;;  %6416 = vmatprep.mubr.msk.f32.mxu0 %vm1158_vm0, %v8394_v12  ;;  %v6122_v49 = vmul.f32 -1.442695, %v2093_v63  ;;  %v6121_v42 = vmul.f32 -1.442695, %v1838_v55  ;;  %v1844_v31 = vadd.f32 %v14113_v51, %v14110_v4  ;;  %v2101_v23 = vadd.f32 %v14114_v14, %v14110_v4  ;;  %v14117_v22 = vld [vmem:[#allocation145_spill] sm:$0xff] }
 0x3b1   : > { %6432 = vmatprep.mubr.msk.f32.mxu1 %vm1158_vm0, %v8394_v12  ;;  %7793 = vpow2.f32 %v6120_v6  ;;  %v6123_v57 = vmul.f32 -1.442695, %v2095_v37  ;;  %v6128_v29 = vmul.f32 -1.442695, %v1842_v1  ;;  %v1848_v62 = vadd.f32 %v14116_v28, %v14115_v26  ;;  %v14118_v47 = vld [vmem:[#allocation146_spill] sm:$0xff]  ;;  %v14119_v40 = vld [vmem:[#allocation147_spill] sm:$0xff] }
 0x3b2   : > { %7795 = vpow2.f32 %v6122_v49  ;;  %v6130_v43 = vmul.f32 -1.442695, %v2099_v20  ;;  %v2105_v10 = vadd.f32 %v14117_v22, %v14115_v26  ;;  %v6129_v13 = vmul.f32 -1.442695, %v1844_v31  ;;  %v14120_v17 = vld [vmem:[#allocation42_spill] sm:$0xff]  ;;  %v14121_v11 = vld [vmem:[#allocation148_spill] sm:$0xff] }
 0x3b3   : > { %4902 = vmatmul.mubr.f32.gmra.mrb[184].mxu0 %v8395_v35  ;;  %7797 = vpow2.f32 %v6121_v42  ;;  %v1850_v0 = vadd.f32 %v14118_v47, %v14115_v26  ;;  %v6131_v27 = vmul.f32 -1.442695, %v2101_v23  ;;  %v6136_v24 = vmul.f32 -1.442695, %v1848_v62  ;;  %v14122_v12 = vld [vmem:[#allocation149_spill] sm:$0xff]  ;;  %v14124_v42 = vld [vmem:[#allocation151_spill] sm:$0xff] }
 0x3b4   : > { %5063 = vmatmul.mubr.f32.gmra.mrb[184].mxu1 %v8395_v35  ;;  %6417 = vmatprep.mubr.msk.f32.mxu0 %vm1158_vm0, %v8396_v44  ;;  %7799 = vpow2.f32 %v6123_v57  ;;  %v6138_v50 = vmul.f32 -1.442695, %v2105_v10  ;;  %v2107_v18 = vadd.f32 %v14119_v40, %v14115_v26  ;;  %v1854_v16 = vadd.f32 %v14121_v11, %v14120_v17  ;;  %v14125_v57 = vld [vmem:[#allocation43_spill] sm:$0xff]  ;;  %v14126_v14 = vld [vmem:[#allocation152_spill] sm:$0xff]  ;;  %v14127_v26 = vld [vmem:[#allocation153_spill] sm:$0xff] }
 0x3b5   : > { %6433 = vmatprep.mubr.msk.f32.mxu1 %vm1158_vm0, %v8396_v44  ;;  %7801 = vpow2.f32 %v6128_v29  ;;  %v6137_v19 = vmul.f32 -1.442695, %v1850_v0  ;;  %v2111_v35 = vadd.f32 %v14122_v12, %v14120_v17  ;;  %v2113_v51 = vadd.f32 %v14124_v42, %v14120_v17  ;;  %v14129_v22 = vld [vmem:[#allocation154_spill] sm:$0xff]  ;;  %v14130_v0 = vld [vmem:[#allocation155_spill] sm:$0xff] }
 0x3b6   : > { %7803 = vpow2.f32 %v6130_v43  ;;  %v1860_v23 = vadd.f32 %v14126_v14, %v14125_v57  ;;  %v2117_v28 = vadd.f32 %v14127_v26, %v14125_v57  ;;  %v1862_v10 = vadd.f32 %v14129_v22, %v14125_v57  ;;  %v14134_v12 = vld [vmem:[#allocation158_spill] sm:$0xff] }
 0x3b7   : > { %4908 = vmatmul.mubr.f32.gmra.mrb[186].mxu0 %v8397_v7  ;;  %7805 = vpow2.f32 %v6129_v13  ;;  %v6146_v3 = vmul.f32 -1.442695, %v2111_v35  ;;  %v6147_v47 = vmul.f32 -1.442695, %v2113_v51  ;;  %v14145_v51 = vld [vmem:[#allocation162_spill] sm:$0xff] }
 0x3b8   : > { %5069 = vmatmul.mubr.f32.gmra.mrb[186].mxu1 %v8397_v7  ;;  %6418 = vmatprep.mubr.msk.f32.mxu0 %vm1158_vm0, %v8398_v39  ;;  %7807 = vpow2.f32 %v6131_v27  ;;  %v14123_v7 = vld [vmem:[#allocation150_spill] sm:$0xff]  ;;  %v2119_v27 = vadd.f32 %v14130_v0, %v14125_v57 }
 0x3b9   : > { %6434 = vmatprep.mubr.msk.f32.mxu1 %vm1158_vm0, %v8398_v39  ;;  %7809 = vpow2.f32 %v6136_v24  ;;  %v1856_v39 = vadd.f32 %v14123_v7, %v14120_v17  ;;  %v14133_v17 = vld [vmem:[#allocation157_spill] sm:$0xff] }
 0x3ba   : > { %7811 = vpow2.f32 %v6138_v50  ;;  %v6152_v50 = vmul.f32 -1.442695, %v1860_v23  ;;  %v6155_v7 = vmul.f32 -1.442695, %v2119_v27  ;;  %v14147_v23 = vld [vmem:[#allocation163_spill] sm:$0xff] }
 0x3bb   : > { %4914 = vmatmul.mubr.f32.gmra.mrb[188].mxu0 %v8399_v48  ;;  %v7794_v9 = vpop.eup %7793  ;;  %7813 = vpow2.f32 %v6137_v19  ;;  %v6145_v36 = vmul.f32 -1.442695, %v1856_v39  ;;  %v14132_v19 = vld [vmem:[#allocation156_spill] sm:$0xff]  ;;  %v14135_v39 = vld [vmem:[#allocation159_spill] sm:$0xff] }
 0x3bc   : > { %5075 = vmatmul.mubr.f32.gmra.mrb[188].mxu1 %v8399_v48  ;;  %6419 = vmatprep.mubr.msk.f32.mxu0 %vm1158_vm0, %v8400_v5  ;;  %v7796_v53 = vpop.eup %7795  ;;  %v3055_v52 = vadd.f32 1.0, %v7794_v9  ;;  %v6139_v48 = vmul.f32 -1.442695, %v2107_v18  ;;  %v14131_v9 = vld [vmem:[#allocation44_spill] sm:$0xff]  ;;  %v6154_v18 = vmul.f32 -1.442695, %v2117_v28 }
 0x3bd   : > { %6435 = vmatprep.mubr.msk.f32.mxu1 %vm1158_vm0, %v8400_v5  ;;  %v3057_v44 = vadd.f32 1.0, %v7796_v53  ;;  %v7798_v5 = vpop.eup %7797  ;;  %v1866_v53 = vadd.f32 %v14132_v19, %v14131_v9  ;;  %v2123_v11 = vadd.f32 %v14133_v17, %v14131_v9  ;;  %v1868_v35 = vadd.f32 %v14134_v12, %v14131_v9 }
 0x3be   : > { %v7800_v8 = vpop.eup %7799  ;;  %7815 = vrcp.f32 %v3055_v52  ;;  %v3056_v6 = vadd.f32 1.0, %v7798_v5  ;;  %v6153_v52 = vmul.f32 -1.442695, %v1862_v10 }
 0x3bf   : > { %4920 = vmatmul.mubr.f32.gmra.mrb[190].mxu0 %v8401_v33  ;;  %v7802_v34 = vpop.eup %7801  ;;  %7817 = vrcp.f32 %v3057_v44  ;;  %v3058_v38 = vadd.f32 1.0, %v7800_v8 }
 0x3c0   : > { %5081 = vmatmul.mubr.f32.gmra.mrb[190].mxu1 %v8401_v33  ;;  %v6144_v33 = vmul.f32 -1.442695, %v1854_v16  ;;  %v7804_v63 = vpop.eup %7803  ;;  %7819 = vpow2.f32 %v6139_v48  ;;  %v3063_v15 = vadd.f32 1.0, %v7802_v34  ;;  %v2125_v48 = vadd.f32 %v14135_v39, %v14131_v9 }
 0x3c1   : > { %v7806_v49 = vpop.eup %7805  ;;  %v3065_v4 = vadd.f32 1.0, %v7804_v63 }
 0x3c2   : > { %7821 = vpow2.f32 %v6144_v33  ;;  %v7808_v55 = vpop.eup %7807  ;;  %v3064_v1 = vadd.f32 1.0, %v7806_v49  ;;  %v6160_v33 = vmul.f32 -1.442695, %v1866_v53 }
 0x3c3   : > { %7823 = vpow2.f32 %v6146_v3  ;;  %v7810_v37 = vpop.eup %7809  ;;  %v3066_v20 = vadd.f32 1.0, %v7808_v55  ;;  %v6162_v3 = vmul.f32 -1.442695, %v2123_v11  ;;  %v14140_v55 = vld [vmem:[#allocation45_spill] sm:$0xff] }
 0x3c4   : > { %7825 = vpow2.f32 %v6145_v36  ;;  %v7812_v56 = vpop.eup %7811  ;;  %v3071_v31 = vadd.f32 1.0, %v7810_v37  ;;  %v6161_v36 = vmul.f32 -1.442695, %v1868_v35  ;;  %v14149_v35 = vld [vmem:[#allocation50_spill] sm:$0xff] }
 0x3c5   : > { %7827 = vrcp.f32 %v3056_v6  ;;  %v7814_v46 = vpop.eup %7813  ;;  %v3073_v29 = vadd.f32 1.0, %v7812_v56  ;;  %v6163_v6 = vmul.f32 -1.442695, %v2125_v48 }
 0x3c6   : > { %7829 = vrcp.f32 %v3058_v38  ;;  %v3072_v43 = vadd.f32 1.0, %v7814_v46 }
 0x3c7   : > { %7831 = vrcp.f32 %v3063_v15  ;;  %v14141_v15 = vld [vmem:[#allocation160_spill] sm:$0xff] }
 0x3c8   : > { %7833 = vrcp.f32 %v3065_v4  ;;  %v12327_v62 = vpop.eup %7815  ;;  %v1872_v37 = vadd.f32 %v14141_v15, %v14140_v55 }
 0x3c9   : > { %14128 = vst [vmem:[#allocation190_spill] sm:$0xff] %v12327_v62  ;;  %7835 = vrcp.f32 %v3064_v1  ;;  %v12331_v13 = vpop.eup %7817  ;;  %v14143_v1 = vld [vmem:[#allocation161_spill] sm:$0xff] }
 0x3ca   : > { %7837 = vrcp.f32 %v3066_v20  ;;  %v7820_v24 = vpop.eup %7819  ;;  %v2129_v46 = vadd.f32 %v14143_v1, %v14140_v55  ;;  %v6168_v28 = vmul.f32 -1.442695, %v1872_v37 }
 0x3cb   : > { %7839 = vrcp.f32 %v3071_v31  ;;  %v3074_v38 = vadd.f32 1.0, %v7820_v24  ;;  %v1874_v31 = vadd.f32 %v14145_v51, %v14140_v55  ;;  %v14158_v51 = vld [vmem:[#allocation53_spill] sm:$0xff] }
 0x3cc   : > { %v7822_v40 = vpop.eup %7821  ;;  %7841 = vrcp.f32 %v3073_v29  ;;  %v2131_v29 = vadd.f32 %v14147_v23, %v14140_v55  ;;  %v6170_v22 = vmul.f32 -1.442695, %v2129_v46 }
 0x3cd   : > { %v7824_v16 = vpop.eup %7823  ;;  %7843 = vrcp.f32 %v3072_v43  ;;  %v3079_v56 = vadd.f32 1.0, %v7822_v40 }
 0x3ce   : > { %v7826_v44 = vpop.eup %7825  ;;  %7845 = vpow2.f32 %v6147_v47  ;;  %v3081_v42 = vadd.f32 1.0, %v7824_v16  ;;  %v6169_v47 = vmul.f32 -1.442695, %v1874_v31  ;;  %v6171_v27 = vmul.f32 -1.442695, %v2131_v29  ;;  %v14159_v31 = vld [vmem:[#allocation105_spill] sm:$0xff] }
 0x3cf   : > { %v12343_v5 = vpop.eup %7827  ;;  %7847 = vpow2.f32 %v6152_v50  ;;  %v3080_v14 = vadd.f32 1.0, %v7826_v44  ;;  %v14150_v44 = vld [vmem:[#allocation164_spill] sm:$0xff] }
 0x3d0   : > { %14136 = vst [vmem:[#allocation192_spill] sm:$0xff] %v12343_v5  ;;  %v12345_v8 = vpop.eup %7829  ;;  %7849 = vpow2.f32 %v6154_v18 }
 0x3d1   : > { %14137 = vst [vmem:[#allocation193_spill] sm:$0xff] %v12345_v8  ;;  %v12347_v34 = vpop.eup %7831  ;;  %7851 = vpow2.f32 %v6153_v52 }
 0x3d2   : > { %14138 = vst [vmem:[#allocation194_spill] sm:$0xff] %v12347_v34  ;;  %v12349_v63 = vpop.eup %7833  ;;  %7853 = vpow2.f32 %v6155_v7  ;;  %v1878_v7 = vadd.f32 %v14150_v44, %v14149_v35 }
 0x3d3   : > { %14139 = vst [vmem:[#allocation14_spill] sm:$0xff] %v12349_v63  ;;  %v12351_v49 = vpop.eup %7835  ;;  %7855 = vpow2.f32 %v6160_v33  ;;  %v14152_v33 = vld [vmem:[#allocation165_spill] sm:$0xff] }
 0x3d4   : > { %v12355_v4 = vpop.eup %7837  ;;  %7857 = vpow2.f32 %v6162_v3  ;;  %v2135_v3 = vadd.f32 %v14152_v33, %v14149_v35 }
 0x3d5   : > { %14142 = vst [vmem:[#allocation15_spill] sm:$0xff] %v12355_v4  ;;  %v12359_v20 = vpop.eup %7839  ;;  %7859 = vpow2.f32 %v6161_v36 }
 0x3d6   : > { %14144 = vst [vmem:[#allocation25_spill] sm:$0xff] %v12359_v20  ;;  %v12363_v57 = vpop.eup %7841  ;;  %7861 = vpow2.f32 %v6163_v6  ;;  %v6178_v29 = vmul.f32 -1.442695, %v2135_v3 }
 0x3d7   : > { %14146 = vst [vmem:[#allocation26_spill] sm:$0xff] %v12363_v57  ;;  %v12367_v26 = vpop.eup %7843  ;;  %7863 = vrcp.f32 %v3074_v38  ;;  %v14154_v38 = vld [vmem:[#allocation104_spill] sm:$0xff] }
 0x3d8   : > { %14148 = vst [vmem:[#allocation27_spill] sm:$0xff] %v12367_v26  ;;  %v7846_v43 = vpop.eup %7845  ;;  %7865 = vrcp.f32 %v3079_v56  ;;  %v1880_v55 = vadd.f32 %v14154_v38, %v14149_v35  ;;  %v14156_v56 = vld [vmem:[#allocation166_spill] sm:$0xff] }
 0x3d9   : > { %v7848_v10 = vpop.eup %7847  ;;  %7867 = vrcp.f32 %v3081_v42  ;;  %v3082_v50 = vadd.f32 1.0, %v7846_v43  ;;  %v2137_v1 = vadd.f32 %v14156_v56, %v14149_v35  ;;  %v6176_v42 = vmul.f32 -1.442695, %v1878_v7  ;;  %v14171_v56 = vld [vmem:[#allocation170_spill] sm:$0xff] }
 0x3da   : > { %v7850_v0 = vpop.eup %7849  ;;  %7869 = vrcp.f32 %v3080_v14  ;;  %v3087_v19 = vadd.f32 1.0, %v7848_v10  ;;  %v1884_v14 = vadd.f32 %v14159_v31, %v14158_v51  ;;  %v6177_v10 = vmul.f32 -1.442695, %v1880_v55  ;;  %v14173_v31 = vld [vmem:[#allocation171_spill] sm:$0xff] }
 0x3db   : > { %v7852_v24 = vpop.eup %7851  ;;  %7871 = vpow2.f32 %v6168_v28  ;;  %v3089_v40 = vadd.f32 1.0, %v7850_v0  ;;  %v14160_v28 = vld [vmem:[#allocation106_spill] sm:$0xff] }
 0x3dc   : > { %v7854_v9 = vpop.eup %7853  ;;  %7873 = vpow2.f32 %v6170_v22  ;;  %v3088_v17 = vadd.f32 1.0, %v7852_v24  ;;  %v2141_v43 = vadd.f32 %v14160_v28, %v14158_v51  ;;  %v6179_v24 = vmul.f32 -1.442695, %v2137_v1  ;;  %v14175_v28 = vld [vmem:[#allocation24_spill] sm:$0xff] }
 0x3dd   : > { %v7856_v53 = vpop.eup %7855  ;;  %7875 = vpow2.f32 %v6169_v47  ;;  %v3090_v16 = vadd.f32 1.0, %v7854_v9  ;;  %v14161_v47 = vld [vmem:[#allocation108_spill] sm:$0xff] }
 0x3de   : > { %v7858_v18 = vpop.eup %7857  ;;  %7877 = vpow2.f32 %v6171_v27  ;;  %v3095_v12 = vadd.f32 1.0, %v7856_v53  ;;  %v1886_v0 = vadd.f32 %v14161_v47, %v14158_v51  ;;  %v6184_v53 = vmul.f32 -1.442695, %v1884_v14 }
 0x3df   : > { %v7860_v11 = vpop.eup %7859  ;;  %7879 = vrcp.f32 %v3082_v50  ;;  %v3097_v48 = vadd.f32 1.0, %v7858_v18  ;;  %v14162_v50 = vld [vmem:[#allocation167_spill] sm:$0xff]  ;;  %v14164_v18 = vld [vmem:[#allocation168_spill] sm:$0xff] }
 0x3e0   : > { %v7862_v52 = vpop.eup %7861  ;;  %7881 = vrcp.f32 %v3087_v19  ;;  %v3096_v6 = vadd.f32 1.0, %v7860_v11  ;;  %v2143_v9 = vadd.f32 %v14162_v50, %v14158_v51 }
 0x3e1   : > { %v12371_v39 = vpop.eup %7863  ;;  %7883 = vrcp.f32 %v3089_v40  ;;  %v3098_v37 = vadd.f32 1.0, %v7862_v52  ;;  %v14163_v40 = vld [vmem:[#allocation13_spill] sm:$0xff] }
 0x3e2   : > { %14151 = vst [vmem:[#allocation28_spill] sm:$0xff] %v12371_v39  ;;  %v12375_v36 = vpop.eup %7865  ;;  %7885 = vrcp.f32 %v3088_v17  ;;  %v1890_v17 = vadd.f32 %v14164_v18, %v14163_v40  ;;  %v6187_v44 = vmul.f32 -1.442695, %v2143_v9  ;;  %v1892_v1 = vadd.f32 %v14171_v56, %v14163_v40  ;;  %v14178_v56 = vld [vmem:[#allocation173_spill] sm:$0xff] }
 0x3e3   : > { %14153 = vst [vmem:[#allocation29_spill] sm:$0xff] %v12375_v36  ;;  %v12379_v15 = vpop.eup %7867  ;;  %7887 = vrcp.f32 %v3090_v16  ;;  %v6186_v16 = vmul.f32 -1.442695, %v2141_v43  ;;  %v2149_v14 = vadd.f32 %v14173_v31, %v14163_v40  ;;  %v14176_v43 = vld [vmem:[#allocation172_spill] sm:$0xff] }
 0x3e4   : > { %14155 = vst [vmem:[#allocation30_spill] sm:$0xff] %v12379_v15  ;;  %v12383_v46 = vpop.eup %7869  ;;  %7889 = vrcp.f32 %v3095_v12  ;;  %v6185_v12 = vmul.f32 -1.442695, %v1886_v0 }
 0x3e5   : > { %14157 = vst [vmem:[#allocation31_spill] sm:$0xff] %v12383_v46  ;;  %v7872_v23 = vpop.eup %7871  ;;  %7891 = vrcp.f32 %v3097_v48  ;;  %v6192_v48 = vmul.f32 -1.442695, %v1890_v17 }
 0x3e6   : > { %v7874_v22 = vpop.eup %7873  ;;  %7893 = vrcp.f32 %v3096_v6  ;;  %v3103_v3 = vadd.f32 1.0, %v7872_v23  ;;  %v14169_v6 = vld [vmem:[#allocation169_spill] sm:$0xff] }
 0x3e7   : > { %v7876_v27 = vpop.eup %7875  ;;  %7895 = vrcp.f32 %v3098_v37  ;;  %v2147_v38 = vadd.f32 %v14169_v6, %v14163_v40  ;;  %v3105_v37 = vadd.f32 1.0, %v7874_v22 }
 0x3e8   : > { %v7878_v19 = vpop.eup %7877  ;;  %7897 = vpow2.f32 %v6176_v42  ;;  %v3104_v51 = vadd.f32 1.0, %v7876_v27  ;;  %v6195_v27 = vmul.f32 -1.442695, %v2149_v14  ;;  %v14180_v14 = vld [vmem:[#allocation110_spill] sm:$0xff] }
 0x3e9   : > { %v12395_v11 = vpop.eup %7879  ;;  %7899 = vpow2.f32 %v6178_v29  ;;  %v3106_v23 = vadd.f32 1.0, %v7878_v19  ;;  %v6194_v22 = vmul.f32 -1.442695, %v2147_v38 }
 0x3ea   : > { %14165 = vst [vmem:[#allocation32_spill] sm:$0xff] %v12395_v11  ;;  %v12397_v52 = vpop.eup %7881  ;;  %7901 = vpow2.f32 %v6177_v10  ;;  %v1896_v10 = vadd.f32 %v14176_v43, %v14175_v28 }
 0x3eb   : > { %14166 = vst [vmem:[#allocation33_spill] sm:$0xff] %v12397_v52  ;;  %v12399_v35 = vpop.eup %7883  ;;  %7903 = vpow2.f32 %v6179_v24  ;;  %v6193_v24 = vmul.f32 -1.442695, %v1892_v1  ;;  %v2153_v1 = vadd.f32 %v14178_v56, %v14175_v28 }
 0x3ec   : > { %14167 = vst [vmem:[#allocation34_spill] sm:$0xff] %v12399_v35  ;;  %v12401_v7 = vpop.eup %7885  ;;  %7905 = vpow2.f32 %v6184_v53  ;;  %v6200_v53 = vmul.f32 -1.442695, %v1896_v10 }
 0x3ed   : > { %v12403_v33 = vpop.eup %7887  ;;  %7907 = vpow2.f32 %v6186_v16 }
 0x3ee   : > { %14168 = vst [vmem:[#allocation12_spill] sm:$0xff] %v12403_v33  ;;  %v12407_v55 = vpop.eup %7889  ;;  %7909 = vpow2.f32 %v6185_v12 }
 0x3ef   : > { %14170 = vst [vmem:[#allocation46_spill] sm:$0xff] %v12407_v55  ;;  %v12411_v42 = vpop.eup %7891  ;;  %7911 = vpow2.f32 %v6187_v44 }
 0x3f0   : > { %14172 = vst [vmem:[#allocation56_spill] sm:$0xff] %v12411_v42  ;;  %v12415_v29 = vpop.eup %7893  ;;  %7913 = vpow2.f32 %v6192_v48 }
 0x3f1   : > { %14174 = vst [vmem:[#allocation35_spill] sm:$0xff] %v12415_v29  ;;  %v12419_v47 = vpop.eup %7895  ;;  %7915 = vrcp.f32 %v3103_v3 }
 0x3f2   : > { %14177 = vst [vmem:[#allocation99_spill] sm:$0xff] %v12419_v47  ;;  %v7898_v0 = vpop.eup %7897  ;;  %7917 = vrcp.f32 %v3105_v37 }
 0x3f3   : > { %v7900_v50 = vpop.eup %7899  ;;  %7919 = vrcp.f32 %v3104_v51  ;;  %v3111_v18 = vadd.f32 1.0, %v7898_v0 }
 0x3f4   : > { %v7902_v9 = vpop.eup %7901  ;;  %7921 = vrcp.f32 %v3106_v23  ;;  %v3113_v17 = vadd.f32 1.0, %v7900_v50  ;;  %v1898_v23 = vadd.f32 %v14180_v14, %v14175_v28 }
 0x3f5   : > { %v7904_v40 = vpop.eup %7903  ;;  %7923 = vpow2.f32 %v6194_v22  ;;  %v3112_v12 = vadd.f32 1.0, %v7902_v9  ;;  %v14182_v22 = vld [vmem:[#allocation111_spill] sm:$0xff]  ;;  %v14185_v9 = vld [vmem:[#allocation112_spill] sm:$0xff] }
 0x3f6   : > { %v7906_v19 = vpop.eup %7905  ;;  %7925 = vpow2.f32 %v6193_v24  ;;  %v3114_v48 = vadd.f32 1.0, %v7904_v40  ;;  %v2155_v0 = vadd.f32 %v14182_v22, %v14175_v28 }
 0x3f7   : > { %v7908_v16 = vpop.eup %7907  ;;  %7927 = vpow2.f32 %v6195_v27  ;;  %v3119_v6 = vadd.f32 1.0, %v7906_v19  ;;  %v14184_v27 = vld [vmem:[#allocation67_spill] sm:$0xff]  ;;  %v14187_v19 = vld [vmem:[#allocation113_spill] sm:$0xff] }
 0x3f8   : > { %v7910_v44 = vpop.eup %7909  ;;  %7929 = vpow2.f32 %v6200_v53  ;;  %v3121_v37 = vadd.f32 1.0, %v7908_v16  ;;  %v1902_v53 = vadd.f32 %v14185_v9, %v14184_v27  ;;  %v14192_v9 = vld [vmem:[#allocation41_spill] sm:$0xff] }
 0x3f9   : > { %v7912_v3 = vpop.eup %7911  ;;  %7931 = vrcp.f32 %v3111_v18  ;;  %v3120_v31 = vadd.f32 1.0, %v7910_v44  ;;  %v6202_v18 = vmul.f32 -1.442695, %v2153_v1  ;;  %v14188_v44 = vld [vmem:[#allocation115_spill] sm:$0xff]  ;;  %v14191_v1 = vld [vmem:[#allocation117_spill] sm:$0xff] }
 0x3fa   : > { %v7914_v38 = vpop.eup %7913  ;;  %7933 = vrcp.f32 %v3113_v17  ;;  %v3122_v10 = vadd.f32 1.0, %v7912_v3  ;;  %v2159_v17 = vadd.f32 %v14187_v19, %v14184_v27  ;;  %v1904_v28 = vadd.f32 %v14188_v44, %v14184_v27 }
 0x3fb   : > { %v12423_v51 = vpop.eup %7915  ;;  %7935 = vrcp.f32 %v3112_v12  ;;  %v3127_v50 = vadd.f32 1.0, %v7914_v38  ;;  %v6201_v12 = vmul.f32 -1.442695, %v1898_v23  ;;  %v6203_v3 = vmul.f32 -1.442695, %v2155_v0 }
 0x3fc   : > { %14179 = vst [vmem:[#allocation36_spill] sm:$0xff] %v12423_v51  ;;  %v12427_v43 = vpop.eup %7917  ;;  %7937 = vrcp.f32 %v3114_v48  ;;  %v6208_v14 = vmul.f32 -1.442695, %v1902_v53  ;;  %v6210_v23 = vmul.f32 -1.442695, %v2159_v17 }
 0x3fd   : > { %14181 = vst [vmem:[#allocation37_spill] sm:$0xff] %v12427_v43  ;;  %v12431_v24 = vpop.eup %7919  ;;  %7939 = vrcp.f32 %v3119_v6  ;;  %v14189_v6 = vld [vmem:[#allocation116_spill] sm:$0xff] }
 0x3fe   : > { %14183 = vst [vmem:[#allocation47_spill] sm:$0xff] %v12431_v24  ;;  %v12435_v40 = vpop.eup %7921  ;;  %7941 = vrcp.f32 %v3121_v37  ;;  %v2161_v38 = vadd.f32 %v14189_v6, %v14184_v27  ;;  %v14190_v37 = vld [vmem:[#allocation70_spill] sm:$0xff] }
 0x3ff   : > { %14186 = vst [vmem:[#allocation38_spill] sm:$0xff] %v12435_v40  ;;  %v7924_v16 = vpop.eup %7923  ;;  %7943 = vrcp.f32 %v3120_v31  ;;  %v1908_v22 = vadd.f32 %v14191_v1, %v14190_v37  ;;  %v2165_v19 = vadd.f32 %v14192_v9, %v14190_v37 }
 0x400   : > { %v7926_v48 = vpop.eup %7925  ;;  %7945 = vrcp.f32 %v3122_v10  ;;  %v6209_v10 = vmul.f32 -1.442695, %v1904_v28  ;;  %v3129_v44 = vadd.f32 1.0, %v7924_v16  ;;  %v6211_v27 = vmul.f32 -1.442695, %v2161_v38  ;;  %v14200_v16 = vld [vmem:[#allocation121_spill] sm:$0xff] }
 0x401   : > { %v7928_v56 = vpop.eup %7927  ;;  %7947 = vrcp.f32 %v3127_v50  ;;  %v14195_v50 = vld [vmem:[#allocation119_spill] sm:$0xff]  ;;  %v3128_v1 = vadd.f32 1.0, %v7926_v48  ;;  %v6216_v9 = vmul.f32 -1.442695, %v1908_v22  ;;  %v6218_v41 = vmul.f32 -1.442695, %v2165_v19 }
 0x402   : > { %v7930_v31 = vpop.eup %7929  ;;  %7949 = vpow2.f32 %v6202_v18  ;;  %v1910_v53 = vadd.f32 %v14195_v50, %v14190_v37  ;;  %v3130_v17 = vadd.f32 1.0, %v7928_v56  ;;  %v14201_v50 = vld [vmem:[#allocation122_spill] sm:$0xff] }
 0x403   : > { %v12447_v59 = vpop.eup %7931  ;;  %7951 = vpow2.f32 %v6201_v12  ;;  %v14198_v12 = vld [vmem:[#allocation120_spill] sm:$0xff]  ;;  %v3135_v60 = vadd.f32 1.0, %v7930_v31  ;;  %v2171_v48 = vadd.f32 %v14201_v50, %v14199_v30  ;;  %v14209_v50 = vld [vmem:[#allocation129_spill] sm:$0xff] }
 0x404   : > { %14193 = vst [vmem:[#allocation48_spill] sm:$0xff] %v12447_v59  ;;  %v12449_v0 = vpop.eup %7933  ;;  %7953 = vpow2.f32 %v6203_v3  ;;  %v2167_v28 = vadd.f32 %v14198_v12, %v14190_v37  ;;  %v1914_v3 = vadd.f32 %v14200_v16, %v14199_v30  ;;  %v6217_v56 = vmul.f32 -1.442695, %v1910_v53  ;;  %v14205_v12 = vld [vmem:[#allocation182_spill] sm:$0xff]  ;;  %v14208_v31 = vld [vmem:[#allocation128_spill] sm:$0xff] }
 0x405   : > { %14194 = vst [vmem:[#allocation18_spill] sm:$0xff] %v12449_v0  ;;  %v12453_v6 = vpop.eup %7935  ;;  %7955 = vpow2.f32 %v6208_v14  ;;  %v14202_v14 = vld [vmem:[#allocation126_spill] sm:$0xff]  ;;  %v1920_v16 = vadd.f32 %v14206_v58, %v14205_v12  ;;  %v1922_v21 = vadd.f32 %v14209_v50, %v14205_v12 }
 0x406   : > { %14196 = vst [vmem:[#allocation49_spill] sm:$0xff] %v12453_v6  ;;  %v12455_v18 = vpop.eup %7937  ;;  %7957 = vpow2.f32 %v6210_v23  ;;  %v1916_v22 = vadd.f32 %v14202_v14, %v14199_v30  ;;  %v14204_v23 = vld [vmem:[#allocation124_spill] sm:$0xff]  ;;  %v14210_v14 = vld [vmem:[#allocation131_spill] sm:$0xff]  ;;  %v6219_v53 = vmul.f32 -1.442695, %v2167_v28 }
 0x407   : > { %14197 = vst [vmem:[#allocation57_spill] sm:$0xff] %v12455_v18  ;;  %v12461_v38 = vpop.eup %7939  ;;  %7959 = vpow2.f32 %v6209_v10  ;;  %v2173_v37 = vadd.f32 %v14204_v23, %v14199_v30  ;;  %v2177_v10 = vadd.f32 %v14208_v31, %v14205_v12  ;;  %v2179_v2 = vadd.f32 %v14210_v14, %v14205_v12  ;;  %v14212_v23 = vld [vmem:[#allocation91_spill] sm:$0xff]  ;;  %v14215_v31 = vld [vmem:[#allocation133_spill] sm:$0xff] }
 0x408   : > { %v12467_v19 = vpop.eup %7941  ;;  %7961 = vrcp.f32 %v3129_v44  ;;  %v6224_v30 = vmul.f32 -1.442695, %v1914_v3  ;;  %v1926_v58 = vadd.f32 %v14213_v32, %v14212_v23  ;;  %v12487_v61 = vmul.f32 -1.442695, %v1916_v22 }
 0x409   : > { %14203 = vst [vmem:[#allocation40_spill] sm:$0xff] %v12467_v19  ;;  %v12473_v54 = vpop.eup %7943  ;;  %7963 = vrcp.f32 %v3128_v1  ;;  %v6226_v1 = vmul.f32 -1.442695, %v2171_v48  ;;  %v2183_v50 = vadd.f32 %v14215_v31, %v14212_v23  ;;  %v12491_v12 = vmul.f32 -1.442695, %v2173_v37  ;;  %v14217_v37 = vld [vmem:[#allocation135_spill] sm:$0xff] }
 0x40a   : > { %14207 = vst [vmem:[#allocation51_spill] sm:$0xff] %v12473_v54  ;;  %v12481_v44 = vpop.eup %7945  ;;  %7965 = vrcp.f32 %v3130_v17  ;;  %v12493_v14 = vmul.f32 -1.442695, %v1920_v16  ;;  %v14216_v17 = vld [vmem:[#allocation134_spill] sm:$0xff]  ;;  %v12497_v32 = vmul.f32 -1.442695, %v2177_v10  ;;  %v2185_v16 = vadd.f32 %v14217_v37, %v14212_v23 }
 0x40b   : > { %14211 = vst [vmem:[#allocation58_spill] sm:$0xff] %v12481_v44  ;;  %v12485_v45 = vpop.eup %7947  ;;  %7967 = vrcp.f32 %v3135_v60  ;;  %v1928_v28 = vadd.f32 %v14216_v17, %v14212_v23  ;;  %v12499_v60 = vmul.f32 -1.442695, %v1922_v21  ;;  %v12501_v48 = vmul.f32 -1.442695, %v2179_v2 }
 0x40c   : > { %14214 = vst [vmem:[#allocation39_spill] sm:$0xff] %v12485_v45  ;;  %v7950_v25 = vpop.eup %7949  ;;  %7969 = vpow2.f32 %v6211_v27  ;;  %v5219_v31 = vsub.f32 1.0, %v12327_v62  ;;  %v12504_v27 = vmul.f32 -1.442695, %v1926_v58  ;;  %v5221_v17 = vsub.f32 1.0, %v12331_v13 }
 0x40d   : > { %v7952_v3 = vpop.eup %7951  ;;  %7971 = vpow2.f32 %v6216_v9  ;;  %v3137_v44 = vadd.f32 1.0, %v7950_v25  ;;  %v12509_v9 = vmul.f32 -1.442695, %v2183_v50  ;;  %v5220_v2 = vsub.f32 1.0, %v12343_v5  ;;  %v8402_v5 = vld [vmem:[%s8740_s13 + $0x20] sm:$0xff] }
 0x40e   : > { %v7954_v22 = vpop.eup %7953  ;;  %7973 = vpow2.f32 %v6218_v41  ;;  %v3136_v10 = vadd.f32 1.0, %v7952_v3  ;;  %v12512_v62 = vmul.f32 -1.442695, %v1928_v28  ;;  %v5222_v58 = vsub.f32 1.0, %v12345_v8 }
 0x40f   : > { %v7956_v45 = vpop.eup %7955  ;;  %7975 = vpow2.f32 %v6217_v56  ;;  %v5227_v23 = vsub.f32 1.0, %v12347_v34  ;;  %v3138_v37 = vadd.f32 1.0, %v7954_v22  ;;  %v12518_v50 = vmul.f32 -1.442695, %v2185_v16  ;;  %v8403_v22 = vld [vmem:[%s8740_s13 + $0x30] sm:$0xff]  ;;  %v8404_v16 = vld [vmem:[%s8740_s13 + $0x28] sm:$0xff] }
 0x410   : > { %v7958_v21 = vpop.eup %7957  ;;  %7977 = vpow2.f32 %v6219_v53  ;;  %v3143_v56 = vadd.f32 1.0, %v7956_v45  ;;  %v12521_v3 = vmul.f32 %v8402_v5, %v5219_v31  ;;  %v5229_v28 = vsub.f32 1.0, %v12349_v63 }
 0x411   : > { %v7960_v41 = vpop.eup %7959  ;;  %7979 = vpow2.f32 %v6224_v30  ;;  %v3145_v34 = vadd.f32 1.0, %v7958_v21  ;;  %v12527_v30 = vmul.f32 %v8403_v22, %v5221_v17  ;;  %v5228_v45 = vsub.f32 1.0, %v12351_v49  ;;  %v8406_v17 = vld [vmem:[%s8740_s13 + $0x60] sm:$0xff] }
 0x412   : > { %v12516_v25 = vpop.eup %7961  ;;  %7981 = vpow2.f32 %v6226_v1  ;;  %v3144_v1 = vadd.f32 1.0, %v7960_v41  ;;  %v12533_v5 = vmul.f32 %v8404_v16, %v5220_v2  ;;  %v5230_v63 = vsub.f32 1.0, %v12355_v4 }
 0x413   : > { %14218 = vst [vmem:[#allocation100_spill] sm:$0xff] %v12516_v25  ;;  %v12523_v53 = vpop.eup %7963  ;;  %7983 = vrcp.f32 %v3137_v44  ;;  %14220 = vst [vmem:[#allocation9_spill] sm:$0xff] %v12527_v30  ;;  %v8405_v44 = vld [vmem:[%s8740_s13 + $0x38] sm:$0xff]  ;;  %v12542_v22 = vmul.f32 %v8406_v17, %v5227_v23  ;;  %v5237_v41 = vsub.f32 1.0, %v12363_v57  ;;  %v5236_v2 = vsub.f32 1.0, %v12367_v26  ;;  %v8408_v26 = vld [vmem:[%s8740_s13 + $0x68] sm:$0xff] }
 0x414   : > { %14219 = vst [vmem:[#allocation63_spill] sm:$0xff] %v12523_v53  ;;  %v12529_v8 = vpop.eup %7965  ;;  %7985 = vrcp.f32 %v3136_v10  ;;  %v12539_v21 = vmul.f32 %v8405_v44, %v5222_v58  ;;  %v5235_v10 = vsub.f32 1.0, %v12359_v20  ;;  %v5238_v4 = vsub.f32 1.0, %v12371_v39  ;;  %v8407_v58 = vld [vmem:[%s8740_s13 + $0x70] sm:$0xff] }
 0x415   : > { %14221 = vst [vmem:[#allocation66_spill] sm:$0xff] %v12529_v8  ;;  %v12535_v31 = vpop.eup %7967  ;;  %7987 = vrcp.f32 %v3138_v37  ;;  %v5243_v37 = vsub.f32 1.0, %v12375_v36  ;;  %v12550_v44 = vmul.f32 %v8407_v58, %v5229_v28  ;;  %v5245_v17 = vsub.f32 1.0, %v12379_v15  ;;  %v8409_v28 = vld [vmem:[%s8740_s13 + $0x78] sm:$0xff] }
 0x416   : > { %14222 = vst [vmem:[#allocation10_spill] sm:$0xff] %v12535_v31  ;;  %v7970_v30 = vpop.eup %7969  ;;  %7989 = vrcp.f32 %v3143_v56  ;;  %v5244_v57 = vsub.f32 1.0, %v12383_v46  ;;  %v12555_v56 = vmul.f32 %v8408_v26, %v5228_v45  ;;  %v5246_v39 = vsub.f32 1.0, %v12395_v11  ;;  %v8410_v26 = vld [vmem:[%s8740_s13 + $0xa0] sm:$0xff] }
 0x417   : > { %v7972_v16 = vpop.eup %7971  ;;  %7991 = vrcp.f32 %v3145_v34  ;;  %v5251_v34 = vsub.f32 1.0, %v12397_v52  ;;  %v12561_v58 = vmul.f32 %v8409_v28, %v5230_v63  ;;  %v5253_v46 = vsub.f32 1.0, %v12399_v35  ;;  %v8413_v28 = vld [vmem:[%s8740_s13 + $0xb8] sm:$0xff] }
 0x418   : > { %v7974_v23 = vpop.eup %7973  ;;  %7993 = vrcp.f32 %v3144_v1  ;;  %v12566_v45 = vmul.f32 %v8410_v26, %v5235_v10  ;;  %v8411_v1 = vld [vmem:[%s8740_s13 + $0xb0] sm:$0xff]  ;;  %v12576_v35 = vmul.f32 %v8413_v28, %v5238_v4  ;;  %v5252_v26 = vsub.f32 1.0, %v12401_v7  ;;  %v8418_v28 = vld [vmem:[%s8740_s13 + $0x120] sm:$0xff] }
 0x419   : > { %v7976_v20 = vpop.eup %7975  ;;  %7995 = vpow2.f32 %v12487_v61  ;;  %v12569_v11 = vmul.f32 %v8411_v1, %v5237_v41  ;;  %v8412_v61 = vld [vmem:[%s8740_s13 + $0xa8] sm:$0xff]  ;;  %v8415_v41 = vld [vmem:[%s8740_s13 + $0xf0] sm:$0xff]  ;;  %v5254_v4 = vsub.f32 1.0, %v12403_v33 }
 0x41a   : > { %v7978_v15 = vpop.eup %7977  ;;  %7997 = vpow2.f32 %v12491_v12  ;;  %v12573_v63 = vmul.f32 %v8412_v61, %v5236_v2  ;;  %v8414_v12 = vld [vmem:[%s8740_s13 + $0xe0] sm:$0xff]  ;;  %v12584_v1 = vmul.f32 %v8415_v41, %v5245_v17  ;;  %v5259_v17 = vsub.f32 1.0, %v12407_v55  ;;  %v8419_v41 = vld [vmem:[%s8740_s13 + $0x130] sm:$0xff] }
 0x41b   : > { %14223 = vst [vmem:[#allocation68_spill] sm:$0xff] %v12569_v11  ;;  %v7980_v52 = vpop.eup %7979  ;;  %7999 = vpow2.f32 %v12493_v14  ;;  %v12579_v36 = vmul.f32 %v8414_v12, %v5243_v37  ;;  %v8416_v14 = vld [vmem:[%s8740_s13 + $0xe8] sm:$0xff]  ;;  %v8417_v37 = vld [vmem:[%s8740_s13 + $0xf8] sm:$0xff]  ;;  %v12597_v12 = vmul.f32 %v8418_v28, %v5251_v34  ;;  %v3146_v34 = vadd.f32 1.0, %v7970_v30  ;;  %v8422_v55 = vld [vmem:[%s8740_s13 + $0x160] sm:$0xff] }
 0x41c   : > { %v7982_v10 = vpop.eup %7981  ;;  %8001 = vpow2.f32 %v12497_v32  ;;  %v12587_v11 = vmul.f32 %v8416_v14, %v5244_v57  ;;  %v12594_v61 = vmul.f32 %v8417_v37, %v5246_v39  ;;  %v5261_v57 = vsub.f32 1.0, %v12411_v42 }
 0x41d   : > { %v12589_v2 = vpop.eup %7983  ;;  %8003 = vpow2.f32 %v12499_v60  ;;  %v12605_v14 = vmul.f32 %v8419_v41, %v5253_v46  ;;  %v5260_v39 = vsub.f32 1.0, %v12415_v29  ;;  %v5262_v60 = vsub.f32 1.0, %v12419_v47 }
 0x41e   : > { %14224 = vst [vmem:[#allocation54_spill] sm:$0xff] %v12589_v2  ;;  %v12599_v32 = vpop.eup %7985  ;;  %8005 = vpow2.f32 %v12501_v48  ;;  %v5267_v28 = vsub.f32 1.0, %v12423_v51  ;;  %v3151_v42 = vadd.f32 1.0, %v7972_v16  ;;  %v8420_v48 = vld [vmem:[%s8740_s13 + $0x128] sm:$0xff]  ;;  %v5269_v47 = vsub.f32 1.0, %v12427_v43 }
 0x41f   : > { %14225 = vst [vmem:[#allocation69_spill] sm:$0xff] %v12599_v32  ;;  %v12607_v33 = vpop.eup %7987  ;;  %8007 = vpow2.f32 %v12504_v27  ;;  %v12617_v46 = vmul.f32 %v8420_v48, %v5252_v26  ;;  %v5268_v30 = vsub.f32 1.0, %v12431_v24  ;;  %v3153_v27 = vadd.f32 1.0, %v7974_v23  ;;  %v8421_v26 = vld [vmem:[%s8740_s13 + $0x138] sm:$0xff]  ;;  %v8423_v23 = vld [vmem:[%s8740_s13 + $0x170] sm:$0xff] }
 0x420   : > { %14226 = vst [vmem:[#allocation11_spill] sm:$0xff] %v12607_v33  ;;  %v12612_v37 = vpop.eup %7989  ;;  %8009 = vpow2.f32 %v12509_v9  ;;  %v5270_v16 = vsub.f32 1.0, %v12435_v40  ;;  %v3152_v9 = vadd.f32 1.0, %v7976_v20  ;;  %v12629_v48 = vmul.f32 %v8421_v26, %v5254_v4 }
 0x421   : > { %14227 = vst [vmem:[#allocation71_spill] sm:$0xff] %v12612_v37  ;;  %14228 = vst [vmem:[#allocation52_spill] sm:$0xff] %v12617_v46  ;;  %v12619_v41 = vpop.eup %7991  ;;  %8011 = vpow2.f32 %v12512_v62  ;;  %v3154_v43 = vadd.f32 1.0, %v7978_v15  ;;  %v12632_v24 = vmul.f32 %v8422_v55, %v5259_v17  ;;  %v12635_v62 = vmul.f32 %v8423_v23, %v5261_v57  ;;  %v8425_v17 = vld [vmem:[%s8740_s13 + $0x178] sm:$0xff] }
 0x422   : > { %14229 = vst [vmem:[#allocation72_spill] sm:$0xff] %v12619_v41  ;;  %v12624_v29 = vpop.eup %7993  ;;  %8013 = vpow2.f32 %v12518_v50  ;;  %v5275_v40 = vsub.f32 1.0, %v12447_v59  ;;  %v3159_v20 = vadd.f32 1.0, %v7980_v52  ;;  %v8424_v50 = vld [vmem:[%s8740_s13 + $0x168] sm:$0xff]  ;;  %v5277_v15 = vsub.f32 1.0, %v12449_v0  ;;  %v8426_v59 = vld [vmem:[%s8740_s13 + $0x1a0] sm:$0xff] }
 0x423   : > { %14230 = vst [vmem:[#allocation16_spill] sm:$0xff] %v12624_v29  ;;  %v7996_v51 = vpop.eup %7995  ;;  %8015 = vrcp.f32 %v3146_v34  ;;  %v12639_v4 = vmul.f32 %v8424_v50, %v5260_v39  ;;  %v3161_v55 = vadd.f32 1.0, %v7982_v10  ;;  %v12643_v57 = vmul.f32 %v8425_v17, %v5262_v60  ;;  %v8427_v52 = vld [vmem:[%s8740_s13 + $0x1b0] sm:$0xff]  ;;  %v8429_v10 = vld [vmem:[%s8740_s13 + $0x1b8] sm:$0xff] }
 0x424   : > { %v7998_v46 = vpop.eup %7997  ;;  %8017 = vrcp.f32 %v3151_v42  ;;  %v3160_v23 = vadd.f32 1.0, %v7996_v51  ;;  %v12646_v42 = vmul.f32 %v8426_v59, %v5267_v28  ;;  %v12649_v39 = vmul.f32 %v8427_v52, %v5269_v47  ;;  %v8430_v59 = vld [vmem:[%s8740_s13 + $0x1e0] sm:$0xff] }
 0x425   : > { %14231 = vst [vmem:[#allocation73_spill] sm:$0xff] %v12639_v4  ;;  %v8000_v26 = vpop.eup %7999  ;;  %8019 = vrcp.f32 %v3153_v27  ;;  %v3162_v0 = vadd.f32 1.0, %v7998_v46  ;;  %v8428_v27 = vld [vmem:[%s8740_s13 + $0x1a8] sm:$0xff]  ;;  %v12655_v60 = vmul.f32 %v8429_v10, %v5270_v16  ;;  %v5276_v51 = vsub.f32 1.0, %v12453_v6  ;;  %v8431_v46 = vld [vmem:[%s8740_s13 + $0x1f0] sm:$0xff] }
 0x426   : > { %v8002_v34 = vpop.eup %8001  ;;  %8021 = vrcp.f32 %v3152_v9  ;;  %v12652_v4 = vmul.f32 %v8428_v27, %v5268_v30  ;;  %v3167_v9 = vadd.f32 1.0, %v8000_v26  ;;  %v12659_v28 = vmul.f32 %v8430_v59, %v5275_v40  ;;  %v14234_v59 = vld [vmem:[#allocation58_spill] sm:$0xff] }
 0x427   : > { %v8004_v50 = vpop.eup %8003  ;;  %8023 = vrcp.f32 %v3154_v43  ;;  %v5278_v52 = vsub.f32 1.0, %v12455_v18  ;;  %v3169_v43 = vadd.f32 1.0, %v8002_v34  ;;  %v12663_v30 = vmul.f32 %v8431_v46, %v5277_v15  ;;  %v14235_v34 = vld [vmem:[#allocation39_spill] sm:$0xff]  ;;  %v8432_v46 = vld [vmem:[%s8740_s13 + $0x1e8] sm:$0xff] }
 0x428   : > { %v8006_v17 = vpop.eup %8005  ;;  %8025 = vrcp.f32 %v3159_v20  ;;  %14232 = vst [vmem:[#allocation17_spill] sm:$0xff] %v12659_v28  ;;  %v5283_v16 = vsub.f32 1.0, %v12461_v38  ;;  %v5285_v10 = vsub.f32 1.0, %v12467_v19  ;;  %v3168_v20 = vadd.f32 1.0, %v8004_v50 }
 0x429   : > { %v8008_v47 = vpop.eup %8007  ;;  %8027 = vrcp.f32 %v3161_v55  ;;  %14233 = vst [vmem:[#allocation74_spill] sm:$0xff] %v12663_v30  ;;  %v5284_v40 = vsub.f32 1.0, %v12473_v54  ;;  %v5286_v6 = vsub.f32 1.0, %v14234_v59  ;;  %v3170_v18 = vadd.f32 1.0, %v8006_v17 }
 0x42a   : > { %v8010_v27 = vpop.eup %8009  ;;  %8029 = vrcp.f32 %v3160_v23  ;;  %v5291_v28 = vsub.f32 1.0, %v14235_v34  ;;  %v3175_v15 = vadd.f32 1.0, %v8008_v47  ;;  %v12671_v30 = vmul.f32 %v8432_v46, %v5276_v51 }
 0x42b   : > { %v8012_v26 = vpop.eup %8011  ;;  %8031 = vrcp.f32 %v3162_v0  ;;  %v5293_v23 = vsub.f32 1.0, %v12516_v25  ;;  %v5292_v50 = vsub.f32 1.0, %v12523_v53  ;;  %v3177_v0 = vadd.f32 1.0, %v8010_v27  ;;  %v8433_v25 = vld [vmem:[%s8740_s13 + $0x1f8] sm:$0xff] }
 0x42c   : > { %v8014_v55 = vpop.eup %8013  ;;  %8033 = vrcp.f32 %v3167_v9  ;;  %v5294_v9 = vsub.f32 1.0, %v12529_v8  ;;  %v5299_v47 = vsub.f32 1.0, %v12535_v31  ;;  %v3176_v51 = vadd.f32 1.0, %v8012_v26  ;;  %v8435_v8 = vld [vmem:[%s8740_s13 + $0x230] sm:$0xff] }
 0x42d   : > { %v12673_v19 = vpop.eup %8015  ;;  %8035 = vrcp.f32 %v3169_v43  ;;  %v3178_v34 = vadd.f32 1.0, %v8014_v55  ;;  %v12684_v53 = vmul.f32 %v8433_v25, %v5278_v52  ;;  %v8434_v43 = vld [vmem:[%s8740_s13 + $0x220] sm:$0xff]  ;;  %v12692_v31 = vmul.f32 %v8435_v8, %v5285_v10 }
 0x42e   : > { %14236 = vst [vmem:[#allocation101_spill] sm:$0xff] %v12673_v19  ;;  %v12677_v17 = vpop.eup %8017  ;;  %8037 = vrcp.f32 %v3168_v20  ;;  %v12687_v27 = vmul.f32 %v8434_v43, %v5283_v16  ;;  %v8436_v20 = vld [vmem:[%s8740_s13 + $0x228] sm:$0xff]  ;;  %v5301_v52 = vsub.f32 1.0, %v12589_v2  ;;  %v8438_v43 = vld [vmem:[%s8740_s13 + $0x260] sm:$0xff]  ;;  %v8441_v2 = vld [vmem:[%s8740_s13 + $0x278] sm:$0xff] }
 0x42f   : > { %14237 = vst [vmem:[#allocation75_spill] sm:$0xff] %v12677_v17  ;;  %v12681_v46 = vpop.eup %8019  ;;  %8039 = vrcp.f32 %v3170_v18  ;;  %14240 = vst [vmem:[#allocation59_spill] sm:$0xff] %v12692_v31  ;;  %v12695_v26 = vmul.f32 %v8436_v20, %v5284_v40  ;;  %v8437_v18 = vld [vmem:[%s8740_s13 + $0x238] sm:$0xff]  ;;  %v12704_v54 = vmul.f32 %v8438_v43, %v5291_v28  ;;  %v14245_v40 = vld [vmem:[#allocation55_spill] sm:$0xff] }
 0x430   : > { %14238 = vst [vmem:[#allocation19_spill] sm:$0xff] %v12681_v46  ;;  %v12689_v59 = vpop.eup %8021  ;;  %8041 = vrcp.f32 %v3175_v15  ;;  %v12698_v55 = vmul.f32 %v8437_v18, %v5286_v6  ;;  %v8439_v15 = vld [vmem:[%s8740_s13 + $0x270] sm:$0xff] }
 0x431   : > { %14239 = vst [vmem:[#allocation77_spill] sm:$0xff] %v12689_v59  ;;  %14241 = vst [vmem:[#allocation78_spill] sm:$0xff] %v12695_v26  ;;  %v12700_v25 = vpop.eup %8023  ;;  %8043 = vrcp.f32 %v3177_v0  ;;  %v12707_v8 = vmul.f32 %v8439_v15, %v5293_v23  ;;  %v12716_v0 = vmul.f32 %v8441_v2, %v5294_v9 }
 0x432   : > { %14242 = vst [vmem:[#allocation20_spill] sm:$0xff] %v12698_v55  ;;  %14243 = vst [vmem:[#allocation79_spill] sm:$0xff] %v12700_v25  ;;  %v12709_v10 = vpop.eup %8025  ;;  %8045 = vrcp.f32 %v3176_v51  ;;  %v8440_v55 = vld [vmem:[%s8740_s13 + $0x268] sm:$0xff]  ;;  %v8442_v51 = vld [vmem:[%s8740_s13 + $0x2a0] sm:$0xff] }
 0x433   : > { %14244 = vst [vmem:[#allocation21_spill] sm:$0xff] %v12709_v10  ;;  %v12713_v26 = vmul.f32 %v8440_v55, %v5292_v50  ;;  %14246 = vst [vmem:[#allocation80_spill] sm:$0xff] %v12716_v0  ;;  %v12718_v31 = vpop.eup %8027  ;;  %8047 = vrcp.f32 %v3178_v34  ;;  %v12723_v15 = vmul.f32 %v8442_v51, %v5299_v47  ;;  %v5300_v50 = vsub.f32 1.0, %v12599_v32  ;;  %v8443_v0 = vld [vmem:[%s8740_s13 + $0x2b0] sm:$0xff] }
 0x434   : > { %14247 = vst [vmem:[#allocation102_spill] sm:$0xff] %v12718_v31  ;;  %v5302_v55 = vsub.f32 1.0, %v12607_v33  ;;  %v5307_v34 = vsub.f32 1.0, %v12612_v37  ;;  %v12735_v47 = vmul.f32 %v8443_v0, %v5301_v52  ;;  %v5308_v32 = vsub.f32 1.0, %v12624_v29 }
 0x435   : > { %v5317_v29 = vsub.f32 1.0, %v12681_v46  ;;  %v8449_v46 = vld [vmem:[%s8740_s13 + $0x2f8] sm:$0xff] }
 0x454   : > { %v4831_v16 = vpop.f32.mrb[160].mxu0  ;;  %v4992_v20 = vpop.f32.mrb[160].mxu1 }
 0x455   : > { %v4832_v6 = vadd.f32 %v4831_v16, %v14245_v40  ;;  %v4833_v18 = vpop.f32.mrb[161].mxu0  ;;  %v4993_v28 = vadd.f32 %v4992_v20, %v14245_v40  ;;  %v4994_v43 = vpop.f32.mrb[161].mxu1  ;;  %v5309_v20 = vsub.f32 1.0, %v12619_v41 }
 0x456   : > { %v4834_v23 = vadd.f32 %v4833_v18, %v14245_v40  ;;  %v12725_v16 = vpop.eup %8029  ;;  %v4995_v2 = vadd.f32 %v4994_v43, %v14245_v40  ;;  %v14250_v40 = vld [vmem:[#allocation62_spill] sm:$0xff] }
 0x457   : > { %8049 = vtanh.f32 %v4832_v6  ;;  %v12730_v9 = vpop.eup %8031  ;;  %v5310_v6 = vsub.f32 1.0, %v12673_v19 }
 0x458   : > { %14248 = vst [vmem:[#allocation178_spill] sm:$0xff] %v12730_v9  ;;  %8051 = vtanh.f32 %v4993_v28  ;;  %v4837_v18 = vpop.f32.mrb[162].mxu0  ;;  %v12737_v51 = vpop.eup %8033  ;;  %v5315_v28 = vsub.f32 1.0, %v12677_v17 }
 0x459   : > { %14249 = vst [vmem:[#allocation60_spill] sm:$0xff] %v12737_v51  ;;  %8053 = vtanh.f32 %v4834_v23  ;;  %v4838_v43 = vadd.f32 %v4837_v18, %v14250_v40  ;;  %v4998_v9 = vpop.f32.mrb[162].mxu1  ;;  %v4839_v33 = vpop.f32.mrb[163].mxu0  ;;  %v8444_v18 = vld [vmem:[%s8740_s13 + $0x2a8] sm:$0xff] }
 0x45a   : > { %v12742_v37 = vpop.eup %8035  ;;  %8055 = vtanh.f32 %v4995_v2  ;;  %v4999_v52 = vadd.f32 %v4998_v9, %v14250_v40  ;;  %v4840_v0 = vadd.f32 %v4839_v33, %v14250_v40  ;;  %v5000_v51 = vpop.f32.mrb[163].mxu1  ;;  %v12752_v19 = vmul.f32 %v8444_v18, %v5300_v50 }
 0x45b   : > { %14251 = vst [vmem:[#allocation180_spill] sm:$0xff] %v12742_v37  ;;  %v12747_v41 = vpop.eup %8037  ;;  %8057 = vtanh.f32 %v4838_v43  ;;  %v5001_v23 = vadd.f32 %v5000_v51, %v14250_v40  ;;  %v5316_v2 = vsub.f32 1.0, %v12689_v59  ;;  %v5318_v9 = vsub.f32 1.0, %v12700_v25  ;;  %v14255_v51 = vld [vmem:[#allocation82_spill] sm:$0xff] }
 0x45c   : > { %14252 = vst [vmem:[#allocation22_spill] sm:$0xff] %v12747_v41  ;;  %v12754_v37 = vpop.eup %8039  ;;  %v5323_v33 = vsub.f32 1.0, %v12709_v10  ;;  %8059 = vtanh.f32 %v4999_v52 }
 0x45d   : > { %14253 = vst [vmem:[#allocation89_spill] sm:$0xff] %v12754_v37  ;;  %v4843_v41 = vpop.f32.mrb[164].mxu0  ;;  %v12759_v17 = vpop.eup %8041  ;;  %8061 = vtanh.f32 %v4840_v0  ;;  %v8445_v37 = vld [vmem:[%s8740_s13 + $0x2b8] sm:$0xff]  ;;  %v8446_v0 = vld [vmem:[%s8740_s13 + $0x2e0] sm:$0xff] }
 0x45e   : > { %14254 = vst [vmem:[#allocation23_spill] sm:$0xff] %v12759_v17  ;;  %v4844_v50 = vadd.f32 %v4843_v41, %v14255_v51  ;;  %v5004_v40 = vpop.f32.mrb[164].mxu1  ;;  %v4845_v18 = vpop.f32.mrb[165].mxu0  ;;  %v12764_v59 = vmul.f32 %v8445_v37, %v5302_v55  ;;  %8063 = vtanh.f32 %v5001_v23  ;;  %v12771_v31 = vmul.f32 %v8446_v0, %v5307_v34  ;;  %v8447_v55 = vld [vmem:[%s8740_s13 + $0x2f0] sm:$0xff]  ;;  %v8448_v23 = vld [vmem:[%s8740_s13 + $0x2e8] sm:$0xff]  ;;  %v8450_v0 = vld [vmem:[%s8740_s13 + $0x320] sm:$0xff] }
 0x45f   : > { %v12766_v25 = vpop.eup %8043  ;;  %v5005_v52 = vadd.f32 %v5004_v40, %v14255_v51  ;;  %v4846_v17 = vadd.f32 %v4845_v18, %v14255_v51  ;;  %v5006_v43 = vpop.f32.mrb[165].mxu1  ;;  %v12777_v10 = vmul.f32 %v8447_v55, %v5309_v20  ;;  %v12785_v34 = vmul.f32 %v8449_v46, %v5310_v6  ;;  %v14264_v6 = vld [vmem:[#allocation190_spill] sm:$0xff] }
 0x460   : > { %14256 = vst [vmem:[#allocation90_spill] sm:$0xff] %v12766_v25  ;;  %v12773_v41 = vpop.eup %8045  ;;  %8065 = vtanh.f32 %v4844_v50  ;;  %v5007_v37 = vadd.f32 %v5006_v43, %v14255_v51  ;;  %v12780_v25 = vmul.f32 %v8448_v23, %v5308_v32  ;;  %v8451_v50 = vld [vmem:[%s8740_s13 + $0x330] sm:$0xff]  ;;  %v14262_v51 = vld [vmem:[#allocation86_spill] sm:$0xff] }
 0x461   : > { %14257 = vst [vmem:[#allocation61_spill] sm:$0xff] %v12773_v41  ;;  %14258 = vst [vmem:[#allocation92_spill] sm:$0xff] %v12777_v10  ;;  %v12782_v40 = vpop.eup %8047  ;;  %8067 = vtanh.f32 %v5005_v52  ;;  %v4849_v18 = vpop.f32.mrb[166].mxu0  ;;  %v12788_v41 = vmul.f32 %v8450_v0, %v5315_v28  ;;  %v12791_v43 = vmul.f32 %v8451_v50, %v5317_v29  ;;  %v8453_v52 = vld [vmem:[%s8740_s13 + $0x338] sm:$0xff] }
 0x462   : > { %14259 = vst [vmem:[#allocation103_spill] sm:$0xff] %v12780_v25  ;;  %14260 = vst [vmem:[#allocation93_spill] sm:$0xff] %v12782_v40  ;;  %v8050_v20 = vpop.eup %8049  ;;  %8069 = vtanh.f32 %v4846_v17  ;;  %v4850_v55 = vadd.f32 %v4849_v18, %v14262_v51  ;;  %v5010_v32 = vpop.f32.mrb[166].mxu1  ;;  %v8452_v40 = vld [vmem:[%s8740_s13 + $0x328] sm:$0xff]  ;;  %v12798_v10 = vmul.f32 %v8453_v52, %v5318_v9  ;;  %v5324_v52 = vsub.f32 1.0, %v12725_v16 }
 0x463   : > { %14261 = vst [vmem:[#allocation64_spill] sm:$0xff] %v12791_v43  ;;  %v4851_v23 = vpop.f32.mrb[167].mxu0  ;;  %v12795_v25 = vmul.f32 %v8452_v40, %v5316_v2  ;;  %v8052_v46 = vpop.eup %8051  ;;  %v5475_v28 = vmul.f32 %v8050_v20, %v14264_v6  ;;  %8071 = vtanh.f32 %v5007_v37  ;;  %v5011_v29 = vadd.f32 %v5010_v32, %v14262_v51  ;;  %v8454_v2 = vld [vmem:[%s8740_s13 + $0x360] sm:$0xff]  ;;  %v14266_v20 = vld [vmem:[#allocation192_spill] sm:$0xff] }
 0x464   : > { %14263 = vst [vmem:[#allocation94_spill] sm:$0xff] %v12798_v10  ;;  %v4852_v0 = vadd.f32 %v4851_v23, %v14262_v51  ;;  %v5012_v17 = vpop.f32.mrb[167].mxu1  ;;  %v8054_v50 = vpop.eup %8053  ;;  %v5477_v18 = vmul.f32 %v8052_v46, %v12331_v13  ;;  %8073 = vtanh.f32 %v4850_v55  ;;  %v12806_v40 = vmul.f32 %v8454_v2, %v5323_v33  ;;  %v14267_v10 = vld [vmem:[#allocation9_spill] sm:$0xff] }
 0x465   : > { %v5013_v43 = vadd.f32 %v5012_v17, %v14262_v51  ;;  %v8056_v9 = vpop.eup %8055  ;;  %v5603_v37 = vadd.f32 %v5475_v28, %v12521_v3  ;;  %v5476_v32 = vmul.f32 %v8054_v50, %v14266_v20  ;;  %8075 = vtanh.f32 %v5011_v29  ;;  %v14268_v55 = vld [vmem:[#allocation193_spill] sm:$0xff]  ;;  %v14270_v28 = vld [vmem:[#allocation194_spill] sm:$0xff] }
 0x466   : > { %14265 = vst [vmem:[#allocation65_spill] sm:$0xff] %v12806_v40  ;;  %v4855_v23 = vpop.f32.mrb[168].mxu0  ;;  %v8058_v6 = vpop.eup %8057  ;;  %v5605_v13 = vadd.f32 %v5477_v18, %v14267_v10  ;;  %v5478_v46 = vmul.f32 %v8056_v9, %v14268_v55  ;;  %8077 = vtanh.f32 %v4852_v0  ;;  %v14269_v51 = vld [vmem:[#allocation177_spill] sm:$0xff]  ;;  %v14271_v18 = vld [vmem:[#allocation14_spill] sm:$0xff] }
 0x467   : > { %v4856_v17 = vadd.f32 %v4855_v23, %v14269_v51  ;;  %v5016_v33 = vpop.f32.mrb[168].mxu1  ;;  %v4857_v2 = vpop.f32.mrb[169].mxu0  ;;  %5731 = vst [vmem:[%s11702_s18 + $0x20] sm:$0xff] %v5603_v37  ;;  %v5604_v3 = vadd.f32 %v5476_v32, %v12533_v5  ;;  %v5483_v50 = vmul.f32 %v8058_v6, %v14270_v28  ;;  %8079 = vtanh.f32 %v5013_v43 }
 0x468   : > { %v8060_v40 = vpop.eup %8059  ;;  %v5017_v29 = vadd.f32 %v5016_v33, %v14269_v51  ;;  %v5018_v20 = vpop.f32.mrb[169].mxu1  ;;  %5733 = vst [vmem:[%s11702_s18 + $0x30] sm:$0xff] %v5605_v13  ;;  %v5606_v0 = vadd.f32 %v5478_v46, %v12539_v21  ;;  %v4858_v23 = vadd.f32 %v4857_v2, %v14269_v51  ;;  %v14273_v46 = vld [vmem:[#allocation114_spill] sm:$0xff] }
 0x469   : > { %v8062_v10 = vpop.eup %8061  ;;  %v5485_v9 = vmul.f32 %v8060_v40, %v14271_v18  ;;  %8081 = vtanh.f32 %v4856_v17  ;;  %5732 = vst [vmem:[%s11702_s18 + $0x28] sm:$0xff] %v5604_v3  ;;  %v5611_v5 = vadd.f32 %v5483_v50, %v12542_v22  ;;  %v5019_v37 = vadd.f32 %v5018_v20, %v14269_v51  ;;  %v14272_v40 = vld [vmem:[#allocation15_spill] sm:$0xff]  ;;  %v14274_v3 = vld [vmem:[#allocation25_spill] sm:$0xff]  ;;  %v14275_v20 = vld [vmem:[#allocation26_spill] sm:$0xff] }
 0x46a   : > { %v8064_v55 = vpop.eup %8063  ;;  %v5484_v43 = vmul.f32 %v8062_v10, %v12351_v49  ;;  %8083 = vtanh.f32 %v5017_v29  ;;  %v4861_v32 = vpop.f32.mrb[170].mxu0  ;;  %5734 = vst [vmem:[%s11702_s18 + $0x38] sm:$0xff] %v5606_v0 }
 0x46b   : > { %v8066_v6 = vpop.eup %8065  ;;  %v5613_v21 = vadd.f32 %v5485_v9, %v12550_v44  ;;  %v5486_v13 = vmul.f32 %v8064_v55, %v14272_v40  ;;  %8085 = vtanh.f32 %v4858_v23  ;;  %v4862_v17 = vadd.f32 %v4861_v32, %v14273_v46  ;;  %v5022_v33 = vpop.f32.mrb[170].mxu1  ;;  %5739 = vst [vmem:[%s11702_s18 + $0x60] sm:$0xff] %v5611_v5  ;;  %v14276_v9 = vld [vmem:[#allocation27_spill] sm:$0xff]  ;;  %v14278_v32 = vld [vmem:[#allocation28_spill] sm:$0xff] }
 0x46c   : > { %v4863_v2 = vpop.f32.mrb[171].mxu0  ;;  %v8068_v22 = vpop.eup %8067  ;;  %v5612_v49 = vadd.f32 %v5484_v43, %v12555_v56  ;;  %v5491_v51 = vmul.f32 %v8066_v6, %v14274_v3  ;;  %8087 = vtanh.f32 %v5019_v37  ;;  %v5023_v28 = vadd.f32 %v5022_v33, %v14273_v46 }
 0x46d   : > { %v5024_v50 = vpop.f32.mrb[171].mxu1  ;;  %v8070_v44 = vpop.eup %8069  ;;  %5741 = vst [vmem:[%s11702_s18 + $0x70] sm:$0xff] %v5613_v21  ;;  %v5614_v29 = vadd.f32 %v5486_v13, %v12561_v58  ;;  %v5493_v10 = vmul.f32 %v8068_v22, %v14275_v20  ;;  %8089 = vtanh.f32 %v4862_v17  ;;  %v4864_v0 = vadd.f32 %v4863_v2, %v14273_v46  ;;  %v14277_v58 = vld [vmem:[#allocation68_spill] sm:$0xff]  ;;  %v14279_v21 = vld [vmem:[#allocation87_spill] sm:$0xff]  ;;  %v14280_v2 = vld [vmem:[#allocation29_spill] sm:$0xff] }
 0x46e   : > { %v8072_v18 = vpop.eup %8071  ;;  %5740 = vst [vmem:[%s11702_s18 + $0x68] sm:$0xff] %v5612_v49  ;;  %v5619_v56 = vadd.f32 %v5491_v51, %v12566_v45  ;;  %v5492_v23 = vmul.f32 %v8070_v44, %v14276_v9  ;;  %8091 = vtanh.f32 %v5023_v28  ;;  %v5025_v55 = vadd.f32 %v5024_v50, %v14273_v46  ;;  %v4867_v5 = vpop.f32.mrb[172].mxu0  ;;  %v14281_v28 = vld [vmem:[#allocation30_spill] sm:$0xff]  ;;  %v14282_v20 = vld [vmem:[#allocation31_spill] sm:$0xff]  ;;  %v14283_v9 = vld [vmem:[#allocation32_spill] sm:$0xff] }
 0x46f   : > { %v8074_v43 = vpop.eup %8073  ;;  %5742 = vst [vmem:[%s11702_s18 + $0x78] sm:$0xff] %v5614_v29  ;;  %v5621_v37 = vadd.f32 %v5493_v10, %v14277_v58  ;;  %v5494_v6 = vmul.f32 %v8072_v18, %v14278_v32  ;;  %8093 = vtanh.f32 %v4864_v0  ;;  %v4868_v40 = vadd.f32 %v4867_v5, %v14279_v21  ;;  %v5028_v13 = vpop.f32.mrb[172].mxu1  ;;  %v14285_v32 = vld [vmem:[#allocation33_spill] sm:$0xff] }
 0x470   : > { %v4869_v17 = vpop.f32.mrb[173].mxu0  ;;  %v8076_v45 = vpop.eup %8075  ;;  %5747 = vst [vmem:[%s11702_s18 + $0xa0] sm:$0xff] %v5619_v56  ;;  %v5620_v33 = vadd.f32 %v5492_v23, %v12573_v63  ;;  %v5499_v46 = vmul.f32 %v8074_v43, %v14280_v2  ;;  %8095 = vtanh.f32 %v5025_v55  ;;  %v5029_v22 = vadd.f32 %v5028_v13, %v14279_v21  ;;  %v14284_v55 = vld [vmem:[#allocation88_spill] sm:$0xff] }
 0x471   : > { %v5030_v49 = vpop.f32.mrb[173].mxu1  ;;  %v8078_v3 = vpop.eup %8077  ;;  %5749 = vst [vmem:[%s11702_s18 + $0xb0] sm:$0xff] %v5621_v37  ;;  %v5622_v51 = vadd.f32 %v5494_v6, %v12576_v35  ;;  %v5501_v50 = vmul.f32 %v8076_v45, %v14281_v28  ;;  %8097 = vtanh.f32 %v4868_v40  ;;  %v4870_v44 = vadd.f32 %v4869_v17, %v14279_v21  ;;  %v14286_v17 = vld [vmem:[#allocation34_spill] sm:$0xff] }
 0x472   : > { %v8080_v29 = vpop.eup %8079  ;;  %5748 = vst [vmem:[%s11702_s18 + $0xa8] sm:$0xff] %v5620_v33  ;;  %v5627_v63 = vadd.f32 %v5499_v46, %v12579_v36  ;;  %v5500_v10 = vmul.f32 %v8078_v3, %v14282_v20  ;;  %8099 = vtanh.f32 %v5029_v22  ;;  %v5031_v0 = vadd.f32 %v5030_v49, %v14279_v21  ;;  %v4873_v18 = vpop.f32.mrb[174].mxu0 }
 0x473   : > { %v8082_v56 = vpop.eup %8081  ;;  %5750 = vst [vmem:[%s11702_s18 + $0xb8] sm:$0xff] %v5622_v51  ;;  %v5629_v35 = vadd.f32 %v5501_v50, %v12584_v1  ;;  %v5502_v23 = vmul.f32 %v8080_v29, %v14283_v9  ;;  %8101 = vtanh.f32 %v4870_v44  ;;  %v4874_v5 = vadd.f32 %v4873_v18, %v14284_v55  ;;  %v5034_v43 = vpop.f32.mrb[174].mxu1  ;;  %v14287_v51 = vld [vmem:[#allocation12_spill] sm:$0xff]  ;;  %v14288_v50 = vld [vmem:[#allocation179_spill] sm:$0xff] }
 0x474   : > { %v4875_v58 = vpop.f32.mrb[175].mxu0  ;;  %v8084_v36 = vpop.eup %8083  ;;  %5755 = vst [vmem:[%s11702_s18 + $0xe0] sm:$0xff] %v5627_v63  ;;  %v5628_v37 = vadd.f32 %v5500_v10, %v12587_v11  ;;  %v5507_v6 = vmul.f32 %v8082_v56, %v14285_v32  ;;  %8103 = vtanh.f32 %v5031_v0  ;;  %v5035_v21 = vadd.f32 %v5034_v43, %v14284_v55  ;;  %v14290_v10 = vld [vmem:[#allocation46_spill] sm:$0xff]  ;;  %v14291_v9 = vld [vmem:[#allocation56_spill] sm:$0xff] }
 0x475   : > { %v5036_v40 = vpop.f32.mrb[175].mxu1  ;;  %v8086_v1 = vpop.eup %8085  ;;  %5757 = vst [vmem:[%s11702_s18 + $0xf0] sm:$0xff] %v5629_v35  ;;  %v5630_v13 = vadd.f32 %v5502_v23, %v12594_v61  ;;  %v5509_v45 = vmul.f32 %v8084_v36, %v14286_v17  ;;  %8105 = vtanh.f32 %v4874_v5  ;;  %v4876_v33 = vadd.f32 %v4875_v58, %v14284_v55  ;;  %v14292_v58 = vld [vmem:[#allocation35_spill] sm:$0xff] }
 0x476   : > { %v8088_v2 = vpop.eup %8087  ;;  %5756 = vst [vmem:[%s11702_s18 + $0xe8] sm:$0xff] %v5628_v37  ;;  %v5635_v11 = vadd.f32 %v5507_v6, %v12597_v12  ;;  %v5508_v46 = vmul.f32 %v8086_v1, %v12401_v7  ;;  %8107 = vtanh.f32 %v5035_v21  ;;  %v5037_v22 = vadd.f32 %v5036_v40, %v14284_v55  ;;  %v4879_v49 = vpop.f32.mrb[176].mxu0  ;;  %v14289_v7 = vld [vmem:[#allocation52_spill] sm:$0xff]  ;;  %v14293_v21 = vld [vmem:[#allocation99_spill] sm:$0xff]  ;;  %v14294_v1 = vld [vmem:[#allocation181_spill] sm:$0xff] }
 0x477   : > { %v8090_v3 = vpop.eup %8089  ;;  %5758 = vst [vmem:[%s11702_s18 + $0xf8] sm:$0xff] %v5630_v13  ;;  %v5637_v61 = vadd.f32 %v5509_v45, %v12605_v14  ;;  %v5510_v28 = vmul.f32 %v8088_v2, %v14287_v51  ;;  %8109 = vtanh.f32 %v4876_v33  ;;  %v4880_v44 = vadd.f32 %v4879_v49, %v14288_v50  ;;  %v5040_v29 = vpop.f32.mrb[176].mxu1  ;;  %v14295_v33 = vld [vmem:[#allocation73_spill] sm:$0xff] }
 0x478   : > { %v4881_v63 = vpop.f32.mrb[177].mxu0  ;;  %v8092_v12 = vpop.eup %8091  ;;  %5763 = vst [vmem:[%s11702_s18 + $0x120] sm:$0xff] %v5635_v11  ;;  %v5636_v20 = vadd.f32 %v5508_v46, %v14289_v7  ;;  %v5515_v0 = vmul.f32 %v8090_v3, %v14290_v10  ;;  %8111 = vtanh.f32 %v5037_v22  ;;  %v5041_v18 = vadd.f32 %v5040_v29, %v14288_v50  ;;  %v14296_v11 = vld [vmem:[#allocation36_spill] sm:$0xff]  ;;  %v14298_v29 = vld [vmem:[#allocation47_spill] sm:$0xff]  ;;  %v14299_v10 = vld [vmem:[#allocation38_spill] sm:$0xff] }
 0x479   : > { %v5042_v56 = vpop.f32.mrb[177].mxu1  ;;  %v8094_v14 = vpop.eup %8093  ;;  %5765 = vst [vmem:[%s11702_s18 + $0x130] sm:$0xff] %v5637_v61  ;;  %v5638_v35 = vadd.f32 %v5510_v28, %v12629_v48  ;;  %v5517_v23 = vmul.f32 %v8092_v12, %v14291_v9  ;;  %8113 = vtanh.f32 %v4880_v44  ;;  %v4882_v55 = vadd.f32 %v4881_v63, %v14288_v50  ;;  %v14297_v61 = vld [vmem:[#allocation37_spill] sm:$0xff] }
 0x47a   : > { %v8096_v5 = vpop.eup %8095  ;;  %5764 = vst [vmem:[%s11702_s18 + $0x128] sm:$0xff] %v5636_v20  ;;  %v5643_v43 = vadd.f32 %v5515_v0, %v12632_v24  ;;  %v5516_v36 = vmul.f32 %v8094_v14, %v14292_v58  ;;  %8115 = vtanh.f32 %v5041_v18  ;;  %v5043_v37 = vadd.f32 %v5042_v56, %v14288_v50  ;;  %v4885_v32 = vpop.f32.mrb[178].mxu0  ;;  %v14300_v18 = vld [vmem:[#allocation118_spill] sm:$0xff] }
 0x47b   : > { %v8098_v6 = vpop.eup %8097  ;;  %5766 = vst [vmem:[%s11702_s18 + $0x138] sm:$0xff] %v5638_v35  ;;  %v5645_v48 = vadd.f32 %v5517_v23, %v12635_v62  ;;  %v5518_v40 = vmul.f32 %v8096_v5, %v14293_v21  ;;  %8117 = vtanh.f32 %v4882_v55  ;;  %v4886_v13 = vadd.f32 %v4885_v32, %v14294_v1  ;;  %v5046_v17 = vpop.f32.mrb[178].mxu1  ;;  %v14301_v23 = vld [vmem:[#allocation48_spill] sm:$0xff]  ;;  %v14304_v21 = vld [vmem:[#allocation49_spill] sm:$0xff] }
 0x47c   : > { %v4887_v45 = vpop.f32.mrb[179].mxu0  ;;  %v8100_v24 = vpop.eup %8099  ;;  %5771 = vst [vmem:[%s11702_s18 + $0x160] sm:$0xff] %v5643_v43  ;;  %v5644_v2 = vadd.f32 %v5516_v36, %v14295_v33  ;;  %v5523_v46 = vmul.f32 %v8098_v6, %v14296_v11  ;;  %8119 = vtanh.f32 %v5043_v37  ;;  %v5047_v22 = vadd.f32 %v5046_v17, %v14294_v1  ;;  %v14302_v36 = vld [vmem:[#allocation18_spill] sm:$0xff] }
 0x47d   : > { %v5048_v49 = vpop.f32.mrb[179].mxu1  ;;  %v8102_v62 = vpop.eup %8101  ;;  %5773 = vst [vmem:[%s11702_s18 + $0x170] sm:$0xff] %v5645_v48  ;;  %v5646_v3 = vadd.f32 %v5518_v40, %v12643_v57  ;;  %v5525_v51 = vmul.f32 %v8100_v24, %v14297_v61  ;;  %8121 = vtanh.f32 %v4886_v13  ;;  %v4888_v28 = vadd.f32 %v4887_v45, %v14294_v1  ;;  %v14306_v24 = vld [vmem:[#allocation57_spill] sm:$0xff] }
 0x47e   : > { %v8104_v50 = vpop.eup %8103  ;;  %5772 = vst [vmem:[%s11702_s18 + $0x168] sm:$0xff] %v5644_v2  ;;  %v5651_v44 = vadd.f32 %v5523_v46, %v12646_v42  ;;  %v5524_v63 = vmul.f32 %v8102_v62, %v14298_v29  ;;  %8123 = vtanh.f32 %v5047_v22  ;;  %v5049_v12 = vadd.f32 %v5048_v49, %v14294_v1  ;;  %v4891_v7 = vpop.f32.mrb[180].mxu0  ;;  %v14307_v2 = vld [vmem:[#allocation184_spill] sm:$0xff] }
 0x47f   : > { %v8106_v20 = vpop.eup %8105  ;;  %5774 = vst [vmem:[%s11702_s18 + $0x178] sm:$0xff] %v5646_v3  ;;  %v5653_v57 = vadd.f32 %v5525_v51, %v12649_v39  ;;  %v5526_v0 = vmul.f32 %v8104_v50, %v14299_v10  ;;  %8125 = vtanh.f32 %v4888_v28  ;;  %v4892_v56 = vadd.f32 %v4891_v7, %v14300_v18  ;;  %v5052_v14 = vpop.f32.mrb[180].mxu1 }
 0x480   : > { %v4893_v35 = vpop.f32.mrb[181].mxu0  ;;  %v8108_v42 = vpop.eup %8107  ;;  %5779 = vst [vmem:[%s11702_s18 + $0x1a0] sm:$0xff] %v5651_v44  ;;  %v5652_v9 = vadd.f32 %v5524_v63, %v12652_v4  ;;  %v5531_v55 = vmul.f32 %v8106_v20, %v14301_v23  ;;  %8127 = vtanh.f32 %v5049_v12  ;;  %v5053_v5 = vadd.f32 %v5052_v14, %v14300_v18  ;;  %v14303_v4 = vld [vmem:[#allocation17_spill] sm:$0xff]  ;;  %v14308_v44 = vld [vmem:[#allocation40_spill] sm:$0xff]  ;;  %v14313_v23 = vld [vmem:[#allocation78_spill] sm:$0xff] }
 0x481   : > { %v5054_v43 = vpop.f32.mrb[181].mxu1  ;;  %v8110_v39 = vpop.eup %8109  ;;  %5781 = vst [vmem:[%s11702_s18 + $0x1b0] sm:$0xff] %v5653_v57  ;;  %v5654_v58 = vadd.f32 %v5526_v0, %v12655_v60  ;;  %v5533_v37 = vmul.f32 %v8108_v42, %v14302_v36  ;;  %8129 = vtanh.f32 %v4892_v56  ;;  %v4894_v32 = vadd.f32 %v4893_v35, %v14300_v18  ;;  %v14305_v60 = vld [vmem:[#allocation74_spill] sm:$0xff]  ;;  %v14312_v14 = vld [vmem:[#allocation185_spill] sm:$0xff] }
 0x482   : > { %v8112_v6 = vpop.eup %8111  ;;  %5780 = vst [vmem:[%s11702_s18 + $0x1a8] sm:$0xff] %v5652_v9  ;;  %v5659_v48 = vadd.f32 %v5531_v55, %v14303_v4  ;;  %v5532_v40 = vmul.f32 %v8110_v39, %v14304_v21  ;;  %8131 = vtanh.f32 %v5053_v5  ;;  %v5055_v1 = vadd.f32 %v5054_v43, %v14300_v18  ;;  %v4897_v13 = vpop.f32.mrb[182].mxu0  ;;  %v14311_v18 = vld [vmem:[#allocation58_spill] sm:$0xff]  ;;  %v14314_v5 = vld [vmem:[#allocation39_spill] sm:$0xff] }
 0x483   : > { %v8114_v17 = vpop.eup %8113  ;;  %5782 = vst [vmem:[%s11702_s18 + $0x1b8] sm:$0xff] %v5654_v58  ;;  %v5661_v45 = vadd.f32 %v5533_v37, %v14305_v60  ;;  %v5534_v33 = vmul.f32 %v8112_v6, %v14306_v24  ;;  %8133 = vtanh.f32 %v4894_v32  ;;  %v4898_v11 = vadd.f32 %v4897_v13, %v14307_v2  ;;  %v5058_v46 = vpop.f32.mrb[182].mxu1  ;;  %v14315_v37 = vld [vmem:[#allocation20_spill] sm:$0xff] }
 0x484   : > { %v4899_v22 = vpop.f32.mrb[183].mxu0  ;;  %v8116_v49 = vpop.eup %8115  ;;  %5787 = vst [vmem:[%s11702_s18 + $0x1e0] sm:$0xff] %v5659_v48  ;;  %v5660_v62 = vadd.f32 %v5532_v40, %v12671_v30  ;;  %v5539_v3 = vmul.f32 %v8114_v17, %v12461_v38  ;;  %8135 = vtanh.f32 %v5055_v1  ;;  %v5059_v61 = vadd.f32 %v5058_v46, %v14307_v2  ;;  %v14309_v38 = vld [vmem:[#allocation51_spill] sm:$0xff]  ;;  %v14316_v6 = vld [vmem:[#allocation100_spill] sm:$0xff] }
 0x485   : > { %v5060_v51 = vpop.f32.mrb[183].mxu1  ;;  %v8118_v28 = vpop.eup %8117  ;;  %5789 = vst [vmem:[%s11702_s18 + $0x1f0] sm:$0xff] %v5661_v45  ;;  %v5662_v50 = vadd.f32 %v5534_v33, %v12684_v53  ;;  %v5541_v29 = vmul.f32 %v8116_v49, %v14308_v44  ;;  %8137 = vtanh.f32 %v4898_v11  ;;  %v4900_v63 = vadd.f32 %v4899_v22, %v14307_v2  ;;  %v14310_v53 = vld [vmem:[#allocation59_spill] sm:$0xff]  ;;  %v14318_v33 = vld [vmem:[#allocation66_spill] sm:$0xff] }
 0x486   : > { %v8120_v12 = vpop.eup %8119  ;;  %5788 = vst [vmem:[%s11702_s18 + $0x1e8] sm:$0xff] %v5660_v62  ;;  %v5667_v30 = vadd.f32 %v5539_v3, %v12687_v27  ;;  %v5540_v7 = vmul.f32 %v8118_v28, %v14309_v38  ;;  %8139 = vtanh.f32 %v5059_v61  ;;  %v5061_v20 = vadd.f32 %v5060_v51, %v14307_v2  ;;  %v4903_v57 = vpop.f32.mrb[184].mxu0  ;;  %v14317_v1 = vld [vmem:[#allocation63_spill] sm:$0xff]  ;;  %v14319_v11 = vld [vmem:[#allocation186_spill] sm:$0xff]  ;;  %v14323_v38 = vld [vmem:[#allocation69_spill] sm:$0xff] }
 0x487   : > { %v8122_v10 = vpop.eup %8121  ;;  %5790 = vst [vmem:[%s11702_s18 + $0x1f8] sm:$0xff] %v5662_v50  ;;  %v5669_v0 = vadd.f32 %v5541_v29, %v14310_v53  ;;  %v5542_v56 = vmul.f32 %v8120_v12, %v14311_v18  ;;  %8141 = vtanh.f32 %v4900_v63  ;;  %v4904_v35 = vadd.f32 %v4903_v57, %v14312_v14  ;;  %v5064_v42 = vpop.f32.mrb[184].mxu1  ;;  %v14320_v3 = vld [vmem:[#allocation10_spill] sm:$0xff]  ;;  %v14321_v50 = vld [vmem:[#allocation80_spill] sm:$0xff] }
 0x488   : > { %v4905_v9 = vpop.f32.mrb[185].mxu0  ;;  %v8124_v27 = vpop.eup %8123  ;;  %5795 = vst [vmem:[%s11702_s18 + $0x220] sm:$0xff] %v5667_v30  ;;  %v5668_v55 = vadd.f32 %v5540_v7, %v14313_v23  ;;  %v5547_v43 = vmul.f32 %v8122_v10, %v14314_v5  ;;  %8143 = vtanh.f32 %v5061_v20  ;;  %v5065_v39 = vadd.f32 %v5064_v42, %v14312_v14  ;;  %v14322_v29 = vld [vmem:[#allocation54_spill] sm:$0xff] }
 0x489   : > { %v5066_v58 = vpop.f32.mrb[185].mxu1  ;;  %v8126_v36 = vpop.eup %8125  ;;  %5797 = vst [vmem:[%s11702_s18 + $0x230] sm:$0xff] %v5669_v0  ;;  %v5670_v32 = vadd.f32 %v5542_v56, %v14315_v37  ;;  %v5549_v4 = vmul.f32 %v8124_v27, %v14316_v6  ;;  %8145 = vtanh.f32 %v4904_v35  ;;  %v4906_v48 = vadd.f32 %v4905_v9, %v14312_v14  ;;  %v14324_v0 = vld [vmem:[#allocation11_spill] sm:$0xff] }
 0x48a   : > { %v8128_v21 = vpop.eup %8127  ;;  %5796 = vst [vmem:[%s11702_s18 + $0x228] sm:$0xff] %v5668_v55  ;;  %v5675_v40 = vadd.f32 %v5547_v43, %v12704_v54  ;;  %v5548_v13 = vmul.f32 %v8126_v36, %v14317_v1  ;;  %8147 = vtanh.f32 %v5065_v39  ;;  %v5067_v17 = vadd.f32 %v5066_v58, %v14312_v14  ;;  %v4909_v60 = vpop.f32.mrb[186].mxu0  ;;  %v14325_v56 = vld [vmem:[#allocation187_spill] sm:$0xff]  ;;  %v14327_v39 = vld [vmem:[#allocation72_spill] sm:$0xff]  ;;  %v14330_v1 = vld [vmem:[#allocation101_spill] sm:$0xff] }
 0x48b   : > { %v8130_v45 = vpop.eup %8129  ;;  %5798 = vst [vmem:[%s11702_s18 + $0x238] sm:$0xff] %v5670_v32  ;;  %v5677_v24 = vadd.f32 %v5549_v4, %v12707_v8  ;;  %v5550_v2 = vmul.f32 %v8128_v21, %v14318_v33  ;;  %8149 = vtanh.f32 %v4906_v48  ;;  %v4910_v46 = vadd.f32 %v4909_v60, %v14319_v11  ;;  %v5070_v22 = vpop.f32.mrb[186].mxu1  ;;  %v14326_v27 = vld [vmem:[#allocation71_spill] sm:$0xff]  ;;  %v14328_v32 = vld [vmem:[#allocation16_spill] sm:$0xff] }
 0x48c   : > { %v4911_v49 = vpop.f32.mrb[187].mxu0  ;;  %v8132_v54 = vpop.eup %8131  ;;  %5803 = vst [vmem:[%s11702_s18 + $0x260] sm:$0xff] %v5675_v40  ;;  %v5676_v62 = vadd.f32 %v5548_v13, %v12713_v26  ;;  %v5555_v61 = vmul.f32 %v8130_v45, %v14320_v3  ;;  %8151 = vtanh.f32 %v5067_v17  ;;  %v5071_v51 = vadd.f32 %v5070_v22, %v14319_v11  ;;  %v14331_v17 = vld [vmem:[#allocation123_spill] sm:$0xff] }
 0x48d   : > { %v5072_v28 = vpop.f32.mrb[187].mxu1  ;;  %v8134_v8 = vpop.eup %8133  ;;  %5805 = vst [vmem:[%s11702_s18 + $0x270] sm:$0xff] %v5677_v24  ;;  %v5678_v44 = vadd.f32 %v5550_v2, %v14321_v50  ;;  %v5557_v63 = vmul.f32 %v8132_v54, %v14322_v29  ;;  %8153 = vtanh.f32 %v4910_v46  ;;  %v4912_v12 = vadd.f32 %v4911_v49, %v14319_v11  ;;  %v14332_v33 = vld [vmem:[#allocation103_spill] sm:$0xff]  ;;  %v14335_v50 = vld [vmem:[#allocation77_spill] sm:$0xff] }
 0x48e   : > { %v8136_v30 = vpop.eup %8135  ;;  %5804 = vst [vmem:[%s11702_s18 + $0x268] sm:$0xff] %v5676_v62  ;;  %v5683_v26 = vadd.f32 %v5555_v61, %v12723_v15  ;;  %v5556_v7 = vmul.f32 %v8134_v8, %v14323_v38  ;;  %8155 = vtanh.f32 %v5071_v51  ;;  %v5073_v20 = vadd.f32 %v5072_v28, %v14319_v11  ;;  %v4915_v57 = vpop.f32.mrb[188].mxu0  ;;  %v14333_v11 = vld [vmem:[#allocation75_spill] sm:$0xff] }
 0x48f   : > { %v8138_v10 = vpop.eup %8137  ;;  %5806 = vst [vmem:[%s11702_s18 + $0x278] sm:$0xff] %v5678_v44  ;;  %v5685_v53 = vadd.f32 %v5557_v63, %v12735_v47  ;;  %v5558_v18 = vmul.f32 %v8136_v30, %v14324_v0  ;;  %8157 = vtanh.f32 %v4912_v12  ;;  %v4916_v14 = vadd.f32 %v4915_v57, %v14325_v56  ;;  %v5076_v35 = vpop.f32.mrb[188].mxu1  ;;  %v14334_v3 = vld [vmem:[#allocation19_spill] sm:$0xff]  ;;  %v14336_v12 = vld [vmem:[#allocation178_spill] sm:$0xff]  ;;  %v14337_v30 = vld [vmem:[#allocation64_spill] sm:$0xff] }
 0x490   : > { %v4917_v42 = vpop.f32.mrb[189].mxu0  ;;  %v8140_v15 = vpop.eup %8139  ;;  %5811 = vst [vmem:[%s11702_s18 + $0x2a0] sm:$0xff] %v5683_v26  ;;  %v5684_v9 = vadd.f32 %v5556_v7, %v12752_v19  ;;  %v5563_v23 = vmul.f32 %v8138_v10, %v14326_v27  ;;  %8159 = vtanh.f32 %v5073_v20  ;;  %v5077_v55 = vadd.f32 %v5076_v35, %v14325_v56  ;;  %v14338_v38 = vld [vmem:[#allocation79_spill] sm:$0xff]  ;;  %v14339_v57 = vld [vmem:[#allocation60_spill] sm:$0xff]  ;;  %v14342_v35 = vld [vmem:[#allocation94_spill] sm:$0xff] }
 0x491   : > { %v5078_v5 = vpop.f32.mrb[189].mxu1  ;;  %v8142_v47 = vpop.eup %8141  ;;  %5813 = vst [vmem:[%s11702_s18 + $0x2b0] sm:$0xff] %v5685_v53  ;;  %v5686_v43 = vadd.f32 %v5558_v18, %v12764_v59  ;;  %v5565_v58 = vmul.f32 %v8140_v15, %v14327_v39  ;;  %8161 = vtanh.f32 %v4916_v14  ;;  %v4918_v36 = vadd.f32 %v4917_v42, %v14325_v56  ;;  %v14329_v59 = vld [vmem:[#allocation92_spill] sm:$0xff]  ;;  %v14340_v53 = vld [vmem:[#allocation21_spill] sm:$0xff]  ;;  %v8455_v15 = vld [vmem:[%s8740_s13 + $0x370] sm:$0xff] }
 0x492   : > { %v8144_v37 = vpop.eup %8143  ;;  %5812 = vst [vmem:[%s11702_s18 + $0x2a8] sm:$0xff] %v5684_v9  ;;  %v5691_v19 = vadd.f32 %v5563_v23, %v12771_v31  ;;  %v5564_v6 = vmul.f32 %v8142_v47, %v14328_v32  ;;  %8163 = vtanh.f32 %v5077_v55  ;;  %v5079_v4 = vadd.f32 %v5078_v5, %v14325_v56  ;;  %v4921_v48 = vpop.f32.mrb[190].mxu0  ;;  %v14341_v56 = vld [vmem:[#allocation180_spill] sm:$0xff]  ;;  %v14343_v9 = vld [vmem:[#allocation102_spill] sm:$0xff]  ;;  %v14347_v32 = vld [vmem:[#allocation89_spill] sm:$0xff] }
 0x493   : > { %v8146_v21 = vpop.eup %8145  ;;  %5814 = vst [vmem:[%s11702_s18 + $0x2b8] sm:$0xff] %v5686_v43  ;;  %v5693_v40 = vadd.f32 %v5565_v58, %v14329_v59  ;;  %v5566_v13 = vmul.f32 %v8144_v37, %v14330_v1  ;;  %8165 = vtanh.f32 %v4918_v36  ;;  %v4922_v60 = vadd.f32 %v4921_v48, %v14331_v17  ;;  %v5082_v45 = vpop.f32.mrb[190].mxu1  ;;  %v14345_v47 = vld [vmem:[#allocation22_spill] sm:$0xff]  ;;  %v14346_v43 = vld [vmem:[#allocation65_spill] sm:$0xff]  ;;  %v8457_v48 = vld [vmem:[%s8740_s13 + $0x378] sm:$0xff] }
 0x494   : > { %v4923_v24 = vpop.f32.mrb[191].mxu0  ;;  %v8148_v31 = vpop.eup %8147  ;;  %5819 = vst [vmem:[%s11702_s18 + $0x2e0] sm:$0xff] %v5691_v19  ;;  %v5692_v2 = vadd.f32 %v5564_v6, %v14332_v33  ;;  %v5571_v46 = vmul.f32 %v8146_v21, %v14333_v11  ;;  %8167 = vtanh.f32 %v5079_v4  ;;  %v5083_v22 = vadd.f32 %v5082_v45, %v14331_v17  ;;  %v8456_v58 = vld [vmem:[%s8740_s13 + $0x368] sm:$0xff]  ;;  %v14348_v1 = vld [vmem:[#allocation23_spill] sm:$0xff] }
 0x495   : > { %v5084_v49 = vpop.f32.mrb[191].mxu1  ;;  %v8150_v54 = vpop.eup %8149  ;;  %5821 = vst [vmem:[%s11702_s18 + $0x2f0] sm:$0xff] %v5693_v40  ;;  %v5694_v62 = vadd.f32 %v5566_v13, %v12785_v34  ;;  %v5573_v61 = vmul.f32 %v8148_v31, %v14334_v3  ;;  %8169 = vtanh.f32 %v4922_v60  ;;  %v4924_v51 = vadd.f32 %v4923_v24, %v14331_v17  ;;  %v14349_v24 = vld [vmem:[#allocation90_spill] sm:$0xff] }
 0x496   : > { %v8152_v28 = vpop.eup %8151  ;;  %5820 = vst [vmem:[%s11702_s18 + $0x2e8] sm:$0xff] %v5692_v2  ;;  %v5699_v8 = vadd.f32 %v5571_v46, %v12788_v41  ;;  %v5572_v44 = vmul.f32 %v8150_v54, %v14335_v50  ;;  %8171 = vtanh.f32 %v5083_v22  ;;  %v5085_v29 = vadd.f32 %v5084_v49, %v14331_v17  ;;  %v8458_v17 = vld [vmem:[%s8740_s13 + $0x3a0] sm:$0xff]  ;;  %v8459_v2 = vld [vmem:[%s8740_s13 + $0x3b0] sm:$0xff]  ;;  %v8460_v3 = vld [vmem:[%s8740_s13 + $0x3a8] sm:$0xff] }
 0x497   : > { %v8154_v63 = vpop.eup %8153  ;;  %v5326_v34 = vsub.f32 1.0, %v14336_v12  ;;  %5822 = vst [vmem:[%s11702_s18 + $0x2f8] sm:$0xff] %v5694_v62  ;;  %v5701_v26 = vadd.f32 %v5573_v61, %v14337_v30  ;;  %v5574_v7 = vmul.f32 %v8152_v28, %v14338_v38  ;;  %8173 = vtanh.f32 %v4924_v51  ;;  %v14350_v49 = vld [vmem:[#allocation61_spill] sm:$0xff] }
 0x498   : > { %v8156_v20 = vpop.eup %8155  ;;  %v5331_v41 = vsub.f32 1.0, %v14339_v57  ;;  %5827 = vst [vmem:[%s11702_s18 + $0x320] sm:$0xff] %v5699_v8  ;;  %v5700_v10 = vadd.f32 %v5572_v44, %v12795_v25  ;;  %v5579_v0 = vmul.f32 %v8154_v63, %v14340_v53  ;;  %8175 = vtanh.f32 %v5085_v29  ;;  %v14351_v8 = vld [vmem:[#allocation93_spill] sm:$0xff]  ;;  %v8461_v29 = vld [vmem:[%s8740_s13 + $0x3b8] sm:$0xff] }
 0x499   : > { %v8158_v18 = vpop.eup %8157  ;;  %v5333_v14 = vsub.f32 1.0, %v14341_v56  ;;  %5829 = vst [vmem:[%s11702_s18 + $0x330] sm:$0xff] %v5701_v26  ;;  %v5702_v42 = vadd.f32 %v5574_v7, %v14342_v35  ;;  %v14344_v27 = vsub.f32 1.0, %v14343_v9  ;;  %v5581_v55 = vmul.f32 %v8156_v20, %v14343_v9  ;;  %v8462_v26 = vld [vmem:[%s8740_s13 + $0x3e0] sm:$0xff] }
 0x49a   : > { %v8160_v5 = vpop.eup %8159  ;;  %v5332_v25 = vsub.f32 1.0, %v14345_v47  ;;  %5828 = vst [vmem:[%s11702_s18 + $0x328] sm:$0xff] %v5700_v10  ;;  %v5707_v39 = vadd.f32 %v5579_v0, %v14346_v43  ;;  %v5452_v36 = vmul.f32 %v8456_v58, %v5324_v52  ;;  %v5580_v37 = vmul.f32 %v8158_v18, %v12725_v16 }
 0x49b   : > { %v5453_v23 = vmul.f32 %v8455_v15, %v14344_v27  ;;  %v8162_v19 = vpop.eup %8161  ;;  %v5334_v6 = vsub.f32 1.0, %v14347_v32  ;;  %5830 = vst [vmem:[%s11702_s18 + $0x338] sm:$0xff] %v5702_v42  ;;  %v5454_v21 = vmul.f32 %v8457_v48, %v5326_v34  ;;  %v5582_v59 = vmul.f32 %v8160_v5, %v14336_v12  ;;  %v8465_v15 = vld [vmem:[%s8740_s13 + $0x3f8] sm:$0xff] }
 0x49c   : > { %v8164_v40 = vpop.eup %8163  ;;  %v5339_v13 = vsub.f32 1.0, %v14348_v1  ;;  %5835 = vst [vmem:[%s11702_s18 + $0x360] sm:$0xff] %v5707_v39  ;;  %v5708_v52 = vadd.f32 %v5580_v37, %v5452_v36  ;;  %v5459_v16 = vmul.f32 %v8458_v17, %v5331_v41  ;;  %v5587_v60 = vmul.f32 %v8162_v19, %v14339_v57  ;;  %v8463_v41 = vld [vmem:[%s8740_s13 + $0x3f0] sm:$0xff] }
 0x49d   : > { %v5709_v4 = vadd.f32 %v5581_v55, %v5453_v23  ;;  %v8166_v45 = vpop.eup %8165  ;;  %v5341_v31 = vsub.f32 1.0, %v14349_v24  ;;  %v5710_v33 = vadd.f32 %v5582_v59, %v5454_v21  ;;  %v5461_v11 = vmul.f32 %v8459_v2, %v5333_v14 }
 0x49e   : > { %v5589_v46 = vmul.f32 %v8164_v40, %v14341_v56  ;;  %v8168_v22 = vpop.eup %8167  ;;  %v5340_v54 = vsub.f32 1.0, %v14350_v49  ;;  %5836 = vst [vmem:[%s11702_s18 + $0x368] sm:$0xff] %v5708_v52  ;;  %v5715_v62 = vadd.f32 %v5587_v60, %v5459_v16  ;;  %v5460_v61 = vmul.f32 %v8460_v3, %v5332_v25  ;;  %v8464_v56 = vld [vmem:[%s8740_s13 + $0x3e8] sm:$0xff]  ;;  %s5856_s13 = scalar_lea.sflag [#allocation5], %s8734_s7 }
 0x49f   : > { %5837 = vst [vmem:[%s11702_s18 + $0x370] sm:$0xff] %v5709_v4  ;;  %v5588_v51 = vmul.f32 %v8166_v45, %v14345_v47  ;;  %v8170_v28 = vpop.eup %8169  ;;  %v5342_v50 = vsub.f32 1.0, %v14351_v8  ;;  %5838 = vst [vmem:[%s11702_s18 + $0x378] sm:$0xff] %v5710_v33  ;;  %v5462_v63 = vmul.f32 %v8461_v29, %v5334_v6  ;;  %v5590_v12 = vmul.f32 %v8168_v22, %v14347_v32 }
 0x4a0   : > { %v5717_v44 = vadd.f32 %v5589_v46, %v5461_v11  ;;  %v8172_v34 = vpop.eup %8171  ;;  %5843 = vst [vmem:[%s11702_s18 + $0x3a0] sm:$0xff] %v5715_v62  ;;  %v5467_v38 = vmul.f32 %v8462_v26, %v5339_v13  ;;  %v5595_v7 = vmul.f32 %v8170_v28, %v14348_v1  ;;  %v5469_v10 = vmul.f32 %v8463_v41, %v5341_v31 }
 0x4a1   : > { %v5716_v30 = vadd.f32 %v5588_v51, %v5460_v61  ;;  %v8174_v20 = vpop.eup %8173  ;;  %v5718_v57 = vadd.f32 %v5590_v12, %v5462_v63  ;;  %v5597_v53 = vmul.f32 %v8172_v34, %v14349_v24  ;;  %v5468_v14 = vmul.f32 %v8464_v56, %v5340_v54 }
 0x4a2   : > { %5845 = vst [vmem:[%s11702_s18 + $0x3b0] sm:$0xff] %v5717_v44  ;;  %v8176_v0 = vpop.eup %8175  ;;  %v5723_v18 = vadd.f32 %v5595_v7, %v5467_v38  ;;  %v5596_v35 = vmul.f32 %v8174_v20, %v14350_v49  ;;  %v5470_v9 = vmul.f32 %v8465_v15, %v5342_v50 }
 0x4a3   : > { %5844 = vst [vmem:[%s11702_s18 + $0x3a8] sm:$0xff] %v5716_v30  ;;  %5846 = vst [vmem:[%s11702_s18 + $0x3b8] sm:$0xff] %v5718_v57  ;;  %v5725_v42 = vadd.f32 %v5597_v53, %v5469_v10  ;;  %v5598_v27 = vmul.f32 %v8176_v0, %v14351_v8 }
 0x4a4   : > { %5851 = vst [vmem:[%s11702_s18 + $0x3e0] sm:$0xff] %v5723_v18  ;;  %v5724_v23 = vadd.f32 %v5596_v35, %v5468_v14 }
 0x4a5   : > { %5853 = vst [vmem:[%s11702_s18 + $0x3f0] sm:$0xff] %v5725_v42  ;;  %v5726_v55 = vadd.f32 %v5598_v27, %v5470_v9 }
 0x4a6   : > { %5852 = vst [vmem:[%s11702_s18 + $0x3e8] sm:$0xff] %v5724_v23 }
 0x4a7   : > { %5854 = vst [vmem:[%s11702_s18 + $0x3f8] sm:$0xff] %v5726_v55 }
 0x4a8   : > { %8509 = shalt.err (!%p8506_p4)
}
 0x4a9   : > { %s8510_s18 = scalar_lea.hbm %s13062_s9, 16384  ;;  %s8514_s8 = scalar_lea.hbm %s13122_s6, 32768 }
 0x4aa   : > { %p8511_p7 = scmp.ne.s32.totalorder %s13062_s9, %s8510_s18  ;;  %p8515_p1 = scmp.lt.u32.totalorder %s13062_s9, %s13122_s6 }
 0x4ab   : > { %p8516_p3 = scmp.lt.u32.totalorder %s8514_s8, %s8510_s18  ;;  %p8518_p9 = scmp.lt.u32.totalorder %s8510_s18, %s13062_s9 }
 0x4ac   : > { %p8512_p10 = pnand %p8511_p7, %p14352_p11 }
 0x4ad   : > { %p8517_p8 = por %p8516_p3, %p8515_p1 }
 0x4ae   : > { %p8513_p12 = pneg %p8512_p10 }
 0x4af   : > { %p8519_p0 = por %p8518_p9, %p8517_p8 }
 0x4b1   : > { %p8520_p6 = pnand %p8519_p0, %p8513_p12 }
 0x4b3   : > { %8523 = shalt.err (!%p8520_p6)
}
 0x4b4   : > { %s8585_s16 = smov 1024   ;;  %s8586_s15 = smov 64  }
 0x4b5   : > { %6830 = dma.vmem_to_hbm [thread:$0]  (%p14352_p11), %s13064_s14, 16384, %s13062_s9, %s5856_s13, %s8585_s16, %s8585_s16, %s8586_s15  }
 0x4b6 PF: > { %s5886_s20 = sand.u32 1, %s8558_s21   ;;  %p14353_p13 = scmp.ne.s32.totalorder %s13374_s12, 0 }
 0x4b7   : > { %p14354_p2 = scmp.ge.s32.totalorder %s8578_s26, 2  ;;  %s5887_s27 = scalar_lea.sflag [#allocation5], %s5886_s20 }
 0x4b9   : > { %p6837_p5 = pnand %p14354_p2, %p14353_p13 }
 0x4bb   : > { %8553 = dma.done.wait (!%p6837_p5), %s5887_s27, 16384  }
 0x4bc   : > { %8555 = vsyncadd (!%p6837_p5), %s5887_s27, 4294950912  ;;  %s22_s26 = sadd.s32 1, %s8578_s26   ;;  %s14355_s21 = smov %s8562_s22 }
 0x4bd   : > { %p19_p4 = scmp.ge.s32.totalorder %s22_s26, 4   ;;  %s14356_s22 = smov %s8566_s23 }
 0x4be   : > { %s14357_s23 = smov %s8678_s11  ;;  %s14358_s24 = smov %s8574_s25 }
 0x4bf   : > { %s14359_s25 = smov %s14361_s29  ;;  %21 = sbr.rel (!%p19_p4) target bundleno = 6 (0x6), region = 92 }
 0x4c6   :  { %5892 = vsyncpa [#allocation4], 1 }
 0x4c7   :  { %5894 = vsyncpa [#allocation4 + $0x1], 1 }
 0x4c8   :  { %5895 = vsyncpa [#allocation5], 1 }
 0x4c9   :  { %5897 = vsyncpa [#allocation5 + $0x1], 1 }

</bundles_post_ra>
